<compile_context>
chip_gen: v5e
topology: v5e:2x2
jax: 0.10.0
libtpu: 0.0.40
codegen_flags: <defaults>
</compile_context>

<pallas_src>
import functools
import math

import jax
import jax.numpy as jnp
import numpy as np
from jax.experimental import pallas as pl
from jax.experimental.pallas import tpu as pltpu


# ----------------------------------------------------------------------------
# config (small, synthetic but consistent with the module's __init__)
# ----------------------------------------------------------------------------
class Cfg:
    nactions = 4
    hidden_size = 64
    emb_dim = 16                 # EMBEDDING_BUCKETS embedding width
    dist_buckets = 12            # goal distance buckets
    angle_buckets = 12           # goal angle buckets
    time_buckets = 24            # episode-time buckets
    img_mean = (0.485, 0.456, 0.406)   # config.NORMALIZATION.img_mean
    img_std = (0.229, 0.224, 0.225)    # config.NORMALIZATION.img_std
    image_scale_hw = (64, 64)          # config.image_scale_hw


def _pad8(v):
    return ((v + 7) // 8) * 8


def _conv_out(s, k, st):
    return (s - k) // st + 1


def _dims(cfg, n):
    h, w = cfg.image_scale_hw
    o1h, o1w = _conv_out(h, 8, 4), _conv_out(w, 8, 4)
    o2h, o2w = _conv_out(o1h, 4, 2), _conv_out(o1w, 4, 2)
    o3h, o3w = _conv_out(o2h, 3, 1), _conv_out(o2w, 3, 1)
    return dict(o1h=o1h, o1w=o1w, o2h=o2h, o2w=o2w, o3h=o3h, o3w=o3w,
                m1p=_pad8(n * o1h * o1w),
                m2p=_pad8(n * o2h * o2w),
                m3p=_pad8(n * o3h * o3w),
                nb=_pad8(n))


def _full_spec(shape):
    # full-array block (block_shape == array shape, so no (8,128) constraint)
    return pl.BlockSpec(shape, lambda i, _n=len(shape): (0,) * _n)


# ----------------------------------------------------------------------------
# 0/1 gather matrices (built once at pack time; turn im2col into matmuls)
# ----------------------------------------------------------------------------
def _conv_gather(n, ih, iw, oh, ow, k, stride, rows_out_pad, rows_in_pad):
    """g[kh*k+kw, out_row, in_row] = 1  selects input row (b, s*i+kh, s*j+kw)."""
    g = np.zeros((k * k, rows_out_pad, rows_in_pad), np.float32)
    for kh in range(k):
        for kw in range(k):
            tap = kh * k + kw
            for b in range(n):
                for i in range(oh):
                    for j in range(ow):
                        r = b * oh * ow + i * ow + j
                        src = b * ih * iw + (stride * i + kh) * iw + (stride * j + kw)
                        g[tap, r, src] = 1.0
    return g


def _flatten_gather(n, nb, spatial, rows_in_pad):
    """g[s, b, b*spatial+s] = 1  pulls spatial position s of sample b."""
    g = np.zeros((spatial, nb, rows_in_pad), np.float32)
    for s in range(spatial):
        for b in range(n):
            g[s, b, b * spatial + s] = 1.0
    return g


# ----------------------------------------------------------------------------
# the fused Pallas kernel
# ----------------------------------------------------------------------------
def _local_policy_kernel(p1_ref, w1_ref, b1_ref,
                         g2_ref, w2_ref, b2_ref,
                         g3_ref, w3_ref, b3_ref,
                         gf_ref, wf_ref,
                         aux_ref, waux_ref,
                         h_ref, m_ref,
                         wih_ref, whh_ref, bih_ref, bhh_ref,
                         whead_ref, bhead_ref,
                         noise_ref,
                         out_ref):
    f32, bf16 = jnp.float32, jnp.bfloat16

    def mm(a, b):
        return jnp.dot(a, b, preferred_element_type=f32)

    # ---- conv1 + ReLU (patch matrix built host-side; normalization folded in) ----
    a1 = jnp.maximum(mm(p1_ref[...], w1_ref[...]) + b1_ref[...], 0.0).astype(bf16)

    # ---- conv2 + ReLU: sum over the 4x4 kernel taps of (row-gather @ tap-weight) --
    acc2 = jnp.zeros((g2_ref.shape[1], w2_ref.shape[2]), f32)
    for p in range(g2_ref.shape[0]):
        taps = mm(g2_ref[p], a1).astype(bf16)        # (M2p, 32) gathered activations
        acc2 = acc2 + mm(taps, w2_ref[p])            # (M2p, 64)
    a2 = jnp.maximum(acc2 + b2_ref[...], 0.0).astype(bf16)

    # ---- conv3 + ReLU: 3x3 taps ---------------------------------------------------
    acc3 = jnp.zeros((g3_ref.shape[1], w3_ref.shape[2]), f32)
    for p in range(g3_ref.shape[0]):
        taps = mm(g3_ref[p], a2).astype(bf16)        # (M3p, 64)
        acc3 = acc3 + mm(taps, w3_ref[p])            # (M3p, 32)
    a3 = jnp.maximum(acc3 + b3_ref[...], 0.0).astype(bf16)

    # ---- fuse linear + ReLU (conv-feature flatten gather + folded emb/bias) -------
    accf = mm(aux_ref[...], waux_ref[...])           # (NB, hid): emb terms + fuse bias
    for s in range(gf_ref.shape[0]):
        taps = mm(gf_ref[s], a3).astype(bf16)        # (NB, 32) conv feats at spatial s
        accf = accf + mm(taps, wf_ref[s])
    x = jnp.maximum(accf, 0.0)                       # (NB, hid) f32
    xb = x.astype(bf16)

    # ---- GRU cell (masks applied to incoming hidden state, as in _forward_gru) ----
    hm = h_ref[...] * m_ref[...]                     # (NB, hid) f32
    hb = hm.astype(bf16)
    ir = mm(xb, wih_ref[0]) + bih_ref[0]
    iz = mm(xb, wih_ref[1]) + bih_ref[1]
    in_ = mm(xb, wih_ref[2]) + bih_ref[2]
    hr = mm(hb, whh_ref[0]) + bhh_ref[0]
    hz = mm(hb, whh_ref[1]) + bhh_ref[1]
    hn = mm(hb, whh_ref[2]) + bhh_ref[2]
    r = jax.nn.sigmoid(ir + hr)
    z = jax.nn.sigmoid(iz + hz)
    n = jnp.tanh(in_ + r * hn)
    h_new = (1.0 - z) * n + z * hm                   # actor_features == new rnn_hxs

    # ---- critic + Categorical head (merged into one matmul) -----------------------
    hnb = h_new.astype(bf16)
    head = mm(hnb, whead_ref[...]) + bhead_ref[...]  # (NB, 1 + A)
    value = head[:, 0:1]                             # (NB, 1)
    logits = head[:, 1:]                             # (NB, A) f32
    nact = logits.shape[-1]

    mx = jnp.max(logits, axis=-1, keepdims=True)
    zl = logits - mx
    lse = jnp.log(jnp.sum(jnp.exp(zl), axis=-1, keepdims=True))
    logp = zl - lse                                  # unperturbed log-softmax

    # Gumbel-max sampling: noise is host-generated Gumbel noise (zeros => mode()).
    pert = logits + noise_ref[...]
    mx_p = jnp.max(pert, axis=-1, keepdims=True)
    iota = jax.lax.broadcasted_iota(jnp.int32, logits.shape, 1)
    # first index achieving the max (matches torch argmax tie-break for mode())
    action = jnp.min(jnp.where(pert >= mx_p, iota, nact), axis=-1, keepdims=True)
    alp = jnp.sum(logp * (iota == action).astype(f32), axis=-1, keepdims=True)
    # TODO(synk): dist_entropy intentionally not computed (act() discards it).

    # ---- pack everything and do ONE lane-dense store -------------------------------
    pad_cols = out_ref.shape[1] - (h_new.shape[1] + 3)
    out_ref[...] = jnp.concatenate(
        [h_new, value, action.astype(f32), alp,
         jnp.zeros((h_new.shape[0], pad_cols), f32)], axis=1)


# ----------------------------------------------------------------------------
# parameters: "torch-like" raw init, then packed/folded kernel operands
# ----------------------------------------------------------------------------
def init_params(cfg, key):
    hid = cfg.hidden_size
    d = _dims(cfg, 1)
    conv_flat = 32 * d["o3h"] * d["o3w"]
    fuse_in = conv_flat + 3 * cfg.emb_dim
    ks = jax.random.split(key, 11)

    def rnd(k, shape, scale=0.05):
        return (scale * jax.random.normal(k, shape)).astype(jnp.float32)

    return dict(
        conv1_w=rnd(ks[0], (32, 3, 8, 8)), conv1_b=jnp.zeros((32,), jnp.float32),
        conv2_w=rnd(ks[1], (64, 32, 4, 4)), conv2_b=jnp.zeros((64,), jnp.float32),
        conv3_w=rnd(ks[2], (32, 64, 3, 3)), conv3_b=jnp.zeros((32,), jnp.float32),
        emb_r=rnd(ks[3], (cfg.dist_buckets, cfg.emb_dim)),
        emb_phi=rnd(ks[4], (cfg.angle_buckets, cfg.emb_dim)),
        emb_t=rnd(ks[5], (cfg.time_buckets, cfg.emb_dim)),
        fuse_w=rnd(ks[6], (fuse_in, hid)), fuse_b=jnp.zeros((hid,), jnp.float32),
        gru_wih=rnd(ks[7], (hid, 3 * hid)), gru_whh=rnd(ks[8], (hid, 3 * hid)),
        gru_bih=jnp.zeros((3 * hid,), jnp.float32),
        gru_bhh=jnp.zeros((3 * hid,), jnp.float32),
        critic_w=rnd(ks[9], (hid, 1)), critic_b=jnp.zeros((1,), jnp.float32),
        dist_w=rnd(ks[10], (hid, cfg.nactions), scale=0.01),
        dist_b=jnp.zeros((cfg.nactions,), jnp.float32),
    )


def pack_params(params, cfg, batch):
    """One-time folding / re-layout of the module weights into kernel operands."""
    hid = cfg.hidden_size
    d = _dims(cfg, batch)
    f32, bf16 = jnp.float32, jnp.bfloat16

    # fold (x/255 - mean)/std into conv1 (exact: the conv is linear)
    mean = jnp.asarray(cfg.img_mean, f32)
    std = jnp.asarray(cfg.img_std, f32)
    scale = (1.0 / (255.0 * std))[None, :, None, None]
    shift = (-mean / std)[None, :, None, None]
    w1_eff = params["conv1_w"] * scale
    b1_eff = params["conv1_b"] + jnp.sum(params["conv1_w"] * shift, axis=(1, 2, 3))
    w1 = w1_eff.transpose(2, 3, 1, 0).reshape(8 * 8 * 3, 32)       # cols = (kh, kw, c)

    w2 = params["conv2_w"].transpose(2, 3, 1, 0).reshape(4 * 4, 32, 64)
    w3 = params["conv3_w"].transpose(2, 3, 1, 0).reshape(3 * 3, 64, 32)

    g2 = _conv_gather(batch, d["o1h"], d["o1w"], d["o2h"], d["o2w"], 4, 2,
                      d["m2p"], d["m1p"])
    g3 = _conv_gather(batch, d["o2h"], d["o2w"], d["o3h"], d["o3w"], 3, 1,
                      d["m3p"], d["m2p"])
    sp3 = d["o3h"] * d["o3w"]
    gf = _flatten_gather(batch, d["nb"], sp3, d["m3p"])

    conv_flat = 32 * sp3
    wfeat = params["fuse_w"][:conv_flat].reshape(sp3, 32, hid)     # (spatial, c, hid)
    w_emb = params["fuse_w"][conv_flat:]
    e = cfg.emb_dim
    waux = jnp.concatenate([
        params["emb_r"] @ w_emb[0:e],                              # fold emb tables
        params["emb_phi"] @ w_emb[e:2 * e],
        params["emb_t"] @ w_emb[2 * e:3 * e],
        params["fuse_b"][None, :],                                 # rides the 1-column
    ], axis=0)

    wih = jnp.stack([params["gru_wih"][:, i * hid:(i + 1) * hid] for i in range(3)], 0)
    whh = jnp.stack([params["gru_whh"][:, i * hid:(i + 1) * hid] for i in range(3)], 0)
    bih = jnp.stack([params["gru_bih"][i * hid:(i + 1) * hid] for i in range(3)], 0)[:, None, :]
    bhh = jnp.stack([params["gru_bhh"][i * hid:(i + 1) * hid] for i in range(3)], 0)[:, None, :]

    # merged critic + action-logits head
    whead = jnp.concatenate([params["critic_w"], params["dist_w"]], axis=1)
    bhead = jnp.concatenate([params["critic_b"], params["dist_b"]], axis=0)[None, :]

    return dict(
        w1=w1.astype(bf16), b1=b1_eff.reshape(1, 32).astype(f32),
        g2=jnp.asarray(g2, bf16), w2=w2.astype(bf16),
        b2=params["conv2_b"].reshape(1, 64).astype(f32),
        g3=jnp.asarray(g3, bf16), w3=w3.astype(bf16),
        b3=params["conv3_b"].reshape(1, 32).astype(f32),
        gf=jnp.asarray(gf, bf16), wfeat=wfeat.astype(bf16),
        waux=waux.astype(bf16),
        wih=wih.astype(bf16), whh=whh.astype(bf16),
        bih=bih.astype(f32), bhh=bhh.astype(f32),
        whead=whead.astype(bf16), bhead=bhead.astype(f32),
    )


# ----------------------------------------------------------------------------
# LocalPolicy.act (deterministic flag mirrors the module; default False == sample)
# ----------------------------------------------------------------------------
def local_policy_act(cfg, packed, inputs, rnn_hxs, prev_actions, masks, rng_key,
                     *, deterministic=False):
    del prev_actions                      # unused by the forward pass (as in CNNBase)
    f32, bf16 = jnp.float32, jnp.bfloat16
    rgb = inputs["rgb_at_t"].astype(f32)          # (N,3,H,W), raw [0,255] (norm folded)
    goal = inputs["goal_at_t"].astype(f32)        # (N,2): (r, phi)
    t = inputs["t"].astype(jnp.int32)             # (N,1)
    n = rgb.shape[0]
    d = _dims(cfg, n)
    hid = cfg.hidden_size
    nb = d["nb"]
    slab_w = max(128, ((hid + 3 + 127) // 128) * 128)

    # conv1 im2col on the raw image (host-side glue; columns ordered (kh, kw, c))
    xim = rgb.transpose(0, 2, 3, 1)               # NHWC
    o1h, o1w = d["o1h"], d["o1w"]
    cols = []
    for kh in range(8):
        for kw in range(8):
            cols.append(xim[:, kh:kh + 4 * (o1h - 1) + 1:4,
                            kw:kw + 4 * (o1w - 1) + 1:4, :])
    p1 = jnp.stack(cols, axis=3).reshape(n * o1h * o1w, 8 * 8 * 3)
    p1 = jnp.pad(p1, ((0, d["m1p"] - n * o1h * o1w), (0, 0))).astype(bf16)

    # goal / time bucketization -> one-hot aux rows (+ constant 1 for the fuse bias)
    r_idx = jnp.clip((goal[:, 0] / 10.0 * cfg.dist_buckets).astype(jnp.int32),
                     0, cfg.dist_buckets - 1)
    phi_idx = jnp.clip(((goal[:, 1] + math.pi) / (2.0 * math.pi)
                        * cfg.angle_buckets).astype(jnp.int32),
                       0, cfg.angle_buckets - 1)
    t_idx = jnp.clip(t[:, 0], 0, cfg.time_buckets - 1)
    aux = jnp.concatenate([jax.nn.one_hot(r_idx, cfg.dist_buckets, dtype=f32),
                           jax.nn.one_hot(phi_idx, cfg.angle_buckets, dtype=f32),
                           jax.nn.one_hot(t_idx, cfg.time_buckets, dtype=f32),
                           jnp.ones((n, 1), f32)], axis=1)
    aux = jnp.pad(aux, ((0, nb - n), (0, 0))).astype(bf16)

    h0 = jnp.pad(rnn_hxs.astype(f32), ((0, nb - n), (0, 0)))
    mk = jnp.pad(masks.astype(f32), ((0, nb - n), (0, 0)))

    # Gumbel-max noise for dist.sample(); zeros reproduce dist.mode() exactly.
    if deterministic:
        noise = jnp.zeros((nb, cfg.nactions), f32)
    else:
        u = jax.random.uniform(rng_key, (nb, cfg.nactions), f32,
                               minval=1e-6, maxval=1.0)
        noise = -jnp.log(-jnp.log(u))

    operands = (p1, packed["w1"], packed["b1"],
                packed["g2"], packed["w2"], packed["b2"],
                packed["g3"], packed["w3"], packed["b3"],
                packed["gf"], packed["wfeat"],
                aux, packed["waux"],
                h0, mk,
                packed["wih"], packed["whh"], packed["bih"], packed["bhh"],
                packed["whead"], packed["bhead"],
                noise)

    out = pl.pallas_call(
        _local_policy_kernel,
        out_shape=jax.ShapeDtypeStruct((nb, slab_w), jnp.float32),
        grid=(1,),
        in_specs=[_full_spec(tuple(op.shape)) for op in operands],
        out_specs=_full_spec((nb, slab_w)),
        compiler_params=pltpu.CompilerParams(
            dimension_semantics=("arbitrary",)),
    )(*operands)

    value = out[:n, hid:hid + 1]
    action = out[:n, hid + 1:hid + 2].astype(jnp.int32)
    action_log_probs = out[:n, hid + 2:hid + 3]
    new_rnn_hxs = out[:n, 0:hid]
    return value, action, action_log_probs, new_rnn_hxs


# ----------------------------------------------------------------------------
# main
# ----------------------------------------------------------------------------
if __name__ == "__main__":
    cfg = Cfg()
    key = jax.random.PRNGKey(0)
    kp, k1, k2, k3, ks = jax.random.split(key, 5)

    params = init_params(cfg, kp)

    N = 2
    H, W = cfg.image_scale_hw
    packed = pack_params(params, cfg, N)

    inputs = {
        "rgb_at_t": jax.random.uniform(k1, (N, 3, H, W), jnp.float32, 0.0, 255.0),
        "goal_at_t": jnp.stack(
            [jax.random.uniform(k2, (N,), jnp.float32, 0.0, 10.0),
             jax.random.uniform(k3, (N,), jnp.float32, -math.pi, math.pi)], axis=1),
        "t": jnp.array([[0], [5]], jnp.int32),
    }
    rnn_hxs = jnp.zeros((N, cfg.hidden_size), jnp.float32)
    prev_actions = jnp.zeros((N, 1), jnp.int32)
    masks = jnp.ones((N, 1), jnp.float32)

    # default act(): stochastic (dist.sample() via Gumbel-max, key-deterministic)
    act_fn = jax.jit(functools.partial(local_policy_act, cfg, deterministic=False))
    value, action, action_log_probs, new_rnn_hxs = act_fn(
        packed, inputs, rnn_hxs, prev_actions, masks, ks)

    jax.block_until_ready((value, action, action_log_probs, new_rnn_hxs))
    assert value.shape == (N, 1)
    assert action.shape == (N, 1) and action.dtype == jnp.int32
    assert action_log_probs.shape == (N, 1)
    assert new_rnn_hxs.shape == (N, cfg.hidden_size)
    assert bool(jnp.all((action >= 0) & (action < cfg.nactions)))
    assert bool(jnp.all(action_log_probs <= 0.0))

    # deterministic mode() path also exercised once
    act_det = jax.jit(functools.partial(local_policy_act, cfg, deterministic=True))
    v2, a2, lp2, h2 = act_det(packed, inputs, rnn_hxs, prev_actions, masks, ks)
    jax.block_until_ready((v2, a2, lp2, h2))
    assert a2.shape == (N, 1)

    print("KERNEL_OK")
</pallas_src>

<mosaic_0001>
module attributes {stable_mosaic.version = 11 : i64} {
  func.func @_local_policy_kernel(%arg0: i32, %arg1: memref<456x192xbf16, #tpu.memory_space<vmem>>, %arg2: memref<192x32xbf16, #tpu.memory_space<vmem>>, %arg3: memref<1x32xf32, #tpu.memory_space<vmem>>, %arg4: memref<16x72x456xbf16, #tpu.memory_space<vmem>>, %arg5: memref<16x32x64xbf16, #tpu.memory_space<vmem>>, %arg6: memref<1x64xf32, #tpu.memory_space<vmem>>, %arg7: memref<9x32x72xbf16, #tpu.memory_space<vmem>>, %arg8: memref<9x64x32xbf16, #tpu.memory_space<vmem>>, %arg9: memref<1x32xf32, #tpu.memory_space<vmem>>, %arg10: memref<16x8x32xbf16, #tpu.memory_space<vmem>>, %arg11: memref<16x32x64xbf16, #tpu.memory_space<vmem>>, %arg12: memref<8x49xbf16, #tpu.memory_space<vmem>>, %arg13: memref<49x64xbf16, #tpu.memory_space<vmem>>, %arg14: memref<8x64xf32, #tpu.memory_space<vmem>>, %arg15: memref<8x1xf32, #tpu.memory_space<vmem>>, %arg16: memref<3x64x64xbf16, #tpu.memory_space<vmem>>, %arg17: memref<3x64x64xbf16, #tpu.memory_space<vmem>>, %arg18: memref<3x1x64xf32, #tpu.memory_space<vmem>>, %arg19: memref<3x1x64xf32, #tpu.memory_space<vmem>>, %arg20: memref<64x5xbf16, #tpu.memory_space<vmem>>, %arg21: memref<1x5xf32, #tpu.memory_space<vmem>>, %arg22: memref<8x4xf32, #tpu.memory_space<vmem>>, %arg23: memref<8x128xf32, #tpu.memory_space<vmem>>) attributes {dimension_semantics = [#tpu.dimension_semantics<arbitrary>], iteration_bounds = array<i64: 1>, scalar_prefetch = 0 : i64, scratch_operands = 0 : i64, tpu.core_type = #tpu.core_type<tc>, window_params = [{pipeline_mode = #tpu.pipeline_mode<synchronous>, transform_indices = @transform_0, window_bounds = array<i64: 456, 192>}, {pipeline_mode = #tpu.pipeline_mode<synchronous>, transform_indices = @transform_1, window_bounds = array<i64: 192, 32>}, {pipeline_mode = #tpu.pipeline_mode<synchronous>, transform_indices = @transform_2, window_bounds = array<i64: 1, 32>}, {pipeline_mode = #tpu.pipeline_mode<synchronous>, transform_indices = @transform_3, window_bounds = array<i64: 16, 72, 456>}, {pipeline_mode = #tpu.pipeline_mode<synchronous>, transform_indices = @transform_4, window_bounds = array<i64: 16, 32, 64>}, {pipeline_mode = #tpu.pipeline_mode<synchronous>, transform_indices = @transform_5, window_bounds = array<i64: 1, 64>}, {pipeline_mode = #tpu.pipeline_mode<synchronous>, transform_indices = @transform_6, window_bounds = array<i64: 9, 32, 72>}, {pipeline_mode = #tpu.pipeline_mode<synchronous>, transform_indices = @transform_7, window_bounds = array<i64: 9, 64, 32>}, {pipeline_mode = #tpu.pipeline_mode<synchronous>, transform_indices = @transform_8, window_bounds = array<i64: 1, 32>}, {pipeline_mode = #tpu.pipeline_mode<synchronous>, transform_indices = @transform_9, window_bounds = array<i64: 16, 8, 32>}, {pipeline_mode = #tpu.pipeline_mode<synchronous>, transform_indices = @transform_10, window_bounds = array<i64: 16, 32, 64>}, {pipeline_mode = #tpu.pipeline_mode<synchronous>, transform_indices = @transform_11, window_bounds = array<i64: 8, 49>}, {pipeline_mode = #tpu.pipeline_mode<synchronous>, transform_indices = @transform_12, window_bounds = array<i64: 49, 64>}, {pipeline_mode = #tpu.pipeline_mode<synchronous>, transform_indices = @transform_13, window_bounds = array<i64: 8, 64>}, {pipeline_mode = #tpu.pipeline_mode<synchronous>, transform_indices = @transform_14, window_bounds = array<i64: 8, 1>}, {pipeline_mode = #tpu.pipeline_mode<synchronous>, transform_indices = @transform_15, window_bounds = array<i64: 3, 64, 64>}, {pipeline_mode = #tpu.pipeline_mode<synchronous>, transform_indices = @transform_16, window_bounds = array<i64: 3, 64, 64>}, {pipeline_mode = #tpu.pipeline_mode<synchronous>, transform_indices = @transform_17, window_bounds = array<i64: 3, 1, 64>}, {pipeline_mode = #tpu.pipeline_mode<synchronous>, transform_indices = @transform_18, window_bounds = array<i64: 3, 1, 64>}, {pipeline_mode = #tpu.pipeline_mode<synchronous>, transform_indices = @transform_19, window_bounds = array<i64: 64, 5>}, {pipeline_mode = #tpu.pipeline_mode<synchronous>, transform_indices = @transform_20, window_bounds = array<i64: 1, 5>}, {pipeline_mode = #tpu.pipeline_mode<synchronous>, transform_indices = @transform_21, window_bounds = array<i64: 8, 4>}, {pipeline_mode = #tpu.pipeline_mode<synchronous>, transform_indices = @transform_22, window_bounds = array<i64: 8, 128>}]} {
    %c0 = arith.constant 0 : index
    %c0_0 = arith.constant 0 : index
    %0 = vector.load %arg1[%c0, %c0_0] : memref<456x192xbf16, #tpu.memory_space<vmem>>, vector<456x192xbf16>
    %c0_1 = arith.constant 0 : index
    %c0_2 = arith.constant 0 : index
    %1 = vector.load %arg2[%c0_1, %c0_2] : memref<192x32xbf16, #tpu.memory_space<vmem>>, vector<192x32xbf16>
    %cst = arith.constant dense<0.000000e+00> : vector<456x32xf32>
    %2 = tpu.matmul %0, %1, %cst {dimension_numbers = #tpu.dot_dimension_numbers<[1], [0], [0], [1], [0, 0, 1, 1], [], []>} : vector<456x192xbf16>, vector<192x32xbf16>, vector<456x32xf32> -> vector<456x32xf32>
    %c0_3 = arith.constant 0 : index
    %c0_4 = arith.constant 0 : index
    %3 = vector.load %arg3[%c0_3, %c0_4] : memref<1x32xf32, #tpu.memory_space<vmem>>, vector<1x32xf32>
    %4 = vector.broadcast %3 : vector<1x32xf32> to vector<456x32xf32>
    %5 = arith.addf %2, %4 : vector<456x32xf32>
    %cst_5 = arith.constant 0.000000e+00 : f32
    %6 = vector.broadcast %cst_5 : f32 to vector<456x32xf32>
    %7 = arith.maximumf %5, %6 : vector<456x32xf32>
    %8 = arith.truncf %7 : vector<456x32xf32> to vector<456x32xbf16>
    %cst_6 = arith.constant 0.000000e+00 : f32
    %9 = vector.broadcast %cst_6 : f32 to vector<72x64xf32>
    %c0_7 = arith.constant 0 : index
    %c0_8 = arith.constant 0 : index
    %c0_9 = arith.constant 0 : index
    %10 = vector.load %arg4[%c0_7, %c0_8, %c0_9] : memref<16x72x456xbf16, #tpu.memory_space<vmem>>, vector<1x72x456xbf16>
    %11 = vector.shape_cast %10 : vector<1x72x456xbf16> to vector<72x456xbf16>
    %cst_10 = arith.constant dense<0.000000e+00> : vector<72x32xf32>
    %12 = tpu.matmul %11, %8, %cst_10 {dimension_numbers = #tpu.dot_dimension_numbers<[1], [0], [0], [1], [0, 0, 1, 1], [], []>} : vector<72x456xbf16>, vector<456x32xbf16>, vector<72x32xf32> -> vector<72x32xf32>
    %13 = arith.truncf %12 : vector<72x32xf32> to vector<72x32xbf16>
    %c0_11 = arith.constant 0 : index
    %c0_12 = arith.constant 0 : index
    %c0_13 = arith.constant 0 : index
    %14 = vector.load %arg5[%c0_11, %c0_12, %c0_13] : memref<16x32x64xbf16, #tpu.memory_space<vmem>>, vector<1x32x64xbf16>
    %15 = vector.shape_cast %14 : vector<1x32x64xbf16> to vector<32x64xbf16>
    %cst_14 = arith.constant dense<0.000000e+00> : vector<72x64xf32>
    %16 = tpu.matmul %13, %15, %cst_14 {dimension_numbers = #tpu.dot_dimension_numbers<[1], [0], [0], [1], [0, 0, 1, 1], [], []>} : vector<72x32xbf16>, vector<32x64xbf16>, vector<72x64xf32> -> vector<72x64xf32>
    %17 = arith.addf %9, %16 : vector<72x64xf32>
    %c1 = arith.constant 1 : index
    %c0_15 = arith.constant 0 : index
    %c0_16 = arith.constant 0 : index
    %18 = vector.load %arg4[%c1, %c0_15, %c0_16] : memref<16x72x456xbf16, #tpu.memory_space<vmem>>, vector<1x72x456xbf16>
    %19 = vector.shape_cast %18 : vector<1x72x456xbf16> to vector<72x456xbf16>
    %cst_17 = arith.constant dense<0.000000e+00> : vector<72x32xf32>
    %20 = tpu.matmul %19, %8, %cst_17 {dimension_numbers = #tpu.dot_dimension_numbers<[1], [0], [0], [1], [0, 0, 1, 1], [], []>} : vector<72x456xbf16>, vector<456x32xbf16>, vector<72x32xf32> -> vector<72x32xf32>
    %21 = arith.truncf %20 : vector<72x32xf32> to vector<72x32xbf16>
    %c1_18 = arith.constant 1 : index
    %c0_19 = arith.constant 0 : index
    %c0_20 = arith.constant 0 : index
    %22 = vector.load %arg5[%c1_18, %c0_19, %c0_20] : memref<16x32x64xbf16, #tpu.memory_space<vmem>>, vector<1x32x64xbf16>
    %23 = vector.shape_cast %22 : vector<1x32x64xbf16> to vector<32x64xbf16>
    %cst_21 = arith.constant dense<0.000000e+00> : vector<72x64xf32>
    %24 = tpu.matmul %21, %23, %cst_21 {dimension_numbers = #tpu.dot_dimension_numbers<[1], [0], [0], [1], [0, 0, 1, 1], [], []>} : vector<72x32xbf16>, vector<32x64xbf16>, vector<72x64xf32> -> vector<72x64xf32>
    %25 = arith.addf %17, %24 : vector<72x64xf32>
    %c2 = arith.constant 2 : index
    %c0_22 = arith.constant 0 : index
    %c0_23 = arith.constant 0 : index
    %26 = vector.load %arg4[%c2, %c0_22, %c0_23] : memref<16x72x456xbf16, #tpu.memory_space<vmem>>, vector<1x72x456xbf16>
    %27 = vector.shape_cast %26 : vector<1x72x456xbf16> to vector<72x456xbf16>
    %cst_24 = arith.constant dense<0.000000e+00> : vector<72x32xf32>
    %28 = tpu.matmul %27, %8, %cst_24 {dimension_numbers = #tpu.dot_dimension_numbers<[1], [0], [0], [1], [0, 0, 1, 1], [], []>} : vector<72x456xbf16>, vector<456x32xbf16>, vector<72x32xf32> -> vector<72x32xf32>
    %29 = arith.truncf %28 : vector<72x32xf32> to vector<72x32xbf16>
    %c2_25 = arith.constant 2 : index
    %c0_26 = arith.constant 0 : index
    %c0_27 = arith.constant 0 : index
    %30 = vector.load %arg5[%c2_25, %c0_26, %c0_27] : memref<16x32x64xbf16, #tpu.memory_space<vmem>>, vector<1x32x64xbf16>
    %31 = vector.shape_cast %30 : vector<1x32x64xbf16> to vector<32x64xbf16>
    %cst_28 = arith.constant dense<0.000000e+00> : vector<72x64xf32>
    %32 = tpu.matmul %29, %31, %cst_28 {dimension_numbers = #tpu.dot_dimension_numbers<[1], [0], [0], [1], [0, 0, 1, 1], [], []>} : vector<72x32xbf16>, vector<32x64xbf16>, vector<72x64xf32> -> vector<72x64xf32>
    %33 = arith.addf %25, %32 : vector<72x64xf32>
    %c3 = arith.constant 3 : index
    %c0_29 = arith.constant 0 : index
    %c0_30 = arith.constant 0 : index
    %34 = vector.load %arg4[%c3, %c0_29, %c0_30] : memref<16x72x456xbf16, #tpu.memory_space<vmem>>, vector<1x72x456xbf16>
    %35 = vector.shape_cast %34 : vector<1x72x456xbf16> to vector<72x456xbf16>
    %cst_31 = arith.constant dense<0.000000e+00> : vector<72x32xf32>
    %36 = tpu.matmul %35, %8, %cst_31 {dimension_numbers = #tpu.dot_dimension_numbers<[1], [0], [0], [1], [0, 0, 1, 1], [], []>} : vector<72x456xbf16>, vector<456x32xbf16>, vector<72x32xf32> -> vector<72x32xf32>
    %37 = arith.truncf %36 : vector<72x32xf32> to vector<72x32xbf16>
    %c3_32 = arith.constant 3 : index
    %c0_33 = arith.constant 0 : index
    %c0_34 = arith.constant 0 : index
    %38 = vector.load %arg5[%c3_32, %c0_33, %c0_34] : memref<16x32x64xbf16, #tpu.memory_space<vmem>>, vector<1x32x64xbf16>
    %39 = vector.shape_cast %38 : vector<1x32x64xbf16> to vector<32x64xbf16>
    %cst_35 = arith.constant dense<0.000000e+00> : vector<72x64xf32>
    %40 = tpu.matmul %37, %39, %cst_35 {dimension_numbers = #tpu.dot_dimension_numbers<[1], [0], [0], [1], [0, 0, 1, 1], [], []>} : vector<72x32xbf16>, vector<32x64xbf16>, vector<72x64xf32> -> vector<72x64xf32>
    %41 = arith.addf %33, %40 : vector<72x64xf32>
    %c4 = arith.constant 4 : index
    %c0_36 = arith.constant 0 : index
    %c0_37 = arith.constant 0 : index
    %42 = vector.load %arg4[%c4, %c0_36, %c0_37] : memref<16x72x456xbf16, #tpu.memory_space<vmem>>, vector<1x72x456xbf16>
    %43 = vector.shape_cast %42 : vector<1x72x456xbf16> to vector<72x456xbf16>
    %cst_38 = arith.constant dense<0.000000e+00> : vector<72x32xf32>
    %44 = tpu.matmul %43, %8, %cst_38 {dimension_numbers = #tpu.dot_dimension_numbers<[1], [0], [0], [1], [0, 0, 1, 1], [], []>} : vector<72x456xbf16>, vector<456x32xbf16>, vector<72x32xf32> -> vector<72x32xf32>
    %45 = arith.truncf %44 : vector<72x32xf32> to vector<72x32xbf16>
    %c4_39 = arith.constant 4 : index
    %c0_40 = arith.constant 0 : index
    %c0_41 = arith.constant 0 : index
    %46 = vector.load %arg5[%c4_39, %c0_40, %c0_41] : memref<16x32x64xbf16, #tpu.memory_space<vmem>>, vector<1x32x64xbf16>
    %47 = vector.shape_cast %46 : vector<1x32x64xbf16> to vector<32x64xbf16>
    %cst_42 = arith.constant dense<0.000000e+00> : vector<72x64xf32>
    %48 = tpu.matmul %45, %47, %cst_42 {dimension_numbers = #tpu.dot_dimension_numbers<[1], [0], [0], [1], [0, 0, 1, 1], [], []>} : vector<72x32xbf16>, vector<32x64xbf16>, vector<72x64xf32> -> vector<72x64xf32>
    %49 = arith.addf %41, %48 : vector<72x64xf32>
    %c5 = arith.constant 5 : index
    %c0_43 = arith.constant 0 : index
    %c0_44 = arith.constant 0 : index
    %50 = vector.load %arg4[%c5, %c0_43, %c0_44] : memref<16x72x456xbf16, #tpu.memory_space<vmem>>, vector<1x72x456xbf16>
    %51 = vector.shape_cast %50 : vector<1x72x456xbf16> to vector<72x456xbf16>
    %cst_45 = arith.constant dense<0.000000e+00> : vector<72x32xf32>
    %52 = tpu.matmul %51, %8, %cst_45 {dimension_numbers = #tpu.dot_dimension_numbers<[1], [0], [0], [1], [0, 0, 1, 1], [], []>} : vector<72x456xbf16>, vector<456x32xbf16>, vector<72x32xf32> -> vector<72x32xf32>
    %53 = arith.truncf %52 : vector<72x32xf32> to vector<72x32xbf16>
    %c5_46 = arith.constant 5 : index
    %c0_47 = arith.constant 0 : index
    %c0_48 = arith.constant 0 : index
    %54 = vector.load %arg5[%c5_46, %c0_47, %c0_48] : memref<16x32x64xbf16, #tpu.memory_space<vmem>>, vector<1x32x64xbf16>
    %55 = vector.shape_cast %54 : vector<1x32x64xbf16> to vector<32x64xbf16>
    %cst_49 = arith.constant dense<0.000000e+00> : vector<72x64xf32>
    %56 = tpu.matmul %53, %55, %cst_49 {dimension_numbers = #tpu.dot_dimension_numbers<[1], [0], [0], [1], [0, 0, 1, 1], [], []>} : vector<72x32xbf16>, vector<32x64xbf16>, vector<72x64xf32> -> vector<72x64xf32>
    %57 = arith.addf %49, %56 : vector<72x64xf32>
    %c6 = arith.constant 6 : index
    %c0_50 = arith.constant 0 : index
    %c0_51 = arith.constant 0 : index
    %58 = vector.load %arg4[%c6, %c0_50, %c0_51] : memref<16x72x456xbf16, #tpu.memory_space<vmem>>, vector<1x72x456xbf16>
    %59 = vector.shape_cast %58 : vector<1x72x456xbf16> to vector<72x456xbf16>
    %cst_52 = arith.constant dense<0.000000e+00> : vector<72x32xf32>
    %60 = tpu.matmul %59, %8, %cst_52 {dimension_numbers = #tpu.dot_dimension_numbers<[1], [0], [0], [1], [0, 0, 1, 1], [], []>} : vector<72x456xbf16>, vector<456x32xbf16>, vector<72x32xf32> -> vector<72x32xf32>
    %61 = arith.truncf %60 : vector<72x32xf32> to vector<72x32xbf16>
    %c6_53 = arith.constant 6 : index
    %c0_54 = arith.constant 0 : index
    %c0_55 = arith.constant 0 : index
    %62 = vector.load %arg5[%c6_53, %c0_54, %c0_55] : memref<16x32x64xbf16, #tpu.memory_space<vmem>>, vector<1x32x64xbf16>
    %63 = vector.shape_cast %62 : vector<1x32x64xbf16> to vector<32x64xbf16>
    %cst_56 = arith.constant dense<0.000000e+00> : vector<72x64xf32>
    %64 = tpu.matmul %61, %63, %cst_56 {dimension_numbers = #tpu.dot_dimension_numbers<[1], [0], [0], [1], [0, 0, 1, 1], [], []>} : vector<72x32xbf16>, vector<32x64xbf16>, vector<72x64xf32> -> vector<72x64xf32>
    %65 = arith.addf %57, %64 : vector<72x64xf32>
    %c7 = arith.constant 7 : index
    %c0_57 = arith.constant 0 : index
    %c0_58 = arith.constant 0 : index
    %66 = vector.load %arg4[%c7, %c0_57, %c0_58] : memref<16x72x456xbf16, #tpu.memory_space<vmem>>, vector<1x72x456xbf16>
    %67 = vector.shape_cast %66 : vector<1x72x456xbf16> to vector<72x456xbf16>
    %cst_59 = arith.constant dense<0.000000e+00> : vector<72x32xf32>
    %68 = tpu.matmul %67, %8, %cst_59 {dimension_numbers = #tpu.dot_dimension_numbers<[1], [0], [0], [1], [0, 0, 1, 1], [], []>} : vector<72x456xbf16>, vector<456x32xbf16>, vector<72x32xf32> -> vector<72x32xf32>
    %69 = arith.truncf %68 : vector<72x32xf32> to vector<72x32xbf16>
    %c7_60 = arith.constant 7 : index
    %c0_61 = arith.constant 0 : index
    %c0_62 = arith.constant 0 : index
    %70 = vector.load %arg5[%c7_60, %c0_61, %c0_62] : memref<16x32x64xbf16, #tpu.memory_space<vmem>>, vector<1x32x64xbf16>
    %71 = vector.shape_cast %70 : vector<1x32x64xbf16> to vector<32x64xbf16>
    %cst_63 = arith.constant dense<0.000000e+00> : vector<72x64xf32>
    %72 = tpu.matmul %69, %71, %cst_63 {dimension_numbers = #tpu.dot_dimension_numbers<[1], [0], [0], [1], [0, 0, 1, 1], [], []>} : vector<72x32xbf16>, vector<32x64xbf16>, vector<72x64xf32> -> vector<72x64xf32>
    %73 = arith.addf %65, %72 : vector<72x64xf32>
    %c8 = arith.constant 8 : index
    %c0_64 = arith.constant 0 : index
    %c0_65 = arith.constant 0 : index
    %74 = vector.load %arg4[%c8, %c0_64, %c0_65] : memref<16x72x456xbf16, #tpu.memory_space<vmem>>, vector<1x72x456xbf16>
    %75 = vector.shape_cast %74 : vector<1x72x456xbf16> to vector<72x456xbf16>
    %cst_66 = arith.constant dense<0.000000e+00> : vector<72x32xf32>
    %76 = tpu.matmul %75, %8, %cst_66 {dimension_numbers = #tpu.dot_dimension_numbers<[1], [0], [0], [1], [0, 0, 1, 1], [], []>} : vector<72x456xbf16>, vector<456x32xbf16>, vector<72x32xf32> -> vector<72x32xf32>
    %77 = arith.truncf %76 : vector<72x32xf32> to vector<72x32xbf16>
    %c8_67 = arith.constant 8 : index
    %c0_68 = arith.constant 0 : index
    %c0_69 = arith.constant 0 : index
    %78 = vector.load %arg5[%c8_67, %c0_68, %c0_69] : memref<16x32x64xbf16, #tpu.memory_space<vmem>>, vector<1x32x64xbf16>
    %79 = vector.shape_cast %78 : vector<1x32x64xbf16> to vector<32x64xbf16>
    %cst_70 = arith.constant dense<0.000000e+00> : vector<72x64xf32>
    %80 = tpu.matmul %77, %79, %cst_70 {dimension_numbers = #tpu.dot_dimension_numbers<[1], [0], [0], [1], [0, 0, 1, 1], [], []>} : vector<72x32xbf16>, vector<32x64xbf16>, vector<72x64xf32> -> vector<72x64xf32>
    %81 = arith.addf %73, %80 : vector<72x64xf32>
    %c9 = arith.constant 9 : index
    %c0_71 = arith.constant 0 : index
    %c0_72 = arith.constant 0 : index
    %82 = vector.load %arg4[%c9, %c0_71, %c0_72] : memref<16x72x456xbf16, #tpu.memory_space<vmem>>, vector<1x72x456xbf16>
    %83 = vector.shape_cast %82 : vector<1x72x456xbf16> to vector<72x456xbf16>
    %cst_73 = arith.constant dense<0.000000e+00> : vector<72x32xf32>
    %84 = tpu.matmul %83, %8, %cst_73 {dimension_numbers = #tpu.dot_dimension_numbers<[1], [0], [0], [1], [0, 0, 1, 1], [], []>} : vector<72x456xbf16>, vector<456x32xbf16>, vector<72x32xf32> -> vector<72x32xf32>
    %85 = arith.truncf %84 : vector<72x32xf32> to vector<72x32xbf16>
    %c9_74 = arith.constant 9 : index
    %c0_75 = arith.constant 0 : index
    %c0_76 = arith.constant 0 : index
    %86 = vector.load %arg5[%c9_74, %c0_75, %c0_76] : memref<16x32x64xbf16, #tpu.memory_space<vmem>>, vector<1x32x64xbf16>
    %87 = vector.shape_cast %86 : vector<1x32x64xbf16> to vector<32x64xbf16>
    %cst_77 = arith.constant dense<0.000000e+00> : vector<72x64xf32>
    %88 = tpu.matmul %85, %87, %cst_77 {dimension_numbers = #tpu.dot_dimension_numbers<[1], [0], [0], [1], [0, 0, 1, 1], [], []>} : vector<72x32xbf16>, vector<32x64xbf16>, vector<72x64xf32> -> vector<72x64xf32>
    %89 = arith.addf %81, %88 : vector<72x64xf32>
    %c10 = arith.constant 10 : index
    %c0_78 = arith.constant 0 : index
    %c0_79 = arith.constant 0 : index
    %90 = vector.load %arg4[%c10, %c0_78, %c0_79] : memref<16x72x456xbf16, #tpu.memory_space<vmem>>, vector<1x72x456xbf16>
    %91 = vector.shape_cast %90 : vector<1x72x456xbf16> to vector<72x456xbf16>
    %cst_80 = arith.constant dense<0.000000e+00> : vector<72x32xf32>
    %92 = tpu.matmul %91, %8, %cst_80 {dimension_numbers = #tpu.dot_dimension_numbers<[1], [0], [0], [1], [0, 0, 1, 1], [], []>} : vector<72x456xbf16>, vector<456x32xbf16>, vector<72x32xf32> -> vector<72x32xf32>
    %93 = arith.truncf %92 : vector<72x32xf32> to vector<72x32xbf16>
    %c10_81 = arith.constant 10 : index
    %c0_82 = arith.constant 0 : index
    %c0_83 = arith.constant 0 : index
    %94 = vector.load %arg5[%c10_81, %c0_82, %c0_83] : memref<16x32x64xbf16, #tpu.memory_space<vmem>>, vector<1x32x64xbf16>
    %95 = vector.shape_cast %94 : vector<1x32x64xbf16> to vector<32x64xbf16>
    %cst_84 = arith.constant dense<0.000000e+00> : vector<72x64xf32>
    %96 = tpu.matmul %93, %95, %cst_84 {dimension_numbers = #tpu.dot_dimension_numbers<[1], [0], [0], [1], [0, 0, 1, 1], [], []>} : vector<72x32xbf16>, vector<32x64xbf16>, vector<72x64xf32> -> vector<72x64xf32>
    %97 = arith.addf %89, %96 : vector<72x64xf32>
    %c11 = arith.constant 11 : index
    %c0_85 = arith.constant 0 : index
    %c0_86 = arith.constant 0 : index
    %98 = vector.load %arg4[%c11, %c0_85, %c0_86] : memref<16x72x456xbf16, #tpu.memory_space<vmem>>, vector<1x72x456xbf16>
    %99 = vector.shape_cast %98 : vector<1x72x456xbf16> to vector<72x456xbf16>
    %cst_87 = arith.constant dense<0.000000e+00> : vector<72x32xf32>
    %100 = tpu.matmul %99, %8, %cst_87 {dimension_numbers = #tpu.dot_dimension_numbers<[1], [0], [0], [1], [0, 0, 1, 1], [], []>} : vector<72x456xbf16>, vector<456x32xbf16>, vector<72x32xf32> -> vector<72x32xf32>
    %101 = arith.truncf %100 : vector<72x32xf32> to vector<72x32xbf16>
    %c11_88 = arith.constant 11 : index
    %c0_89 = arith.constant 0 : index
    %c0_90 = arith.constant 0 : index
    %102 = vector.load %arg5[%c11_88, %c0_89, %c0_90] : memref<16x32x64xbf16, #tpu.memory_space<vmem>>, vector<1x32x64xbf16>
    %103 = vector.shape_cast %102 : vector<1x32x64xbf16> to vector<32x64xbf16>
    %cst_91 = arith.constant dense<0.000000e+00> : vector<72x64xf32>
    %104 = tpu.matmul %101, %103, %cst_91 {dimension_numbers = #tpu.dot_dimension_numbers<[1], [0], [0], [1], [0, 0, 1, 1], [], []>} : vector<72x32xbf16>, vector<32x64xbf16>, vector<72x64xf32> -> vector<72x64xf32>
    %105 = arith.addf %97, %104 : vector<72x64xf32>
    %c12 = arith.constant 12 : index
    %c0_92 = arith.constant 0 : index
    %c0_93 = arith.constant 0 : index
    %106 = vector.load %arg4[%c12, %c0_92, %c0_93] : memref<16x72x456xbf16, #tpu.memory_space<vmem>>, vector<1x72x456xbf16>
    %107 = vector.shape_cast %106 : vector<1x72x456xbf16> to vector<72x456xbf16>
    %cst_94 = arith.constant dense<0.000000e+00> : vector<72x32xf32>
    %108 = tpu.matmul %107, %8, %cst_94 {dimension_numbers = #tpu.dot_dimension_numbers<[1], [0], [0], [1], [0, 0, 1, 1], [], []>} : vector<72x456xbf16>, vector<456x32xbf16>, vector<72x32xf32> -> vector<72x32xf32>
    %109 = arith.truncf %108 : vector<72x32xf32> to vector<72x32xbf16>
    %c12_95 = arith.constant 12 : index
    %c0_96 = arith.constant 0 : index
    %c0_97 = arith.constant 0 : index
    %110 = vector.load %arg5[%c12_95, %c0_96, %c0_97] : memref<16x32x64xbf16, #tpu.memory_space<vmem>>, vector<1x32x64xbf16>
    %111 = vector.shape_cast %110 : vector<1x32x64xbf16> to vector<32x64xbf16>
    %cst_98 = arith.constant dense<0.000000e+00> : vector<72x64xf32>
    %112 = tpu.matmul %109, %111, %cst_98 {dimension_numbers = #tpu.dot_dimension_numbers<[1], [0], [0], [1], [0, 0, 1, 1], [], []>} : vector<72x32xbf16>, vector<32x64xbf16>, vector<72x64xf32> -> vector<72x64xf32>
    %113 = arith.addf %105, %112 : vector<72x64xf32>
    %c13 = arith.constant 13 : index
    %c0_99 = arith.constant 0 : index
    %c0_100 = arith.constant 0 : index
    %114 = vector.load %arg4[%c13, %c0_99, %c0_100] : memref<16x72x456xbf16, #tpu.memory_space<vmem>>, vector<1x72x456xbf16>
    %115 = vector.shape_cast %114 : vector<1x72x456xbf16> to vector<72x456xbf16>
    %cst_101 = arith.constant dense<0.000000e+00> : vector<72x32xf32>
    %116 = tpu.matmul %115, %8, %cst_101 {dimension_numbers = #tpu.dot_dimension_numbers<[1], [0], [0], [1], [0, 0, 1, 1], [], []>} : vector<72x456xbf16>, vector<456x32xbf16>, vector<72x32xf32> -> vector<72x32xf32>
    %117 = arith.truncf %116 : vector<72x32xf32> to vector<72x32xbf16>
    %c13_102 = arith.constant 13 : index
    %c0_103 = arith.constant 0 : index
    %c0_104 = arith.constant 0 : index
    %118 = vector.load %arg5[%c13_102, %c0_103, %c0_104] : memref<16x32x64xbf16, #tpu.memory_space<vmem>>, vector<1x32x64xbf16>
    %119 = vector.shape_cast %118 : vector<1x32x64xbf16> to vector<32x64xbf16>
    %cst_105 = arith.constant dense<0.000000e+00> : vector<72x64xf32>
    %120 = tpu.matmul %117, %119, %cst_105 {dimension_numbers = #tpu.dot_dimension_numbers<[1], [0], [0], [1], [0, 0, 1, 1], [], []>} : vector<72x32xbf16>, vector<32x64xbf16>, vector<72x64xf32> -> vector<72x64xf32>
    %121 = arith.addf %113, %120 : vector<72x64xf32>
    %c14 = arith.constant 14 : index
    %c0_106 = arith.constant 0 : index
    %c0_107 = arith.constant 0 : index
    %122 = vector.load %arg4[%c14, %c0_106, %c0_107] : memref<16x72x456xbf16, #tpu.memory_space<vmem>>, vector<1x72x456xbf16>
    %123 = vector.shape_cast %122 : vector<1x72x456xbf16> to vector<72x456xbf16>
    %cst_108 = arith.constant dense<0.000000e+00> : vector<72x32xf32>
    %124 = tpu.matmul %123, %8, %cst_108 {dimension_numbers = #tpu.dot_dimension_numbers<[1], [0], [0], [1], [0, 0, 1, 1], [], []>} : vector<72x456xbf16>, vector<456x32xbf16>, vector<72x32xf32> -> vector<72x32xf32>
    %125 = arith.truncf %124 : vector<72x32xf32> to vector<72x32xbf16>
    %c14_109 = arith.constant 14 : index
    %c0_110 = arith.constant 0 : index
    %c0_111 = arith.constant 0 : index
    %126 = vector.load %arg5[%c14_109, %c0_110, %c0_111] : memref<16x32x64xbf16, #tpu.memory_space<vmem>>, vector<1x32x64xbf16>
    %127 = vector.shape_cast %126 : vector<1x32x64xbf16> to vector<32x64xbf16>
    %cst_112 = arith.constant dense<0.000000e+00> : vector<72x64xf32>
    %128 = tpu.matmul %125, %127, %cst_112 {dimension_numbers = #tpu.dot_dimension_numbers<[1], [0], [0], [1], [0, 0, 1, 1], [], []>} : vector<72x32xbf16>, vector<32x64xbf16>, vector<72x64xf32> -> vector<72x64xf32>
    %129 = arith.addf %121, %128 : vector<72x64xf32>
    %c15 = arith.constant 15 : index
    %c0_113 = arith.constant 0 : index
    %c0_114 = arith.constant 0 : index
    %130 = vector.load %arg4[%c15, %c0_113, %c0_114] : memref<16x72x456xbf16, #tpu.memory_space<vmem>>, vector<1x72x456xbf16>
    %131 = vector.shape_cast %130 : vector<1x72x456xbf16> to vector<72x456xbf16>
    %cst_115 = arith.constant dense<0.000000e+00> : vector<72x32xf32>
    %132 = tpu.matmul %131, %8, %cst_115 {dimension_numbers = #tpu.dot_dimension_numbers<[1], [0], [0], [1], [0, 0, 1, 1], [], []>} : vector<72x456xbf16>, vector<456x32xbf16>, vector<72x32xf32> -> vector<72x32xf32>
    %133 = arith.truncf %132 : vector<72x32xf32> to vector<72x32xbf16>
    %c15_116 = arith.constant 15 : index
    %c0_117 = arith.constant 0 : index
    %c0_118 = arith.constant 0 : index
    %134 = vector.load %arg5[%c15_116, %c0_117, %c0_118] : memref<16x32x64xbf16, #tpu.memory_space<vmem>>, vector<1x32x64xbf16>
    %135 = vector.shape_cast %134 : vector<1x32x64xbf16> to vector<32x64xbf16>
    %cst_119 = arith.constant dense<0.000000e+00> : vector<72x64xf32>
    %136 = tpu.matmul %133, %135, %cst_119 {dimension_numbers = #tpu.dot_dimension_numbers<[1], [0], [0], [1], [0, 0, 1, 1], [], []>} : vector<72x32xbf16>, vector<32x64xbf16>, vector<72x64xf32> -> vector<72x64xf32>
    %137 = arith.addf %129, %136 : vector<72x64xf32>
    %c0_120 = arith.constant 0 : index
    %c0_121 = arith.constant 0 : index
    %138 = vector.load %arg6[%c0_120, %c0_121] : memref<1x64xf32, #tpu.memory_space<vmem>>, vector<1x64xf32>
    %139 = vector.broadcast %138 : vector<1x64xf32> to vector<72x64xf32>
    %140 = arith.addf %137, %139 : vector<72x64xf32>
    %cst_122 = arith.constant 0.000000e+00 : f32
    %141 = vector.broadcast %cst_122 : f32 to vector<72x64xf32>
    %142 = arith.maximumf %140, %141 : vector<72x64xf32>
    %143 = arith.truncf %142 : vector<72x64xf32> to vector<72x64xbf16>
    %cst_123 = arith.constant 0.000000e+00 : f32
    %144 = vector.broadcast %cst_123 : f32 to vector<32x32xf32>
    %c0_124 = arith.constant 0 : index
    %c0_125 = arith.constant 0 : index
    %c0_126 = arith.constant 0 : index
    %145 = vector.load %arg7[%c0_124, %c0_125, %c0_126] : memref<9x32x72xbf16, #tpu.memory_space<vmem>>, vector<1x32x72xbf16>
    %146 = vector.shape_cast %145 : vector<1x32x72xbf16> to vector<32x72xbf16>
    %cst_127 = arith.constant dense<0.000000e+00> : vector<32x64xf32>
    %147 = tpu.matmul %146, %143, %cst_127 {dimension_numbers = #tpu.dot_dimension_numbers<[1], [0], [0], [1], [0, 0, 1, 1], [], []>} : vector<32x72xbf16>, vector<72x64xbf16>, vector<32x64xf32> -> vector<32x64xf32>
    %148 = arith.truncf %147 : vector<32x64xf32> to vector<32x64xbf16>
    %c0_128 = arith.constant 0 : index
    %c0_129 = arith.constant 0 : index
    %c0_130 = arith.constant 0 : index
    %149 = vector.load %arg8[%c0_128, %c0_129, %c0_130] : memref<9x64x32xbf16, #tpu.memory_space<vmem>>, vector<1x64x32xbf16>
    %150 = vector.shape_cast %149 : vector<1x64x32xbf16> to vector<64x32xbf16>
    %cst_131 = arith.constant dense<0.000000e+00> : vector<32x32xf32>
    %151 = tpu.matmul %148, %150, %cst_131 {dimension_numbers = #tpu.dot_dimension_numbers<[1], [0], [0], [1], [0, 0, 1, 1], [], []>} : vector<32x64xbf16>, vector<64x32xbf16>, vector<32x32xf32> -> vector<32x32xf32>
    %152 = arith.addf %144, %151 : vector<32x32xf32>
    %c1_132 = arith.constant 1 : index
    %c0_133 = arith.constant 0 : index
    %c0_134 = arith.constant 0 : index
    %153 = vector.load %arg7[%c1_132, %c0_133, %c0_134] : memref<9x32x72xbf16, #tpu.memory_space<vmem>>, vector<1x32x72xbf16>
    %154 = vector.shape_cast %153 : vector<1x32x72xbf16> to vector<32x72xbf16>
    %cst_135 = arith.constant dense<0.000000e+00> : vector<32x64xf32>
    %155 = tpu.matmul %154, %143, %cst_135 {dimension_numbers = #tpu.dot_dimension_numbers<[1], [0], [0], [1], [0, 0, 1, 1], [], []>} : vector<32x72xbf16>, vector<72x64xbf16>, vector<32x64xf32> -> vector<32x64xf32>
    %156 = arith.truncf %155 : vector<32x64xf32> to vector<32x64xbf16>
    %c1_136 = arith.constant 1 : index
    %c0_137 = arith.constant 0 : index
    %c0_138 = arith.constant 0 : index
    %157 = vector.load %arg8[%c1_136, %c0_137, %c0_138] : memref<9x64x32xbf16, #tpu.memory_space<vmem>>, vector<1x64x32xbf16>
    %158 = vector.shape_cast %157 : vector<1x64x32xbf16> to vector<64x32xbf16>
    %cst_139 = arith.constant dense<0.000000e+00> : vector<32x32xf32>
    %159 = tpu.matmul %156, %158, %cst_139 {dimension_numbers = #tpu.dot_dimension_numbers<[1], [0], [0], [1], [0, 0, 1, 1], [], []>} : vector<32x64xbf16>, vector<64x32xbf16>, vector<32x32xf32> -> vector<32x32xf32>
    %160 = arith.addf %152, %159 : vector<32x32xf32>
    %c2_140 = arith.constant 2 : index
    %c0_141 = arith.constant 0 : index
    %c0_142 = arith.constant 0 : index
    %161 = vector.load %arg7[%c2_140, %c0_141, %c0_142] : memref<9x32x72xbf16, #tpu.memory_space<vmem>>, vector<1x32x72xbf16>
    %162 = vector.shape_cast %161 : vector<1x32x72xbf16> to vector<32x72xbf16>
    %cst_143 = arith.constant dense<0.000000e+00> : vector<32x64xf32>
    %163 = tpu.matmul %162, %143, %cst_143 {dimension_numbers = #tpu.dot_dimension_numbers<[1], [0], [0], [1], [0, 0, 1, 1], [], []>} : vector<32x72xbf16>, vector<72x64xbf16>, vector<32x64xf32> -> vector<32x64xf32>
    %164 = arith.truncf %163 : vector<32x64xf32> to vector<32x64xbf16>
    %c2_144 = arith.constant 2 : index
    %c0_145 = arith.constant 0 : index
    %c0_146 = arith.constant 0 : index
    %165 = vector.load %arg8[%c2_144, %c0_145, %c0_146] : memref<9x64x32xbf16, #tpu.memory_space<vmem>>, vector<1x64x32xbf16>
    %166 = vector.shape_cast %165 : vector<1x64x32xbf16> to vector<64x32xbf16>
    %cst_147 = arith.constant dense<0.000000e+00> : vector<32x32xf32>
    %167 = tpu.matmul %164, %166, %cst_147 {dimension_numbers = #tpu.dot_dimension_numbers<[1], [0], [0], [1], [0, 0, 1, 1], [], []>} : vector<32x64xbf16>, vector<64x32xbf16>, vector<32x32xf32> -> vector<32x32xf32>
    %168 = arith.addf %160, %167 : vector<32x32xf32>
    %c3_148 = arith.constant 3 : index
    %c0_149 = arith.constant 0 : index
    %c0_150 = arith.constant 0 : index
    %169 = vector.load %arg7[%c3_148, %c0_149, %c0_150] : memref<9x32x72xbf16, #tpu.memory_space<vmem>>, vector<1x32x72xbf16>
    %170 = vector.shape_cast %169 : vector<1x32x72xbf16> to vector<32x72xbf16>
    %cst_151 = arith.constant dense<0.000000e+00> : vector<32x64xf32>
    %171 = tpu.matmul %170, %143, %cst_151 {dimension_numbers = #tpu.dot_dimension_numbers<[1], [0], [0], [1], [0, 0, 1, 1], [], []>} : vector<32x72xbf16>, vector<72x64xbf16>, vector<32x64xf32> -> vector<32x64xf32>
    %172 = arith.truncf %171 : vector<32x64xf32> to vector<32x64xbf16>
    %c3_152 = arith.constant 3 : index
    %c0_153 = arith.constant 0 : index
    %c0_154 = arith.constant 0 : index
    %173 = vector.load %arg8[%c3_152, %c0_153, %c0_154] : memref<9x64x32xbf16, #tpu.memory_space<vmem>>, vector<1x64x32xbf16>
    %174 = vector.shape_cast %173 : vector<1x64x32xbf16> to vector<64x32xbf16>
    %cst_155 = arith.constant dense<0.000000e+00> : vector<32x32xf32>
    %175 = tpu.matmul %172, %174, %cst_155 {dimension_numbers = #tpu.dot_dimension_numbers<[1], [0], [0], [1], [0, 0, 1, 1], [], []>} : vector<32x64xbf16>, vector<64x32xbf16>, vector<32x32xf32> -> vector<32x32xf32>
    %176 = arith.addf %168, %175 : vector<32x32xf32>
    %c4_156 = arith.constant 4 : index
    %c0_157 = arith.constant 0 : index
    %c0_158 = arith.constant 0 : index
    %177 = vector.load %arg7[%c4_156, %c0_157, %c0_158] : memref<9x32x72xbf16, #tpu.memory_space<vmem>>, vector<1x32x72xbf16>
    %178 = vector.shape_cast %177 : vector<1x32x72xbf16> to vector<32x72xbf16>
    %cst_159 = arith.constant dense<0.000000e+00> : vector<32x64xf32>
    %179 = tpu.matmul %178, %143, %cst_159 {dimension_numbers = #tpu.dot_dimension_numbers<[1], [0], [0], [1], [0, 0, 1, 1], [], []>} : vector<32x72xbf16>, vector<72x64xbf16>, vector<32x64xf32> -> vector<32x64xf32>
    %180 = arith.truncf %179 : vector<32x64xf32> to vector<32x64xbf16>
    %c4_160 = arith.constant 4 : index
    %c0_161 = arith.constant 0 : index
    %c0_162 = arith.constant 0 : index
    %181 = vector.load %arg8[%c4_160, %c0_161, %c0_162] : memref<9x64x32xbf16, #tpu.memory_space<vmem>>, vector<1x64x32xbf16>
    %182 = vector.shape_cast %181 : vector<1x64x32xbf16> to vector<64x32xbf16>
    %cst_163 = arith.constant dense<0.000000e+00> : vector<32x32xf32>
    %183 = tpu.matmul %180, %182, %cst_163 {dimension_numbers = #tpu.dot_dimension_numbers<[1], [0], [0], [1], [0, 0, 1, 1], [], []>} : vector<32x64xbf16>, vector<64x32xbf16>, vector<32x32xf32> -> vector<32x32xf32>
    %184 = arith.addf %176, %183 : vector<32x32xf32>
    %c5_164 = arith.constant 5 : index
    %c0_165 = arith.constant 0 : index
    %c0_166 = arith.constant 0 : index
    %185 = vector.load %arg7[%c5_164, %c0_165, %c0_166] : memref<9x32x72xbf16, #tpu.memory_space<vmem>>, vector<1x32x72xbf16>
    %186 = vector.shape_cast %185 : vector<1x32x72xbf16> to vector<32x72xbf16>
    %cst_167 = arith.constant dense<0.000000e+00> : vector<32x64xf32>
    %187 = tpu.matmul %186, %143, %cst_167 {dimension_numbers = #tpu.dot_dimension_numbers<[1], [0], [0], [1], [0, 0, 1, 1], [], []>} : vector<32x72xbf16>, vector<72x64xbf16>, vector<32x64xf32> -> vector<32x64xf32>
    %188 = arith.truncf %187 : vector<32x64xf32> to vector<32x64xbf16>
    %c5_168 = arith.constant 5 : index
    %c0_169 = arith.constant 0 : index
    %c0_170 = arith.constant 0 : index
    %189 = vector.load %arg8[%c5_168, %c0_169, %c0_170] : memref<9x64x32xbf16, #tpu.memory_space<vmem>>, vector<1x64x32xbf16>
    %190 = vector.shape_cast %189 : vector<1x64x32xbf16> to vector<64x32xbf16>
    %cst_171 = arith.constant dense<0.000000e+00> : vector<32x32xf32>
    %191 = tpu.matmul %188, %190, %cst_171 {dimension_numbers = #tpu.dot_dimension_numbers<[1], [0], [0], [1], [0, 0, 1, 1], [], []>} : vector<32x64xbf16>, vector<64x32xbf16>, vector<32x32xf32> -> vector<32x32xf32>
    %192 = arith.addf %184, %191 : vector<32x32xf32>
    %c6_172 = arith.constant 6 : index
    %c0_173 = arith.constant 0 : index
    %c0_174 = arith.constant 0 : index
    %193 = vector.load %arg7[%c6_172, %c0_173, %c0_174] : memref<9x32x72xbf16, #tpu.memory_space<vmem>>, vector<1x32x72xbf16>
    %194 = vector.shape_cast %193 : vector<1x32x72xbf16> to vector<32x72xbf16>
    %cst_175 = arith.constant dense<0.000000e+00> : vector<32x64xf32>
    %195 = tpu.matmul %194, %143, %cst_175 {dimension_numbers = #tpu.dot_dimension_numbers<[1], [0], [0], [1], [0, 0, 1, 1], [], []>} : vector<32x72xbf16>, vector<72x64xbf16>, vector<32x64xf32> -> vector<32x64xf32>
    %196 = arith.truncf %195 : vector<32x64xf32> to vector<32x64xbf16>
    %c6_176 = arith.constant 6 : index
    %c0_177 = arith.constant 0 : index
    %c0_178 = arith.constant 0 : index
    %197 = vector.load %arg8[%c6_176, %c0_177, %c0_178] : memref<9x64x32xbf16, #tpu.memory_space<vmem>>, vector<1x64x32xbf16>
    %198 = vector.shape_cast %197 : vector<1x64x32xbf16> to vector<64x32xbf16>
    %cst_179 = arith.constant dense<0.000000e+00> : vector<32x32xf32>
    %199 = tpu.matmul %196, %198, %cst_179 {dimension_numbers = #tpu.dot_dimension_numbers<[1], [0], [0], [1], [0, 0, 1, 1], [], []>} : vector<32x64xbf16>, vector<64x32xbf16>, vector<32x32xf32> -> vector<32x32xf32>
    %200 = arith.addf %192, %199 : vector<32x32xf32>
    %c7_180 = arith.constant 7 : index
    %c0_181 = arith.constant 0 : index
    %c0_182 = arith.constant 0 : index
    %201 = vector.load %arg7[%c7_180, %c0_181, %c0_182] : memref<9x32x72xbf16, #tpu.memory_space<vmem>>, vector<1x32x72xbf16>
    %202 = vector.shape_cast %201 : vector<1x32x72xbf16> to vector<32x72xbf16>
    %cst_183 = arith.constant dense<0.000000e+00> : vector<32x64xf32>
    %203 = tpu.matmul %202, %143, %cst_183 {dimension_numbers = #tpu.dot_dimension_numbers<[1], [0], [0], [1], [0, 0, 1, 1], [], []>} : vector<32x72xbf16>, vector<72x64xbf16>, vector<32x64xf32> -> vector<32x64xf32>
    %204 = arith.truncf %203 : vector<32x64xf32> to vector<32x64xbf16>
    %c7_184 = arith.constant 7 : index
    %c0_185 = arith.constant 0 : index
    %c0_186 = arith.constant 0 : index
    %205 = vector.load %arg8[%c7_184, %c0_185, %c0_186] : memref<9x64x32xbf16, #tpu.memory_space<vmem>>, vector<1x64x32xbf16>
    %206 = vector.shape_cast %205 : vector<1x64x32xbf16> to vector<64x32xbf16>
    %cst_187 = arith.constant dense<0.000000e+00> : vector<32x32xf32>
    %207 = tpu.matmul %204, %206, %cst_187 {dimension_numbers = #tpu.dot_dimension_numbers<[1], [0], [0], [1], [0, 0, 1, 1], [], []>} : vector<32x64xbf16>, vector<64x32xbf16>, vector<32x32xf32> -> vector<32x32xf32>
    %208 = arith.addf %200, %207 : vector<32x32xf32>
    %c8_188 = arith.constant 8 : index
    %c0_189 = arith.constant 0 : index
    %c0_190 = arith.constant 0 : index
    %209 = vector.load %arg7[%c8_188, %c0_189, %c0_190] : memref<9x32x72xbf16, #tpu.memory_space<vmem>>, vector<1x32x72xbf16>
    %210 = vector.shape_cast %209 : vector<1x32x72xbf16> to vector<32x72xbf16>
    %cst_191 = arith.constant dense<0.000000e+00> : vector<32x64xf32>
    %211 = tpu.matmul %210, %143, %cst_191 {dimension_numbers = #tpu.dot_dimension_numbers<[1], [0], [0], [1], [0, 0, 1, 1], [], []>} : vector<32x72xbf16>, vector<72x64xbf16>, vector<32x64xf32> -> vector<32x64xf32>
    %212 = arith.truncf %211 : vector<32x64xf32> to vector<32x64xbf16>
    %c8_192 = arith.constant 8 : index
    %c0_193 = arith.constant 0 : index
    %c0_194 = arith.constant 0 : index
    %213 = vector.load %arg8[%c8_192, %c0_193, %c0_194] : memref<9x64x32xbf16, #tpu.memory_space<vmem>>, vector<1x64x32xbf16>
    %214 = vector.shape_cast %213 : vector<1x64x32xbf16> to vector<64x32xbf16>
    %cst_195 = arith.constant dense<0.000000e+00> : vector<32x32xf32>
    %215 = tpu.matmul %212, %214, %cst_195 {dimension_numbers = #tpu.dot_dimension_numbers<[1], [0], [0], [1], [0, 0, 1, 1], [], []>} : vector<32x64xbf16>, vector<64x32xbf16>, vector<32x32xf32> -> vector<32x32xf32>
    %216 = arith.addf %208, %215 : vector<32x32xf32>
    %c0_196 = arith.constant 0 : index
    %c0_197 = arith.constant 0 : index
    %217 = vector.load %arg9[%c0_196, %c0_197] : memref<1x32xf32, #tpu.memory_space<vmem>>, vector<1x32xf32>
    %218 = vector.broadcast %217 : vector<1x32xf32> to vector<32x32xf32>
    %219 = arith.addf %216, %218 : vector<32x32xf32>
    %cst_198 = arith.constant 0.000000e+00 : f32
    %220 = vector.broadcast %cst_198 : f32 to vector<32x32xf32>
    %221 = arith.maximumf %219, %220 : vector<32x32xf32>
    %222 = arith.truncf %221 : vector<32x32xf32> to vector<32x32xbf16>
    %c0_199 = arith.constant 0 : index
    %c0_200 = arith.constant 0 : index
    %223 = vector.load %arg12[%c0_199, %c0_200] : memref<8x49xbf16, #tpu.memory_space<vmem>>, vector<8x49xbf16>
    %c0_201 = arith.constant 0 : index
    %c0_202 = arith.constant 0 : index
    %224 = vector.load %arg13[%c0_201, %c0_202] : memref<49x64xbf16, #tpu.memory_space<vmem>>, vector<49x64xbf16>
    %cst_203 = arith.constant dense<0.000000e+00> : vector<8x64xf32>
    %225 = tpu.matmul %223, %224, %cst_203 {dimension_numbers = #tpu.dot_dimension_numbers<[1], [0], [0], [1], [0, 0, 1, 1], [], []>} : vector<8x49xbf16>, vector<49x64xbf16>, vector<8x64xf32> -> vector<8x64xf32>
    %c0_204 = arith.constant 0 : index
    %c0_205 = arith.constant 0 : index
    %c0_206 = arith.constant 0 : index
    %226 = vector.load %arg10[%c0_204, %c0_205, %c0_206] : memref<16x8x32xbf16, #tpu.memory_space<vmem>>, vector<1x8x32xbf16>
    %227 = vector.shape_cast %226 : vector<1x8x32xbf16> to vector<8x32xbf16>
    %cst_207 = arith.constant dense<0.000000e+00> : vector<8x32xf32>
    %228 = tpu.matmul %227, %222, %cst_207 {dimension_numbers = #tpu.dot_dimension_numbers<[1], [0], [0], [1], [0, 0, 1, 1], [], []>} : vector<8x32xbf16>, vector<32x32xbf16>, vector<8x32xf32> -> vector<8x32xf32>
    %229 = arith.truncf %228 : vector<8x32xf32> to vector<8x32xbf16>
    %c0_208 = arith.constant 0 : index
    %c0_209 = arith.constant 0 : index
    %c0_210 = arith.constant 0 : index
    %230 = vector.load %arg11[%c0_208, %c0_209, %c0_210] : memref<16x32x64xbf16, #tpu.memory_space<vmem>>, vector<1x32x64xbf16>
    %231 = vector.shape_cast %230 : vector<1x32x64xbf16> to vector<32x64xbf16>
    %cst_211 = arith.constant dense<0.000000e+00> : vector<8x64xf32>
    %232 = tpu.matmul %229, %231, %cst_211 {dimension_numbers = #tpu.dot_dimension_numbers<[1], [0], [0], [1], [0, 0, 1, 1], [], []>} : vector<8x32xbf16>, vector<32x64xbf16>, vector<8x64xf32> -> vector<8x64xf32>
    %233 = arith.addf %225, %232 : vector<8x64xf32>
    %c1_212 = arith.constant 1 : index
    %c0_213 = arith.constant 0 : index
    %c0_214 = arith.constant 0 : index
    %234 = vector.load %arg10[%c1_212, %c0_213, %c0_214] : memref<16x8x32xbf16, #tpu.memory_space<vmem>>, vector<1x8x32xbf16>
    %235 = vector.shape_cast %234 : vector<1x8x32xbf16> to vector<8x32xbf16>
    %cst_215 = arith.constant dense<0.000000e+00> : vector<8x32xf32>
    %236 = tpu.matmul %235, %222, %cst_215 {dimension_numbers = #tpu.dot_dimension_numbers<[1], [0], [0], [1], [0, 0, 1, 1], [], []>} : vector<8x32xbf16>, vector<32x32xbf16>, vector<8x32xf32> -> vector<8x32xf32>
    %237 = arith.truncf %236 : vector<8x32xf32> to vector<8x32xbf16>
    %c1_216 = arith.constant 1 : index
    %c0_217 = arith.constant 0 : index
    %c0_218 = arith.constant 0 : index
    %238 = vector.load %arg11[%c1_216, %c0_217, %c0_218] : memref<16x32x64xbf16, #tpu.memory_space<vmem>>, vector<1x32x64xbf16>
    %239 = vector.shape_cast %238 : vector<1x32x64xbf16> to vector<32x64xbf16>
    %cst_219 = arith.constant dense<0.000000e+00> : vector<8x64xf32>
    %240 = tpu.matmul %237, %239, %cst_219 {dimension_numbers = #tpu.dot_dimension_numbers<[1], [0], [0], [1], [0, 0, 1, 1], [], []>} : vector<8x32xbf16>, vector<32x64xbf16>, vector<8x64xf32> -> vector<8x64xf32>
    %241 = arith.addf %233, %240 : vector<8x64xf32>
    %c2_220 = arith.constant 2 : index
    %c0_221 = arith.constant 0 : index
    %c0_222 = arith.constant 0 : index
    %242 = vector.load %arg10[%c2_220, %c0_221, %c0_222] : memref<16x8x32xbf16, #tpu.memory_space<vmem>>, vector<1x8x32xbf16>
    %243 = vector.shape_cast %242 : vector<1x8x32xbf16> to vector<8x32xbf16>
    %cst_223 = arith.constant dense<0.000000e+00> : vector<8x32xf32>
    %244 = tpu.matmul %243, %222, %cst_223 {dimension_numbers = #tpu.dot_dimension_numbers<[1], [0], [0], [1], [0, 0, 1, 1], [], []>} : vector<8x32xbf16>, vector<32x32xbf16>, vector<8x32xf32> -> vector<8x32xf32>
    %245 = arith.truncf %244 : vector<8x32xf32> to vector<8x32xbf16>
    %c2_224 = arith.constant 2 : index
    %c0_225 = arith.constant 0 : index
    %c0_226 = arith.constant 0 : index
    %246 = vector.load %arg11[%c2_224, %c0_225, %c0_226] : memref<16x32x64xbf16, #tpu.memory_space<vmem>>, vector<1x32x64xbf16>
    %247 = vector.shape_cast %246 : vector<1x32x64xbf16> to vector<32x64xbf16>
    %cst_227 = arith.constant dense<0.000000e+00> : vector<8x64xf32>
    %248 = tpu.matmul %245, %247, %cst_227 {dimension_numbers = #tpu.dot_dimension_numbers<[1], [0], [0], [1], [0, 0, 1, 1], [], []>} : vector<8x32xbf16>, vector<32x64xbf16>, vector<8x64xf32> -> vector<8x64xf32>
    %249 = arith.addf %241, %248 : vector<8x64xf32>
    %c3_228 = arith.constant 3 : index
    %c0_229 = arith.constant 0 : index
    %c0_230 = arith.constant 0 : index
    %250 = vector.load %arg10[%c3_228, %c0_229, %c0_230] : memref<16x8x32xbf16, #tpu.memory_space<vmem>>, vector<1x8x32xbf16>
    %251 = vector.shape_cast %250 : vector<1x8x32xbf16> to vector<8x32xbf16>
    %cst_231 = arith.constant dense<0.000000e+00> : vector<8x32xf32>
    %252 = tpu.matmul %251, %222, %cst_231 {dimension_numbers = #tpu.dot_dimension_numbers<[1], [0], [0], [1], [0, 0, 1, 1], [], []>} : vector<8x32xbf16>, vector<32x32xbf16>, vector<8x32xf32> -> vector<8x32xf32>
    %253 = arith.truncf %252 : vector<8x32xf32> to vector<8x32xbf16>
    %c3_232 = arith.constant 3 : index
    %c0_233 = arith.constant 0 : index
    %c0_234 = arith.constant 0 : index
    %254 = vector.load %arg11[%c3_232, %c0_233, %c0_234] : memref<16x32x64xbf16, #tpu.memory_space<vmem>>, vector<1x32x64xbf16>
    %255 = vector.shape_cast %254 : vector<1x32x64xbf16> to vector<32x64xbf16>
    %cst_235 = arith.constant dense<0.000000e+00> : vector<8x64xf32>
    %256 = tpu.matmul %253, %255, %cst_235 {dimension_numbers = #tpu.dot_dimension_numbers<[1], [0], [0], [1], [0, 0, 1, 1], [], []>} : vector<8x32xbf16>, vector<32x64xbf16>, vector<8x64xf32> -> vector<8x64xf32>
    %257 = arith.addf %249, %256 : vector<8x64xf32>
    %c4_236 = arith.constant 4 : index
    %c0_237 = arith.constant 0 : index
    %c0_238 = arith.constant 0 : index
    %258 = vector.load %arg10[%c4_236, %c0_237, %c0_238] : memref<16x8x32xbf16, #tpu.memory_space<vmem>>, vector<1x8x32xbf16>
    %259 = vector.shape_cast %258 : vector<1x8x32xbf16> to vector<8x32xbf16>
    %cst_239 = arith.constant dense<0.000000e+00> : vector<8x32xf32>
    %260 = tpu.matmul %259, %222, %cst_239 {dimension_numbers = #tpu.dot_dimension_numbers<[1], [0], [0], [1], [0, 0, 1, 1], [], []>} : vector<8x32xbf16>, vector<32x32xbf16>, vector<8x32xf32> -> vector<8x32xf32>
    %261 = arith.truncf %260 : vector<8x32xf32> to vector<8x32xbf16>
    %c4_240 = arith.constant 4 : index
    %c0_241 = arith.constant 0 : index
    %c0_242 = arith.constant 0 : index
    %262 = vector.load %arg11[%c4_240, %c0_241, %c0_242] : memref<16x32x64xbf16, #tpu.memory_space<vmem>>, vector<1x32x64xbf16>
    %263 = vector.shape_cast %262 : vector<1x32x64xbf16> to vector<32x64xbf16>
    %cst_243 = arith.constant dense<0.000000e+00> : vector<8x64xf32>
    %264 = tpu.matmul %261, %263, %cst_243 {dimension_numbers = #tpu.dot_dimension_numbers<[1], [0], [0], [1], [0, 0, 1, 1], [], []>} : vector<8x32xbf16>, vector<32x64xbf16>, vector<8x64xf32> -> vector<8x64xf32>
    %265 = arith.addf %257, %264 : vector<8x64xf32>
    %c5_244 = arith.constant 5 : index
    %c0_245 = arith.constant 0 : index
    %c0_246 = arith.constant 0 : index
    %266 = vector.load %arg10[%c5_244, %c0_245, %c0_246] : memref<16x8x32xbf16, #tpu.memory_space<vmem>>, vector<1x8x32xbf16>
    %267 = vector.shape_cast %266 : vector<1x8x32xbf16> to vector<8x32xbf16>
    %cst_247 = arith.constant dense<0.000000e+00> : vector<8x32xf32>
    %268 = tpu.matmul %267, %222, %cst_247 {dimension_numbers = #tpu.dot_dimension_numbers<[1], [0], [0], [1], [0, 0, 1, 1], [], []>} : vector<8x32xbf16>, vector<32x32xbf16>, vector<8x32xf32> -> vector<8x32xf32>
    %269 = arith.truncf %268 : vector<8x32xf32> to vector<8x32xbf16>
    %c5_248 = arith.constant 5 : index
    %c0_249 = arith.constant 0 : index
    %c0_250 = arith.constant 0 : index
    %270 = vector.load %arg11[%c5_248, %c0_249, %c0_250] : memref<16x32x64xbf16, #tpu.memory_space<vmem>>, vector<1x32x64xbf16>
    %271 = vector.shape_cast %270 : vector<1x32x64xbf16> to vector<32x64xbf16>
    %cst_251 = arith.constant dense<0.000000e+00> : vector<8x64xf32>
    %272 = tpu.matmul %269, %271, %cst_251 {dimension_numbers = #tpu.dot_dimension_numbers<[1], [0], [0], [1], [0, 0, 1, 1], [], []>} : vector<8x32xbf16>, vector<32x64xbf16>, vector<8x64xf32> -> vector<8x64xf32>
    %273 = arith.addf %265, %272 : vector<8x64xf32>
    %c6_252 = arith.constant 6 : index
    %c0_253 = arith.constant 0 : index
    %c0_254 = arith.constant 0 : index
    %274 = vector.load %arg10[%c6_252, %c0_253, %c0_254] : memref<16x8x32xbf16, #tpu.memory_space<vmem>>, vector<1x8x32xbf16>
    %275 = vector.shape_cast %274 : vector<1x8x32xbf16> to vector<8x32xbf16>
    %cst_255 = arith.constant dense<0.000000e+00> : vector<8x32xf32>
    %276 = tpu.matmul %275, %222, %cst_255 {dimension_numbers = #tpu.dot_dimension_numbers<[1], [0], [0], [1], [0, 0, 1, 1], [], []>} : vector<8x32xbf16>, vector<32x32xbf16>, vector<8x32xf32> -> vector<8x32xf32>
    %277 = arith.truncf %276 : vector<8x32xf32> to vector<8x32xbf16>
    %c6_256 = arith.constant 6 : index
    %c0_257 = arith.constant 0 : index
    %c0_258 = arith.constant 0 : index
    %278 = vector.load %arg11[%c6_256, %c0_257, %c0_258] : memref<16x32x64xbf16, #tpu.memory_space<vmem>>, vector<1x32x64xbf16>
    %279 = vector.shape_cast %278 : vector<1x32x64xbf16> to vector<32x64xbf16>
    %cst_259 = arith.constant dense<0.000000e+00> : vector<8x64xf32>
    %280 = tpu.matmul %277, %279, %cst_259 {dimension_numbers = #tpu.dot_dimension_numbers<[1], [0], [0], [1], [0, 0, 1, 1], [], []>} : vector<8x32xbf16>, vector<32x64xbf16>, vector<8x64xf32> -> vector<8x64xf32>
    %281 = arith.addf %273, %280 : vector<8x64xf32>
    %c7_260 = arith.constant 7 : index
    %c0_261 = arith.constant 0 : index
    %c0_262 = arith.constant 0 : index
    %282 = vector.load %arg10[%c7_260, %c0_261, %c0_262] : memref<16x8x32xbf16, #tpu.memory_space<vmem>>, vector<1x8x32xbf16>
    %283 = vector.shape_cast %282 : vector<1x8x32xbf16> to vector<8x32xbf16>
    %cst_263 = arith.constant dense<0.000000e+00> : vector<8x32xf32>
    %284 = tpu.matmul %283, %222, %cst_263 {dimension_numbers = #tpu.dot_dimension_numbers<[1], [0], [0], [1], [0, 0, 1, 1], [], []>} : vector<8x32xbf16>, vector<32x32xbf16>, vector<8x32xf32> -> vector<8x32xf32>
    %285 = arith.truncf %284 : vector<8x32xf32> to vector<8x32xbf16>
    %c7_264 = arith.constant 7 : index
    %c0_265 = arith.constant 0 : index
    %c0_266 = arith.constant 0 : index
    %286 = vector.load %arg11[%c7_264, %c0_265, %c0_266] : memref<16x32x64xbf16, #tpu.memory_space<vmem>>, vector<1x32x64xbf16>
    %287 = vector.shape_cast %286 : vector<1x32x64xbf16> to vector<32x64xbf16>
    %cst_267 = arith.constant dense<0.000000e+00> : vector<8x64xf32>
    %288 = tpu.matmul %285, %287, %cst_267 {dimension_numbers = #tpu.dot_dimension_numbers<[1], [0], [0], [1], [0, 0, 1, 1], [], []>} : vector<8x32xbf16>, vector<32x64xbf16>, vector<8x64xf32> -> vector<8x64xf32>
    %289 = arith.addf %281, %288 : vector<8x64xf32>
    %c8_268 = arith.constant 8 : index
    %c0_269 = arith.constant 0 : index
    %c0_270 = arith.constant 0 : index
    %290 = vector.load %arg10[%c8_268, %c0_269, %c0_270] : memref<16x8x32xbf16, #tpu.memory_space<vmem>>, vector<1x8x32xbf16>
    %291 = vector.shape_cast %290 : vector<1x8x32xbf16> to vector<8x32xbf16>
    %cst_271 = arith.constant dense<0.000000e+00> : vector<8x32xf32>
    %292 = tpu.matmul %291, %222, %cst_271 {dimension_numbers = #tpu.dot_dimension_numbers<[1], [0], [0], [1], [0, 0, 1, 1], [], []>} : vector<8x32xbf16>, vector<32x32xbf16>, vector<8x32xf32> -> vector<8x32xf32>
    %293 = arith.truncf %292 : vector<8x32xf32> to vector<8x32xbf16>
    %c8_272 = arith.constant 8 : index
    %c0_273 = arith.constant 0 : index
    %c0_274 = arith.constant 0 : index
    %294 = vector.load %arg11[%c8_272, %c0_273, %c0_274] : memref<16x32x64xbf16, #tpu.memory_space<vmem>>, vector<1x32x64xbf16>
    %295 = vector.shape_cast %294 : vector<1x32x64xbf16> to vector<32x64xbf16>
    %cst_275 = arith.constant dense<0.000000e+00> : vector<8x64xf32>
    %296 = tpu.matmul %293, %295, %cst_275 {dimension_numbers = #tpu.dot_dimension_numbers<[1], [0], [0], [1], [0, 0, 1, 1], [], []>} : vector<8x32xbf16>, vector<32x64xbf16>, vector<8x64xf32> -> vector<8x64xf32>
    %297 = arith.addf %289, %296 : vector<8x64xf32>
    %c9_276 = arith.constant 9 : index
    %c0_277 = arith.constant 0 : index
    %c0_278 = arith.constant 0 : index
    %298 = vector.load %arg10[%c9_276, %c0_277, %c0_278] : memref<16x8x32xbf16, #tpu.memory_space<vmem>>, vector<1x8x32xbf16>
    %299 = vector.shape_cast %298 : vector<1x8x32xbf16> to vector<8x32xbf16>
    %cst_279 = arith.constant dense<0.000000e+00> : vector<8x32xf32>
    %300 = tpu.matmul %299, %222, %cst_279 {dimension_numbers = #tpu.dot_dimension_numbers<[1], [0], [0], [1], [0, 0, 1, 1], [], []>} : vector<8x32xbf16>, vector<32x32xbf16>, vector<8x32xf32> -> vector<8x32xf32>
    %301 = arith.truncf %300 : vector<8x32xf32> to vector<8x32xbf16>
    %c9_280 = arith.constant 9 : index
    %c0_281 = arith.constant 0 : index
    %c0_282 = arith.constant 0 : index
    %302 = vector.load %arg11[%c9_280, %c0_281, %c0_282] : memref<16x32x64xbf16, #tpu.memory_space<vmem>>, vector<1x32x64xbf16>
    %303 = vector.shape_cast %302 : vector<1x32x64xbf16> to vector<32x64xbf16>
    %cst_283 = arith.constant dense<0.000000e+00> : vector<8x64xf32>
    %304 = tpu.matmul %301, %303, %cst_283 {dimension_numbers = #tpu.dot_dimension_numbers<[1], [0], [0], [1], [0, 0, 1, 1], [], []>} : vector<8x32xbf16>, vector<32x64xbf16>, vector<8x64xf32> -> vector<8x64xf32>
    %305 = arith.addf %297, %304 : vector<8x64xf32>
    %c10_284 = arith.constant 10 : index
    %c0_285 = arith.constant 0 : index
    %c0_286 = arith.constant 0 : index
    %306 = vector.load %arg10[%c10_284, %c0_285, %c0_286] : memref<16x8x32xbf16, #tpu.memory_space<vmem>>, vector<1x8x32xbf16>
    %307 = vector.shape_cast %306 : vector<1x8x32xbf16> to vector<8x32xbf16>
    %cst_287 = arith.constant dense<0.000000e+00> : vector<8x32xf32>
    %308 = tpu.matmul %307, %222, %cst_287 {dimension_numbers = #tpu.dot_dimension_numbers<[1], [0], [0], [1], [0, 0, 1, 1], [], []>} : vector<8x32xbf16>, vector<32x32xbf16>, vector<8x32xf32> -> vector<8x32xf32>
    %309 = arith.truncf %308 : vector<8x32xf32> to vector<8x32xbf16>
    %c10_288 = arith.constant 10 : index
    %c0_289 = arith.constant 0 : index
    %c0_290 = arith.constant 0 : index
    %310 = vector.load %arg11[%c10_288, %c0_289, %c0_290] : memref<16x32x64xbf16, #tpu.memory_space<vmem>>, vector<1x32x64xbf16>
    %311 = vector.shape_cast %310 : vector<1x32x64xbf16> to vector<32x64xbf16>
    %cst_291 = arith.constant dense<0.000000e+00> : vector<8x64xf32>
    %312 = tpu.matmul %309, %311, %cst_291 {dimension_numbers = #tpu.dot_dimension_numbers<[1], [0], [0], [1], [0, 0, 1, 1], [], []>} : vector<8x32xbf16>, vector<32x64xbf16>, vector<8x64xf32> -> vector<8x64xf32>
    %313 = arith.addf %305, %312 : vector<8x64xf32>
    %c11_292 = arith.constant 11 : index
    %c0_293 = arith.constant 0 : index
    %c0_294 = arith.constant 0 : index
    %314 = vector.load %arg10[%c11_292, %c0_293, %c0_294] : memref<16x8x32xbf16, #tpu.memory_space<vmem>>, vector<1x8x32xbf16>
    %315 = vector.shape_cast %314 : vector<1x8x32xbf16> to vector<8x32xbf16>
    %cst_295 = arith.constant dense<0.000000e+00> : vector<8x32xf32>
    %316 = tpu.matmul %315, %222, %cst_295 {dimension_numbers = #tpu.dot_dimension_numbers<[1], [0], [0], [1], [0, 0, 1, 1], [], []>} : vector<8x32xbf16>, vector<32x32xbf16>, vector<8x32xf32> -> vector<8x32xf32>
    %317 = arith.truncf %316 : vector<8x32xf32> to vector<8x32xbf16>
    %c11_296 = arith.constant 11 : index
    %c0_297 = arith.constant 0 : index
    %c0_298 = arith.constant 0 : index
    %318 = vector.load %arg11[%c11_296, %c0_297, %c0_298] : memref<16x32x64xbf16, #tpu.memory_space<vmem>>, vector<1x32x64xbf16>
    %319 = vector.shape_cast %318 : vector<1x32x64xbf16> to vector<32x64xbf16>
    %cst_299 = arith.constant dense<0.000000e+00> : vector<8x64xf32>
    %320 = tpu.matmul %317, %319, %cst_299 {dimension_numbers = #tpu.dot_dimension_numbers<[1], [0], [0], [1], [0, 0, 1, 1], [], []>} : vector<8x32xbf16>, vector<32x64xbf16>, vector<8x64xf32> -> vector<8x64xf32>
    %321 = arith.addf %313, %320 : vector<8x64xf32>
    %c12_300 = arith.constant 12 : index
    %c0_301 = arith.constant 0 : index
    %c0_302 = arith.constant 0 : index
    %322 = vector.load %arg10[%c12_300, %c0_301, %c0_302] : memref<16x8x32xbf16, #tpu.memory_space<vmem>>, vector<1x8x32xbf16>
    %323 = vector.shape_cast %322 : vector<1x8x32xbf16> to vector<8x32xbf16>
    %cst_303 = arith.constant dense<0.000000e+00> : vector<8x32xf32>
    %324 = tpu.matmul %323, %222, %cst_303 {dimension_numbers = #tpu.dot_dimension_numbers<[1], [0], [0], [1], [0, 0, 1, 1], [], []>} : vector<8x32xbf16>, vector<32x32xbf16>, vector<8x32xf32> -> vector<8x32xf32>
    %325 = arith.truncf %324 : vector<8x32xf32> to vector<8x32xbf16>
    %c12_304 = arith.constant 12 : index
    %c0_305 = arith.constant 0 : index
    %c0_306 = arith.constant 0 : index
    %326 = vector.load %arg11[%c12_304, %c0_305, %c0_306] : memref<16x32x64xbf16, #tpu.memory_space<vmem>>, vector<1x32x64xbf16>
    %327 = vector.shape_cast %326 : vector<1x32x64xbf16> to vector<32x64xbf16>
    %cst_307 = arith.constant dense<0.000000e+00> : vector<8x64xf32>
    %328 = tpu.matmul %325, %327, %cst_307 {dimension_numbers = #tpu.dot_dimension_numbers<[1], [0], [0], [1], [0, 0, 1, 1], [], []>} : vector<8x32xbf16>, vector<32x64xbf16>, vector<8x64xf32> -> vector<8x64xf32>
    %329 = arith.addf %321, %328 : vector<8x64xf32>
    %c13_308 = arith.constant 13 : index
    %c0_309 = arith.constant 0 : index
    %c0_310 = arith.constant 0 : index
    %330 = vector.load %arg10[%c13_308, %c0_309, %c0_310] : memref<16x8x32xbf16, #tpu.memory_space<vmem>>, vector<1x8x32xbf16>
    %331 = vector.shape_cast %330 : vector<1x8x32xbf16> to vector<8x32xbf16>
    %cst_311 = arith.constant dense<0.000000e+00> : vector<8x32xf32>
    %332 = tpu.matmul %331, %222, %cst_311 {dimension_numbers = #tpu.dot_dimension_numbers<[1], [0], [0], [1], [0, 0, 1, 1], [], []>} : vector<8x32xbf16>, vector<32x32xbf16>, vector<8x32xf32> -> vector<8x32xf32>
    %333 = arith.truncf %332 : vector<8x32xf32> to vector<8x32xbf16>
    %c13_312 = arith.constant 13 : index
    %c0_313 = arith.constant 0 : index
    %c0_314 = arith.constant 0 : index
    %334 = vector.load %arg11[%c13_312, %c0_313, %c0_314] : memref<16x32x64xbf16, #tpu.memory_space<vmem>>, vector<1x32x64xbf16>
    %335 = vector.shape_cast %334 : vector<1x32x64xbf16> to vector<32x64xbf16>
    %cst_315 = arith.constant dense<0.000000e+00> : vector<8x64xf32>
    %336 = tpu.matmul %333, %335, %cst_315 {dimension_numbers = #tpu.dot_dimension_numbers<[1], [0], [0], [1], [0, 0, 1, 1], [], []>} : vector<8x32xbf16>, vector<32x64xbf16>, vector<8x64xf32> -> vector<8x64xf32>
    %337 = arith.addf %329, %336 : vector<8x64xf32>
    %c14_316 = arith.constant 14 : index
    %c0_317 = arith.constant 0 : index
    %c0_318 = arith.constant 0 : index
    %338 = vector.load %arg10[%c14_316, %c0_317, %c0_318] : memref<16x8x32xbf16, #tpu.memory_space<vmem>>, vector<1x8x32xbf16>
    %339 = vector.shape_cast %338 : vector<1x8x32xbf16> to vector<8x32xbf16>
    %cst_319 = arith.constant dense<0.000000e+00> : vector<8x32xf32>
    %340 = tpu.matmul %339, %222, %cst_319 {dimension_numbers = #tpu.dot_dimension_numbers<[1], [0], [0], [1], [0, 0, 1, 1], [], []>} : vector<8x32xbf16>, vector<32x32xbf16>, vector<8x32xf32> -> vector<8x32xf32>
    %341 = arith.truncf %340 : vector<8x32xf32> to vector<8x32xbf16>
    %c14_320 = arith.constant 14 : index
    %c0_321 = arith.constant 0 : index
    %c0_322 = arith.constant 0 : index
    %342 = vector.load %arg11[%c14_320, %c0_321, %c0_322] : memref<16x32x64xbf16, #tpu.memory_space<vmem>>, vector<1x32x64xbf16>
    %343 = vector.shape_cast %342 : vector<1x32x64xbf16> to vector<32x64xbf16>
    %cst_323 = arith.constant dense<0.000000e+00> : vector<8x64xf32>
    %344 = tpu.matmul %341, %343, %cst_323 {dimension_numbers = #tpu.dot_dimension_numbers<[1], [0], [0], [1], [0, 0, 1, 1], [], []>} : vector<8x32xbf16>, vector<32x64xbf16>, vector<8x64xf32> -> vector<8x64xf32>
    %345 = arith.addf %337, %344 : vector<8x64xf32>
    %c15_324 = arith.constant 15 : index
    %c0_325 = arith.constant 0 : index
    %c0_326 = arith.constant 0 : index
    %346 = vector.load %arg10[%c15_324, %c0_325, %c0_326] : memref<16x8x32xbf16, #tpu.memory_space<vmem>>, vector<1x8x32xbf16>
    %347 = vector.shape_cast %346 : vector<1x8x32xbf16> to vector<8x32xbf16>
    %cst_327 = arith.constant dense<0.000000e+00> : vector<8x32xf32>
    %348 = tpu.matmul %347, %222, %cst_327 {dimension_numbers = #tpu.dot_dimension_numbers<[1], [0], [0], [1], [0, 0, 1, 1], [], []>} : vector<8x32xbf16>, vector<32x32xbf16>, vector<8x32xf32> -> vector<8x32xf32>
    %349 = arith.truncf %348 : vector<8x32xf32> to vector<8x32xbf16>
    %c15_328 = arith.constant 15 : index
    %c0_329 = arith.constant 0 : index
    %c0_330 = arith.constant 0 : index
    %350 = vector.load %arg11[%c15_328, %c0_329, %c0_330] : memref<16x32x64xbf16, #tpu.memory_space<vmem>>, vector<1x32x64xbf16>
    %351 = vector.shape_cast %350 : vector<1x32x64xbf16> to vector<32x64xbf16>
    %cst_331 = arith.constant dense<0.000000e+00> : vector<8x64xf32>
    %352 = tpu.matmul %349, %351, %cst_331 {dimension_numbers = #tpu.dot_dimension_numbers<[1], [0], [0], [1], [0, 0, 1, 1], [], []>} : vector<8x32xbf16>, vector<32x64xbf16>, vector<8x64xf32> -> vector<8x64xf32>
    %353 = arith.addf %345, %352 : vector<8x64xf32>
    %cst_332 = arith.constant 0.000000e+00 : f32
    %354 = vector.broadcast %cst_332 : f32 to vector<8x64xf32>
    %355 = arith.maximumf %353, %354 : vector<8x64xf32>
    %356 = arith.truncf %355 : vector<8x64xf32> to vector<8x64xbf16>
    %c0_333 = arith.constant 0 : index
    %c0_334 = arith.constant 0 : index
    %357 = vector.load %arg14[%c0_333, %c0_334] : memref<8x64xf32, #tpu.memory_space<vmem>>, vector<8x64xf32>
    %c0_335 = arith.constant 0 : index
    %c0_336 = arith.constant 0 : index
    %358 = vector.load %arg15[%c0_335, %c0_336] : memref<8x1xf32, #tpu.memory_space<vmem>>, vector<8x1xf32>
    %359 = vector.broadcast %358 : vector<8x1xf32> to vector<8x64xf32>
    %360 = arith.mulf %357, %359 : vector<8x64xf32>
    %361 = arith.truncf %360 : vector<8x64xf32> to vector<8x64xbf16>
    %c0_337 = arith.constant 0 : index
    %c0_338 = arith.constant 0 : index
    %c0_339 = arith.constant 0 : index
    %362 = vector.load %arg16[%c0_337, %c0_338, %c0_339] : memref<3x64x64xbf16, #tpu.memory_space<vmem>>, vector<1x64x64xbf16>
    %363 = vector.shape_cast %362 : vector<1x64x64xbf16> to vector<64x64xbf16>
    %cst_340 = arith.constant dense<0.000000e+00> : vector<8x64xf32>
    %364 = tpu.matmul %356, %363, %cst_340 {dimension_numbers = #tpu.dot_dimension_numbers<[1], [0], [0], [1], [0, 0, 1, 1], [], []>} : vector<8x64xbf16>, vector<64x64xbf16>, vector<8x64xf32> -> vector<8x64xf32>
    %c0_341 = arith.constant 0 : index
    %c0_342 = arith.constant 0 : index
    %c0_343 = arith.constant 0 : index
    %365 = vector.load %arg18[%c0_341, %c0_342, %c0_343] : memref<3x1x64xf32, #tpu.memory_space<vmem>>, vector<1x1x64xf32>
    %366 = vector.shape_cast %365 : vector<1x1x64xf32> to vector<1x64xf32>
    %367 = vector.broadcast %366 : vector<1x64xf32> to vector<8x64xf32>
    %368 = arith.addf %364, %367 : vector<8x64xf32>
    %c1_344 = arith.constant 1 : index
    %c0_345 = arith.constant 0 : index
    %c0_346 = arith.constant 0 : index
    %369 = vector.load %arg16[%c1_344, %c0_345, %c0_346] : memref<3x64x64xbf16, #tpu.memory_space<vmem>>, vector<1x64x64xbf16>
    %370 = vector.shape_cast %369 : vector<1x64x64xbf16> to vector<64x64xbf16>
    %cst_347 = arith.constant dense<0.000000e+00> : vector<8x64xf32>
    %371 = tpu.matmul %356, %370, %cst_347 {dimension_numbers = #tpu.dot_dimension_numbers<[1], [0], [0], [1], [0, 0, 1, 1], [], []>} : vector<8x64xbf16>, vector<64x64xbf16>, vector<8x64xf32> -> vector<8x64xf32>
    %c1_348 = arith.constant 1 : index
    %c0_349 = arith.constant 0 : index
    %c0_350 = arith.constant 0 : index
    %372 = vector.load %arg18[%c1_348, %c0_349, %c0_350] : memref<3x1x64xf32, #tpu.memory_space<vmem>>, vector<1x1x64xf32>
    %373 = vector.shape_cast %372 : vector<1x1x64xf32> to vector<1x64xf32>
    %374 = vector.broadcast %373 : vector<1x64xf32> to vector<8x64xf32>
    %375 = arith.addf %371, %374 : vector<8x64xf32>
    %c2_351 = arith.constant 2 : index
    %c0_352 = arith.constant 0 : index
    %c0_353 = arith.constant 0 : index
    %376 = vector.load %arg16[%c2_351, %c0_352, %c0_353] : memref<3x64x64xbf16, #tpu.memory_space<vmem>>, vector<1x64x64xbf16>
    %377 = vector.shape_cast %376 : vector<1x64x64xbf16> to vector<64x64xbf16>
    %cst_354 = arith.constant dense<0.000000e+00> : vector<8x64xf32>
    %378 = tpu.matmul %356, %377, %cst_354 {dimension_numbers = #tpu.dot_dimension_numbers<[1], [0], [0], [1], [0, 0, 1, 1], [], []>} : vector<8x64xbf16>, vector<64x64xbf16>, vector<8x64xf32> -> vector<8x64xf32>
    %c2_355 = arith.constant 2 : index
    %c0_356 = arith.constant 0 : index
    %c0_357 = arith.constant 0 : index
    %379 = vector.load %arg18[%c2_355, %c0_356, %c0_357] : memref<3x1x64xf32, #tpu.memory_space<vmem>>, vector<1x1x64xf32>
    %380 = vector.shape_cast %379 : vector<1x1x64xf32> to vector<1x64xf32>
    %381 = vector.broadcast %380 : vector<1x64xf32> to vector<8x64xf32>
    %382 = arith.addf %378, %381 : vector<8x64xf32>
    %c0_358 = arith.constant 0 : index
    %c0_359 = arith.constant 0 : index
    %c0_360 = arith.constant 0 : index
    %383 = vector.load %arg17[%c0_358, %c0_359, %c0_360] : memref<3x64x64xbf16, #tpu.memory_space<vmem>>, vector<1x64x64xbf16>
    %384 = vector.shape_cast %383 : vector<1x64x64xbf16> to vector<64x64xbf16>
    %cst_361 = arith.constant dense<0.000000e+00> : vector<8x64xf32>
    %385 = tpu.matmul %361, %384, %cst_361 {dimension_numbers = #tpu.dot_dimension_numbers<[1], [0], [0], [1], [0, 0, 1, 1], [], []>} : vector<8x64xbf16>, vector<64x64xbf16>, vector<8x64xf32> -> vector<8x64xf32>
    %c0_362 = arith.constant 0 : index
    %c0_363 = arith.constant 0 : index
    %c0_364 = arith.constant 0 : index
    %386 = vector.load %arg19[%c0_362, %c0_363, %c0_364] : memref<3x1x64xf32, #tpu.memory_space<vmem>>, vector<1x1x64xf32>
    %387 = vector.shape_cast %386 : vector<1x1x64xf32> to vector<1x64xf32>
    %388 = vector.broadcast %387 : vector<1x64xf32> to vector<8x64xf32>
    %389 = arith.addf %385, %388 : vector<8x64xf32>
    %c1_365 = arith.constant 1 : index
    %c0_366 = arith.constant 0 : index
    %c0_367 = arith.constant 0 : index
    %390 = vector.load %arg17[%c1_365, %c0_366, %c0_367] : memref<3x64x64xbf16, #tpu.memory_space<vmem>>, vector<1x64x64xbf16>
    %391 = vector.shape_cast %390 : vector<1x64x64xbf16> to vector<64x64xbf16>
    %cst_368 = arith.constant dense<0.000000e+00> : vector<8x64xf32>
    %392 = tpu.matmul %361, %391, %cst_368 {dimension_numbers = #tpu.dot_dimension_numbers<[1], [0], [0], [1], [0, 0, 1, 1], [], []>} : vector<8x64xbf16>, vector<64x64xbf16>, vector<8x64xf32> -> vector<8x64xf32>
    %c1_369 = arith.constant 1 : index
    %c0_370 = arith.constant 0 : index
    %c0_371 = arith.constant 0 : index
    %393 = vector.load %arg19[%c1_369, %c0_370, %c0_371] : memref<3x1x64xf32, #tpu.memory_space<vmem>>, vector<1x1x64xf32>
    %394 = vector.shape_cast %393 : vector<1x1x64xf32> to vector<1x64xf32>
    %395 = vector.broadcast %394 : vector<1x64xf32> to vector<8x64xf32>
    %396 = arith.addf %392, %395 : vector<8x64xf32>
    %c2_372 = arith.constant 2 : index
    %c0_373 = arith.constant 0 : index
    %c0_374 = arith.constant 0 : index
    %397 = vector.load %arg17[%c2_372, %c0_373, %c0_374] : memref<3x64x64xbf16, #tpu.memory_space<vmem>>, vector<1x64x64xbf16>
    %398 = vector.shape_cast %397 : vector<1x64x64xbf16> to vector<64x64xbf16>
    %cst_375 = arith.constant dense<0.000000e+00> : vector<8x64xf32>
    %399 = tpu.matmul %361, %398, %cst_375 {dimension_numbers = #tpu.dot_dimension_numbers<[1], [0], [0], [1], [0, 0, 1, 1], [], []>} : vector<8x64xbf16>, vector<64x64xbf16>, vector<8x64xf32> -> vector<8x64xf32>
    %c2_376 = arith.constant 2 : index
    %c0_377 = arith.constant 0 : index
    %c0_378 = arith.constant 0 : index
    %400 = vector.load %arg19[%c2_376, %c0_377, %c0_378] : memref<3x1x64xf32, #tpu.memory_space<vmem>>, vector<1x1x64xf32>
    %401 = vector.shape_cast %400 : vector<1x1x64xf32> to vector<1x64xf32>
    %402 = vector.broadcast %401 : vector<1x64xf32> to vector<8x64xf32>
    %403 = arith.addf %399, %402 : vector<8x64xf32>
    %404 = arith.addf %368, %389 : vector<8x64xf32>
    %405 = arith.negf %404 : vector<8x64xf32>
    %406 = math.exp %405 : vector<8x64xf32>
    %cst_379 = arith.constant 1.000000e+00 : f32
    %407 = vector.broadcast %cst_379 : f32 to vector<8x64xf32>
    %408 = arith.addf %407, %406 : vector<8x64xf32>
    %409 = arith.divf %407, %408 : vector<8x64xf32>
    %410 = arith.addf %375, %396 : vector<8x64xf32>
    %411 = arith.negf %410 : vector<8x64xf32>
    %412 = math.exp %411 : vector<8x64xf32>
    %cst_380 = arith.constant 1.000000e+00 : f32
    %413 = vector.broadcast %cst_380 : f32 to vector<8x64xf32>
    %414 = arith.addf %413, %412 : vector<8x64xf32>
    %415 = arith.divf %413, %414 : vector<8x64xf32>
    %416 = arith.mulf %409, %403 : vector<8x64xf32>
    %417 = arith.addf %382, %416 : vector<8x64xf32>
    %418 = math.tanh %417 : vector<8x64xf32>
    %cst_381 = arith.constant 1.000000e+00 : f32
    %419 = vector.broadcast %cst_381 : f32 to vector<8x64xf32>
    %420 = arith.subf %419, %415 : vector<8x64xf32>
    %421 = arith.mulf %420, %418 : vector<8x64xf32>
    %422 = arith.mulf %415, %360 : vector<8x64xf32>
    %423 = arith.addf %421, %422 : vector<8x64xf32>
    %424 = arith.truncf %423 : vector<8x64xf32> to vector<8x64xbf16>
    %c0_382 = arith.constant 0 : index
    %c0_383 = arith.constant 0 : index
    %425 = vector.load %arg20[%c0_382, %c0_383] : memref<64x5xbf16, #tpu.memory_space<vmem>>, vector<64x5xbf16>
    %cst_384 = arith.constant dense<0.000000e+00> : vector<8x5xf32>
    %426 = tpu.matmul %424, %425, %cst_384 {dimension_numbers = #tpu.dot_dimension_numbers<[1], [0], [0], [1], [0, 0, 1, 1], [], []>} : vector<8x64xbf16>, vector<64x5xbf16>, vector<8x5xf32> -> vector<8x5xf32>
    %c0_385 = arith.constant 0 : index
    %c0_386 = arith.constant 0 : index
    %427 = vector.load %arg21[%c0_385, %c0_386] : memref<1x5xf32, #tpu.memory_space<vmem>>, vector<1x5xf32>
    %428 = vector.broadcast %427 : vector<1x5xf32> to vector<8x5xf32>
    %429 = arith.addf %426, %428 : vector<8x5xf32>
    %430 = vector.extract_strided_slice %429 {offsets = [0, 0], sizes = [8, 1], strides = [1, 1]} : vector<8x5xf32> to vector<8x1xf32>
    %431 = vector.extract_strided_slice %429 {offsets = [0, 1], sizes = [8, 4], strides = [1, 1]} : vector<8x5xf32> to vector<8x4xf32>
    %cst_387 = arith.constant dense<0xFF800000> : vector<8xf32>
    %432 = vector.multi_reduction <maximumf>, %431, %cst_387 [1] : vector<8x4xf32> to vector<8xf32>
    %433 = vector.shape_cast %432 : vector<8xf32> to vector<8x1xf32>
    %434 = vector.broadcast %433 : vector<8x1xf32> to vector<8x4xf32>
    %435 = arith.subf %431, %434 : vector<8x4xf32>
    %436 = math.exp %435 : vector<8x4xf32>
    %cst_388 = arith.constant dense<0.000000e+00> : vector<8xf32>
    %437 = vector.multi_reduction <add>, %436, %cst_388 [1] : vector<8x4xf32> to vector<8xf32>
    %438 = vector.shape_cast %437 : vector<8xf32> to vector<8x1xf32>
    %439 = math.log %438 : vector<8x1xf32>
    %440 = vector.broadcast %439 : vector<8x1xf32> to vector<8x4xf32>
    %441 = arith.subf %435, %440 : vector<8x4xf32>
    %c0_389 = arith.constant 0 : index
    %c0_390 = arith.constant 0 : index
    %442 = vector.load %arg22[%c0_389, %c0_390] : memref<8x4xf32, #tpu.memory_space<vmem>>, vector<8x4xf32>
    %443 = arith.addf %431, %442 : vector<8x4xf32>
    %cst_391 = arith.constant dense<0xFF800000> : vector<8xf32>
    %444 = vector.multi_reduction <maximumf>, %443, %cst_391 [1] : vector<8x4xf32> to vector<8xf32>
    %445 = vector.shape_cast %444 : vector<8xf32> to vector<8x1xf32>
    %446 = tpu.iota {dimensions = array<i32: 1>} : vector<8x4xi32>
    %447 = vector.broadcast %445 : vector<8x1xf32> to vector<8x4xf32>
    %448 = arith.cmpf oge, %443, %447 : vector<8x4xf32>
    %c4_i32 = arith.constant 4 : i32
    %449 = vector.broadcast %c4_i32 : i32 to vector<8x4xi32>
    %450 = arith.select %448, %446, %449 : vector<8x4xi1>, vector<8x4xi32>
    %cst_392 = arith.constant dense<2147483647> : vector<8xi32>
    %451 = vector.multi_reduction <minsi>, %450, %cst_392 [1] : vector<8x4xi32> to vector<8xi32>
    %452 = vector.shape_cast %451 : vector<8xi32> to vector<8x1xi32>
    %453 = vector.broadcast %452 : vector<8x1xi32> to vector<8x4xi32>
    %454 = arith.cmpi eq, %446, %453 : vector<8x4xi32>
    %455 = arith.extui %454 : vector<8x4xi1> to vector<8x4xi32>
    %456 = arith.sitofp %455 : vector<8x4xi32> to vector<8x4xf32>
    %457 = arith.mulf %441, %456 : vector<8x4xf32>
    %cst_393 = arith.constant dense<0.000000e+00> : vector<8xf32>
    %458 = vector.multi_reduction <add>, %457, %cst_393 [1] : vector<8x4xf32> to vector<8xf32>
    %459 = vector.shape_cast %458 : vector<8xf32> to vector<8x1xf32>
    %460 = arith.sitofp %452 : vector<8x1xi32> to vector<8x1xf32>
    %cst_394 = arith.constant 0.000000e+00 : f32
    %461 = vector.broadcast %cst_394 : f32 to vector<8x61xf32>
    %462 = tpu.concatenate %423, %430, %460, %459, %461 in 1 : vector<8x64xf32>, vector<8x1xf32>, vector<8x1xf32>, vector<8x1xf32>, vector<8x61xf32> -> vector<8x128xf32>
    %c0_395 = arith.constant 0 : index
    %c0_396 = arith.constant 0 : index
    %463 = vector.load %arg23[%c0_395, %c0_396] : memref<8x128xf32, #tpu.memory_space<vmem>>, vector<8x128xf32>
    tpu.vector_store %arg23[%c0_395, %c0_396], %462 {strides = array<i32>} : memref<8x128xf32, #tpu.memory_space<vmem>>, vector<8x128xf32>,
    return
  }
  func.func @transform_0(%arg0: i32) -> (i32, i32) {
    %c0_i32 = arith.constant 0 : i32
    %c0_i32_0 = arith.constant 0 : i32
    %c0_i32_1 = arith.constant 0 : i32
    return %c0_i32, %c0_i32_0 : i32, i32
  }
  func.func @transform_1(%arg0: i32) -> (i32, i32) {
    %c0_i32 = arith.constant 0 : i32
    %c0_i32_0 = arith.constant 0 : i32
    %c0_i32_1 = arith.constant 0 : i32
    return %c0_i32, %c0_i32_0 : i32, i32
  }
  func.func @transform_2(%arg0: i32) -> (i32, i32) {
    %c0_i32 = arith.constant 0 : i32
    %c0_i32_0 = arith.constant 0 : i32
    %c0_i32_1 = arith.constant 0 : i32
    return %c0_i32, %c0_i32_0 : i32, i32
  }
  func.func @transform_3(%arg0: i32) -> (i32, i32, i32) {
    %c0_i32 = arith.constant 0 : i32
    %c0_i32_0 = arith.constant 0 : i32
    %c0_i32_1 = arith.constant 0 : i32
    %c0_i32_2 = arith.constant 0 : i32
    return %c0_i32, %c0_i32_0, %c0_i32_1 : i32, i32, i32
  }
  func.func @transform_4(%arg0: i32) -> (i32, i32, i32) {
    %c0_i32 = arith.constant 0 : i32
    %c0_i32_0 = arith.constant 0 : i32
    %c0_i32_1 = arith.constant 0 : i32
    %c0_i32_2 = arith.constant 0 : i32
    return %c0_i32, %c0_i32_0, %c0_i32_1 : i32, i32, i32
  }
  func.func @transform_5(%arg0: i32) -> (i32, i32) {
    %c0_i32 = arith.constant 0 : i32
    %c0_i32_0 = arith.constant 0 : i32
    %c0_i32_1 = arith.constant 0 : i32
    return %c0_i32, %c0_i32_0 : i32, i32
  }
  func.func @transform_6(%arg0: i32) -> (i32, i32, i32) {
    %c0_i32 = arith.constant 0 : i32
    %c0_i32_0 = arith.constant 0 : i32
    %c0_i32_1 = arith.constant 0 : i32
    %c0_i32_2 = arith.constant 0 : i32
    return %c0_i32, %c0_i32_0, %c0_i32_1 : i32, i32, i32
  }
  func.func @transform_7(%arg0: i32) -> (i32, i32, i32) {
    %c0_i32 = arith.constant 0 : i32
    %c0_i32_0 = arith.constant 0 : i32
    %c0_i32_1 = arith.constant 0 : i32
    %c0_i32_2 = arith.constant 0 : i32
    return %c0_i32, %c0_i32_0, %c0_i32_1 : i32, i32, i32
  }
  func.func @transform_8(%arg0: i32) -> (i32, i32) {
    %c0_i32 = arith.constant 0 : i32
    %c0_i32_0 = arith.constant 0 : i32
    %c0_i32_1 = arith.constant 0 : i32
    return %c0_i32, %c0_i32_0 : i32, i32
  }
  func.func @transform_9(%arg0: i32) -> (i32, i32, i32) {
    %c0_i32 = arith.constant 0 : i32
    %c0_i32_0 = arith.constant 0 : i32
    %c0_i32_1 = arith.constant 0 : i32
    %c0_i32_2 = arith.constant 0 : i32
    return %c0_i32, %c0_i32_0, %c0_i32_1 : i32, i32, i32
  }
  func.func @transform_10(%arg0: i32) -> (i32, i32, i32) {
    %c0_i32 = arith.constant 0 : i32
    %c0_i32_0 = arith.constant 0 : i32
    %c0_i32_1 = arith.constant 0 : i32
    %c0_i32_2 = arith.constant 0 : i32
    return %c0_i32, %c0_i32_0, %c0_i32_1 : i32, i32, i32
  }
  func.func @transform_11(%arg0: i32) -> (i32, i32) {
    %c0_i32 = arith.constant 0 : i32
    %c0_i32_0 = arith.constant 0 : i32
    %c0_i32_1 = arith.constant 0 : i32
    return %c0_i32, %c0_i32_0 : i32, i32
  }
  func.func @transform_12(%arg0: i32) -> (i32, i32) {
    %c0_i32 = arith.constant 0 : i32
    %c0_i32_0 = arith.constant 0 : i32
    %c0_i32_1 = arith.constant 0 : i32
    return %c0_i32, %c0_i32_0 : i32, i32
  }
  func.func @transform_13(%arg0: i32) -> (i32, i32) {
    %c0_i32 = arith.constant 0 : i32
    %c0_i32_0 = arith.constant 0 : i32
    %c0_i32_1 = arith.constant 0 : i32
    return %c0_i32, %c0_i32_0 : i32, i32
  }
  func.func @transform_14(%arg0: i32) -> (i32, i32) {
    %c0_i32 = arith.constant 0 : i32
    %c0_i32_0 = arith.constant 0 : i32
    %c0_i32_1 = arith.constant 0 : i32
    return %c0_i32, %c0_i32_0 : i32, i32
  }
  func.func @transform_15(%arg0: i32) -> (i32, i32, i32) {
    %c0_i32 = arith.constant 0 : i32
    %c0_i32_0 = arith.constant 0 : i32
    %c0_i32_1 = arith.constant 0 : i32
    %c0_i32_2 = arith.constant 0 : i32
    return %c0_i32, %c0_i32_0, %c0_i32_1 : i32, i32, i32
  }
  func.func @transform_16(%arg0: i32) -> (i32, i32, i32) {
    %c0_i32 = arith.constant 0 : i32
    %c0_i32_0 = arith.constant 0 : i32
    %c0_i32_1 = arith.constant 0 : i32
    %c0_i32_2 = arith.constant 0 : i32
    return %c0_i32, %c0_i32_0, %c0_i32_1 : i32, i32, i32
  }
  func.func @transform_17(%arg0: i32) -> (i32, i32, i32) {
    %c0_i32 = arith.constant 0 : i32
    %c0_i32_0 = arith.constant 0 : i32
    %c0_i32_1 = arith.constant 0 : i32
    %c0_i32_2 = arith.constant 0 : i32
    return %c0_i32, %c0_i32_0, %c0_i32_1 : i32, i32, i32
  }
  func.func @transform_18(%arg0: i32) -> (i32, i32, i32) {
    %c0_i32 = arith.constant 0 : i32
    %c0_i32_0 = arith.constant 0 : i32
    %c0_i32_1 = arith.constant 0 : i32
    %c0_i32_2 = arith.constant 0 : i32
    return %c0_i32, %c0_i32_0, %c0_i32_1 : i32, i32, i32
  }
  func.func @transform_19(%arg0: i32) -> (i32, i32) {
    %c0_i32 = arith.constant 0 : i32
    %c0_i32_0 = arith.constant 0 : i32
    %c0_i32_1 = arith.constant 0 : i32
    return %c0_i32, %c0_i32_0 : i32, i32
  }
  func.func @transform_20(%arg0: i32) -> (i32, i32) {
    %c0_i32 = arith.constant 0 : i32
    %c0_i32_0 = arith.constant 0 : i32
    %c0_i32_1 = arith.constant 0 : i32
    return %c0_i32, %c0_i32_0 : i32, i32
  }
  func.func @transform_21(%arg0: i32) -> (i32, i32) {
    %c0_i32 = arith.constant 0 : i32
    %c0_i32_0 = arith.constant 0 : i32
    %c0_i32_1 = arith.constant 0 : i32
    return %c0_i32, %c0_i32_0 : i32, i32
  }
  func.func @transform_22(%arg0: i32) -> (i32, i32) {
    %c0_i32 = arith.constant 0 : i32
    %c0_i32_0 = arith.constant 0 : i32
    %c0_i32_1 = arith.constant 0 : i32
    return %c0_i32, %c0_i32_0 : i32, i32
  }
}

</mosaic_0001>

<bundles_post_ra>
// kernel: local_policy_act.1
= control target key start
LH: loop header
LB: loop body
LE: loop exit
PB: predicated region body
PF: predicated region fallthrough
CT: control target
= control target key end

     0   :  { %vm487_vm0 = vcmask 523264   ;;  %vm1090_vm1 = vcmask 1043456   ;;  %vm1074_vm2 = vcmask 588800   ;;  %vm1512_vm3 = vcmask 261120   ;;  %s11865_s24 = smov 1   ;;  %s16241_s1 = inlined_call_operand.vmem [shape: bf16[192,32], index: 1, kind: input, shape index: {}]   ;;  %s16242_s0 = inlined_call_operand.vmem [shape: bf16[456,192], index: 0, kind: input, shape index: {}]   ;;  %s16243_s2 = inlined_call_operand.vmem [shape: f32[1,32], index: 2, kind: input, shape index: {}]   ;;  %s16244_s3 = inlined_call_operand.vmem [shape: bf16[16,72,456], index: 3, kind: input, shape index: {}]   ;;  %s16245_s4 = inlined_call_operand.vmem [shape: bf16[16,32,64], index: 4, kind: input, shape index: {}]   ;;  %s16246_s5 = inlined_call_operand.vmem [shape: f32[1,64], index: 5, kind: input, shape index: {}]   ;;  %s16247_s7 = inlined_call_operand.vmem [shape: bf16[9,64,32], index: 7, kind: input, shape index: {}]   ;;  %s16248_s6 = inlined_call_operand.vmem [shape: bf16[9,32,72], index: 6, kind: input, shape index: {}]   ;;  %s16249_s8 = inlined_call_operand.vmem [shape: f32[1,32], index: 8, kind: input, shape index: {}]   ;;  %s16250_s10 = inlined_call_operand.vmem [shape: bf16[16,32,64], index: 10, kind: input, shape index: {}]   ;;  %s16251_s9 = inlined_call_operand.vmem [shape: bf16[16,8,32], index: 9, kind: input, shape index: {}]   ;;  %s16252_s12 = inlined_call_operand.vmem [shape: bf16[49,64], index: 12, kind: input, shape index: {}]   ;;  %s16253_s11 = inlined_call_operand.vmem [shape: bf16[8,49], index: 11, kind: input, shape index: {}]   ;;  %s16254_s14 = inlined_call_operand.vmem [shape: f32[8,1], index: 14, kind: input, shape index: {}]   ;;  %s16255_s17 = inlined_call_operand.vmem [shape: f32[3,1,64], index: 17, kind: input, shape index: {}]   ;;  %s16256_s15 = inlined_call_operand.vmem [shape: bf16[3,64,64], index: 15, kind: input, shape index: {}]   ;;  %s16257_s16 = inlined_call_operand.vmem [shape: bf16[3,64,64], index: 16, kind: input, shape index: {}]   ;;  %s16258_s13 = inlined_call_operand.vmem [shape: f32[8,64], index: 13, kind: input, shape index: {}]   ;;  %s16259_s18 = inlined_call_operand.vmem [shape: f32[3,1,64], index: 18, kind: input, shape index: {}]   ;;  %s16260_s20 = inlined_call_operand.vmem [shape: f32[1,5], index: 20, kind: input, shape index: {}]   ;;  %s16261_s19 = inlined_call_operand.vmem [shape: bf16[64,5], index: 19, kind: input, shape index: {}]   ;;  %s16262_s21 = inlined_call_operand.vmem [shape: f32[8,4], index: 21, kind: input, shape index: {}]   ;;  %s16263_s22 = inlined_call_operand.vmem [shape: f32[8,128], index: 22, kind: output, shape index: {}]  }
   0x1   :  { %16292 = sst [smem:[#allocation18_spill]] %s16241_s1  ;;  %vm7350_vm4 = vcmask 1040384   ;;  %vm7346_vm5 = vcmask 400384   ;;  %vm8583_vm14 = vcmask 39944  }
   0x2   :  { %16293 = sst [smem:[#allocation19_spill]] %s16242_s0 }
   0x3   :  { %16294 = sst [smem:[#allocation20_spill]] %s16243_s2 }
   0x4   :  { %16295 = sst [smem:[#allocation21_spill]] %s16244_s3 }
   0x5   :  { %16296 = sst [smem:[#allocation22_spill]] %s16245_s4 }
   0x6   :  { %16297 = sst [smem:[#allocation23_spill]] %s16246_s5 }
   0x7   :  { %16298 = sst [smem:[#allocation24_spill]] %s16247_s7 }
   0x8   :  { %s16299_s29 = sld [smem:[#allocation18_spill]] }
   0x9   :  { %s16300_s1 = sld [smem:[#allocation19_spill]] }
   0xa   :  { %s16301_s28 = sld [smem:[#allocation20_spill]] }
   0xb   :  { %s16311_s30 = sld [smem:[#allocation21_spill]] }
   0xc   :  { %s16312_s4 = sld [smem:[#allocation22_spill]] }
   0xd   :  { %s16438_s0 = sld [smem:[#allocation23_spill]] }
   0xe   :  { %v11423_v0 = vld [vmem:[%s16299_s29 + $0x38] sm:$0xff]  ;;  %v11422_v2 = vld [vmem:[%s16299_s29 + $0x30] sm:$0xff]  ;;  %v11421_v4 = vld [vmem:[%s16299_s29 + $0x28] sm:$0xff] }
   0xf   :  { %v11427_v1 = vld [vmem:[%s16299_s29 + $0x58] sm:$0xff]  ;;  %575 = vmatpush.bf16.msra.mxu0 %v11423_v0  ;;  %v11426_v3 = vld [vmem:[%s16299_s29 + $0x50] sm:$0xff]  ;;  %v11425_v5 = vld [vmem:[%s16299_s29 + $0x48] sm:$0xff] }
  0x10   :  { %732 = vmatpush.bf16.msra.mxu1 %v11427_v1  ;;  %v11420_v6 = vld [vmem:[%s16299_s29 + $0x20] sm:$0xff]  ;;  %v8667_v9 = vld [vmem:[%s16300_s1 + $0x8] sm:$0xf0]  ;;  %v11419_v10 = vld [vmem:[%s16299_s29 + $0x18] sm:$0xff] }
  0x11   :  { %v11424_v7 = vld [vmem:[%s16299_s29 + $0x40] sm:$0xff]  ;;  %v11418_v12 = vld [vmem:[%s16299_s29 + $0x10] sm:$0xff]  ;;  %v11417_v13 = vld [vmem:[%s16299_s29 + $0x8] sm:$0xff] }
  0x12   :  { %v11360_v8 = vld [vmem:[%s16300_s1 + $0x4] sm:$0xf]  ;;  %v8665_v15 = vld [vmem:[%s16300_s1] sm:$0xf]  ;;  %v11361_v16 = vld [vmem:[%s16300_s1 + $0x4] sm:$0xf0] }
  0x13   :  { %576 = vmatpush.bf16.msra.mxu0 %v11422_v2  ;;  %v8670_v11 = vor.u32 %v11360_v8, %v8667_v9  ;;  %v11416_v14 = vld [vmem:[%s16299_s29] sm:$0xff]  ;;  %v11362_v17 = vld [vmem:[%s16300_s1 + $0x14] sm:$0xf]  ;;  %v8675_v18 = vld [vmem:[%s16300_s1 + $0x18] sm:$0xf0]  ;;  %v8666_v19 = vor.u32 %v11361_v16, %v8665_v15 }
  0x14   :  { %733 = vmatpush.bf16.msra.mxu1 %v11426_v3  ;;  %v8678_v20 = vor.u32 %v11362_v17, %v8675_v18  ;;  %v8673_v21 = vld [vmem:[%s16300_s1 + $0x10] sm:$0xf]  ;;  %v11363_v22 = vld [vmem:[%s16300_s1 + $0x14] sm:$0xf0]  ;;  %v11364_v23 = vld [vmem:[%s16300_s1 + $0x24] sm:$0xf] }
  0x15   :  { %v8683_v24 = vld [vmem:[%s16300_s1 + $0x28] sm:$0xf0]  ;;  %v8674_v25 = vor.u32 %v11363_v22, %v8673_v21  ;;  %v8681_v27 = vld [vmem:[%s16300_s1 + $0x20] sm:$0xf]  ;;  %v11365_v28 = vld [vmem:[%s16300_s1 + $0x24] sm:$0xf0] }
  0x16   :  { %v8686_v26 = vor.u32 %v11364_v23, %v8683_v24  ;;  %v11366_v29 = vld [vmem:[%s16300_s1 + $0x34] sm:$0xf]  ;;  %v8691_v30 = vld [vmem:[%s16300_s1 + $0x38] sm:$0xf0]  ;;  %v8682_v31 = vor.u32 %v11365_v28, %v8681_v27  ;;  %v8689_v33 = vld [vmem:[%s16300_s1 + $0x30] sm:$0xf] }
  0x17   :  { %577 = vmatpush.bf16.msra.mxu0 %v11421_v4  ;;  %v8694_v32 = vor.u32 %v11366_v29, %v8691_v30  ;;  %v11367_v34 = vld [vmem:[%s16300_s1 + $0x34] sm:$0xf0]  ;;  %v11368_v35 = vld [vmem:[%s16300_s1 + $0x44] sm:$0xf]  ;;  %v8699_v36 = vld [vmem:[%s16300_s1 + $0x48] sm:$0xf0] }
  0x18   :  { %734 = vmatpush.bf16.msra.mxu1 %v11425_v5  ;;  %v8690_v37 = vor.u32 %v11367_v34, %v8689_v33  ;;  %v8702_v38 = vor.u32 %v11368_v35, %v8699_v36  ;;  %v8697_v39 = vld [vmem:[%s16300_s1 + $0x40] sm:$0xf]  ;;  %v11369_v40 = vld [vmem:[%s16300_s1 + $0x44] sm:$0xf0]  ;;  %v11370_v41 = vld [vmem:[%s16300_s1 + $0x54] sm:$0xf] }
  0x19   :  { %v8707_v42 = vld [vmem:[%s16300_s1 + $0x58] sm:$0xf0]  ;;  %v8698_v43 = vor.u32 %v11369_v40, %v8697_v39  ;;  %v8705_v45 = vld [vmem:[%s16300_s1 + $0x50] sm:$0xf]  ;;  %v11371_v46 = vld [vmem:[%s16300_s1 + $0x54] sm:$0xf0] }
  0x1a   :  { %v8710_v44 = vor.u32 %v11370_v41, %v8707_v42  ;;  %v11372_v47 = vld [vmem:[%s16300_s1 + $0x64] sm:$0xf]  ;;  %v8715_v48 = vld [vmem:[%s16300_s1 + $0x68] sm:$0xf0]  ;;  %v8706_v49 = vor.u32 %v11371_v46, %v8705_v45  ;;  %v8713_v51 = vld [vmem:[%s16300_s1 + $0x60] sm:$0xf] }
  0x1b   :  { %578 = vmatpush.bf16.msra.mxu0 %v11420_v6  ;;  %v8718_v50 = vor.u32 %v11372_v47, %v8715_v48  ;;  %v11373_v52 = vld [vmem:[%s16300_s1 + $0x64] sm:$0xf0]  ;;  %v11374_v53 = vld [vmem:[%s16300_s1 + $0x74] sm:$0xf]  ;;  %v8723_v54 = vld [vmem:[%s16300_s1 + $0x78] sm:$0xf0] }
  0x1c   :  { %735 = vmatpush.bf16.msra.mxu1 %v11424_v7  ;;  %v8714_v55 = vor.u32 %v11373_v52, %v8713_v51  ;;  %v8726_v56 = vor.u32 %v11374_v53, %v8723_v54  ;;  %v8721_v57 = vld [vmem:[%s16300_s1 + $0x70] sm:$0xf]  ;;  %v11375_v58 = vld [vmem:[%s16300_s1 + $0x74] sm:$0xf0]  ;;  %v11376_v59 = vld [vmem:[%s16300_s1 + $0x84] sm:$0xf] }
  0x1d   :  { %v8731_v60 = vld [vmem:[%s16300_s1 + $0x88] sm:$0xf0]  ;;  %v8722_v61 = vor.u32 %v11375_v58, %v8721_v57  ;;  %v8729_v1 = vld [vmem:[%s16300_s1 + $0x80] sm:$0xf]  ;;  %v11377_v2 = vld [vmem:[%s16300_s1 + $0x84] sm:$0xf0] }
  0x1e   :  { %v8734_v62 = vor.u32 %v11376_v59, %v8731_v60  ;;  %v12140_v3 = vld [vmem:[%s16301_s28] ss:$0 sm:$0xff]  ;;  %v11378_v4 = vld [vmem:[%s16300_s1 + $0x94] sm:$0xf]  ;;  %v8739_v5 = vld [vmem:[%s16300_s1 + $0x98] sm:$0xf0]  ;;  %v8730_v6 = vor.u32 %v11377_v2, %v8729_v1 }
  0x1f   :  { %579 = vmatpush.bf16.msra.mxu0 %v11419_v10  ;;  %8935 = vmatmul.msk.bf16.vlgmr.msra.gmra.mxu1 %vm487_vm0, %v8670_v11  ;;  %v8742_v8 = vor.u32 %v11378_v4, %v8739_v5  ;;  %v8737_v16 = vld [vmem:[%s16300_s1 + $0x90] sm:$0xf]  ;;  %v11379_v17 = vld [vmem:[%s16300_s1 + $0x94] sm:$0xf0]  ;;  %v8747_v21 = vld [vmem:[%s16300_s1 + $0xa8] sm:$0xf0] }
  0x20   :  { %v8738_v23 = vor.u32 %v11379_v17, %v8737_v16  ;;  %v8745_v33 = vld [vmem:[%s16300_s1 + $0xa0] sm:$0xf]  ;;  %v11381_v34 = vld [vmem:[%s16300_s1 + $0xa4] sm:$0xf0]  ;;  %v11383_v51 = vld [vmem:[%s16300_s1 + $0xb4] sm:$0xf0] }
  0x21   :  { %v8746_v40 = vor.u32 %v11381_v34, %v8745_v33  ;;  %v11384_v54 = vld [vmem:[%s16300_s1 + $0xc4] sm:$0xf]  ;;  %v8761_v4 = vld [vmem:[%s16300_s1 + $0xc0] sm:$0xf]  ;;  %v11385_v5 = vld [vmem:[%s16300_s1 + $0xc4] sm:$0xf0] }
  0x23   :  { %580 = vmatpush.bf16.msra.mxu0 %v11418_v12 }
  0x27   :  { %581 = vmatpush.bf16.msra.mxu0 %v11417_v13 }
  0x2b   :  { %582 = vmatpush.bf16.msra.mxu0 %v11416_v14 }
  0x2e   :  { %583 = vmatmul.bf16.vlgmr.msra.gmra.mxu0 %v8666_v19 }
  0x2f   :  { %8936 = vmatmul.msk.bf16.gmra.mxu1 %vm487_vm0, %v8678_v20  ;;  %v11380_v20 = vld [vmem:[%s16300_s1 + $0xa4] sm:$0xf] }
  0x3e   :  { %588 = vmatmul.bf16.gmra.mxu0 %v8674_v25  ;;  %v8750_v25 = vor.u32 %v11380_v20, %v8747_v21  ;;  %v8769_v21 = vld [vmem:[%s16300_s1 + $0xd0] sm:$0xf] }
  0x3f   :  { %8937 = vmatmul.msk.bf16.gmra.mxu1 %vm487_vm0, %v8686_v26 }
  0x4e   :  { %593 = vmatmul.bf16.gmra.mxu0 %v8682_v31 }
  0x4f   :  { %8938 = vmatmul.msk.bf16.gmra.mxu1 %vm487_vm0, %v8694_v32 }
  0x5e   :  { %598 = vmatmul.bf16.gmra.mxu0 %v8690_v37  ;;  %v11382_v37 = vld [vmem:[%s16300_s1 + $0xb4] sm:$0xf] }
  0x5f   :  { %8939 = vmatmul.msk.bf16.gmra.mxu1 %vm487_vm0, %v8702_v38  ;;  %v8755_v38 = vld [vmem:[%s16300_s1 + $0xb8] sm:$0xf0] }
  0x60   :  { %v8758_v42 = vor.u32 %v11382_v37, %v8755_v38  ;;  %v11390_v37 = vld [vmem:[%s16300_s1 + $0xf4] sm:$0xf]  ;;  %v8787_v38 = vld [vmem:[%s16300_s1 + $0xf8] sm:$0xf0] }
  0x6e   :  { %603 = vmatmul.bf16.gmra.mxu0 %v8698_v43 }
  0x6f   :  { %8940 = vmatmul.msk.bf16.gmra.mxu1 %vm487_vm0, %v8710_v44 }
  0x7e   :  { %608 = vmatmul.bf16.gmra.mxu0 %v8706_v49 }
  0x7f   :  { %8941 = vmatmul.msk.bf16.gmra.mxu1 %vm487_vm0, %v8718_v50  ;;  %v8753_v50 = vld [vmem:[%s16300_s1 + $0xb0] sm:$0xf] }
  0x80   :  { %v8754_v57 = vor.u32 %v11383_v51, %v8753_v50 }
  0x8e   :  { %613 = vmatmul.bf16.gmra.mxu0 %v8714_v55  ;;  %v8763_v55 = vld [vmem:[%s16300_s1 + $0xc8] sm:$0xf0] }
  0x8f   :  { %8942 = vmatmul.msk.bf16.gmra.mxu1 %vm487_vm0, %v8726_v56  ;;  %v8766_v59 = vor.u32 %v11384_v54, %v8763_v55 }
  0x9c   :  { %v737_v63 = vpop.f32.mrf.mxu1 }
  0x9e   :  { %618 = vmatmul.bf16.gmra.mxu0 %v8722_v61 }
  0x9f   :  { %8943 = vmatmul.msk.bf16.gmra.mxu1 %vm487_vm0, %v8734_v62 }
  0xa4   :  { %v739_v0 = vpop.f32.mrf.mxu1 }
  0xab   :  { %v584_v7 = vpop.f32.mrf.mxu0 }
  0xac   :  { %v585_v9 = vadd.f32 %v12140_v3, %v584_v7  ;;  %v742_v10 = vpop.f32.mrf.mxu1 }
  0xae   :  { %v738_v11 = vadd.f32 %v737_v63, %v585_v9  ;;  %623 = vmatmul.bf16.gmra.mxu0 %v8730_v6  ;;  %v8771_v9 = vld [vmem:[%s16300_s1 + $0xd8] sm:$0xf0] }
  0xaf   :  { %8944 = vmatmul.msk.bf16.gmra.mxu1 %vm487_vm0, %v8742_v8  ;;  %v11386_v8 = vld [vmem:[%s16300_s1 + $0xd4] sm:$0xf] }
  0xb0   :  { %v881_v18 = vmax.f32 %v738_v11, 0.0  ;;  %v8762_v11 = vor.u32 %v11385_v5, %v8761_v4 }
  0xb3   :  { %v586_v12 = vpop.f32.mrf.mxu0 }
  0xb4   :  { %v587_v13 = vadd.f32 %v12140_v3, %v586_v12  ;;  %v744_v14 = vpop.f32.mrf.mxu1 }
  0xb6   :  { %v740_v15 = vadd.f32 %v739_v0, %v587_v13  ;;  %v8774_v13 = vor.u32 %v11386_v8, %v8771_v9  ;;  %v11394_v8 = vld [vmem:[%s16300_s1 + $0x114] sm:$0xf]  ;;  %v8803_v9 = vld [vmem:[%s16300_s1 + $0x118] sm:$0xf0] }
  0xb8   :  { %v882_v19 = vmax.f32 %v740_v15, 0.0 }
  0xba   :  { %v12163_v22 = vpack.c.bf16 %v882_v19, %v881_v18 }
  0xbb   :  { %v589_v24 = vpop.f32.mrf.mxu0 }
  0xbc   :  { %16302 = vst [vmem:[#allocation2_spill] sm:$0xff] %v12163_v22  ;;  %v590_v26 = vadd.f32 %v12140_v3, %v589_v24  ;;  %v747_v27 = vpop.f32.mrf.mxu1 }
  0xbe   :  { %v743_v28 = vadd.f32 %v742_v10, %v590_v26  ;;  %628 = vmatmul.bf16.gmra.mxu0 %v8738_v23  ;;  %v11387_v23 = vld [vmem:[%s16300_s1 + $0xd4] sm:$0xf0]  ;;  %v11388_v26 = vld [vmem:[%s16300_s1 + $0xe4] sm:$0xf] }
  0xbf   :  { %8945 = vmatmul.msk.bf16.gmra.mxu1 %vm487_vm0, %v8750_v25 }
  0xc0   :  { %v883_v35 = vmax.f32 %v743_v28, 0.0 }
  0xc3   :  { %v591_v29 = vpop.f32.mrf.mxu0 }
  0xc4   :  { %v592_v30 = vadd.f32 %v12140_v3, %v591_v29  ;;  %v749_v31 = vpop.f32.mrf.mxu1  ;;  %v8770_v29 = vor.u32 %v11387_v23, %v8769_v21 }
  0xc6   :  { %v745_v32 = vadd.f32 %v744_v14, %v592_v30 }
  0xc8   :  { %v884_v36 = vmax.f32 %v745_v32, 0.0 }
  0xca   :  { %v12180_v39 = vpack.c.bf16 %v884_v36, %v883_v35  ;;  %v8777_v35 = vld [vmem:[%s16300_s1 + $0xe0] sm:$0xf]  ;;  %v11389_v36 = vld [vmem:[%s16300_s1 + $0xe4] sm:$0xf0] }
  0xcb   :  { %v594_v41 = vpop.f32.mrf.mxu0 }
  0xcc   :  { %16303 = vst [vmem:[#allocation3_spill] sm:$0xff] %v12180_v39  ;;  %v595_v43 = vadd.f32 %v12140_v3, %v594_v41  ;;  %v752_v44 = vpop.f32.mrf.mxu1 }
  0xce   :  { %v748_v45 = vadd.f32 %v747_v27, %v595_v43  ;;  %633 = vmatmul.bf16.gmra.mxu0 %v8746_v40  ;;  %v8779_v27 = vld [vmem:[%s16300_s1 + $0xe8] sm:$0xf0]  ;;  %v8778_v40 = vor.u32 %v11389_v36, %v8777_v35  ;;  %v11396_v36 = vld [vmem:[%s16300_s1 + $0x124] sm:$0xf] }
  0xcf   :  { %8946 = vmatmul.msk.bf16.gmra.mxu1 %vm487_vm0, %v8758_v42  ;;  %v8790_v42 = vor.u32 %v11390_v37, %v8787_v38  ;;  %v8811_v37 = vld [vmem:[%s16300_s1 + $0x128] sm:$0xf0] }
  0xd0   :  { %v885_v52 = vmax.f32 %v748_v45, 0.0 }
  0xd3   :  { %v596_v46 = vpop.f32.mrf.mxu0 }
  0xd4   :  { %v597_v47 = vadd.f32 %v12140_v3, %v596_v46  ;;  %v754_v48 = vpop.f32.mrf.mxu1  ;;  %v8785_v46 = vld [vmem:[%s16300_s1 + $0xf0] sm:$0xf] }
  0xd6   :  { %v750_v49 = vadd.f32 %v749_v31, %v597_v47  ;;  %v8782_v31 = vor.u32 %v11388_v26, %v8779_v27  ;;  %v11391_v47 = vld [vmem:[%s16300_s1 + $0xf4] sm:$0xf0] }
  0xd7   :  { %v8786_v50 = vor.u32 %v11391_v47, %v8785_v46 }
  0xd8   :  { %v886_v53 = vmax.f32 %v750_v49, 0.0  ;;  %v8795_v49 = vld [vmem:[%s16300_s1 + $0x108] sm:$0xf0] }
  0xda   :  { %v12197_v56 = vpack.c.bf16 %v886_v53, %v885_v52 }
  0xdb   :  { %v599_v58 = vpop.f32.mrf.mxu0 }
  0xdc   :  { %16304 = vst [vmem:[#allocation4_spill] sm:$0xff] %v12197_v56  ;;  %v600_v60 = vadd.f32 %v12140_v3, %v599_v58  ;;  %v757_v61 = vpop.f32.mrf.mxu1 }
  0xde   :  { %v753_v62 = vadd.f32 %v752_v44, %v600_v60  ;;  %638 = vmatmul.bf16.gmra.mxu0 %v8754_v57 }
  0xdf   :  { %8947 = vmatmul.msk.bf16.gmra.mxu1 %vm487_vm0, %v8766_v59 }
  0xe0   :  { %v887_v6 = vmax.f32 %v753_v62, 0.0 }
  0xe3   :  { %v601_v63 = vpop.f32.mrf.mxu0 }
  0xe4   :  { %v602_v0 = vadd.f32 %v12140_v3, %v601_v63  ;;  %v759_v1 = vpop.f32.mrf.mxu1 }
  0xe6   :  { %v755_v2 = vadd.f32 %v754_v48, %v602_v0  ;;  %v11392_v48 = vld [vmem:[%s16300_s1 + $0x104] sm:$0xf] }
  0xe7   :  { %v8798_v52 = vor.u32 %v11392_v48, %v8795_v49 }
  0xe8   :  { %v888_v7 = vmax.f32 %v755_v2, 0.0  ;;  %v11393_v2 = vld [vmem:[%s16300_s1 + $0x104] sm:$0xf0] }
  0xea   :  { %v12214_v10 = vpack.c.bf16 %v888_v7, %v887_v6 }
  0xeb   :  { %v604_v12 = vpop.f32.mrf.mxu0 }
  0xec   :  { %16305 = vst [vmem:[#allocation5_spill] sm:$0xff] %v12214_v10  ;;  %v605_v14 = vadd.f32 %v12140_v3, %v604_v12  ;;  %v12217_v15 = vpop.f32.mrf.mxu1 }
  0xee   :  { %v758_v16 = vadd.f32 %v757_v61, %v605_v14  ;;  %643 = vmatmul.bf16.gmra.mxu0 %v8762_v11 }
  0xef   :  { %8948 = vmatmul.msk.bf16.gmra.mxu1 %vm487_vm0, %v8774_v13 }
  0xf0   :  { %v889_v24 = vmax.f32 %v758_v16, 0.0 }
  0xf3   :  { %v606_v17 = vpop.f32.mrf.mxu0 }
  0xf4   :  { %v607_v18 = vadd.f32 %v12140_v3, %v606_v17  ;;  %v764_v19 = vpop.f32.mrf.mxu1  ;;  %v8806_v17 = vor.u32 %v11394_v8, %v8803_v9  ;;  %v11400_v9 = vld [vmem:[%s16300_s1 + $0x144] sm:$0xf] }
  0xf6   :  { %v760_v20 = vadd.f32 %v759_v1, %v607_v18  ;;  %v8793_v1 = vld [vmem:[%s16300_s1 + $0x100] sm:$0xf] }
  0xf7   :  { %v8794_v14 = vor.u32 %v11393_v2, %v8793_v1 }
  0xf8   :  { %v890_v25 = vmax.f32 %v760_v20, 0.0 }
  0xfa   :  { %v12233_v28 = vpack.c.bf16 %v890_v25, %v889_v24 }
  0xfb   :  { %v609_v30 = vpop.f32.mrf.mxu0 }
  0xfc   :  { %16306 = vst [vmem:[#allocation6_spill] sm:$0xff] %v12233_v28  ;;  %v767_v32 = vpop.f32.mrf.mxu1  ;;  %v610_v4 = vadd.f32 %v12140_v3, %v609_v30 }
  0xfe   :  { %648 = vmatmul.bf16.gmra.mxu0 %v8770_v29  ;;  %v763_v18 = vadd.f32 %v12217_v15, %v610_v4 }
  0xff   :  { %8949 = vmatmul.msk.bf16.gmra.mxu1 %vm487_vm0, %v8782_v31 }
 0x103   :  { %v611_v33 = vpop.f32.mrf.mxu0 }
 0x104   :  { %v769_v34 = vpop.f32.mrf.mxu1  ;;  %v612_v62 = vadd.f32 %v12140_v3, %v611_v33  ;;  %v11395_v33 = vld [vmem:[%s16300_s1 + $0x114] sm:$0xf0] }
 0x106   :  { %v765_v11 = vadd.f32 %v764_v19, %v612_v62  ;;  %v891_v19 = vmax.f32 %v763_v18, 0.0 }
 0x108   :  { %v892_v24 = vmax.f32 %v765_v11, 0.0  ;;  %v8827_v11 = vld [vmem:[%s16300_s1 + $0x148] sm:$0xf0] }
 0x10a   :  { %v12289_v27 = vpack.c.bf16 %v892_v24, %v891_v19 }
 0x10b   :  { %v614_v41 = vpop.f32.mrf.mxu0 }
 0x10c   :  { %v772_v43 = vpop.f32.mrf.mxu1  ;;  %v615_v58 = vadd.f32 %v12140_v3, %v614_v41  ;;  %16308 = vst [vmem:[#allocation8_spill] sm:$0xff] %v12289_v27 }
 0x10e   :  { %653 = vmatmul.bf16.gmra.mxu0 %v8778_v40  ;;  %v768_v5 = vadd.f32 %v767_v32, %v615_v58  ;;  %v8801_v32 = vld [vmem:[%s16300_s1 + $0x110] sm:$0xf] }
 0x10f   :  { %8950 = vmatmul.msk.bf16.gmra.mxu1 %vm487_vm0, %v8790_v42  ;;  %v8802_v40 = vor.u32 %v11395_v33, %v8801_v32  ;;  %v8814_v42 = vor.u32 %v11396_v36, %v8811_v37  ;;  %v11402_v32 = vld [vmem:[%s16300_s1 + $0x154] sm:$0xf]  ;;  %v8835_v33 = vld [vmem:[%s16300_s1 + $0x158] sm:$0xf0] }
 0x110   :  { %v893_v20 = vmax.f32 %v768_v5, 0.0  ;;  %v8817_v5 = vld [vmem:[%s16300_s1 + $0x130] sm:$0xf]  ;;  %v8838_v37 = vor.u32 %v11402_v32, %v8835_v33 }
 0x113   :  { %v616_v44 = vpop.f32.mrf.mxu0 }
 0x114   :  { %v774_v45 = vpop.f32.mrf.mxu1  ;;  %v617_v55 = vadd.f32 %v12140_v3, %v616_v44 }
 0x116   :  { %v770_v63 = vadd.f32 %v769_v34, %v617_v55  ;;  %v8819_v55 = vld [vmem:[%s16300_s1 + $0x138] sm:$0xf0] }
 0x118   :  { %v894_v12 = vmax.f32 %v770_v63, 0.0 }
 0x11a   :  { %v12285_v25 = vpack.c.bf16 %v894_v12, %v893_v20 }
 0x11b   :  { %v619_v51 = vpop.f32.mrf.mxu0 }
 0x11c   :  { %v777_v53 = vpop.f32.mrf.mxu1  ;;  %v620_v54 = vadd.f32 %v12140_v3, %v619_v51  ;;  %16307 = vst [vmem:[#allocation7_spill] sm:$0xff] %v12285_v25  ;;  %v11397_v51 = vld [vmem:[%s16300_s1 + $0x124] sm:$0xf0] }
 0x11e   :  { %658 = vmatmul.bf16.gmra.mxu0 %v8786_v50  ;;  %v773_v59 = vadd.f32 %v772_v43, %v620_v54  ;;  %v8809_v50 = vld [vmem:[%s16300_s1 + $0x120] sm:$0xf]  ;;  %v11398_v54 = vld [vmem:[%s16300_s1 + $0x134] sm:$0xf] }
 0x11f   :  { %8951 = vmatmul.msk.bf16.gmra.mxu1 %vm487_vm0, %v8798_v52  ;;  %v8810_v58 = vor.u32 %v11397_v51, %v8809_v50  ;;  %v11404_v51 = vld [vmem:[%s16300_s1 + $0x164] sm:$0xf] }
 0x120   :  { %v895_v6 = vmax.f32 %v773_v59, 0.0 }
 0x123   :  { %v621_v57 = vpop.f32.mrf.mxu0 }
 0x124   :  { %v622_v60 = vadd.f32 %v12140_v3, %v621_v57  ;;  %v779_v61 = vpop.f32.mrf.mxu1 }
 0x126   :  { %v775_v0 = vadd.f32 %v774_v45, %v622_v60  ;;  %v8822_v60 = vor.u32 %v11398_v54, %v8819_v55 }
 0x128   :  { %v896_v7 = vmax.f32 %v775_v0, 0.0 }
 0x12a   :  { %v12280_v13 = vpack.c.bf16 %v896_v7, %v895_v6  ;;  %v11399_v6 = vld [vmem:[%s16300_s1 + $0x134] sm:$0xf0] }
 0x12b   :  { %v624_v16 = vpop.f32.mrf.mxu0 }
 0x12c   :  { %v625_v21 = vadd.f32 %v12140_v3, %v624_v16  ;;  %1094 = vmatpush.bf16.msra.mxu2 %v12280_v13  ;;  %v782_v23 = vpop.f32.mrf.mxu1 }
 0x12e   :  { %v778_v26 = vadd.f32 %v777_v53, %v625_v21  ;;  %663 = vmatmul.bf16.gmra.mxu0 %v8794_v14  ;;  %v8818_v14 = vor.u32 %v11399_v6, %v8817_v5 }
 0x12f   :  { %8952 = vmatmul.msk.bf16.gmra.mxu1 %vm487_vm0, %v8806_v17  ;;  %v8830_v17 = vor.u32 %v11400_v9, %v8827_v11  ;;  %v8849_v9 = vld [vmem:[%s16300_s1 + $0x170] sm:$0xf]  ;;  %v11407_v11 = vld [vmem:[%s16300_s1 + $0x174] sm:$0xf0] }
 0x130   :  { %1095 = vmatpush.bf16.msra.mxu2 %v12285_v25  ;;  %v897_v34 = vmax.f32 %v778_v26, 0.0 }
 0x133   :  { %v626_v29 = vpop.f32.mrf.mxu0 }
 0x134   :  { %v627_v15 = vadd.f32 %v12140_v3, %v626_v29  ;;  %1096 = vmatpush.bf16.msra.mxu2 %v12289_v27  ;;  %v784_v30 = vpop.f32.mrf.mxu1  ;;  %v8825_v29 = vld [vmem:[%s16300_s1 + $0x140] sm:$0xf] }
 0x136   :  { %v780_v31 = vadd.f32 %v779_v61, %v627_v15  ;;  %v11401_v15 = vld [vmem:[%s16300_s1 + $0x144] sm:$0xf0] }
 0x138   :  { %v898_v35 = vmax.f32 %v780_v31, 0.0  ;;  %1097 = vmatpush.bf16.msra.mxu2 %v12233_v28 }
 0x13a   :  { %v12306_v38 = vpack.c.bf16 %v898_v35, %v897_v34  ;;  %v8826_v35 = vor.u32 %v11401_v15, %v8825_v29 }
 0x13b   :  { %v629_v41 = vpop.f32.mrf.mxu0 }
 0x13c   :  { %16309 = vst [vmem:[#allocation9_spill] sm:$0xff] %v12306_v38  ;;  %v630_v43 = vadd.f32 %v12140_v3, %v629_v41  ;;  %1098 = vmatpush.bf16.msra.mxu2 %v12214_v10  ;;  %v787_v44 = vpop.f32.mrf.mxu1 }
 0x13e   :  { %v783_v45 = vadd.f32 %v782_v23, %v630_v43  ;;  %668 = vmatmul.bf16.gmra.mxu0 %v8802_v40 }
 0x13f   :  { %8953 = vmatmul.msk.bf16.gmra.mxu1 %vm487_vm0, %v8814_v42 }
 0x140   :  { %1099 = vmatpush.bf16.msra.mxu2 %v12197_v56  ;;  %v899_v52 = vmax.f32 %v783_v45, 0.0 }
 0x143   :  { %v631_v46 = vpop.f32.mrf.mxu0 }
 0x144   :  { %v632_v47 = vadd.f32 %v12140_v3, %v631_v46  ;;  %1100 = vmatpush.bf16.msra.mxu2 %v12180_v39  ;;  %v789_v48 = vpop.f32.mrf.mxu1 }
 0x146   :  { %v785_v49 = vadd.f32 %v784_v30, %v632_v47  ;;  %v8833_v47 = vld [vmem:[%s16300_s1 + $0x150] sm:$0xf] }
 0x148   :  { %v900_v53 = vmax.f32 %v785_v49, 0.0  ;;  %1101 = vmatpush.bf16.msra.mxu2 %v12163_v22 }
 0x14a   :  { %v12327_v57 = vpack.c.bf16 %v900_v53, %v899_v52  ;;  %v8843_v52 = vld [vmem:[%s16300_s1 + $0x168] sm:$0xf0] }
 0x14b   :  { %v634_v59 = vpop.f32.mrf.mxu0 }
 0x14c   :  { %16310 = vst [vmem:[#allocation10_spill] sm:$0xff] %v12327_v57  ;;  %v635_v61 = vadd.f32 %v12140_v3, %v634_v59  ;;  %v792_v62 = vpop.f32.mrf.mxu1 }
 0x14e   :  { %v788_v63 = vadd.f32 %v787_v44, %v635_v61  ;;  %673 = vmatmul.bf16.gmra.mxu0 %v8810_v58  ;;  %v8846_v58 = vor.u32 %v11404_v51, %v8843_v52 }
 0x14f   :  { %8954 = vmatmul.msk.bf16.gmra.mxu1 %vm487_vm0, %v8822_v60 }
 0x150   :  { %v901_v7 = vmax.f32 %v788_v63, 0.0  ;;  %v11405_v63 = vld [vmem:[%s16300_s1 + $0x164] sm:$0xf0] }
 0x153   :  { %v636_v0 = vpop.f32.mrf.mxu0 }
 0x154   :  { %v637_v1 = vadd.f32 %v12140_v3, %v636_v0  ;;  %v794_v2 = vpop.f32.mrf.mxu1  ;;  %v11406_v0 = vld [vmem:[%s16300_s1 + $0x174] sm:$0xf] }
 0x156   :  { %v790_v4 = vadd.f32 %v789_v48, %v637_v1  ;;  %v11403_v48 = vld [vmem:[%s16300_s1 + $0x154] sm:$0xf0]  ;;  %v8851_v1 = vld [vmem:[%s16300_s1 + $0x178] sm:$0xf0] }
 0x157   :  { %v8834_v54 = vor.u32 %v11403_v48, %v8833_v47  ;;  %v8854_v5 = vor.u32 %v11406_v0, %v8851_v1 }
 0x158   :  { %v902_v8 = vmax.f32 %v790_v4, 0.0 }
 0x15a   :  { %v12344_v12 = vpack.c.bf16 %v902_v8, %v901_v7 }
 0x15b   :  { %v639_v16 = vpop.f32.mrf.mxu0 }
 0x15c   :  { %v640_v18 = vadd.f32 %v12140_v3, %v639_v16  ;;  %v797_v20 = vpop.f32.mrf.mxu1  ;;  %v8859_v16 = vld [vmem:[%s16300_s1 + $0x188] sm:$0xf0] }
 0x15e   :  { %v793_v21 = vadd.f32 %v792_v62, %v640_v18  ;;  %678 = vmatmul.bf16.gmra.mxu0 %v8818_v14  ;;  %v8841_v62 = vld [vmem:[%s16300_s1 + $0x160] sm:$0xf]  ;;  %v11408_v14 = vld [vmem:[%s16300_s1 + $0x184] sm:$0xf] }
 0x15f   :  { %8955 = vmatmul.msk.bf16.gmra.mxu1 %vm487_vm0, %v8830_v17  ;;  %v8850_v17 = vor.u32 %v11407_v11, %v8849_v9  ;;  %v8875_v9 = vld [vmem:[%s16300_s1 + $0x1a8] sm:$0xf0] }
 0x160   :  { %v903_v30 = vmax.f32 %v793_v21, 0.0 }
 0x163   :  { %v641_v23 = vpop.f32.mrf.mxu0 }
 0x164   :  { %v642_v24 = vadd.f32 %v12140_v3, %v641_v23  ;;  %v799_v26 = vpop.f32.mrf.mxu1 }
 0x166   :  { %v795_v19 = vadd.f32 %v794_v2, %v642_v24  ;;  %v8842_v2 = vor.u32 %v11405_v63, %v8841_v62 }
 0x168   :  { %v904_v31 = vmax.f32 %v795_v19, 0.0 }
 0x16a   :  { %v12361_v34 = vpack.c.bf16 %v904_v31, %v903_v30 }
 0x16b   :  { %v644_v36 = vpop.f32.mrf.mxu0 }
 0x16c   :  { %v645_v40 = vadd.f32 %v12140_v3, %v644_v36  ;;  %v12364_v41 = vpop.f32.mrf.mxu1  ;;  %v11409_v36 = vld [vmem:[%s16300_s1 + $0x184] sm:$0xf0] }
 0x16e   :  { %v798_v42 = vadd.f32 %v797_v20, %v645_v40  ;;  %683 = vmatmul.bf16.gmra.mxu0 %v8826_v35  ;;  %v8862_v20 = vor.u32 %v11408_v14, %v8859_v16  ;;  %v8857_v35 = vld [vmem:[%s16300_s1 + $0x180] sm:$0xf] }
 0x16f   :  { %8956 = vmatmul.msk.bf16.gmra.mxu1 %vm487_vm0, %v8838_v37 }
 0x170   :  { %v905_v49 = vmax.f32 %v798_v42, 0.0 }
 0x173   :  { %v646_v43 = vpop.f32.mrf.mxu0 }
 0x174   :  { %v647_v44 = vadd.f32 %v12140_v3, %v646_v43  ;;  %v804_v45 = vpop.f32.mrf.mxu1 }
 0x176   :  { %v800_v46 = vadd.f32 %v799_v26, %v647_v44  ;;  %v11410_v44 = vld [vmem:[%s16300_s1 + $0x194] sm:$0xf] }
 0x178   :  { %v906_v50 = vmax.f32 %v800_v46, 0.0  ;;  %v8867_v46 = vld [vmem:[%s16300_s1 + $0x198] sm:$0xf0] }
 0x179   :  { %v8870_v52 = vor.u32 %v11410_v44, %v8867_v46  ;;  %v11415_v44 = vld [vmem:[%s16300_s1 + $0x1b4] sm:$0xf0] }
 0x17a   :  { %v12380_v53 = vpack.c.bf16 %v906_v50, %v905_v49  ;;  %v8858_v50 = vor.u32 %v11409_v36, %v8857_v35 }
 0x17b   :  { %v649_v55 = vpop.f32.mrf.mxu0 }
 0x17c   :  { %v807_v59 = vpop.f32.mrf.mxu1  ;;  %v650_v37 = vadd.f32 %v12140_v3, %v649_v55 }
 0x17e   :  { %688 = vmatmul.bf16.gmra.mxu0 %v8834_v54  ;;  %v803_v54 = vadd.f32 %v12364_v41, %v650_v37 }
 0x17f   :  { %8957 = vmatmul.msk.bf16.gmra.mxu1 %vm487_vm0, %v8846_v58 }
 0x183   :  { %v651_v60 = vpop.f32.mrf.mxu0 }
 0x184   :  { %v809_v61 = vpop.f32.mrf.mxu1  ;;  %v652_v31 = vadd.f32 %v12140_v3, %v651_v60 }
 0x186   :  { %v805_v47 = vadd.f32 %v804_v45, %v652_v31  ;;  %v907_v45 = vmax.f32 %v803_v54, 0.0 }
 0x188   :  { %v908_v60 = vmax.f32 %v805_v47, 0.0  ;;  %v8966_v47 = vld [vmem:[%s16311_s30] sm:$0xf] }
 0x18a   :  { %v12436_v63 = vpack.c.bf16 %v908_v60, %v907_v45 }
 0x18b   :  { %v654_v4 = vpop.f32.mrf.mxu0 }
 0x18c   :  { %v812_v6 = vpop.f32.mrf.mxu1  ;;  %v655_v19 = vadd.f32 %v12140_v3, %v654_v4  ;;  %v8865_v4 = vld [vmem:[%s16300_s1 + $0x190] sm:$0xf] }
 0x18e   :  { %693 = vmatmul.bf16.gmra.mxu0 %v8842_v2  ;;  %v808_v40 = vadd.f32 %v807_v59, %v655_v19  ;;  %v11413_v19 = vld [vmem:[%s16300_s1 + $0x1a4] sm:$0xf0] }
 0x18f   :  { %8958 = vmatmul.msk.bf16.gmra.mxu1 %vm487_vm0, %v8854_v5  ;;  %v11411_v5 = vld [vmem:[%s16300_s1 + $0x194] sm:$0xf0] }
 0x190   :  { %v909_v55 = vmax.f32 %v808_v40, 0.0  ;;  %v8866_v14 = vor.u32 %v11411_v5, %v8865_v4 }
 0x193   :  { %v656_v7 = vpop.f32.mrf.mxu0 }
 0x194   :  { %v814_v8 = vpop.f32.mrf.mxu1  ;;  %v657_v24 = vadd.f32 %v12140_v3, %v656_v7 }
 0x196   :  { %v810_v32 = vadd.f32 %v809_v61, %v657_v24 }
 0x198   :  { %v910_v48 = vmax.f32 %v810_v32, 0.0 }
 0x19a   :  { %v12432_v61 = vpack.c.bf16 %v910_v48, %v909_v55  ;;  %v11430_v48 = vld [vmem:[%s16311_s30 + $0xc] sm:$0xf0] }
 0x19b   :  { %v659_v18 = vpop.f32.mrf.mxu0 }
 0x19c   :  { %v817_v21 = vpop.f32.mrf.mxu1  ;;  %v660_v23 = vadd.f32 %v12140_v3, %v659_v18 }
 0x19e   :  { %698 = vmatmul.bf16.gmra.mxu0 %v8850_v17  ;;  %v813_v29 = vadd.f32 %v812_v6, %v660_v23 }
 0x19f   :  { %8959 = vmatmul.msk.bf16.gmra.mxu1 %vm487_vm0, %v8862_v20 }
 0x1a0   :  { %v911_v42 = vmax.f32 %v813_v29, 0.0  ;;  %v11414_v29 = vld [vmem:[%s16300_s1 + $0x1b4] sm:$0xf] }
 0x1a3   :  { %v661_v26 = vpop.f32.mrf.mxu0 }
 0x1a4   :  { %v662_v15 = vadd.f32 %v12140_v3, %v661_v26  ;;  %v819_v30 = vpop.f32.mrf.mxu1  ;;  %v8873_v26 = vld [vmem:[%s16300_s1 + $0x1a0] sm:$0xf] }
 0x1a6   :  { %v815_v33 = vadd.f32 %v814_v8, %v662_v15  ;;  %v11412_v8 = vld [vmem:[%s16300_s1 + $0x1a4] sm:$0xf]  ;;  %v8883_v15 = vld [vmem:[%s16300_s1 + $0x1b8] sm:$0xf0] }
 0x1a7   :  { %v8878_v17 = vor.u32 %v11412_v8, %v8875_v9  ;;  %v8886_v32 = vor.u32 %v11414_v29, %v8883_v15  ;;  %v9014_v15 = vld [vmem:[%s16311_s30 + $0x60] sm:$0xf] }
 0x1a8   :  { %v912_v43 = vmax.f32 %v815_v33, 0.0 }
 0x1aa   :  { %v12427_v49 = vpack.c.bf16 %v912_v43, %v911_v42  ;;  %v128_v42 = vld [vmem:[%s16300_s1 + $0x1c0] sm:$0xff]  ;;  %v8881_v43 = vld [vmem:[%s16300_s1 + $0x1b0] sm:$0xf] }
 0x1ab   :  { %v664_v51 = vpop.f32.mrf.mxu0  ;;  %v327_v46 = vunpack.c.h.b16 %v128_v42  ;;  %v326_v45 = vunpack.c.l.b16 %v128_v42 }
 0x1ac   :  { %v665_v58 = vadd.f32 %v12140_v3, %v664_v51  ;;  %1127 = vmatpush.bf16.msra.mxu3 %v12427_v49  ;;  %v822_v59 = vpop.f32.mrf.mxu1  ;;  %v8882_v51 = vor.u32 %v11415_v44, %v8881_v43 }
 0x1ad   :  { %v385_v54 = vpack.c.b16 %v327_v46, %v327_v46  ;;  %v384_v4 = vpack.c.b16 %v326_v45, %v326_v45 }
 0x1ae   :  { %v818_v62 = vadd.f32 %v817_v21, %v665_v58  ;;  %703 = vmatmul.bf16.gmra.mxu0 %v8858_v50  ;;  %v8967_v50 = vor.u32 %v11430_v48, %v8966_v47  ;;  %v12542_v47 = vld [vmem:[%s16311_s30 + $0x80] sm:$0xff] }
 0x1af   :  { %8960 = vmatmul.msk.bf16.gmra.mxu1 %vm487_vm0, %v8870_v52  ;;  %v1035_v48 = vunpack.c.l.b16 %v12542_v47 }
 0x1b0   :  { %1128 = vmatpush.bf16.msra.mxu3 %v12432_v61  ;;  %v913_v6 = vmax.f32 %v818_v62, 0.0  ;;  %1102 = vmatmul.bf16.vlgmr.msra.gmra.mxu2 %v8967_v50 }
 0x1b1   :  { %v1055_v50 = vpack.c.b16 %v1035_v48, %v1035_v48 }
 0x1b3   :  { %v666_v0 = vpop.f32.mrf.mxu0 }
 0x1b4   :  { %v667_v41 = vadd.f32 %v12140_v3, %v666_v0  ;;  %1129 = vmatpush.bf16.msra.mxu3 %v12436_v63  ;;  %v12440_v1 = vpop.f32.mrf.mxu1  ;;  %v8982_v0 = vld [vmem:[%s16311_s30 + $0x20] sm:$0xf] }
 0x1b6   :  { %v820_v2 = vadd.f32 %v819_v30, %v667_v41  ;;  %v8874_v30 = vor.u32 %v11413_v19, %v8873_v26  ;;  %v11434_v41 = vld [vmem:[%s16311_s30 + $0x2c] sm:$0xf0] }
 0x1b8   :  { %v914_v7 = vmax.f32 %v820_v2, 0.0  ;;  %1130 = vmatpush.bf16.msra.mxu3 %v12380_v53  ;;  %v8983_v2 = vor.u32 %v11434_v41, %v8982_v0 }
 0x1ba   :  { %v12455_v11 = vpack.c.bf16 %v914_v7, %v913_v6 }
 0x1bb   :  { %v669_v16 = vpop.f32.mrf.mxu0 }
 0x1bc   :  { %v670_v18 = vadd.f32 %v12140_v3, %v669_v16  ;;  %1131 = vmatpush.bf16.msra.mxu3 %v12361_v34  ;;  %v827_v20 = vpop.f32.mrf.mxu1  ;;  %v8998_v16 = vld [vmem:[%s16311_s30 + $0x40] sm:$0xf] }
 0x1be   :  { %v12459_v21 = vadd.f32 %v822_v59, %v670_v18  ;;  %708 = vmatmul.bf16.gmra.mxu0 %v8866_v14 }
 0x1bf   :  { %8961 = vmatmul.msk.bf16.gmra.mxu1 %vm487_vm0, %v8878_v17  ;;  %v11438_v17 = vld [vmem:[%s16311_s30 + $0x4c] sm:$0xf0] }
 0x1c0   :  { %1132 = vmatpush.bf16.msra.mxu3 %v12344_v12  ;;  %1107 = vmatmul.bf16.gmra.mxu2 %v8983_v2  ;;  %v8999_v18 = vor.u32 %v11438_v17, %v8998_v16 }
 0x1c3   :  { %v12463_v23 = vpop.f32.mrf.mxu0 }
 0x1c4   :  { %1133 = vmatpush.bf16.msra.mxu3 %v12327_v57  ;;  %v12466_v24 = vpop.f32.mrf.mxu1 }
 0x1c8   :  { %1134 = vmatpush.bf16.msra.mxu3 %v12306_v38 }
 0x1cb   :  { %v674_v31 = vpop.f32.mrf.mxu0 }
 0x1cc   :  { %v675_v33 = vadd.f32 %v12140_v3, %v674_v31  ;;  %v832_v35 = vpop.f32.mrf.mxu1 }
 0x1ce   :  { %v12482_v36 = vadd.f32 %v827_v20, %v675_v33  ;;  %713 = vmatmul.bf16.gmra.mxu0 %v8874_v30  ;;  %v11442_v30 = vld [vmem:[%s16311_s30 + $0x6c] sm:$0xf0]  ;;  %v11428_v33 = vld [vmem:[%s16311_s30 + $0x4] sm:$0xf] }
 0x1cf   :  { %8962 = vmatmul.msk.bf16.gmra.mxu1 %vm487_vm0, %v8886_v32  ;;  %v9015_v31 = vor.u32 %v11442_v30, %v9014_v15 }
 0x1d0   :  { %1112 = vmatmul.bf16.gmra.mxu2 %v8999_v18 }
 0x1d3   :  { %v12485_v37 = vpop.f32.mrf.mxu0 }
 0x1d4   :  { %v12487_v40 = vpop.f32.mrf.mxu1 }
 0x1db   :  { %v679_v52 = vpop.f32.mrf.mxu0 }
 0x1dc   :  { %v680_v55 = vadd.f32 %v12140_v3, %v679_v52  ;;  %v837_v58 = vpop.f32.mrf.mxu1  ;;  %v11432_v52 = vld [vmem:[%s16311_s30 + $0x24] sm:$0xf] }
 0x1de   :  { %v12505_v59 = vadd.f32 %v832_v35, %v680_v55  ;;  %718 = vmatmul.bf16.gmra.mxu0 %v8882_v51  ;;  %v8968_v35 = vld [vmem:[%s16311_s30 + $0x10] sm:$0xf0] }
 0x1df   :  { %8963 = vmatmul.msk.bf16.gmra.mxu1 %vm487_vm0, %v385_v54  ;;  %v8971_v43 = vor.u32 %v11428_v33, %v8968_v35  ;;  %v8984_v54 = vld [vmem:[%s16311_s30 + $0x30] sm:$0xf0] }
 0x1e0   :  { %1117 = vmatmul.bf16.gmra.mxu2 %v9015_v31 }
 0x1e1   :  { %1135 = vmatmul.bf16.vlgmr.msra.gmra.mxu3 %v8971_v43 }
 0x1e3   :  { %v12508_v60 = vpop.f32.mrf.mxu0 }
 0x1e4   :  { %v12510_v62 = vpop.f32.mrf.mxu1 }
 0x1eb   :  { %v684_v5 = vpop.f32.mrf.mxu0 }
 0x1ec   :  { %v685_v6 = vadd.f32 %v12140_v3, %v684_v5  ;;  %v842_v7 = vpop.f32.mrf.mxu1 }
 0x1ee   :  { %v12519_v8 = vadd.f32 %v837_v58, %v685_v6  ;;  %723 = vmatmul.bf16.gmra.mxu0 %v384_v4  ;;  %v8987_v58 = vor.u32 %v11432_v52, %v8984_v54 }
 0x1f0   :  { %1122 = vmatmul.bf16.gmra.mxu2 %v1055_v50 }
 0x1f1   :  { %1140 = vmatmul.bf16.gmra.mxu3 %v8987_v58  ;;  %v677_v58 = vadd.f32 %v12140_v3, %v12485_v37 }
 0x1f3   :  { %v686_v9 = vpop.f32.mrf.mxu0  ;;  %v830_v37 = vadd.f32 %v12466_v24, %v677_v58  ;;  %v917_v24 = vmax.f32 %v12482_v36, 0.0 }
 0x1f4   :  { %v844_v14 = vpop.f32.mrf.mxu1  ;;  %v687_v35 = vadd.f32 %v12140_v3, %v686_v9 }
 0x1f6   :  { %v840_v50 = vadd.f32 %v12510_v62, %v687_v35  ;;  %v8974_v35 = vld [vmem:[%s16311_s30 + $0x8] sm:$0xf] }
 0x1fb   :  { %v689_v20 = vpop.f32.mrf.mxu0 }
 0x1fc   :  { %v847_v26 = vpop.f32.mrf.mxu1  ;;  %v690_v15 = vadd.f32 %v12140_v3, %v689_v20 }
 0x203   :  { %v691_v19 = vpop.f32.mrf.mxu0 }
 0x204   :  { %v849_v29 = vpop.f32.mrf.mxu1  ;;  %v692_v16 = vadd.f32 %v12140_v3, %v691_v19  ;;  %v9000_v19 = vld [vmem:[%s16311_s30 + $0x50] sm:$0xf0] }
 0x206   :  { %v845_v43 = vadd.f32 %v844_v14, %v692_v16  ;;  %v918_v16 = vmax.f32 %v830_v37, 0.0 }
 0x20b   :  { %v694_v32 = vpop.f32.mrf.mxu0 }
 0x20c   :  { %v852_v42 = vpop.f32.mrf.mxu1  ;;  %v695_v2 = vadd.f32 %v12140_v3, %v694_v32 }
 0x20e   :  { %v848_v30 = vadd.f32 %v847_v26, %v695_v2  ;;  %v672_v2 = vadd.f32 %v12140_v3, %v12463_v23  ;;  %v9016_v23 = vld [vmem:[%s16311_s30 + $0x70] sm:$0xf0] }
 0x210   :  { %v925_v20 = vmax.f32 %v848_v30, 0.0  ;;  %v12618_v30 = vpack.c.bf16 %v918_v16, %v917_v24  ;;  %v9210_v16 = vld [vmem:[%s16311_s30 + $0x168] sm:$0xf] }
 0x213   :  { %v696_v44 = vpop.f32.mrf.mxu0 }
 0x214   :  { %v854_v46 = vpop.f32.mrf.mxu1  ;;  %v697_v0 = vadd.f32 %v12140_v3, %v696_v44 }
 0x216   :  { %v850_v17 = vadd.f32 %v849_v29, %v697_v0  ;;  %v843_v29 = vadd.f32 %v842_v7, %v690_v15  ;;  %v922_v0 = vmax.f32 %v840_v50, 0.0  ;;  %v8990_v50 = vld [vmem:[%s16311_s30 + $0x28] sm:$0xf] }
 0x218   :  { %v926_v44 = vmax.f32 %v850_v17, 0.0  ;;  %v923_v7 = vmax.f32 %v843_v29, 0.0 }
 0x21a   :  { %v12576_v52 = vpack.c.bf16 %v926_v44, %v925_v20  ;;  %v11467_v44 = vld [vmem:[%s16311_s30 + $0x134] sm:$0xf0] }
 0x21b   :  { %v699_v51 = vpop.f32.mrf.mxu0 }
 0x21c   :  { %v857_v55 = vpop.f32.mrf.mxu1  ;;  %v700_v45 = vadd.f32 %v12140_v3, %v699_v51  ;;  %v924_v51 = vmax.f32 %v845_v43, 0.0  ;;  %v9178_v43 = vld [vmem:[%s16311_s30 + $0x128] sm:$0xf] }
 0x21e   :  { %v853_v4 = vadd.f32 %v852_v42, %v700_v45  ;;  %v11436_v42 = vld [vmem:[%s16311_s30 + $0x44] sm:$0xf] }
 0x21f   :  { %v9003_v14 = vor.u32 %v11436_v42, %v9000_v19  ;;  %v9179_v19 = vor.u32 %v11467_v44, %v9178_v43 }
 0x220   :  { %v927_v31 = vmax.f32 %v853_v4, 0.0 }
 0x221   :  { %1145 = vmatmul.bf16.gmra.mxu3 %v9003_v14 }
 0x223   :  { %v701_v41 = vpop.f32.mrf.mxu0 }
 0x224   :  { %v702_v5 = vadd.f32 %v12140_v3, %v701_v41  ;;  %v12555_v6 = vpop.f32.mrf.mxu1  ;;  %v921_v41 = vmax.f32 %v12519_v8, 0.0  ;;  %v825_v8 = vadd.f32 %v12440_v1, %v672_v2 }
 0x226   :  { %v855_v18 = vadd.f32 %v854_v46, %v702_v5  ;;  %v682_v46 = vadd.f32 %v12140_v3, %v12508_v60  ;;  %v12585_v60 = vpack.c.bf16 %v924_v51, %v923_v7  ;;  %v919_v5 = vmax.f32 %v12505_v59, 0.0  ;;  %v11435_v51 = vld [vmem:[%s16311_s30 + $0x34] sm:$0xf0] }
 0x227   :  { %v916_v15 = vmax.f32 %v825_v8, 0.0  ;;  %v11471_v7 = vld [vmem:[%s16311_s30 + $0x154] sm:$0xf0] }
 0x228   :  { %v928_v33 = vmax.f32 %v855_v18, 0.0  ;;  %v835_v45 = vadd.f32 %v12487_v40, %v682_v46  ;;  %v12597_v40 = vpack.c.bf16 %v922_v0, %v921_v41  ;;  %v11439_v8 = vld [vmem:[%s16311_s30 + $0x54] sm:$0xf0] }
 0x22a   :  { %v12560_v48 = vpack.c.bf16 %v928_v33, %v927_v31  ;;  %v920_v4 = vmax.f32 %v835_v45, 0.0  ;;  %v915_v31 = vmax.f32 %v12459_v21, 0.0  ;;  %v11431_v21 = vld [vmem:[%s16311_s30 + $0x14] sm:$0xf0]  ;;  %v8991_v45 = vor.u32 %v11435_v51, %v8990_v50 }
 0x22b   :  { %v704_v32 = vpop.f32.mrf.mxu0  ;;  %v8975_v42 = vor.u32 %v11431_v21, %v8974_v35 }
 0x22c   :  { %v705_v26 = vadd.f32 %v12140_v3, %v704_v32  ;;  %1160 = vmatpush.bf16.msrb.mxu2 %v12560_v48  ;;  %1810 = vmatpush.bf16.msrb.mxu1 %v12560_v48  ;;  %v12571_v9 = vpop.f32.mrf.mxu1  ;;  %v12603_v17 = vpack.c.bf16 %v920_v4, %v919_v5  ;;  %v11440_v3 = vld [vmem:[%s16311_s30 + $0x64] sm:$0xf]  ;;  %v12623_v33 = vpack.c.bf16 %v916_v15, %v915_v31  ;;  %v9006_v5 = vld [vmem:[%s16311_s30 + $0x48] sm:$0xf]  ;;  %v11863_v31 = vld [vmem:[%s16301_s28] ss:$0 sm:$0xff] }
 0x22d   :  { %v9019_v59 = vor.u32 %v11440_v3, %v9016_v23  ;;  %v11475_v3 = vld [vmem:[%s16311_s30 + $0x174] sm:$0xf0]  ;;  %s16442_s28 = sld [smem:[#allocation24_spill]] }
 0x22e   :  { %v12578_v54 = vadd.f32 %v857_v55, %v705_v26  ;;  %v1036_v26 = vunpack.c.h.b16 %v12542_v47  ;;  %v9194_v47 = vld [vmem:[%s16311_s30 + $0x148] sm:$0xf]  ;;  %v9211_v15 = vor.u32 %v11475_v3, %v9210_v16 }
 0x22f   :  { %v9195_v0 = vor.u32 %v11471_v7, %v9194_v47 }
 0x230   :  { %1161 = vmatpush.bf16.msrb.mxu2 %v12576_v52  ;;  %1811 = vmatpush.bf16.msrb.mxu1 %v12576_v52  ;;  %v1056_v14 = vpack.c.b16 %v1036_v26, %v1036_v26 }
 0x231   :  { %1150 = vmatmul.bf16.gmra.mxu3 %v9019_v59  ;;  %v9007_v59 = vor.u32 %v11439_v8, %v9006_v5 }
 0x233   :  { %v12587_v62 = vpop.f32.mrf.mxu0  ;;  %v12670_v37 = vpop.f32.mrf.mxu2 }
 0x234   :  { %1162 = vmatpush.bf16.msrb.mxu2 %v12585_v60  ;;  %1812 = vmatpush.bf16.msrb.mxu1 %v12585_v60  ;;  %v12592_v55 = vpop.f32.mrf.mxu1  ;;  %v707_v8 = vadd.f32 %v11863_v31, %v12587_v62 }
 0x236   :  { %v860_v62 = vadd.f32 %v12555_v6, %v707_v8  ;;  %v929_v6 = vmax.f32 %v12578_v54, 0.0  ;;  %v8976_v54 = vld [vmem:[%s16311_s30 + $0x18] sm:$0xf0] }
 0x238   :  { %1163 = vmatpush.bf16.msrb.mxu2 %v12597_v40  ;;  %1813 = vmatpush.bf16.msrb.mxu1 %v12597_v40 }
 0x23b   :  { %v12605_v18 = vpop.f32.mrf.mxu0  ;;  %v12690_v24 = vpop.f32.mrf.mxu2 }
 0x23c   :  { %1164 = vmatpush.bf16.msrb.mxu2 %v12603_v17  ;;  %1814 = vmatpush.bf16.msrb.mxu1 %v12603_v17  ;;  %v12616_v1 = vpop.f32.mrf.mxu1 }
 0x240   :  { %1165 = vmatpush.bf16.msrb.mxu2 %v12618_v30  ;;  %1815 = vmatpush.bf16.msrb.mxu1 %v12618_v30 }
 0x241   :  { %1155 = vmatmul.bf16.gmra.mxu3 %v1056_v14 }
 0x243   :  { %v12625_v36 = vpop.f32.mrf.mxu0 }
 0x244   :  { %1166 = vmatpush.bf16.msrb.mxu2 %v12623_v33  ;;  %1816 = vmatpush.bf16.msrb.mxu1 %v12623_v33  ;;  %v12641_v32 = vpop.f32.mrf.mxu1  ;;  %v712_v7 = vadd.f32 %v11863_v31, %v12625_v36  ;;  %v9226_v36 = vld [vmem:[%s16311_s30 + $0x188] sm:$0xf] }
 0x246   :  { %v865_v16 = vadd.f32 %v12592_v55, %v712_v7 }
 0x248   :  { %1167 = vmatpush.bf16.msrb.mxu2 %v12455_v11  ;;  %1817 = vmatpush.bf16.msrb.mxu1 %v12455_v11  ;;  %v932_v55 = vmax.f32 %v865_v16, 0.0 }
 0x24b   :  { %v714_v29 = vpop.f32.mrf.mxu0  ;;  %1168 = vmatmul.bf16.vlgmr.msrb.gmra.mxu2 %v8975_v42  ;;  %1818 = vmatmul.bf16.vlgmr.msrb.gmra.mxu1 %v9179_v19  ;;  %v12699_v19 = vpop.f32.mrf.mxu2 }
 0x24c   :  { %1358 = vmatpush.bf16.msra.mxu2 %v12280_v13  ;;  %2111 = vmatpush.bf16.msra.mxu1 %v12427_v49  ;;  %v872_v20 = vpop.f32.mrf.mxu1  ;;  %v715_v51 = vadd.f32 %v11863_v31, %v714_v29  ;;  %v11443_v29 = vld [vmem:[%s16311_s30 + $0x74] sm:$0xf0] }
 0x250   :  { %1359 = vmatpush.bf16.msra.mxu2 %v12285_v25  ;;  %2112 = vmatpush.bf16.msra.mxu1 %v12432_v61 }
 0x253   :  { %v716_v46 = vpop.f32.mrf.mxu0  ;;  %v12728_v3 = vpop.f32.mrf.mxu2 }
 0x254   :  { %1360 = vmatpush.bf16.msra.mxu2 %v12289_v27  ;;  %2113 = vmatpush.bf16.msra.mxu1 %v12436_v63  ;;  %v874_v58 = vpop.f32.mrf.mxu1  ;;  %v717_v26 = vadd.f32 %v11863_v31, %v716_v46  ;;  %v9022_v46 = vld [vmem:[%s16311_s30 + $0x68] sm:$0xf] }
 0x258   :  { %1361 = vmatpush.bf16.msra.mxu2 %v12233_v28  ;;  %2114 = vmatpush.bf16.msra.mxu1 %v12380_v53 }
 0x25b   :  { %v719_v41 = vpop.f32.mrf.mxu0  ;;  %1173 = vmatmul.bf16.gmra.mxu2 %v8991_v45  ;;  %1823 = vmatmul.bf16.gmra.mxu1 %v9195_v0  ;;  %v870_v0 = vadd.f32 %v12641_v32, %v717_v26  ;;  %v11479_v32 = vld [vmem:[%s16311_s30 + $0x194] sm:$0xf0]  ;;  %v12755_v26 = vld [vmem:[%s16311_s30 + $0x88] sm:$0xff] }
 0x25c   :  { %1362 = vmatpush.bf16.msra.mxu2 %v12214_v10  ;;  %2115 = vmatpush.bf16.msra.mxu1 %v12361_v34  ;;  %v877_v2 = vpop.f32.mrf.mxu1  ;;  %v720_v44 = vadd.f32 %v11863_v31, %v719_v41  ;;  %v1037_v7 = vunpack.c.l.b16 %v12755_v26 }
 0x25e   :  { %v873_v47 = vadd.f32 %v872_v20, %v720_v44 }
 0x260   :  { %1363 = vmatpush.bf16.msra.mxu2 %v12197_v56  ;;  %2116 = vmatpush.bf16.msra.mxu1 %v12344_v12  ;;  %v935_v5 = vmax.f32 %v873_v47, 0.0 }
 0x263   :  { %v721_v4 = vpop.f32.mrf.mxu0 }
 0x264   :  { %1364 = vmatpush.bf16.msra.mxu2 %v12180_v39  ;;  %2117 = vmatpush.bf16.msra.mxu1 %v12327_v57  ;;  %v879_v23 = vpop.f32.mrf.mxu1  ;;  %v722_v35 = vadd.f32 %v11863_v31, %v721_v4  ;;  %v868_v4 = vadd.f32 %v12616_v1, %v715_v51  ;;  %v9227_v1 = vor.u32 %v11479_v32, %v9226_v36  ;;  %v9180_v51 = vld [vmem:[%s16311_s30 + $0x138] sm:$0xf0]  ;;  %v11433_v32 = vld [vmem:[%s16311_s30 + $0x2c] sm:$0xf]  ;;  %v1136_v8 = vpop.f32.mrf.mxu3 }
 0x265   :  { %v934_v23 = vmax.f32 %v870_v0, 0.0  ;;  %v12808_v16 = vadd.f32 %v1136_v8, %v12670_v37 }
 0x266   :  { %v875_v14 = vadd.f32 %v874_v58, %v722_v35  ;;  %v710_v58 = vadd.f32 %v11863_v31, %v12605_v18  ;;  %v9023_v18 = vor.u32 %v11443_v29, %v9022_v46  ;;  %v933_v35 = vmax.f32 %v868_v4, 0.0  ;;  %v11469_v4 = vld [vmem:[%s16311_s30 + $0x14c] sm:$0xf] }
 0x267   :  { %v1057_v46 = vpack.c.b16 %v1037_v7, %v1037_v7 }
 0x268   :  { %1365 = vmatpush.bf16.msra.mxu2 %v12163_v22  ;;  %2118 = vmatpush.bf16.msra.mxu1 %v12306_v38  ;;  %v936_v41 = vmax.f32 %v875_v14, 0.0  ;;  %v12760_v14 = vld [vmem:[%s16311_s30 + $0x1a8] sm:$0xff] }
 0x26b   :  { %v724_v21 = vpop.f32.mrf.mxu0  ;;  %1178 = vmatmul.bf16.gmra.mxu2 %v9007_v59  ;;  %1828 = vmatmul.bf16.gmra.mxu1 %v9211_v15  ;;  %v12730_v59 = vpack.c.bf16 %v936_v41, %v935_v5  ;;  %v863_v15 = vadd.f32 %v12571_v9, %v710_v58  ;;  %v12744_v9 = vpop.f32.mrf.mxu2  ;;  %v8992_v58 = vld [vmem:[%s16311_s30 + $0x38] sm:$0xf0] }
 0x26c   :  { %1424 = vmatpush.bf16.msrb.mxu2 %v12560_v48  ;;  %2412 = vmatpush.bf16.msrb.mxu1 %v12280_v13  ;;  %v725_v43 = vadd.f32 %v11863_v31, %v724_v21  ;;  %v12738_v31 = vpack.c.bf16 %v934_v23, %v933_v35  ;;  %v9196_v5 = vld [vmem:[%s16311_s30 + $0x158] sm:$0xf0]  ;;  %v9053_v23 = vld [vmem:[%s16311_s30 + $0x90] sm:$0xf]  ;;  %v11482_v35 = vld [vmem:[%s16311_s30 + $0x1b4] sm:$0xf] }
 0x26d   :  { %v931_v21 = vmax.f32 %v863_v15, 0.0  ;;  %v11448_v15 = vld [vmem:[%s16311_s30 + $0x9c] sm:$0xf0] }
 0x26e   :  { %v878_v42 = vadd.f32 %v877_v2, %v725_v43  ;;  %v930_v43 = vmax.f32 %v860_v62, 0.0  ;;  %v9276_v62 = vld [vmem:[%s16311_s30 + $0x1c0] sm:$0xf0] }
 0x26f   :  { %v12746_v44 = vpack.c.bf16 %v932_v55, %v931_v21  ;;  %v9054_v55 = vor.u32 %v11448_v15, %v9053_v23  ;;  %v9279_v21 = vor.u32 %v11482_v35, %v9276_v62  ;;  %v11441_v23 = vld [vmem:[%s16311_s30 + $0x6c] sm:$0xf]  ;;  %v9228_v35 = vld [vmem:[%s16311_s30 + $0x198] sm:$0xf0] }
 0x270   :  { %1425 = vmatpush.bf16.msrb.mxu2 %v12576_v52  ;;  %2413 = vmatpush.bf16.msrb.mxu1 %v12285_v25  ;;  %v937_v50 = vmax.f32 %v878_v42, 0.0  ;;  %v11429_v42 = vld [vmem:[%s16311_s30 + $0xc] sm:$0xf]  ;;  %v12775_v47 = vpack.c.bf16 %v930_v43, %v929_v6  ;;  %v12828_v43 = vpop.f32.mrf.mxu3 }
 0x271   :  { %v8979_v0 = vor.u32 %v11429_v42, %v8976_v54  ;;  %v11437_v42 = vld [vmem:[%s16311_s30 + $0x4c] sm:$0xf]  ;;  %v9008_v54 = vld [vmem:[%s16311_s30 + $0x58] sm:$0xf0] }
 0x272   :  { %v966_v45 = vpack.c.bf16 %v937_v50, %v937_v50  ;;  %v11465_v50 = vld [vmem:[%s16311_s30 + $0x12c] sm:$0xf] }
 0x273   :  { %v726_v2 = vpop.f32.mrf.mxu0  ;;  %v9183_v41 = vor.u32 %v11465_v50, %v9180_v51  ;;  %v11473_v50 = vld [vmem:[%s16311_s30 + $0x16c] sm:$0xf]  ;;  %v9212_v51 = vld [vmem:[%s16311_s30 + $0x178] sm:$0xf0] }
 0x274   :  { %1426 = vmatpush.bf16.msrb.mxu2 %v12585_v60  ;;  %2414 = vmatpush.bf16.msrb.mxu1 %v12289_v27  ;;  %v12712_v20 = vsel %vm1090_vm1, %v966_v45, 0  ;;  %v1692_v45 = vunpack.c.l.b16 %v12760_v14  ;;  %v12783_v2 = vpop.f32.mrf.mxu2  ;;  %v11477_v15 = vld [vmem:[%s16311_s30 + $0x18c] sm:$0xf] }
 0x275   :  { %1196 = vmatpush.bf16.msrb.mxu3 %v12712_v20  ;;  %1846 = vmatpush.bf16.msrb.mxu0 %v12712_v20 }
 0x276   :  { %v1712_v29 = vpack.c.b16 %v1692_v45, %v1692_v45 }
 0x278   :  { %1427 = vmatpush.bf16.msrb.mxu2 %v12597_v40  ;;  %2415 = vmatpush.bf16.msrb.mxu1 %v12233_v28  ;;  %v1141_v7 = vpop.f32.mrf.mxu3 }
 0x279   :  { %1197 = vmatpush.bf16.msrb.mxu3 %v12730_v59  ;;  %1847 = vmatpush.bf16.msrb.mxu0 %v12730_v59  ;;  %v12851_v45 = vadd.f32 %v1141_v7, %v12699_v19  ;;  %v9292_v19 = vld [vmem:[%s16311_s30 + $0x1e0] sm:$0xf0] }
 0x27b   :  { %1183 = vmatmul.bf16.gmra.mxu2 %v9023_v18  ;;  %1833 = vmatmul.bf16.gmra.mxu1 %v9227_v1  ;;  %v8995_v18 = vor.u32 %v11433_v32, %v8992_v58  ;;  %v9199_v1 = vor.u32 %v11469_v4, %v9196_v5  ;;  %v11486_v32 = vld [vmem:[%s16311_s30 + $0x1d4] sm:$0xf] }
 0x27c   :  { %1428 = vmatpush.bf16.msrb.mxu2 %v12603_v17  ;;  %2416 = vmatpush.bf16.msrb.mxu1 %v12214_v10  ;;  %v12791_v36 = vpop.f32.mrf.mxu2  ;;  %v9295_v5 = vor.u32 %v11486_v32, %v9292_v19 }
 0x27d   :  { %1198 = vmatpush.bf16.msrb.mxu3 %v12738_v31  ;;  %1848 = vmatpush.bf16.msrb.mxu0 %v12738_v31 }
 0x280   :  { %1429 = vmatpush.bf16.msrb.mxu2 %v12618_v30  ;;  %2417 = vmatpush.bf16.msrb.mxu1 %v12197_v56  ;;  %v12871_v8 = vpop.f32.mrf.mxu3 }
 0x281   :  { %1199 = vmatpush.bf16.msrb.mxu3 %v12746_v44  ;;  %1849 = vmatpush.bf16.msrb.mxu0 %v12746_v44 }
 0x284   :  { %1430 = vmatpush.bf16.msrb.mxu2 %v12623_v33  ;;  %2418 = vmatpush.bf16.msrb.mxu1 %v12180_v39  ;;  %v12824_v37 = vpop.f32.mrf.mxu2 }
 0x285   :  { %1200 = vmatpush.bf16.msrb.mxu3 %v12775_v47  ;;  %1850 = vmatpush.bf16.msrb.mxu0 %v12775_v47 }
 0x288   :  { %1431 = vmatpush.bf16.msrb.mxu2 %v12455_v11  ;;  %2419 = vmatpush.bf16.msrb.mxu1 %v12163_v22 }
 0x289   :  { %1391 = vmatpush.bf16.msra.mxu3 %v12427_v49  ;;  %2144 = vmatpush.bf16.msra.mxu0 %v12560_v48 }
 0x28a   :  { %9028 = vmatmul.msk.bf16.vlgmr.msrb.gmra.mxu3 %vm1074_vm2, %v8979_v0  ;;  %9232 = vmatmul.msk.bf16.vlgmr.msrb.gmra.mxu0 %vm1074_vm2, %v9183_v41  ;;  %v9011_v0 = vor.u32 %v11437_v42, %v9008_v54  ;;  %v9215_v41 = vor.u32 %v11473_v50, %v9212_v51  ;;  %v11456_v42 = vld [vmem:[%s16311_s30 + $0xdc] sm:$0xf0]  ;;  %v9231_v54 = vor.u32 %v11477_v15, %v9228_v35  ;;  %v11490_v50 = vld [vmem:[%s16311_s30 + $0x1f4] sm:$0xf] }
 0x28b   :  { %1188 = vmatmul.bf16.gmra.mxu2 %v1057_v46  ;;  %1838 = vmatmul.bf16.gmra.mxu1 %v1712_v29  ;;  %v9069_v46 = vld [vmem:[%s16311_s30 + $0xb0] sm:$0xf]  ;;  %v11452_v29 = vld [vmem:[%s16311_s30 + $0xbc] sm:$0xf0] }
 0x28c   :  { %v12834_v6 = vpop.f32.mrf.mxu2  ;;  %v9070_v4 = vor.u32 %v11452_v29, %v9069_v46  ;;  %v1693_v46 = vunpack.c.h.b16 %v12760_v14  ;;  %v9324_v14 = vld [vmem:[%s16311_s30 + $0x220] sm:$0xf0]  ;;  %v11462_v15 = vld [vmem:[%s16312_s4 + $0x10] sm:$0xff] }
 0x28d   :  { %1392 = vmatpush.bf16.msra.mxu3 %v12432_v61  ;;  %2145 = vmatpush.bf16.msra.mxu0 %v12576_v52  ;;  %v11516_v35 = vld [vmem:[%s16312_s4 + $0x40] sm:$0xff] }
 0x291   :  { %1393 = vmatpush.bf16.msra.mxu3 %v12436_v63  ;;  %2146 = vmatpush.bf16.msra.mxu0 %v12585_v60 }
 0x294   :  { %v1125_v58 = vpop.f32.mrf.mxu2 }
 0x295   :  { %1394 = vmatpush.bf16.msra.mxu3 %v12380_v53  ;;  %2147 = vmatpush.bf16.msra.mxu0 %v12597_v40  ;;  %v9101_v58 = vld [vmem:[%s16311_s30 + $0xf0] sm:$0xf] }
 0x299   :  { %1395 = vmatpush.bf16.msra.mxu3 %v12361_v34  ;;  %2148 = vmatpush.bf16.msra.mxu0 %v12603_v17 }
 0x29a   :  { %9029 = vmatmul.msk.bf16.gmra.mxu3 %vm1074_vm2, %v8995_v18  ;;  %9233 = vmatmul.msk.bf16.gmra.mxu0 %vm1074_vm2, %v9199_v1  ;;  %v9024_v18 = vld [vmem:[%s16311_s30 + $0x78] sm:$0xf0] }
 0x29b   :  { %1366 = vmatmul.bf16.vlgmr.msra.gmra.mxu2 %v9054_v55  ;;  %2119 = vmatmul.bf16.vlgmr.msra.gmra.mxu1 %v9279_v21  ;;  %v9027_v55 = vor.u32 %v11441_v23, %v9024_v18  ;;  %v9085_v21 = vld [vmem:[%s16311_s30 + $0xd0] sm:$0xf]  ;;  %v11517_v23 = vld [vmem:[%s16312_s4 + $0x48] sm:$0xff] }
 0x29c   :  { %v9086_v51 = vor.u32 %v11456_v42, %v9085_v21  ;;  %2587 = vmatpush.bf16.msra.mxu1 %v11517_v23 }
 0x29d   :  { %1396 = vmatpush.bf16.msra.mxu3 %v12344_v12  ;;  %2149 = vmatpush.bf16.msra.mxu0 %v12618_v30 }
 0x2a0   :  { %2588 = vmatpush.bf16.msra.mxu1 %v11516_v35  ;;  %v11489_v35 = vld [vmem:[%s16311_s30 + $0x1e4] sm:$0xf0] }
 0x2a1   :  { %1397 = vmatpush.bf16.msra.mxu3 %v12327_v57  ;;  %2150 = vmatpush.bf16.msra.mxu0 %v12623_v33 }
 0x2a4   :  { %v1146_v1 = vpop.f32.mrf.mxu3 }
 0x2a5   :  { %1398 = vmatpush.bf16.msra.mxu3 %v12306_v38  ;;  %2151 = vmatpush.bf16.msra.mxu0 %v12455_v11  ;;  %v12890_v62 = vadd.f32 %v1146_v1, %v12744_v9  ;;  %v9308_v9 = vld [vmem:[%s16311_s30 + $0x200] sm:$0xf0] }
 0x2a6   :  { %v9311_v7 = vor.u32 %v11490_v50, %v9308_v9  ;;  %v11446_v50 = vld [vmem:[%s16311_s30 + $0x94] sm:$0xf]  ;;  %v9055_v9 = vld [vmem:[%s16311_s30 + $0xa0] sm:$0xf0] }
 0x2a9   :  { %1460 = vmatpush.bf16.msrb.mxu3 %v12712_v20  ;;  %2445 = vmatpush.bf16.msrb.mxu0 %v12427_v49 }
 0x2aa   :  { %9030 = vmatmul.msk.bf16.gmra.mxu3 %vm1074_vm2, %v9011_v0  ;;  %9234 = vmatmul.msk.bf16.gmra.mxu0 %vm1074_vm2, %v9215_v41  ;;  %v1038_v41 = vunpack.c.h.b16 %v12755_v26  ;;  %v11494_v26 = vld [vmem:[%s16311_s30 + $0x214] sm:$0xf] }
 0x2ab   :  { %1371 = vmatmul.bf16.gmra.mxu2 %v9070_v4  ;;  %2124 = vmatmul.bf16.gmra.mxu1 %v9295_v5  ;;  %v11460_v4 = vld [vmem:[%s16311_s30 + $0xfc] sm:$0xf0]  ;;  %v1713_v5 = vpack.c.b16 %v1693_v46, %v1693_v46  ;;  %v9327_v1 = vor.u32 %v11494_v26, %v9324_v14 }
 0x2ac   :  { %v12909_v0 = vpop.f32.mrf.mxu3  ;;  %v1058_v19 = vpack.c.b16 %v1038_v41, %v1038_v41  ;;  %v9102_v18 = vor.u32 %v11460_v4, %v9101_v58 }
 0x2ad   :  { %1461 = vmatpush.bf16.msrb.mxu3 %v12730_v59  ;;  %2446 = vmatpush.bf16.msrb.mxu0 %v12432_v61 }
 0x2b1   :  { %1462 = vmatpush.bf16.msrb.mxu3 %v12738_v31  ;;  %2447 = vmatpush.bf16.msrb.mxu0 %v12436_v63 }
 0x2b4   :  { %v1151_v29 = vpop.f32.mrf.mxu3 }
 0x2b5   :  { %1463 = vmatpush.bf16.msrb.mxu3 %v12746_v44  ;;  %2448 = vmatpush.bf16.msrb.mxu0 %v12380_v53  ;;  %v12916_v32 = vadd.f32 %v1151_v29, %v12791_v36  ;;  %v11463_v36 = vld [vmem:[%s16312_s4 + $0x18] sm:$0xff]  ;;  %v9058_v29 = vor.u32 %v11446_v50, %v9055_v9  ;;  %v11449_v50 = vld [vmem:[%s16311_s30 + $0xa4] sm:$0xf0] }
 0x2b6   :  { %1534 = vmatpush.bf16.msra.mxu2 %v11463_v36 }
 0x2b9   :  { %1464 = vmatpush.bf16.msrb.mxu3 %v12775_v47  ;;  %2449 = vmatpush.bf16.msrb.mxu0 %v12361_v34 }
 0x2ba   :  { %9031 = vmatmul.msk.bf16.gmra.mxu3 %vm1074_vm2, %v9027_v55  ;;  %9235 = vmatmul.msk.bf16.gmra.mxu0 %vm1074_vm2, %v9231_v54  ;;  %v12952_v54 = vld [vmem:[%s16311_s30 + $0x110] sm:$0xff] }
 0x2bb   :  { %1376 = vmatmul.bf16.gmra.mxu2 %v9086_v51  ;;  %2129 = vmatmul.bf16.gmra.mxu1 %v9311_v7  ;;  %v12963_v51 = vld [vmem:[%s16311_s30 + $0x230] sm:$0xff]  ;;  %v11485_v7 = vld [vmem:[%s16311_s30 + $0x1c4] sm:$0xf0]  ;;  %v1304_v41 = vunpack.c.l.b16 %v12952_v54 }
 0x2bc   :  { %v12944_v55 = vpop.f32.mrf.mxu3  ;;  %1535 = vmatpush.bf16.msra.mxu2 %v11462_v15  ;;  %16313 = vst [vmem:[#allocation11_spill] sm:$0xff] %v12963_v51  ;;  %v9298_v15 = vld [vmem:[%s16311_s30 + $0x1d8] sm:$0xf] }
 0x2bd   :  { %2450 = vmatpush.bf16.msrb.mxu0 %v12344_v12  ;;  %v1324_v26 = vpack.c.b16 %v1304_v41, %v1304_v41  ;;  %v9299_v9 = vor.u32 %v11489_v35, %v9298_v15 }
 0x2c1   :  { %2451 = vmatpush.bf16.msrb.mxu0 %v12327_v57 }
 0x2c4   :  { %v1156_v46 = vpop.f32.mrf.mxu3 }
 0x2c5   :  { %2452 = vmatpush.bf16.msrb.mxu0 %v12306_v38  ;;  %v12974_v58 = vadd.f32 %v1156_v46, %v12834_v6  ;;  %v11450_v6 = vld [vmem:[%s16311_s30 + $0xb4] sm:$0xf] }
 0x2ca   :  { %9032 = vmatmul.msk.bf16.gmra.mxu3 %vm1074_vm2, %v1058_v19  ;;  %9236 = vmatmul.msk.bf16.gmra.mxu0 %vm1074_vm2, %v1713_v5  ;;  %v2025_v19 = vunpack.c.h.b16 %v12963_v51 }
 0x2cb   :  { %1381 = vmatmul.bf16.gmra.mxu2 %v9102_v18  ;;  %2134 = vmatmul.bf16.gmra.mxu1 %v9327_v1  ;;  %v9071_v1 = vld [vmem:[%s16311_s30 + $0xc0] sm:$0xf0] }
 0x2cc   :  { %v2045_v14 = vpack.c.b16 %v2025_v19, %v2025_v19  ;;  %v1158_v36 = vpop.f32.mrf.mxu3 }
 0x2cd   :  { %v9314_v36 = vld [vmem:[%s16311_s30 + $0x1f8] sm:$0xf] }
 0x2ce   :  { %v1169_v21 = vpop.f32.mrf.mxu2 }
 0x2cf   :  { %v12947_v42 = vadd.f32 %v1169_v21, %v12808_v16  ;;  %v9282_v16 = vld [vmem:[%s16311_s30 + $0x1b8] sm:$0xf] }
 0x2d0   :  { %v9283_v4 = vor.u32 %v11485_v7, %v9282_v16  ;;  %v9061_v21 = vld [vmem:[%s16311_s30 + $0x98] sm:$0xf]  ;;  %v9378_v16 = vld [vmem:[%s16311_s30 + $0x240] sm:$0xf]  ;;  %v11502_v7 = vld [vmem:[%s16311_s30 + $0x24c] sm:$0xf0] }
 0x2d1   :  { %v9062_v46 = vor.u32 %v11449_v50, %v9061_v21 }
 0x2d6   :  { %v12976_v5 = vpop.f32.mrf.mxu2 }
 0x2da   :  { %1399 = vmatmul.bf16.vlgmr.msra.gmra.mxu3 %v9058_v29  ;;  %2152 = vmatmul.bf16.vlgmr.msra.gmra.mxu0 %v9283_v4  ;;  %v9379_v29 = vor.u32 %v11502_v7, %v9378_v16  ;;  %v9103_v16 = vld [vmem:[%s16311_s30 + $0x100] sm:$0xf0]  ;;  %v9330_v7 = vld [vmem:[%s16311_s30 + $0x218] sm:$0xf] }
 0x2db   :  { %2746 = vmatpush.bf16.msra.mxu0 %v12280_v13  ;;  %1386 = vmatmul.bf16.gmra.mxu2 %v1324_v26  ;;  %v11454_v26 = vld [vmem:[%s16311_s30 + $0xd4] sm:$0xf] }
 0x2dc   :  { %2139 = vmatmul.bf16.gmra.mxu1 %v2045_v14  ;;  %v9087_v14 = vld [vmem:[%s16311_s30 + $0xe0] sm:$0xf0] }
 0x2de   :  { %v1174_v23 = vpop.f32.mrf.mxu2 }
 0x2df   :  { %2747 = vmatpush.bf16.msra.mxu0 %v12285_v25  ;;  %v12981_v18 = vadd.f32 %v1174_v23, %v12851_v45  ;;  %v9074_v45 = vor.u32 %v11450_v6, %v9071_v1  ;;  %v9090_v23 = vor.u32 %v11454_v26, %v9087_v14  ;;  %v9077_v6 = vld [vmem:[%s16311_s30 + $0xb8] sm:$0xf]  ;;  %v11453_v1 = vld [vmem:[%s16311_s30 + $0xc4] sm:$0xf0] }
 0x2e0   :  { %v11457_v26 = vld [vmem:[%s16311_s30 + $0xe4] sm:$0xf0] }
 0x2e3   :  { %2748 = vmatpush.bf16.msra.mxu0 %v12289_v27 }
 0x2e6   :  { %v13009_v41 = vpop.f32.mrf.mxu2 }
 0x2e7   :  { %2749 = vmatpush.bf16.msra.mxu0 %v12233_v28 }
 0x2ea   :  { %1404 = vmatmul.bf16.gmra.mxu3 %v9074_v45  ;;  %2157 = vmatmul.bf16.gmra.mxu0 %v9299_v9  ;;  %v9078_v45 = vor.u32 %v11453_v1, %v9077_v6  ;;  %v11458_v9 = vld [vmem:[%s16311_s30 + $0xf4] sm:$0xf] }
 0x2eb   :  { %2750 = vmatpush.bf16.msra.mxu0 %v12214_v10  ;;  %1432 = vmatmul.bf16.vlgmr.msrb.gmra.mxu2 %v9062_v46  ;;  %v11497_v46 = vld [vmem:[%s16311_s30 + $0x224] sm:$0xf0] }
 0x2ec   :  { %1744 = vmatpush.bf16.msrb.mxu2 %v12280_v13  ;;  %2420 = vmatmul.bf16.vlgmr.msrb.gmra.mxu1 %v9379_v29  ;;  %v9106_v29 = vor.u32 %v11458_v9, %v9103_v16  ;;  %v9331_v14 = vor.u32 %v11497_v46, %v9330_v7  ;;  %v1139_v9 = vadd.f32 %v12828_v43, %v12690_v24  ;;  %v1305_v16 = vunpack.c.h.b16 %v12952_v54 }
 0x2ed   :  { %2848 = vmatpush.bf16.msrb.mxu1 %v12712_v20 }
 0x2ee   :  { %v1179_v19 = vpop.f32.mrf.mxu2  ;;  %v1172_v46 = vadd.f32 %v12976_v5, %v1139_v9  ;;  %v9063_v9 = vld [vmem:[%s16311_s30 + $0xa8] sm:$0xf0] }
 0x2ef   :  { %2751 = vmatpush.bf16.msra.mxu0 %v12197_v56  ;;  %v13016_v4 = vadd.f32 %v1179_v19, %v12890_v62  ;;  %v11493_v62 = vld [vmem:[%s16311_s30 + $0x204] sm:$0xf0]  ;;  %v9093_v19 = vld [vmem:[%s16311_s30 + $0xd8] sm:$0xf] }
 0x2f0   :  { %1745 = vmatpush.bf16.msrb.mxu2 %v12285_v25  ;;  %v9315_v15 = vor.u32 %v11493_v62, %v9314_v36  ;;  %v11444_v62 = vld [vmem:[%s16312_s4] sm:$0xff] }
 0x2f1   :  { %2849 = vmatpush.bf16.msrb.mxu1 %v12730_v59 }
 0x2f3   :  { %2752 = vmatpush.bf16.msra.mxu0 %v12180_v39 }
 0x2f4   :  { %1746 = vmatpush.bf16.msrb.mxu2 %v12289_v27 }
 0x2f5   :  { %2850 = vmatpush.bf16.msrb.mxu1 %v12738_v31 }
 0x2f6   :  { %v13042_v35 = vpop.f32.mrf.mxu2 }
 0x2f7   :  { %2753 = vmatpush.bf16.msra.mxu0 %v12163_v22 }
 0x2f8   :  { %1747 = vmatpush.bf16.msrb.mxu2 %v12233_v28 }
 0x2f9   :  { %2851 = vmatpush.bf16.msrb.mxu1 %v12746_v44 }
 0x2fa   :  { %1409 = vmatmul.bf16.gmra.mxu3 %v9090_v23  ;;  %2162 = vmatmul.bf16.gmra.mxu0 %v9315_v15  ;;  %v9094_v23 = vor.u32 %v11457_v26, %v9093_v19  ;;  %v9109_v19 = vld [vmem:[%s16311_s30 + $0xf8] sm:$0xf] }
 0x2fb   :  { %1437 = vmatmul.bf16.gmra.mxu2 %v9078_v45  ;;  %v13086_v45 = vld [vmem:[%s16311_s30 + $0x238] sm:$0xff] }
 0x2fc   :  { %1748 = vmatpush.bf16.msrb.mxu2 %v12214_v10  ;;  %16314 = vst [vmem:[#allocation12_spill] sm:$0xff] %v13086_v45  ;;  %v2026_v7 = vunpack.c.l.b16 %v13086_v45 }
 0x2fd   :  { %2852 = vmatpush.bf16.msrb.mxu1 %v12775_v47 }
 0x2fe   :  { %v1184_v21 = vpop.f32.mrf.mxu2  ;;  %v2046_v26 = vpack.c.b16 %v2026_v7, %v2026_v7 }
 0x2ff   :  { %v13049_v50 = vadd.f32 %v1184_v21, %v12916_v32  ;;  %v11445_v32 = vld [vmem:[%s16312_s4 + $0x8] sm:$0xff] }
 0x300   :  { %1749 = vmatpush.bf16.msrb.mxu2 %v12197_v56  ;;  %1594 = vmatpush.bf16.msra.mxu3 %v11445_v32 }
 0x304   :  { %1750 = vmatpush.bf16.msrb.mxu2 %v12180_v39  ;;  %1595 = vmatpush.bf16.msra.mxu3 %v11444_v62 }
 0x306   :  { %v13074_v36 = vpop.f32.mrf.mxu2 }
 0x308   :  { %1751 = vmatpush.bf16.msrb.mxu2 %v12163_v22 }
 0x30a   :  { %1414 = vmatmul.bf16.gmra.mxu3 %v9106_v29  ;;  %2167 = vmatmul.bf16.gmra.mxu0 %v9331_v14  ;;  %v1325_v29 = vpack.c.b16 %v1305_v16, %v1305_v16  ;;  %v11500_v16 = vld [vmem:[%s16311_s30 + $0x244] sm:$0xf] }
 0x30b   :  { %1442 = vmatmul.bf16.gmra.mxu2 %v9094_v23  ;;  %v1144_v23 = vadd.f32 %v12871_v8, %v12728_v3  ;;  %v9380_v3 = vld [vmem:[%s16311_s30 + $0x250] sm:$0xf0] }
 0x30d   :  { %v1202_v6 = vpop.f32.mrf.mxu3 }
 0x30e   :  { %v13081_v1 = vadd.f32 %v1202_v6, %v12947_v42  ;;  %v1189_v15 = vpop.f32.mrf.mxu2  ;;  %v13116_v6 = vld [vmem:[%s16311_s30 + $0x118] sm:$0xff] }
 0x30f   :  { %v13089_v21 = vadd.f32 %v1189_v15, %v12974_v58  ;;  %v11461_v58 = vld [vmem:[%s16311_s30 + $0x104] sm:$0xf0]  ;;  %v11447_v15 = vld [vmem:[%s16311_s30 + $0x9c] sm:$0xf]  ;;  %v1306_v7 = vunpack.c.l.b16 %v13116_v6 }
 0x310   :  { %v9110_v54 = vor.u32 %v11461_v58, %v9109_v19 }
 0x315   :  { %v1204_v42 = vpop.f32.mrf.mxu3 }
 0x316   :  { %v13096_v32 = vadd.f32 %v1204_v42, %v1172_v46  ;;  %v1191_v43 = vpop.f32.mrf.mxu2  ;;  %v9066_v42 = vor.u32 %v11447_v15, %v9063_v9  ;;  %v9079_v15 = vld [vmem:[%s16311_s30 + $0xc8] sm:$0xf0]  ;;  %v13155_v9 = vpop.f32.mrf.mxu0 }
 0x31a   :  { %1419 = vmatmul.bf16.gmra.mxu3 %v1325_v29  ;;  %2172 = vmatmul.bf16.gmra.mxu0 %v2046_v26  ;;  %v9383_v29 = vor.u32 %v11500_v16, %v9380_v3 }
 0x31b   :  { %1447 = vmatmul.bf16.gmra.mxu2 %v9110_v54 }
 0x31d   :  { %v1207_v5 = vpop.f32.mrf.mxu3 }
 0x31e   :  { %v13107_v14 = vadd.f32 %v1207_v5, %v12981_v18  ;;  %v13109_v62 = vpop.f32.mrf.mxu2  ;;  %v1177_v18 = vadd.f32 %v13009_v41, %v1144_v23  ;;  %v1326_v41 = vpack.c.b16 %v1306_v7, %v1306_v7  ;;  %v1149_v5 = vadd.f32 %v12909_v0, %v12783_v2  ;;  %v11451_v23 = vld [vmem:[%s16311_s30 + $0xbc] sm:$0xf]  ;;  %v9396_v2 = vld [vmem:[%s16311_s30 + $0x270] sm:$0xf0] }
 0x31f   :  { %v9082_v3 = vor.u32 %v11451_v23, %v9079_v15  ;;  %v11455_v23 = vld [vmem:[%s16311_s30 + $0xdc] sm:$0xf]  ;;  %v9095_v15 = vld [vmem:[%s16311_s30 + $0xe8] sm:$0xf0]  ;;  %v11534_v7 = vld [vmem:[%s16312_s4 + $0x50] sm:$0xff] }
 0x325   :  { %v1209_v8 = vpop.f32.mrf.mxu3 }
 0x326   :  { %v13132_v46 = vadd.f32 %v1209_v8, %v1177_v18  ;;  %v13136_v58 = vpop.f32.mrf.mxu2  ;;  %v11504_v18 = vld [vmem:[%s16311_s30 + $0x264] sm:$0xf] }
 0x327   :  { %v9399_v8 = vor.u32 %v11504_v18, %v9396_v2  ;;  %v9098_v2 = vor.u32 %v11455_v23, %v9095_v15  ;;  %v11459_v23 = vld [vmem:[%s16311_s30 + $0xfc] sm:$0xf]  ;;  %v9111_v15 = vld [vmem:[%s16311_s30 + $0x108] sm:$0xf0] }
 0x32a   :  { %9115 = vmatmul.msk.bf16.vlgmr.msrb.gmra.mxu3 %vm1074_vm2, %v9066_v42  ;;  %2453 = vmatmul.bf16.vlgmr.msrb.gmra.mxu0 %v9383_v29  ;;  %v13173_v29 = vpop.f32.mrf.mxu0 }
 0x32b   :  { %1777 = vmatpush.bf16.msrb.mxu3 %v12427_v49  ;;  %1452 = vmatmul.bf16.gmra.mxu2 %v1326_v41 }
 0x32d   :  { %v1212_v26 = vpop.f32.mrf.mxu3 }
 0x32e   :  { %v13141_v43 = vadd.f32 %v1212_v26, %v13016_v4  ;;  %v13144_v54 = vpop.f32.mrf.mxu2  ;;  %v1182_v4 = vadd.f32 %v13042_v35, %v1149_v5  ;;  %v1154_v5 = vadd.f32 %v12944_v55, %v12824_v37  ;;  %v9412_v37 = vld [vmem:[%s16311_s30 + $0x290] sm:$0xf0] }
 0x32f   :  { %1778 = vmatpush.bf16.msrb.mxu3 %v12432_v61 }
 0x333   :  { %1779 = vmatpush.bf16.msrb.mxu3 %v12436_v63 }
 0x335   :  { %v1214_v0 = vpop.f32.mrf.mxu3 }
 0x336   :  { %v13164_v16 = vadd.f32 %v1214_v0, %v1182_v4  ;;  %v13169_v42 = vpop.f32.mrf.mxu2  ;;  %v11508_v4 = vld [vmem:[%s16311_s30 + $0x284] sm:$0xf] }
 0x337   :  { %1780 = vmatpush.bf16.msrb.mxu3 %v12380_v53  ;;  %v9415_v0 = vor.u32 %v11508_v4, %v9412_v37  ;;  %v11512_v4 = vld [vmem:[%s16311_s30 + $0x2a4] sm:$0xf] }
 0x33a   :  { %9116 = vmatmul.msk.bf16.gmra.mxu3 %vm1074_vm2, %v9082_v3  ;;  %2458 = vmatmul.bf16.gmra.mxu0 %v9399_v8  ;;  %v13200_v3 = vpop.f32.mrf.mxu0 }
 0x33b   :  { %1781 = vmatpush.bf16.msrb.mxu3 %v12361_v34 }
 0x33d   :  { %v1217_v35 = vpop.f32.mrf.mxu3 }
 0x33e   :  { %v13176_v41 = vadd.f32 %v1217_v35, %v13049_v50  ;;  %v13179_v26 = vpop.f32.mrf.mxu2  ;;  %v1187_v50 = vadd.f32 %v13074_v36, %v1154_v5 }
 0x33f   :  { %1782 = vmatpush.bf16.msrb.mxu3 %v12344_v12 }
 0x343   :  { %1783 = vmatpush.bf16.msrb.mxu3 %v12327_v57 }
 0x345   :  { %v1219_v55 = vpop.f32.mrf.mxu3 }
 0x346   :  { %v13197_v18 = vadd.f32 %v1219_v55, %v1187_v50  ;;  %v13204_v8 = vpop.f32.mrf.mxu2  ;;  %v13210_v55 = vpop.f32.mrf.mxu0 }
 0x347   :  { %1784 = vmatpush.bf16.msrb.mxu3 %v12306_v38 }
 0x34a   :  { %9117 = vmatmul.msk.bf16.gmra.mxu3 %vm1074_vm2, %v9098_v2  ;;  %2463 = vmatmul.bf16.gmra.mxu0 %v9415_v0  ;;  %v11535_v2 = vld [vmem:[%s16312_s4 + $0x58] sm:$0xff]  ;;  %v9114_v0 = vor.u32 %v11459_v23, %v9111_v15  ;;  %v13239_v23 = vld [vmem:[%s16311_s30 + $0x2c0] sm:$0xff]  ;;  %v1307_v15 = vunpack.c.h.b16 %v13116_v6  ;;  %v9482_v6 = vld [vmem:[%s16311_s30 + $0x2d0] sm:$0xf] }
 0x34b   :  { %2921 = vmatpush.bf16.msrb.mxu0 %v11535_v2  ;;  %16315 = vst [vmem:[#allocation13_spill] sm:$0xff] %v13239_v23 }
 0x34d   :  { %v1222_v35 = vpop.f32.mrf.mxu3 }
 0x34e   :  { %v13208_v5 = vadd.f32 %v1222_v35, %v13089_v21  ;;  %v1382_v50 = vpop.f32.mrf.mxu2  ;;  %v9428_v21 = vld [vmem:[%s16311_s30 + $0x2b0] sm:$0xf0]  ;;  %v13233_v19 = vpop.f32.mrf.mxu0 }
 0x34f   :  { %v9431_v35 = vor.u32 %v11512_v4, %v9428_v21  ;;  %2922 = vmatpush.bf16.msrb.mxu0 %v11534_v7  ;;  %v2359_v4 = vunpack.c.h.b16 %v13239_v23 }
 0x355   :  { %v1224_v37 = vpop.f32.mrf.mxu3 }
 0x356   :  { %v13227_v36 = vpop.f32.mrf.mxu2  ;;  %v13243_v2 = vpop.f32.mrf.mxu0 }
 0x35a   :  { %9118 = vmatmul.msk.bf16.gmra.mxu3 %vm1074_vm2, %v9114_v0  ;;  %2468 = vmatmul.bf16.gmra.mxu0 %v9431_v35  ;;  %v1327_v0 = vpack.c.b16 %v1307_v15, %v1307_v15  ;;  %v2379_v35 = vpack.c.b16 %v2359_v4, %v2359_v4  ;;  %v11520_v15 = vld [vmem:[%s16311_s30 + $0x2dc] sm:$0xf0] }
 0x35d   :  { %v1400_v37 = vpop.f32.mrf.mxu3 }
 0x35e   :  { %v1401_v24 = vadd.f32 %v1400_v37, %v13109_v62  ;;  %v1387_v45 = vpop.f32.mrf.mxu2  ;;  %v13247_v37 = vpop.f32.mrf.mxu0 }
 0x365   :  { %v1402_v21 = vpop.f32.mrf.mxu3 }
 0x366   :  { %v1389_v38 = vpop.f32.mrf.mxu2 }
 0x367   :  { %v9483_v38 = vor.u32 %v11520_v15, %v9482_v6  ;;  %v16317_v15 = vpack.c.bf16 %v13132_v46, %v13107_v14  ;;  %v16318_v14 = vpack.c.bf16 %v13164_v16, %v13141_v43 }
 0x36a   :  { %9119 = vmatmul.msk.bf16.gmra.mxu3 %vm1074_vm2, %v1327_v0  ;;  %2473 = vmatmul.bf16.gmra.mxu0 %v2379_v35  ;;  %v13255_v35 = vpop.f32.mrf.mxu0 }
 0x36d   :  { %v1405_v62 = vpop.f32.mrf.mxu3 }
 0x36e   :  { %v1406_v7 = vadd.f32 %v1405_v62, %v13144_v54  ;;  %v1433_v51 = vpop.f32.mrf.mxu2  ;;  %v16316_v54 = vpack.c.bf16 %v13096_v32, %v13081_v1 }
 0x36f   :  { %v1434_v57 = vadd.f32 %v1433_v51, %v1401_v24 }
 0x375   :  { %v1407_v4 = vpop.f32.mrf.mxu3 }
 0x376   :  { %v1435_v0 = vpop.f32.mrf.mxu2 }
 0x37a   :  { %9145 = vmatmul.msk.bf16.vlgmr.msra.gmra.mxu3 %vm1512_vm3, %v16316_v54  ;;  %2754 = vmatmul.bf16.vlgmr.msra.gmra.mxu0 %v9483_v38 }
 0x37b   :  { %2078 = vmatpush.bf16.msra.mxu3 %v12280_v13  ;;  %3182 = vmatpush.bf16.msra.mxu0 %v12712_v20 }
 0x37d   :  { %v1410_v51 = vpop.f32.mrf.mxu3 }
 0x37e   :  { %v1411_v24 = vadd.f32 %v1410_v51, %v13179_v26  ;;  %v1438_v62 = vpop.f32.mrf.mxu2 }
 0x37f   :  { %2079 = vmatpush.bf16.msra.mxu3 %v12285_v25  ;;  %3183 = vmatpush.bf16.msra.mxu0 %v12730_v59  ;;  %v1439_v6 = vadd.f32 %v1438_v62, %v1406_v7 }
 0x383   :  { %2080 = vmatpush.bf16.msra.mxu3 %v12289_v27  ;;  %3184 = vmatpush.bf16.msra.mxu0 %v12738_v31 }
 0x385   :  { %v1412_v1 = vpop.f32.mrf.mxu3 }
 0x386   :  { %v1440_v32 = vpop.f32.mrf.mxu2 }
 0x387   :  { %2081 = vmatpush.bf16.msra.mxu3 %v12233_v28  ;;  %3185 = vmatpush.bf16.msra.mxu0 %v12746_v44 }
 0x38a   :  { %9146 = vmatmul.msk.bf16.gmra.mxu3 %vm1512_vm3, %v16317_v15 }
 0x38b   :  { %2082 = vmatpush.bf16.msra.mxu3 %v12214_v10  ;;  %3186 = vmatpush.bf16.msra.mxu0 %v12775_v47 }
 0x38d   :  { %v1415_v26 = vpop.f32.mrf.mxu3 }
 0x38e   :  { %v1416_v7 = vadd.f32 %v1415_v26, %v1382_v50  ;;  %v1443_v38 = vpop.f32.mrf.mxu2 }
 0x38f   :  { %2083 = vmatpush.bf16.msra.mxu3 %v12197_v56  ;;  %v1444_v54 = vadd.f32 %v1443_v38, %v1411_v24  ;;  %v16319_v24 = vpack.c.bf16 %v13197_v18, %v13176_v41  ;;  %v1403_v56 = vadd.f32 %v1402_v21, %v13136_v58  ;;  %v1408_v18 = vadd.f32 %v1407_v4, %v13169_v42  ;;  %v11468_v4 = vld [vmem:[%s16311_s30 + $0x144] sm:$0xf] }
 0x390   :  { %v1413_v42 = vadd.f32 %v1412_v1, %v13204_v8  ;;  %v11472_v1 = vld [vmem:[%s16311_s30 + $0x164] sm:$0xf] }
 0x391   :  { %v1436_v28 = vadd.f32 %v1435_v0, %v1403_v56  ;;  %v9172_v56 = vld [vmem:[%s16311_s30 + $0x130] sm:$0xf0] }
 0x393   :  { %2084 = vmatpush.bf16.msra.mxu3 %v12180_v39 }
 0x395   :  { %v1417_v51 = vpop.f32.mrf.mxu3 }
 0x396   :  { %v1445_v62 = vpop.f32.mrf.mxu2  ;;  %v1418_v8 = vadd.f32 %v1417_v51, %v13227_v36  ;;  %v11480_v36 = vld [vmem:[%s16312_s4 + $0x20] sm:$0xff] }
 0x397   :  { %2085 = vmatpush.bf16.msra.mxu3 %v12163_v22 }
 0x39a   :  { %9147 = vmatmul.msk.bf16.gmra.mxu3 %vm1512_vm3, %v16318_v14 }
 0x39d   :  { %v1420_v46 = vpop.f32.mrf.mxu3 }
 0x39e   :  { %v1421_v15 = vadd.f32 %v1420_v46, %v1387_v45  ;;  %v1448_v23 = vpop.f32.mrf.mxu2  ;;  %v1230_v45 = vpack.c.bf16 %v13208_v5, %v13208_v5 }
 0x39f   :  { %v1449_v10 = vadd.f32 %v1448_v23, %v1416_v7 }
 0x3a5   :  { %v1422_v50 = vpop.f32.mrf.mxu3 }
 0x3a6   :  { %v1450_v26 = vpop.f32.mrf.mxu2 }
 0x3aa   :  { %9148 = vmatmul.msk.bf16.gmra.mxu3 %vm1512_vm3, %v16319_v24 }
 0x3ad   :  { %v1466_v38 = vpop.f32.mrf.mxu3 }
 0x3ae   :  { %v1453_v39 = vpop.f32.mrf.mxu2  ;;  %v1467_v16 = vadd.f32 %v1466_v38, %v1434_v57 }
 0x3af   :  { %v1454_v22 = vadd.f32 %v1453_v39, %v1421_v15  ;;  %v11464_v39 = vld [vmem:[%s16311_s30 + $0x124] sm:$0xf]  ;;  %v9188_v15 = vld [vmem:[%s16311_s30 + $0x150] sm:$0xf0] }
 0x3b0   :  { %v9175_v21 = vor.u32 %v11464_v39, %v9172_v56  ;;  %v9191_v38 = vor.u32 %v11468_v4, %v9188_v15 }
 0x3b5   :  { %v1468_v43 = vpop.f32.mrf.mxu3 }
 0x3b6   :  { %v1469_v14 = vadd.f32 %v1468_v43, %v1436_v28  ;;  %v1455_v7 = vpop.f32.mrf.mxu2  ;;  %v1441_v28 = vadd.f32 %v1440_v32, %v1408_v18  ;;  %v1446_v32 = vadd.f32 %v1445_v62, %v1413_v42  ;;  %v1451_v62 = vadd.f32 %v1450_v26, %v1418_v8  ;;  %v11476_v26 = vld [vmem:[%s16311_s30 + $0x184] sm:$0xf]  ;;  %v11466_v42 = vld [vmem:[%s16311_s30 + $0x12c] sm:$0xf0] }
 0x3b8   :  { %v1490_v23 = vpack.c.bf16 %v1469_v14, %v1467_v16  ;;  %v9204_v14 = vld [vmem:[%s16311_s30 + $0x170] sm:$0xf0] }
 0x3ba   :  { %9132 = vmatmul.msk.bf16.vlgmr.msra.gmra.mxu2 %vm1512_vm3, %v1490_v23  ;;  %9149 = vmatmul.msk.bf16.gmra.mxu3 %vm1512_vm3, %v1230_v45 }
 0x3bd   :  { %v1471_v41 = vpop.f32.mrf.mxu3 }
 0x3be   :  { %v1472_v58 = vadd.f32 %v1471_v41, %v1439_v6  ;;  %v9207_v41 = vor.u32 %v11472_v1, %v9204_v14 }
 0x3c5   :  { %v1473_v57 = vpop.f32.mrf.mxu3 }
 0x3c6   :  { %v1474_v5 = vadd.f32 %v1473_v57, %v1441_v28  ;;  %v11499_v28 = vld [vmem:[%s16312_s4 + $0x38] sm:$0xff] }
 0x3c8   :  { %v1491_v0 = vpack.c.bf16 %v1474_v5, %v1472_v58  ;;  %v11498_v58 = vld [vmem:[%s16312_s4 + $0x30] sm:$0xff] }
 0x3ca   :  { %9133 = vmatmul.msk.bf16.gmra.mxu2 %vm1512_vm3, %v1491_v0  ;;  %1785 = vmatmul.bf16.vlgmr.msrb.gmra.mxu3 %v9175_v21 }
 0x3cb   :  { %2253 = vmatpush.bf16.msrb.mxu3 %v11499_v28 }
 0x3cd   :  { %v1476_v46 = vpop.f32.mrf.mxu3 }
 0x3ce   :  { %v1477_v6 = vadd.f32 %v1476_v46, %v1444_v54  ;;  %v11481_v54 = vld [vmem:[%s16312_s4 + $0x28] sm:$0xff]  ;;  %v9170_v46 = vld [vmem:[%s16311_s30 + $0x120] sm:$0xf] }
 0x3cf   :  { %1919 = vmatpush.bf16.msra.mxu2 %v11481_v54  ;;  %2254 = vmatpush.bf16.msrb.mxu3 %v11498_v58  ;;  %v9171_v15 = vor.u32 %v11466_v42, %v9170_v46 }
 0x3d3   :  { %1920 = vmatpush.bf16.msra.mxu2 %v11480_v36  ;;  %v11478_v36 = vld [vmem:[%s16311_s30 + $0x18c] sm:$0xf0] }
 0x3d5   :  { %v1478_v50 = vpop.f32.mrf.mxu3 }
 0x3d6   :  { %v1479_v24 = vadd.f32 %v1478_v50, %v1446_v32 }
 0x3d8   :  { %v1492_v43 = vpack.c.bf16 %v1479_v24, %v1477_v6  ;;  %v9186_v6 = vld [vmem:[%s16311_s30 + $0x140] sm:$0xf]  ;;  %v11470_v24 = vld [vmem:[%s16311_s30 + $0x14c] sm:$0xf0] }
 0x3d9   :  { %v9187_v8 = vor.u32 %v11470_v24, %v9186_v6  ;;  %v1819_v24 = vpop.f32.mrf.mxu1 }
 0x3da   :  { %9134 = vmatmul.msk.bf16.gmra.mxu2 %vm1512_vm3, %v1492_v43  ;;  %1790 = vmatmul.bf16.gmra.mxu3 %v9191_v38  ;;  %v9274_v38 = vld [vmem:[%s16311_s30 + $0x1b0] sm:$0xf]  ;;  %v11484_v43 = vld [vmem:[%s16311_s30 + $0x1bc] sm:$0xf0] }
 0x3db   :  { %v9275_v1 = vor.u32 %v11484_v43, %v9274_v38 }
 0x3dd   :  { %v1481_v16 = vpop.f32.mrf.mxu3 }
 0x3de   :  { %v1482_v23 = vadd.f32 %v1481_v16, %v1449_v10  ;;  %v9220_v10 = vld [vmem:[%s16311_s30 + $0x190] sm:$0xf0] }
 0x3df   :  { %v9223_v57 = vor.u32 %v11476_v26, %v9220_v10 }
 0x3e1   :  { %v1821_v43 = vpop.f32.mrf.mxu1 }
 0x3e5   :  { %v1483_v45 = vpop.f32.mrf.mxu3 }
 0x3e6   :  { %v1484_v7 = vadd.f32 %v1483_v45, %v1451_v62  ;;  %v9202_v62 = vld [vmem:[%s16311_s30 + $0x160] sm:$0xf]  ;;  %v11474_v45 = vld [vmem:[%s16311_s30 + $0x16c] sm:$0xf0] }
 0x3e8   :  { %v1493_v51 = vpack.c.bf16 %v1484_v7, %v1482_v23  ;;  %v9203_v23 = vor.u32 %v11474_v45, %v9202_v62 }
 0x3e9   :  { %v1824_v62 = vpop.f32.mrf.mxu1 }
 0x3ea   :  { %9135 = vmatmul.msk.bf16.gmra.mxu2 %vm1512_vm3, %v1493_v51  ;;  %1795 = vmatmul.bf16.gmra.mxu3 %v9207_v41  ;;  %v9218_v41 = vld [vmem:[%s16311_s30 + $0x180] sm:$0xf] }
 0x3ed   :  { %v1486_v18 = vpop.f32.mrf.mxu3 }
 0x3ee   :  { %v1487_v39 = vadd.f32 %v1486_v18, %v1454_v22  ;;  %v9166_v22 = vld [vmem:[%s16311_s30 + $0x1a0] sm:$0xff]  ;;  %v9219_v18 = vor.u32 %v11478_v36, %v9218_v41 }
 0x3ef   :  { %v1691_v0 = vunpack.c.h.b16 %v9166_v22 }
 0x3f0   :  { %v1494_v5 = vpack.c.bf16 %v1487_v39, %v1487_v39 }
 0x3f1   :  { %v1711_v32 = vpack.c.b16 %v1691_v0, %v1691_v0  ;;  %v1826_v41 = vpop.f32.mrf.mxu1 }
 0x3f5   :  { %v1488_v56 = vpop.f32.mrf.mxu3 }
 0x3f6   :  { %v1690_v56 = vunpack.c.l.b16 %v9166_v22 }
 0x3f8   :  { %v1710_v58 = vpack.c.b16 %v1690_v56, %v1690_v56 }
 0x3fa   :  { %9136 = vmatmul.msk.bf16.gmra.mxu2 %vm1512_vm3, %v1494_v5  ;;  %1800 = vmatmul.bf16.gmra.mxu3 %v9223_v57 }
 0x3fd   :  { %v1597_v21 = vpop.f32.mrf.mxu3 }
 0x405   :  { %v13344_v4 = vpop.f32.mrf.mxu3 }
 0x40a   :  { %1752 = vmatmul.bf16.vlgmr.msrb.gmra.mxu2 %v9171_v15  ;;  %1805 = vmatmul.bf16.gmra.mxu3 %v1711_v32 }
 0x40b   :  { %2180 = vmatpush.bf16.msrb.mxu2 %v12712_v20 }
 0x40d   :  { %v1602_v50 = vpop.f32.mrf.mxu3 }
 0x40f   :  { %2181 = vmatpush.bf16.msrb.mxu2 %v12730_v59 }
 0x413   :  { %2182 = vmatpush.bf16.msrb.mxu2 %v12738_v31 }
 0x415   :  { %v13361_v16 = vpop.f32.mrf.mxu3 }
 0x417   :  { %2183 = vmatpush.bf16.msrb.mxu2 %v12746_v44 }
 0x41a   :  { %1757 = vmatmul.bf16.gmra.mxu2 %v9187_v8  ;;  %2086 = vmatmul.bf16.vlgmr.msra.gmra.mxu3 %v9275_v1 }
 0x41b   :  { %2184 = vmatpush.bf16.msrb.mxu2 %v12775_v47  ;;  %2514 = vmatpush.bf16.msra.mxu3 %v12712_v20 }
 0x41d   :  { %v1607_v14 = vpop.f32.mrf.mxu3 }
 0x41f   :  { %2515 = vmatpush.bf16.msra.mxu3 %v12730_v59 }
 0x423   :  { %2516 = vmatpush.bf16.msra.mxu3 %v12738_v31 }
 0x425   :  { %v13374_v54 = vpop.f32.mrf.mxu3 }
 0x426   :  { %16320 = vst [vmem:[#allocation14_spill] sm:$0xff] %v13374_v54 }
 0x427   :  { %2517 = vmatpush.bf16.msra.mxu3 %v12746_v44 }
 0x42a   :  { %1762 = vmatmul.bf16.gmra.mxu2 %v9203_v23 }
 0x42b   :  { %2518 = vmatpush.bf16.msra.mxu3 %v12775_v47 }
 0x42d   :  { %v1612_v7 = vpop.f32.mrf.mxu3 }
 0x435   :  { %v13384_v51 = vpop.f32.mrf.mxu3 }
 0x436   :  { %16321 = vst [vmem:[#allocation15_spill] sm:$0xff] %v13384_v51 }
 0x43a   :  { %1767 = vmatmul.bf16.gmra.mxu2 %v9219_v18  ;;  %v1829_v18 = vpop.f32.mrf.mxu1 }
 0x43d   :  { %v1537_v26 = vpop.f32.mrf.mxu2  ;;  %v1617_v10 = vpop.f32.mrf.mxu3 }
 0x43e   :  { %v13386_v39 = vadd.f32 %v1597_v21, %v1537_v26 }
 0x445   :  { %v13388_v28 = vpop.f32.mrf.mxu2  ;;  %v1619_v57 = vpop.f32.mrf.mxu3 }
 0x44a   :  { %1772 = vmatmul.bf16.gmra.mxu2 %v1710_v58  ;;  %v1831_v58 = vpop.f32.mrf.mxu1 }
 0x44d   :  { %v1542_v5 = vpop.f32.mrf.mxu2  ;;  %v1786_v6 = vpop.f32.mrf.mxu3 }
 0x44e   :  { %v13390_v0 = vadd.f32 %v1602_v50, %v1542_v5 }
 0x455   :  { %v13392_v46 = vpop.f32.mrf.mxu2  ;;  %v1788_v22 = vpop.f32.mrf.mxu3 }
 0x45d   :  { %v1547_v42 = vpop.f32.mrf.mxu2  ;;  %v1791_v1 = vpop.f32.mrf.mxu3 }
 0x45e   :  { %v13394_v15 = vadd.f32 %v1607_v14, %v1547_v42 }
 0x465   :  { %v13396_v32 = vpop.f32.mrf.mxu2  ;;  %v1793_v23 = vpop.f32.mrf.mxu3 }
 0x466   :  { %16322 = vst [vmem:[#allocation16_spill] sm:$0xff] %v13396_v32 }
 0x46d   :  { %v1552_v21 = vpop.f32.mrf.mxu2  ;;  %v1796_v36 = vpop.f32.mrf.mxu3 }
 0x46e   :  { %v13398_v38 = vadd.f32 %v1612_v7, %v1552_v21 }
 0x475   :  { %v13400_v8 = vpop.f32.mrf.mxu2  ;;  %v1798_v56 = vpop.f32.mrf.mxu3 }
 0x476   :  { %16323 = vst [vmem:[#allocation17_spill] sm:$0xff] %v13400_v8 }
 0x47d   :  { %v1557_v50 = vpop.f32.mrf.mxu2  ;;  %v1801_v54 = vpop.f32.mrf.mxu3 }
 0x47e   :  { %v13402_v45 = vadd.f32 %v1617_v10, %v1557_v50  ;;  %v1834_v50 = vpop.f32.mrf.mxu1 }
 0x485   :  { %v1559_v14 = vpop.f32.mrf.mxu2 }
 0x48d   :  { %v1753_v26 = vpop.f32.mrf.mxu2 }
 0x48e   :  { %v1787_v57 = vadd.f32 %v1786_v6, %v1753_v26  ;;  %v1803_v26 = vpop.f32.mrf.mxu3 }
 0x490   :  { %v1820_v5 = vadd.f32 %v1819_v24, %v1787_v57 }
 0x492   :  { %v1853_v51 = vadd.f32 %v13155_v9, %v1820_v5 }
 0x495   :  { %v1755_v7 = vpop.f32.mrf.mxu2 }
 0x496   :  { %v1789_v42 = vadd.f32 %v1788_v22, %v1755_v7  ;;  %v1806_v7 = vpop.f32.mrf.mxu3 }
 0x498   :  { %v1822_v21 = vadd.f32 %v1821_v43, %v1789_v42  ;;  %v1836_v43 = vpop.f32.mrf.mxu1 }
 0x49a   :  { %v1855_v8 = vadd.f32 %v13173_v29, %v1822_v21 }
 0x49c   :  { %v1876_v10 = vpack.c.bf16 %v1855_v8, %v1853_v51 }
 0x49d   :  { %v1758_v32 = vpop.f32.mrf.mxu2 }
 0x49e   :  { %9249 = vmatmul.msk.bf16.vlgmr.msra.gmra.mxu2 %vm1512_vm3, %v1876_v10  ;;  %v1792_v14 = vadd.f32 %v1791_v1, %v1758_v32  ;;  %v1872_v1 = vpop.f32.mrf.mxu0 }
 0x49f   :  { %2478 = vmatpush.bf16.msra.mxu2 %v12560_v48 }
 0x4a0   :  { %v1825_v24 = vadd.f32 %v1824_v62, %v1792_v14  ;;  %v1839_v32 = vpop.f32.mrf.mxu1 }
 0x4a2   :  { %v1858_v29 = vadd.f32 %v13200_v3, %v1825_v24 }
 0x4a3   :  { %2479 = vmatpush.bf16.msra.mxu2 %v12576_v52 }
 0x4a5   :  { %v1760_v6 = vpop.f32.mrf.mxu2 }
 0x4a6   :  { %v1794_v22 = vadd.f32 %v1793_v23, %v1760_v6  ;;  %v1874_v21 = vpop.f32.mrf.mxu0 }
 0x4a7   :  { %2480 = vmatpush.bf16.msra.mxu2 %v12585_v60 }
 0x4a8   :  { %v1827_v9 = vadd.f32 %v1826_v41, %v1794_v22  ;;  %v1808_v41 = vpop.f32.mrf.mxu3  ;;  %v1841_v42 = vpop.f32.mrf.mxu1 }
 0x4a9   :  { %v9322_v41 = vld [vmem:[%s16311_s30 + $0x210] sm:$0xf]  ;;  %v11487_v42 = vld [vmem:[%s16311_s30 + $0x1dc] sm:$0xf] }
 0x4aa   :  { %v1860_v51 = vadd.f32 %v13210_v55, %v1827_v9 }
 0x4ab   :  { %2481 = vmatpush.bf16.msra.mxu2 %v12597_v40 }
 0x4ac   :  { %v1877_v8 = vpack.c.bf16 %v1860_v51, %v1858_v29 }
 0x4ad   :  { %v1763_v57 = vpop.f32.mrf.mxu2 }
 0x4ae   :  { %9250 = vmatmul.msk.bf16.gmra.mxu2 %vm1512_vm3, %v1877_v8  ;;  %v1797_v62 = vadd.f32 %v1796_v36, %v1763_v57 }
 0x4af   :  { %2482 = vmatpush.bf16.msra.mxu2 %v12603_v17 }
 0x4b0   :  { %v1830_v5 = vadd.f32 %v1829_v18, %v1797_v62 }
 0x4b2   :  { %v1863_v10 = vadd.f32 %v13233_v19, %v1830_v5  ;;  %v11496_v5 = vld [vmem:[%s16311_s30 + $0x21c] sm:$0xf0] }
 0x4b3   :  { %2483 = vmatpush.bf16.msra.mxu2 %v12618_v30 }
 0x4b5   :  { %v1765_v23 = vpop.f32.mrf.mxu2 }
 0x4b6   :  { %v1799_v3 = vadd.f32 %v1798_v56, %v1765_v23 }
 0x4b7   :  { %2484 = vmatpush.bf16.msra.mxu2 %v12623_v33 }
 0x4b8   :  { %v1832_v55 = vadd.f32 %v1831_v58, %v1799_v3  ;;  %v9323_v3 = vor.u32 %v11496_v5, %v9322_v41  ;;  %v11507_v41 = vld [vmem:[%s16311_s30 + $0x274] sm:$0xf0] }
 0x4ba   :  { %v1865_v14 = vadd.f32 %v13243_v2, %v1832_v55  ;;  %v9290_v2 = vld [vmem:[%s16311_s30 + $0x1d0] sm:$0xf]  ;;  %v9300_v55 = vld [vmem:[%s16311_s30 + $0x1e8] sm:$0xf0] }
 0x4bb   :  { %2485 = vmatpush.bf16.msra.mxu2 %v12455_v11  ;;  %v9303_v21 = vor.u32 %v11487_v42, %v9300_v55  ;;  %v16329_v42 = vld [vmem:[#allocation6_spill] sm:$0xff] }
 0x4bc   :  { %v1878_v6 = vpack.c.bf16 %v1865_v14, %v1863_v10  ;;  %v16324_v10 = vld [vmem:[#allocation10_spill] sm:$0xff]  ;;  %v11491_v14 = vld [vmem:[%s16311_s30 + $0x1fc] sm:$0xf] }
 0x4bd   :  { %v1768_v24 = vpop.f32.mrf.mxu2 }
 0x4be   :  { %9251 = vmatmul.msk.bf16.gmra.mxu2 %vm1512_vm3, %v1878_v6  ;;  %v1802_v36 = vadd.f32 %v1801_v54, %v1768_v24  ;;  %v11488_v54 = vld [vmem:[%s16311_s30 + $0x1dc] sm:$0xf0]  ;;  %v9316_v6 = vld [vmem:[%s16311_s30 + $0x208] sm:$0xf0] }
 0x4bf   :  { %v16325_v24 = vld [vmem:[#allocation11_spill] sm:$0xff] }
 0x4c0   :  { %v1835_v9 = vadd.f32 %v1834_v50, %v1802_v36  ;;  %v9291_v50 = vor.u32 %v11488_v54, %v9290_v2  ;;  %v2024_v36 = vunpack.c.l.b16 %v16325_v24 }
 0x4c2   :  { %v1868_v29 = vadd.f32 %v13247_v37, %v1835_v9  ;;  %2091 = vmatmul.bf16.gmra.mxu3 %v9291_v50  ;;  %v2044_v9 = vpack.c.b16 %v2024_v36, %v2024_v36 }
 0x4c5   :  { %v1770_v22 = vpop.f32.mrf.mxu2 }
 0x4c6   :  { %v1804_v18 = vadd.f32 %v1803_v26, %v1770_v22  ;;  %v9319_v22 = vor.u32 %v11491_v14, %v9316_v6  ;;  %v16330_v14 = vld [vmem:[#allocation5_spill] sm:$0xff] }
 0x4c8   :  { %v1837_v56 = vadd.f32 %v1836_v43, %v1804_v18  ;;  %v16326_v18 = vld [vmem:[#allocation9_spill] sm:$0xff] }
 0x4ca   :  { %v1870_v58 = vadd.f32 %v13255_v35, %v1837_v56  ;;  %v9306_v35 = vld [vmem:[%s16311_s30 + $0x1f0] sm:$0xf]  ;;  %v11495_v56 = vld [vmem:[%s16311_s30 + $0x21c] sm:$0xf] }
 0x4cc   :  { %v1879_v51 = vpack.c.bf16 %v1870_v58, %v1868_v29  ;;  %v9332_v29 = vld [vmem:[%s16311_s30 + $0x228] sm:$0xf0] }
 0x4cd   :  { %v1773_v8 = vpop.f32.mrf.mxu2  ;;  %v9335_v58 = vor.u32 %v11495_v56, %v9332_v29  ;;  %v16333_v29 = vld [vmem:[#allocation3_spill] sm:$0xff] }
 0x4ce   :  { %v1807_v19 = vadd.f32 %v1806_v7, %v1773_v8  ;;  %9252 = vmatmul.msk.bf16.gmra.mxu2 %vm1512_vm3, %v1879_v51  ;;  %v11492_v7 = vld [vmem:[%s16311_s30 + $0x1fc] sm:$0xf0] }
 0x4cf   :  { %v9307_v62 = vor.u32 %v11492_v7, %v9306_v35 }
 0x4d0   :  { %v1840_v26 = vadd.f32 %v1839_v32, %v1807_v19  ;;  %v11483_v32 = vld [vmem:[%s16311_s30 + $0x1bc] sm:$0xf]  ;;  %v16327_v19 = vld [vmem:[#allocation12_spill] sm:$0xff] }
 0x4d1   :  { %v2027_v2 = vunpack.c.h.b16 %v16327_v19 }
 0x4d2   :  { %v1873_v37 = vadd.f32 %v1872_v1, %v1840_v26  ;;  %2096 = vmatmul.bf16.gmra.mxu3 %v9307_v62  ;;  %v9284_v1 = vld [vmem:[%s16311_s30 + $0x1c8] sm:$0xf0] }
 0x4d3   :  { %v9287_v23 = vor.u32 %v11483_v32, %v9284_v1  ;;  %v2047_v50 = vpack.c.b16 %v2027_v2, %v2027_v2  ;;  %v2120_v32 = vpop.f32.mrf.mxu1  ;;  %v2153_v1 = vpop.f32.mrf.mxu0 }
 0x4d4   :  { %v1880_v57 = vpack.c.bf16 %v1873_v37, %v1873_v37  ;;  %v9386_v37 = vld [vmem:[%s16311_s30 + $0x248] sm:$0xf] }
 0x4d5   :  { %v1775_v43 = vpop.f32.mrf.mxu2 }
 0x4de   :  { %9253 = vmatmul.msk.bf16.gmra.mxu2 %vm1512_vm3, %v1880_v57 }
 0x4e2   :  { %2101 = vmatmul.bf16.gmra.mxu3 %v9323_v3 }
 0x4ee   :  { %9336 = vmatmul.msk.bf16.vlgmr.msrb.gmra.mxu2 %vm1074_vm2, %v9287_v23  ;;  %v9402_v23 = vld [vmem:[%s16311_s30 + $0x268] sm:$0xf] }
 0x4ef   :  { %2779 = vmatpush.bf16.msrb.mxu2 %v12427_v49  ;;  %v9403_v3 = vor.u32 %v11507_v41, %v9402_v23  ;;  %v9434_v23 = vld [vmem:[%s16311_s30 + $0x2a8] sm:$0xf]  ;;  %v11515_v41 = vld [vmem:[%s16311_s30 + $0x2b4] sm:$0xf0] }
 0x4f2   :  { %2106 = vmatmul.bf16.gmra.mxu3 %v2044_v9 }
 0x4f3   :  { %2780 = vmatpush.bf16.msrb.mxu2 %v12432_v61 }
 0x4f7   :  { %2781 = vmatpush.bf16.msrb.mxu2 %v12436_v63 }
 0x4fb   :  { %2782 = vmatpush.bf16.msrb.mxu2 %v12380_v53 }
 0x4fe   :  { %9337 = vmatmul.msk.bf16.gmra.mxu2 %vm1074_vm2, %v9303_v21  ;;  %v2155_v21 = vpop.f32.mrf.mxu0 }
 0x4ff   :  { %2783 = vmatpush.bf16.msrb.mxu2 %v12361_v34 }
 0x503   :  { %2784 = vmatpush.bf16.msrb.mxu2 %v12344_v12 }
 0x506   :  { %v2158_v56 = vpop.f32.mrf.mxu0 }
 0x507   :  { %2785 = vmatpush.bf16.msrb.mxu2 %v16324_v10 }
 0x50b   :  { %2786 = vmatpush.bf16.msrb.mxu2 %v16326_v18 }
 0x50e   :  { %9338 = vmatmul.msk.bf16.gmra.mxu2 %vm1074_vm2, %v9319_v22  ;;  %v16332_v22 = vld [vmem:[#allocation4_spill] sm:$0xff] }
 0x51e   :  { %9339 = vmatmul.msk.bf16.gmra.mxu2 %vm1074_vm2, %v9335_v58  ;;  %v9418_v58 = vld [vmem:[%s16311_s30 + $0x288] sm:$0xf] }
 0x521   :  { %v1922_v51 = vpop.f32.mrf.mxu2 }
 0x522   :  { %v13481_v8 = vadd.f32 %v1922_v51, %v13386_v39  ;;  %v11503_v39 = vld [vmem:[%s16311_s30 + $0x254] sm:$0xf0] }
 0x523   :  { %v9387_v35 = vor.u32 %v11503_v39, %v9386_v37  ;;  %v11511_v51 = vld [vmem:[%s16311_s30 + $0x294] sm:$0xf0]  ;;  %v2160_v37 = vpop.f32.mrf.mxu0 }
 0x524   :  { %v9419_v2 = vor.u32 %v11511_v51, %v9418_v58  ;;  %v9435_v51 = vor.u32 %v11515_v41, %v9434_v23 }
 0x529   :  { %v13484_v54 = vpop.f32.mrf.mxu2 }
 0x52e   :  { %9340 = vmatmul.msk.bf16.gmra.mxu2 %vm1074_vm2, %v2047_v50 }
 0x531   :  { %v1927_v26 = vpop.f32.mrf.mxu2 }
 0x532   :  { %v13488_v43 = vadd.f32 %v1927_v26, %v13390_v0  ;;  %v2087_v0 = vpop.f32.mrf.mxu3 }
 0x539   :  { %v13496_v57 = vpop.f32.mrf.mxu2 }
 0x53a   :  { %v2089_v55 = vpop.f32.mrf.mxu3 }
 0x53e   :  { %2486 = vmatmul.bf16.vlgmr.msra.gmra.mxu2 %v9387_v35 }
 0x53f   :  { %3080 = vmatpush.bf16.msra.mxu2 %v12280_v13 }
 0x541   :  { %v1932_v7 = vpop.f32.mrf.mxu2 }
 0x542   :  { %v13500_v62 = vadd.f32 %v1932_v7, %v13394_v15  ;;  %v2122_v15 = vpop.f32.mrf.mxu1 }
 0x543   :  { %3081 = vmatpush.bf16.msra.mxu2 %v12285_v25 }
 0x545   :  { %v2092_v9 = vpop.f32.mrf.mxu3 }
 0x547   :  { %3082 = vmatpush.bf16.msra.mxu2 %v12289_v27 }
 0x549   :  { %v13510_v5 = vpop.f32.mrf.mxu2 }
 0x54a   :  { %16328 = vst [vmem:[#allocation10_spill] sm:$0xff] %v13510_v5  ;;  %v2125_v36 = vpop.f32.mrf.mxu1 }
 0x54b   :  { %3083 = vmatpush.bf16.msra.mxu2 %v16329_v42  ;;  %v2126_v25 = vadd.f32 %v2125_v36, %v2092_v9 }
 0x54d   :  { %v2094_v26 = vpop.f32.mrf.mxu3 }
 0x54e   :  { %2491 = vmatmul.bf16.gmra.mxu2 %v9403_v3  ;;  %v2163_v3 = vpop.f32.mrf.mxu0 }
 0x54f   :  { %3084 = vmatpush.bf16.msra.mxu2 %v16330_v14 }
 0x551   :  { %v1937_v6 = vpop.f32.mrf.mxu2 }
 0x552   :  { %v13515_v24 = vadd.f32 %v1937_v6, %v13398_v38  ;;  %v16335_v38 = vld [vmem:[#allocation2_spill] sm:$0xff]  ;;  %v2127_v50 = vpop.f32.mrf.mxu1 }
 0x553   :  { %3085 = vmatpush.bf16.msra.mxu2 %v16332_v22 }
 0x554   :  { %16331 = vst [vmem:[#allocation11_spill] sm:$0xff] %v13515_v24 }
 0x555   :  { %v2097_v58 = vpop.f32.mrf.mxu3 }
 0x557   :  { %3086 = vmatpush.bf16.msra.mxu2 %v16333_v29  ;;  %v2165_v29 = vpop.f32.mrf.mxu0 }
 0x559   :  { %v13525_v19 = vpop.f32.mrf.mxu2 }
 0x55a   :  { %16334 = vst [vmem:[#allocation9_spill] sm:$0xff] %v13525_v19  ;;  %v2130_v7 = vpop.f32.mrf.mxu1  ;;  %v2121_v19 = vadd.f32 %v2120_v32, %v2087_v0 }
 0x55b   :  { %3087 = vmatpush.bf16.msra.mxu2 %v16335_v38 }
 0x55c   :  { %v2154_v22 = vadd.f32 %v2153_v1, %v2121_v19  ;;  %v2128_v1 = vadd.f32 %v2127_v50, %v2094_v26 }
 0x55e   :  { %2496 = vmatmul.bf16.gmra.mxu2 %v9419_v2 }
 0x55f   :  { %v2168_v27 = vpop.f32.mrf.mxu0 }
 0x561   :  { %v1942_v39 = vpop.f32.mrf.mxu2 }
 0x562   :  { %v13529_v35 = vadd.f32 %v1942_v39, %v13402_v45  ;;  %v2132_v2 = vpop.f32.mrf.mxu1  ;;  %v13540_v45 = vld [vmem:[%s16311_s30 + $0x2c8] sm:$0xff]  ;;  %v2099_v39 = vpop.f32.mrf.mxu3 }
 0x563   :  { %v2360_v24 = vunpack.c.l.b16 %v13540_v45 }
 0x564   :  { %16336 = vst [vmem:[#allocation12_spill] sm:$0xff] %v13529_v35  ;;  %v2123_v35 = vadd.f32 %v2122_v15, %v2089_v55  ;;  %v2159_v55 = vadd.f32 %v2158_v56, %v2126_v25 }
 0x565   :  { %v2380_v23 = vpack.c.b16 %v2360_v24, %v2360_v24  ;;  %v2161_v24 = vadd.f32 %v2160_v37, %v2128_v1  ;;  %v2133_v37 = vadd.f32 %v2132_v2, %v2099_v39  ;;  %v9500_v1 = vld [vmem:[%s16311_s30 + $0x300] sm:$0xf0] }
 0x566   :  { %v2156_v14 = vadd.f32 %v2155_v21, %v2123_v35  ;;  %v2131_v35 = vadd.f32 %v2130_v7, %v2097_v58 }
 0x567   :  { %v2170_v21 = vpop.f32.mrf.mxu0 }
 0x569   :  { %v1944_v6 = vpop.f32.mrf.mxu2 }
 0x56a   :  { %v2135_v41 = vpop.f32.mrf.mxu1  ;;  %v2102_v0 = vpop.f32.mrf.mxu3 }
 0x56b   :  { %v2136_v39 = vadd.f32 %v2135_v41, %v2102_v0 }
 0x56e   :  { %2501 = vmatmul.bf16.gmra.mxu2 %v9435_v51 }
 0x571   :  { %v2186_v38 = vpop.f32.mrf.mxu2 }
 0x572   :  { %v2187_v6 = vadd.f32 %v2186_v38, %v2154_v22  ;;  %v2137_v15 = vpop.f32.mrf.mxu1  ;;  %v2173_v38 = vpop.f32.mrf.mxu0 }
 0x579   :  { %v2188_v42 = vpop.f32.mrf.mxu2 }
 0x57a   :  { %v2189_v5 = vadd.f32 %v2188_v42, %v2156_v14  ;;  %v9484_v42 = vld [vmem:[%s16311_s30 + $0x2e0] sm:$0xf0]  ;;  %v2104_v14 = vpop.f32.mrf.mxu3  ;;  %v2140_v56 = vpop.f32.mrf.mxu1 }
 0x57c   :  { %v2210_v51 = vpack.c.bf16 %v2189_v5, %v2187_v6  ;;  %v11518_v5 = vld [vmem:[%s16311_s30 + $0x2d4] sm:$0xf] }
 0x57d   :  { %v9487_v19 = vor.u32 %v11518_v5, %v9484_v42  ;;  %v2166_v5 = vadd.f32 %v2165_v29, %v2133_v37  ;;  %v9516_v29 = vld [vmem:[%s16311_s30 + $0x320] sm:$0xf0] }
 0x57e   :  { %9353 = vmatmul.msk.bf16.vlgmr.msrb.gmra.mxu3 %vm1512_vm3, %v2210_v51  ;;  %2506 = vmatmul.bf16.gmra.mxu2 %v2380_v23  ;;  %v2164_v23 = vadd.f32 %v2163_v3, %v2131_v35  ;;  %v2175_v51 = vpop.f32.mrf.mxu0 }
 0x57f   :  { %2812 = vmatpush.bf16.msrb.mxu3 %v12560_v48 }
 0x581   :  { %v2191_v32 = vpop.f32.mrf.mxu2 }
 0x582   :  { %v2192_v36 = vadd.f32 %v2191_v32, %v2159_v55  ;;  %v2107_v50 = vpop.f32.mrf.mxu3  ;;  %v2142_v6 = vpop.f32.mrf.mxu1  ;;  %v11522_v32 = vld [vmem:[%s16311_s30 + $0x2f4] sm:$0xf] }
 0x583   :  { %2813 = vmatpush.bf16.msrb.mxu3 %v12576_v52 }
 0x587   :  { %2814 = vmatpush.bf16.msrb.mxu3 %v12585_v60 }
 0x589   :  { %v2193_v22 = vpop.f32.mrf.mxu2 }
 0x58a   :  { %v2194_v9 = vadd.f32 %v2193_v22, %v2161_v24  ;;  %v2109_v55 = vpop.f32.mrf.mxu3  ;;  %v9503_v24 = vor.u32 %v11522_v32, %v9500_v1  ;;  %v2138_v22 = vadd.f32 %v2137_v15, %v2104_v14  ;;  %v11530_v15 = vld [vmem:[%s16311_s30 + $0x334] sm:$0xf]  ;;  %v9394_v14 = vld [vmem:[%s16311_s30 + $0x260] sm:$0xf] }
 0x58b   :  { %2815 = vmatpush.bf16.msrb.mxu3 %v12597_v40  ;;  %v11552_v55 = vld [vmem:[%s16312_s4 + $0x60] sm:$0xff] }
 0x58c   :  { %v2211_v25 = vpack.c.bf16 %v2194_v9, %v2192_v36  ;;  %v2169_v36 = vadd.f32 %v2168_v27, %v2136_v39  ;;  %v11526_v9 = vld [vmem:[%s16311_s30 + $0x314] sm:$0xf] }
 0x58d   :  { %v9519_v37 = vor.u32 %v11526_v9, %v9516_v29  ;;  %v11514_v9 = vld [vmem:[%s16311_s30 + $0x2ac] sm:$0xf0]  ;;  %v11505_v29 = vld [vmem:[%s16311_s30 + $0x26c] sm:$0xf] }
 0x58e   :  { %9354 = vmatmul.msk.bf16.gmra.mxu3 %vm1512_vm3, %v2211_v25  ;;  %2787 = vmatmul.bf16.vlgmr.msrb.gmra.mxu2 %v9487_v19  ;;  %v2171_v19 = vadd.f32 %v2170_v21, %v2138_v22  ;;  %v9532_v21 = vld [vmem:[%s16311_s30 + $0x340] sm:$0xf0] }
 0x58f   :  { %2816 = vmatpush.bf16.msrb.mxu3 %v12603_v17  ;;  %v9535_v1 = vor.u32 %v11530_v15, %v9532_v21 }
 0x591   :  { %v2196_v26 = vpop.f32.mrf.mxu2 }
 0x592   :  { %v2197_v7 = vadd.f32 %v2196_v26, %v2164_v23  ;;  %v2141_v23 = vadd.f32 %v2140_v56, %v2107_v50  ;;  %v11506_v56 = vld [vmem:[%s16311_s30 + $0x26c] sm:$0xf0] }
 0x593   :  { %2817 = vmatpush.bf16.msrb.mxu3 %v12618_v30  ;;  %v9395_v50 = vor.u32 %v11506_v56, %v9394_v14  ;;  %v11513_v14 = vld [vmem:[%s16311_s30 + $0x2ac] sm:$0xf]  ;;  %v9436_v56 = vld [vmem:[%s16311_s30 + $0x2b8] sm:$0xf0] }
 0x594   :  { %v2174_v27 = vadd.f32 %v2173_v38, %v2141_v23  ;;  %v11553_v38 = vld [vmem:[%s16312_s4 + $0x68] sm:$0xff] }
 0x595   :  { %3255 = vmatpush.bf16.msrb.mxu2 %v11553_v38  ;;  %2425 = vmatmul.bf16.gmra.mxu1 %v9395_v50  ;;  %v11509_v23 = vld [vmem:[%s16311_s30 + $0x28c] sm:$0xf]  ;;  %v9439_v38 = vor.u32 %v11513_v14, %v9436_v56  ;;  %v16344_v14 = vld [vmem:[#allocation5_spill] sm:$0xff] }
 0x597   :  { %2818 = vmatpush.bf16.msrb.mxu3 %v12623_v33 }
 0x599   :  { %v2198_v42 = vpop.f32.mrf.mxu2  ;;  %3256 = vmatpush.bf16.msrb.mxu2 %v11552_v55 }
 0x59a   :  { %v2199_v58 = vadd.f32 %v2198_v42, %v2166_v5  ;;  %v13595_v5 = vld [vmem:[%s16311_s30 + $0x350] sm:$0xff]  ;;  %v11501_v42 = vld [vmem:[%s16311_s30 + $0x24c] sm:$0xf] }
 0x59b   :  { %2819 = vmatpush.bf16.msrb.mxu3 %v12455_v11 }
 0x59c   :  { %v2212_v3 = vpack.c.bf16 %v2199_v58, %v2197_v7  ;;  %v2693_v7 = vunpack.c.h.b16 %v13595_v5  ;;  %v9388_v58 = vld [vmem:[%s16311_s30 + $0x258] sm:$0xf0] }
 0x59d   :  { %v9391_v39 = vor.u32 %v11501_v42, %v9388_v58 }
 0x59e   :  { %9355 = vmatmul.msk.bf16.gmra.mxu3 %vm1512_vm3, %v2212_v3  ;;  %2792 = vmatmul.bf16.gmra.mxu2 %v9503_v24  ;;  %v9410_v24 = vld [vmem:[%s16311_s30 + $0x280] sm:$0xf]  ;;  %v11510_v3 = vld [vmem:[%s16311_s30 + $0x28c] sm:$0xf0]  ;;  %v2713_v22 = vpack.c.b16 %v2693_v7, %v2693_v7 }
 0x5a1   :  { %v2201_v2 = vpop.f32.mrf.mxu2 }
 0x5a2   :  { %v2202_v26 = vadd.f32 %v2201_v2, %v2169_v36  ;;  %v9411_v2 = vor.u32 %v11510_v3, %v9410_v24  ;;  %v9426_v36 = vld [vmem:[%s16311_s30 + $0x2a0] sm:$0xf] }
 0x5a5   :  { %2430 = vmatmul.bf16.gmra.mxu1 %v9411_v2 }
 0x5a9   :  { %v2203_v25 = vpop.f32.mrf.mxu2 }
 0x5aa   :  { %v2204_v35 = vadd.f32 %v2203_v25, %v2171_v19  ;;  %v9427_v19 = vor.u32 %v11514_v9, %v9426_v36  ;;  %v9404_v25 = vld [vmem:[%s16311_s30 + $0x278] sm:$0xf0]  ;;  %v2421_v36 = vpop.f32.mrf.mxu1 }
 0x5ac   :  { %v2213_v6 = vpack.c.bf16 %v2204_v35, %v2202_v26  ;;  %v9586_v26 = vld [vmem:[%s16311_s30 + $0x360] sm:$0xf]  ;;  %v11538_v35 = vld [vmem:[%s16311_s30 + $0x36c] sm:$0xf0] }
 0x5ae   :  { %9356 = vmatmul.msk.bf16.gmra.mxu3 %vm1512_vm3, %v2213_v6  ;;  %2797 = vmatmul.bf16.gmra.mxu2 %v9519_v37  ;;  %v9407_v37 = vor.u32 %v11505_v29, %v9404_v25  ;;  %v9587_v6 = vor.u32 %v11538_v35, %v9586_v26  ;;  %v16339_v29 = vld [vmem:[#allocation16_spill] sm:$0xff]  ;;  %v9506_v26 = vld [vmem:[%s16311_s30 + $0x2f8] sm:$0xf]  ;;  %v11525_v35 = vld [vmem:[%s16311_s30 + $0x304] sm:$0xf0] }
 0x5b1   :  { %v2206_v41 = vpop.f32.mrf.mxu2 }
 0x5b2   :  { %v2207_v0 = vadd.f32 %v2206_v41, %v2174_v27  ;;  %v9420_v41 = vld [vmem:[%s16311_s30 + $0x298] sm:$0xf0] }
 0x5b3   :  { %v9423_v27 = vor.u32 %v11509_v23, %v9420_v41  ;;  %v9507_v41 = vor.u32 %v11525_v35, %v9506_v26 }
 0x5b4   :  { %v2214_v32 = vpack.c.bf16 %v2207_v0, %v2207_v0  ;;  %v16337_v0 = vld [vmem:[#allocation13_spill] sm:$0xff] }
 0x5b5   :  { %2435 = vmatmul.bf16.gmra.mxu1 %v9427_v19  ;;  %v2358_v15 = vunpack.c.l.b16 %v16337_v0  ;;  %v16340_v19 = vld [vmem:[#allocation14_spill] sm:$0xff] }
 0x5b6   :  { %v1610_v25 = vadd.f32 %v16340_v19, %v16339_v29  ;;  %v16343_v0 = vld [vmem:[#allocation6_spill] sm:$0xff] }
 0x5b7   :  { %v2378_v21 = vpack.c.b16 %v2358_v15, %v2358_v15  ;;  %v2423_v15 = vpop.f32.mrf.mxu1 }
 0x5b9   :  { %v2208_v51 = vpop.f32.mrf.mxu2 }
 0x5be   :  { %9357 = vmatmul.msk.bf16.gmra.mxu3 %vm1512_vm3, %v2214_v32  ;;  %2802 = vmatmul.bf16.gmra.mxu2 %v9535_v1  ;;  %v1600_v32 = vadd.f32 %v13344_v4, %v13388_v28  ;;  %v2361_v1 = vunpack.c.h.b16 %v13540_v45  ;;  %v9490_v4 = vld [vmem:[%s16311_s30 + $0x2d8] sm:$0xf]  ;;  %v11521_v28 = vld [vmem:[%s16311_s30 + $0x2e4] sm:$0xf0] }
 0x5c0   :  { %v1947_v55 = vadd.f32 %v13484_v54, %v1600_v32  ;;  %v2381_v7 = vpack.c.b16 %v2361_v1, %v2361_v1  ;;  %v16347_v1 = vld [vmem:[#allocation4_spill] sm:$0xff] }
 0x5c1   :  { %v2487_v9 = vpop.f32.mrf.mxu2 }
 0x5c5   :  { %2440 = vmatmul.bf16.gmra.mxu1 %v2378_v21 }
 0x5c9   :  { %v2489_v21 = vpop.f32.mrf.mxu2 }
 0x5ce   :  { %9440 = vmatmul.msk.bf16.vlgmr.msra.gmra.mxu3 %vm1074_vm2, %v9391_v39  ;;  %2807 = vmatmul.bf16.gmra.mxu2 %v2713_v22  ;;  %v9491_v39 = vor.u32 %v11521_v28, %v9490_v4  ;;  %v16338_v22 = vld [vmem:[#allocation7_spill] sm:$0xff]  ;;  %v9522_v4 = vld [vmem:[%s16311_s30 + $0x318] sm:$0xf] }
 0x5cf   :  { %3113 = vmatpush.bf16.msra.mxu3 %v12427_v49  ;;  %v11529_v28 = vld [vmem:[%s16311_s30 + $0x324] sm:$0xf0] }
 0x5d0   :  { %v9523_v19 = vor.u32 %v11529_v28, %v9522_v4 }
 0x5d3   :  { %3114 = vmatpush.bf16.msra.mxu3 %v12432_v61 }
 0x5d7   :  { %3115 = vmatpush.bf16.msra.mxu3 %v12436_v63 }
 0x5db   :  { %3116 = vmatpush.bf16.msra.mxu3 %v12380_v53 }
 0x5de   :  { %9441 = vmatmul.msk.bf16.gmra.mxu3 %vm1074_vm2, %v9407_v37  ;;  %3088 = vmatmul.bf16.vlgmr.msra.gmra.mxu2 %v9587_v6 }
 0x5df   :  { %3117 = vmatpush.bf16.msra.mxu3 %v12361_v34  ;;  %3516 = vmatpush.bf16.msra.mxu2 %v12712_v20 }
 0x5e3   :  { %3118 = vmatpush.bf16.msra.mxu3 %v12344_v12  ;;  %3517 = vmatpush.bf16.msra.mxu2 %v12730_v59 }
 0x5e7   :  { %3119 = vmatpush.bf16.msra.mxu3 %v16324_v10  ;;  %3518 = vmatpush.bf16.msra.mxu2 %v12738_v31 }
 0x5eb   :  { %3120 = vmatpush.bf16.msra.mxu3 %v16326_v18  ;;  %3519 = vmatpush.bf16.msra.mxu2 %v12746_v44 }
 0x5ee   :  { %9442 = vmatmul.msk.bf16.gmra.mxu3 %vm1074_vm2, %v9423_v27 }
 0x5ef   :  { %3520 = vmatpush.bf16.msra.mxu2 %v12775_v47 }
 0x5fe   :  { %9443 = vmatmul.msk.bf16.gmra.mxu3 %vm1074_vm2, %v9439_v38  ;;  %v16345_v38 = vld [vmem:[#allocation11_spill] sm:$0xff] }
 0x601   :  { %v2256_v50 = vpop.f32.mrf.mxu3 }
 0x602   :  { %v13659_v51 = vadd.f32 %v2256_v50, %v13481_v8  ;;  %v1605_v8 = vadd.f32 %v13361_v16, %v13392_v46  ;;  %v2454_v46 = vpop.f32.mrf.mxu0 }
 0x604   :  { %v1949_v54 = vadd.f32 %v13496_v57, %v1605_v8  ;;  %v16341_v57 = vld [vmem:[#allocation8_spill] sm:$0xff]  ;;  %v16350_v8 = vld [vmem:[#allocation3_spill] sm:$0xff] }
 0x609   :  { %v2258_v42 = vpop.f32.mrf.mxu3 }
 0x60a   :  { %v13665_v58 = vadd.f32 %v2258_v42, %v1947_v55  ;;  %v2456_v27 = vpop.f32.mrf.mxu0  ;;  %v16348_v55 = vld [vmem:[#allocation17_spill] sm:$0xff]  ;;  %v16349_v42 = vld [vmem:[#allocation15_spill] sm:$0xff] }
 0x60e   :  { %9444 = vmatmul.msk.bf16.gmra.mxu3 %vm1074_vm2, %v2381_v7  ;;  %v1615_v7 = vadd.f32 %v16349_v42, %v16348_v55  ;;  %v11533_v55 = vld [vmem:[%s16311_s30 + $0x344] sm:$0xf0] }
 0x611   :  { %v2261_v24 = vpop.f32.mrf.mxu3 }
 0x612   :  { %v13669_v3 = vadd.f32 %v2261_v24, %v13488_v43  ;;  %v2459_v32 = vpop.f32.mrf.mxu0  ;;  %v2492_v24 = vpop.f32.mrf.mxu2 }
 0x619   :  { %v2263_v45 = vpop.f32.mrf.mxu3 }
 0x61a   :  { %v13680_v2 = vadd.f32 %v2263_v45, %v1949_v54  ;;  %v2426_v54 = vpop.f32.mrf.mxu1  ;;  %v16351_v45 = vld [vmem:[#allocation9_spill] sm:$0xff]  ;;  %v2461_v26 = vpop.f32.mrf.mxu0 }
 0x61e   :  { %2820 = vmatmul.bf16.vlgmr.msrb.gmra.mxu3 %v9491_v39  ;;  %v1953_v39 = vadd.f32 %v16351_v45, %v1615_v7 }
 0x61f   :  { %3414 = vmatpush.bf16.msrb.mxu3 %v12280_v13 }
 0x621   :  { %v2266_v43 = vpop.f32.mrf.mxu3 }
 0x622   :  { %v13684_v16 = vadd.f32 %v2266_v43, %v13500_v62  ;;  %v16342_v62 = vld [vmem:[#allocation10_spill] sm:$0xff]  ;;  %v2428_v35 = vpop.f32.mrf.mxu1 }
 0x623   :  { %3415 = vmatpush.bf16.msrb.mxu3 %v16338_v22  ;;  %v1951_v37 = vadd.f32 %v16342_v62, %v1610_v25  ;;  %v16353_v25 = vld [vmem:[#allocation2_spill] sm:$0xff]  ;;  %v2494_v62 = vpop.f32.mrf.mxu2 }
 0x627   :  { %3416 = vmatpush.bf16.msrb.mxu3 %v16341_v57 }
 0x629   :  { %v2268_v6 = vpop.f32.mrf.mxu3 }
 0x62a   :  { %v13697_v23 = vadd.f32 %v2268_v6, %v1951_v37  ;;  %v16354_v6 = vld [vmem:[#allocation12_spill] sm:$0xff]  ;;  %v2431_v4 = vpop.f32.mrf.mxu1 }
 0x62b   :  { %3417 = vmatpush.bf16.msrb.mxu3 %v16343_v0  ;;  %v2497_v42 = vpop.f32.mrf.mxu2  ;;  %v2460_v0 = vadd.f32 %v2459_v32, %v2426_v54 }
 0x62e   :  { %2825 = vmatmul.bf16.gmra.mxu3 %v9507_v41 }
 0x62f   :  { %3418 = vmatpush.bf16.msrb.mxu3 %v16344_v14 }
 0x631   :  { %v2271_v56 = vpop.f32.mrf.mxu3 }
 0x632   :  { %v13702_v50 = vadd.f32 %v2271_v56, %v16345_v38  ;;  %v2464_v56 = vpop.f32.mrf.mxu0  ;;  %v9538_v38 = vld [vmem:[%s16311_s30 + $0x338] sm:$0xf] }
 0x633   :  { %3419 = vmatpush.bf16.msrb.mxu3 %v16347_v1  ;;  %v9539_v28 = vor.u32 %v11533_v55, %v9538_v38 }
 0x634   :  { %16346 = vst [vmem:[#allocation13_spill] sm:$0xff] %v13702_v50 }
 0x637   :  { %3420 = vmatpush.bf16.msrb.mxu3 %v16350_v8 }
 0x639   :  { %v2273_v43 = vpop.f32.mrf.mxu3 }
 0x63a   :  { %v13715_v29 = vadd.f32 %v2273_v43, %v1953_v39  ;;  %v2466_v45 = vpop.f32.mrf.mxu0  ;;  %v2455_v43 = vadd.f32 %v2454_v46, %v2421_v36 }
 0x63b   :  { %3421 = vmatpush.bf16.msrb.mxu3 %v16353_v25 }
 0x63c   :  { %16352 = vst [vmem:[#allocation7_spill] sm:$0xff] %v13715_v29  ;;  %v2488_v25 = vadd.f32 %v2487_v9, %v2455_v43  ;;  %v2462_v9 = vadd.f32 %v2461_v26, %v2428_v35  ;;  %v2465_v43 = vadd.f32 %v2464_v56, %v2431_v4 }
 0x63e   :  { %2830 = vmatmul.bf16.gmra.mxu3 %v9523_v19  ;;  %v2499_v19 = vpop.f32.mrf.mxu2 }
 0x641   :  { %v2276_v37 = vpop.f32.mrf.mxu3 }
 0x642   :  { %v13719_v41 = vadd.f32 %v2276_v37, %v16354_v6  ;;  %v13730_v37 = vld [vmem:[%s16311_s30 + $0x358] sm:$0xff]  ;;  %v2433_v6 = vpop.f32.mrf.mxu1  ;;  %v2469_v55 = vpop.f32.mrf.mxu0 }
 0x643   :  { %v2694_v8 = vunpack.c.l.b16 %v13730_v37 }
 0x644   :  { %16355 = vst [vmem:[#allocation16_spill] sm:$0xff] %v13719_v41  ;;  %v2457_v41 = vadd.f32 %v2456_v27, %v2423_v15  ;;  %v2493_v15 = vadd.f32 %v2492_v24, %v2460_v0 }
 0x645   :  { %v2714_v38 = vpack.c.b16 %v2694_v8, %v2694_v8 }
 0x646   :  { %v2490_v29 = vadd.f32 %v2489_v21, %v2457_v41  ;;  %v2502_v50 = vpop.f32.mrf.mxu2 }
 0x649   :  { %v2278_v7 = vpop.f32.mrf.mxu3 }
 0x64a   :  { %v2436_v46 = vpop.f32.mrf.mxu1  ;;  %v2471_v27 = vpop.f32.mrf.mxu0 }
 0x64e   :  { %2835 = vmatmul.bf16.gmra.mxu3 %v9539_v28  ;;  %v2504_v21 = vpop.f32.mrf.mxu2 }
 0x651   :  { %v2520_v39 = vpop.f32.mrf.mxu3 }
 0x652   :  { %v2521_v7 = vadd.f32 %v2520_v39, %v2488_v25  ;;  %v2438_v8 = vpop.f32.mrf.mxu1  ;;  %v2474_v24 = vpop.f32.mrf.mxu0 }
 0x656   :  { %v2507_v26 = vpop.f32.mrf.mxu2 }
 0x659   :  { %v2522_v1 = vpop.f32.mrf.mxu3 }
 0x65a   :  { %v2523_v14 = vadd.f32 %v2522_v1, %v2490_v29  ;;  %v9588_v1 = vld [vmem:[%s16311_s30 + $0x370] sm:$0xf0]  ;;  %v2495_v29 = vadd.f32 %v2494_v62, %v2462_v9  ;;  %v2441_v35 = vpop.f32.mrf.mxu1  ;;  %v2467_v62 = vadd.f32 %v2466_v45, %v2433_v6  ;;  %v2470_v6 = vadd.f32 %v2469_v55, %v2436_v46  ;;  %v11524_v55 = vld [vmem:[%s16311_s30 + $0x2fc] sm:$0xf0] }
 0x65b   :  { %v9604_v9 = vld [vmem:[%s16311_s30 + $0x390] sm:$0xf0] }
 0x65c   :  { %v2544_v28 = vpack.c.bf16 %v2523_v14, %v2521_v7  ;;  %v11536_v14 = vld [vmem:[%s16311_s30 + $0x364] sm:$0xf]  ;;  %v2476_v7 = vpop.f32.mrf.mxu0 }
 0x65d   :  { %v9591_v41 = vor.u32 %v11536_v14, %v9588_v1  ;;  %v2500_v14 = vadd.f32 %v2499_v19, %v2467_v62  ;;  %v9620_v19 = vld [vmem:[%s16311_s30 + $0x3b0] sm:$0xf0] }
 0x65e   :  { %9457 = vmatmul.msk.bf16.vlgmr.msra.gmra.mxu1 %vm1512_vm3, %v2544_v28  ;;  %2840 = vmatmul.bf16.gmra.mxu3 %v2714_v38  ;;  %v2498_v38 = vadd.f32 %v2497_v42, %v2465_v43  ;;  %v2509_v28 = vpop.f32.mrf.mxu2 }
 0x65f   :  { %3146 = vmatpush.bf16.msra.mxu1 %v12560_v48  ;;  %v11571_v28 = vld [vmem:[%s16312_s4 + $0x78] sm:$0xff] }
 0x661   :  { %v2525_v36 = vpop.f32.mrf.mxu3 }
 0x662   :  { %v2526_v32 = vadd.f32 %v2525_v36, %v2493_v15  ;;  %v11540_v36 = vld [vmem:[%s16311_s30 + $0x384] sm:$0xf]  ;;  %v2443_v15 = vpop.f32.mrf.mxu1 }
 0x663   :  { %3147 = vmatpush.bf16.msra.mxu1 %v12576_v52 }
 0x667   :  { %3148 = vmatpush.bf16.msra.mxu1 %v12585_v60 }
 0x669   :  { %v2527_v25 = vpop.f32.mrf.mxu3 }
 0x66a   :  { %v2528_v54 = vadd.f32 %v2527_v25, %v2495_v29  ;;  %v9607_v29 = vor.u32 %v11540_v36, %v9604_v9  ;;  %v2472_v25 = vadd.f32 %v2471_v27, %v2438_v8 }
 0x66b   :  { %3149 = vmatpush.bf16.msra.mxu1 %v12597_v40 }
 0x66c   :  { %v2545_v0 = vpack.c.bf16 %v2528_v54, %v2526_v32  ;;  %v2503_v32 = vadd.f32 %v2502_v50, %v2470_v6  ;;  %v11544_v54 = vld [vmem:[%s16311_s30 + $0x3a4] sm:$0xf]  ;;  %v9498_v50 = vld [vmem:[%s16311_s30 + $0x2f0] sm:$0xf] }
 0x66d   :  { %v9623_v62 = vor.u32 %v11544_v54, %v9620_v19  ;;  %v9499_v46 = vor.u32 %v11524_v55, %v9498_v50  ;;  %v11532_v54 = vld [vmem:[%s16311_s30 + $0x33c] sm:$0xf0]  ;;  %v11527_v55 = vld [vmem:[%s16311_s30 + $0x31c] sm:$0xf] }
 0x66e   :  { %9458 = vmatmul.msk.bf16.gmra.mxu1 %vm1512_vm3, %v2545_v0  ;;  %3121 = vmatmul.bf16.vlgmr.msra.gmra.mxu3 %v9591_v41  ;;  %v2505_v41 = vadd.f32 %v2504_v21, %v2472_v25 }
 0x66f   :  { %3150 = vmatpush.bf16.msra.mxu1 %v12603_v17  ;;  %2759 = vmatmul.bf16.gmra.mxu0 %v9499_v46  ;;  %v9524_v46 = vld [vmem:[%s16311_s30 + $0x328] sm:$0xf0] }
 0x670   :  { %3589 = vmatpush.bf16.msra.mxu3 %v11571_v28 }
 0x671   :  { %v2530_v39 = vpop.f32.mrf.mxu3 }
 0x672   :  { %v2531_v56 = vadd.f32 %v2530_v39, %v2498_v38  ;;  %v2475_v38 = vadd.f32 %v2474_v24, %v2441_v35  ;;  %v11548_v24 = vld [vmem:[%s16311_s30 + $0x3c4] sm:$0xf]  ;;  %v9636_v35 = vld [vmem:[%s16311_s30 + $0x3d0] sm:$0xf0] }
 0x673   :  { %3151 = vmatpush.bf16.msra.mxu1 %v12618_v30  ;;  %v9639_v15 = vor.u32 %v11548_v24, %v9636_v35 }
 0x674   :  { %v2508_v21 = vadd.f32 %v2507_v26, %v2475_v38  ;;  %v11570_v26 = vld [vmem:[%s16312_s4 + $0x70] sm:$0xff]  ;;  %v2692_v38 = vunpack.c.l.b16 %v13595_v5  ;;  %v11531_v5 = vld [vmem:[%s16311_s30 + $0x33c] sm:$0xf] }
 0x675   :  { %3590 = vmatpush.bf16.msra.mxu3 %v11570_v26 }
 0x676   :  { %v2712_v50 = vpack.c.b16 %v2692_v38, %v2692_v38  ;;  %v16359_v38 = vld [vmem:[#allocation5_spill] sm:$0xff] }
 0x677   :  { %3152 = vmatpush.bf16.msra.mxu1 %v12623_v33 }
 0x679   :  { %v2532_v1 = vpop.f32.mrf.mxu3 }
 0x67a   :  { %v2533_v4 = vadd.f32 %v2532_v1, %v2500_v14  ;;  %v9514_v14 = vld [vmem:[%s16311_s30 + $0x310] sm:$0xf]  ;;  %v11528_v1 = vld [vmem:[%s16311_s30 + $0x31c] sm:$0xf0] }
 0x67b   :  { %3153 = vmatpush.bf16.msra.mxu1 %v12455_v11 }
 0x67c   :  { %v2546_v42 = vpack.c.bf16 %v2533_v4, %v2531_v56  ;;  %v9515_v56 = vor.u32 %v11528_v1, %v9514_v14  ;;  %v13791_v4 = vld [vmem:[%s16311_s30 + $0x3e0] sm:$0xff] }
 0x67e   :  { %9459 = vmatmul.msk.bf16.gmra.mxu1 %vm1512_vm3, %v2546_v42  ;;  %3126 = vmatmul.bf16.gmra.mxu3 %v9607_v29  ;;  %v3027_v29 = vunpack.c.h.b16 %v13791_v4  ;;  %v11519_v42 = vld [vmem:[%s16311_s30 + $0x2dc] sm:$0xf] }
 0x67f   :  { %2764 = vmatmul.bf16.gmra.mxu0 %v9515_v56 }
 0x680   :  { %v3047_v25 = vpack.c.b16 %v3027_v29, %v3027_v29 }
 0x681   :  { %v2535_v45 = vpop.f32.mrf.mxu3 }
 0x682   :  { %v2536_v39 = vadd.f32 %v2535_v45, %v2503_v32  ;;  %v9492_v45 = vld [vmem:[%s16311_s30 + $0x2e8] sm:$0xf0]  ;;  %v9530_v32 = vld [vmem:[%s16311_s30 + $0x330] sm:$0xf] }
 0x683   :  { %v9495_v6 = vor.u32 %v11519_v42, %v9492_v45  ;;  %v9531_v19 = vor.u32 %v11532_v54, %v9530_v32  ;;  %v2788_v45 = vpop.f32.mrf.mxu2 }
 0x689   :  { %v2537_v0 = vpop.f32.mrf.mxu3 }
 0x68a   :  { %v2538_v43 = vadd.f32 %v2537_v0, %v2505_v41  ;;  %v11523_v41 = vld [vmem:[%s16311_s30 + $0x2fc] sm:$0xf]  ;;  %v9508_v0 = vld [vmem:[%s16311_s30 + $0x308] sm:$0xf0] }
 0x68b   :  { %v2790_v54 = vpop.f32.mrf.mxu2 }
 0x68c   :  { %v2547_v7 = vpack.c.bf16 %v2538_v43, %v2536_v39  ;;  %v9690_v39 = vld [vmem:[%s16311_s30 + $0x3f0] sm:$0xf]  ;;  %v11556_v43 = vld [vmem:[%s16311_s30 + $0x3fc] sm:$0xf0] }
 0x68e   :  { %9460 = vmatmul.msk.bf16.gmra.mxu1 %vm1512_vm3, %v2547_v7  ;;  %3131 = vmatmul.bf16.gmra.mxu3 %v9623_v62  ;;  %v9511_v62 = vor.u32 %v11523_v41, %v9508_v0  ;;  %v9691_v7 = vor.u32 %v11556_v43, %v9690_v39  ;;  %v16356_v39 = vld [vmem:[#allocation6_spill] sm:$0xff] }
 0x68f   :  { %2769 = vmatmul.bf16.gmra.mxu0 %v9531_v19  ;;  %v11543_v19 = vld [vmem:[%s16311_s30 + $0x394] sm:$0xf0] }
 0x691   :  { %v2540_v27 = vpop.f32.mrf.mxu3 }
 0x692   :  { %v2541_v8 = vadd.f32 %v2540_v27, %v2508_v21  ;;  %v9527_v27 = vor.u32 %v11527_v55, %v9524_v46  ;;  %v9540_v21 = vld [vmem:[%s16311_s30 + $0x348] sm:$0xf0]  ;;  %v16360_v46 = vld [vmem:[#allocation4_spill] sm:$0xff] }
 0x694   :  { %v2548_v9 = vpack.c.bf16 %v2541_v8, %v2541_v8  ;;  %v9543_v8 = vor.u32 %v11531_v5, %v9540_v21  ;;  %v16361_v5 = vld [vmem:[#allocation7_spill] sm:$0xff] }
 0x699   :  { %v2542_v36 = vpop.f32.mrf.mxu3 }
 0x69e   :  { %9461 = vmatmul.msk.bf16.gmra.mxu1 %vm1512_vm3, %v2548_v9  ;;  %3136 = vmatmul.bf16.gmra.mxu3 %v9639_v15  ;;  %v2695_v9 = vunpack.c.h.b16 %v13730_v37 }
 0x69f   :  { %2774 = vmatmul.bf16.gmra.mxu0 %v2712_v50 }
 0x6a0   :  { %v2715_v15 = vpack.c.b16 %v2695_v9, %v2695_v9  ;;  %v11547_v9 = vld [vmem:[%s16311_s30 + $0x3b4] sm:$0xf0] }
 0x6ae   :  { %9544 = vmatmul.msk.bf16.vlgmr.msrb.gmra.mxu1 %vm1074_vm2, %v9495_v6  ;;  %3141 = vmatmul.bf16.gmra.mxu3 %v3047_v25 }
 0x6af   :  { %3447 = vmatpush.bf16.msrb.mxu1 %v12427_v49 }
 0x6b3   :  { %3448 = vmatpush.bf16.msrb.mxu1 %v12432_v61 }
 0x6b7   :  { %3449 = vmatpush.bf16.msrb.mxu1 %v12436_v63 }
 0x6bb   :  { %3450 = vmatpush.bf16.msrb.mxu1 %v12380_v53 }
 0x6be   :  { %9545 = vmatmul.msk.bf16.gmra.mxu1 %vm1074_vm2, %v9511_v62  ;;  %3422 = vmatmul.bf16.vlgmr.msrb.gmra.mxu3 %v9691_v7  ;;  %v16357_v62 = vld [vmem:[#allocation13_spill] sm:$0xff]  ;;  %v2793_v7 = vpop.f32.mrf.mxu2 }
 0x6bf   :  { %3451 = vmatpush.bf16.msrb.mxu1 %v12361_v34  ;;  %3850 = vmatpush.bf16.msrb.mxu3 %v12712_v20 }
 0x6c3   :  { %3452 = vmatpush.bf16.msrb.mxu1 %v12344_v12  ;;  %3851 = vmatpush.bf16.msrb.mxu3 %v12730_v59 }
 0x6c7   :  { %3453 = vmatpush.bf16.msrb.mxu1 %v16324_v10  ;;  %3852 = vmatpush.bf16.msrb.mxu3 %v12738_v31 }
 0x6cb   :  { %3454 = vmatpush.bf16.msrb.mxu1 %v16326_v18  ;;  %3853 = vmatpush.bf16.msrb.mxu3 %v12746_v44 }
 0x6ce   :  { %9546 = vmatmul.msk.bf16.gmra.mxu1 %vm1074_vm2, %v9527_v27 }
 0x6cf   :  { %3854 = vmatpush.bf16.msrb.mxu3 %v12775_v47 }
 0x6db   :  { %v2590_v24 = vpop.f32.mrf.mxu1 }
 0x6dc   :  { %v13848_v35 = vadd.f32 %v2590_v24, %v13659_v51  ;;  %v9594_v51 = vld [vmem:[%s16311_s30 + $0x368] sm:$0xf] }
 0x6dd   :  { %v16363_v24 = vld [vmem:[#allocation3_spill] sm:$0xff] }
 0x6de   :  { %9547 = vmatmul.msk.bf16.gmra.mxu1 %vm1074_vm2, %v9543_v8  ;;  %v2795_v8 = vpop.f32.mrf.mxu2 }
 0x6e3   :  { %v2592_v28 = vpop.f32.mrf.mxu1 }
 0x6e4   :  { %v13852_v36 = vadd.f32 %v2592_v28, %v13665_v58  ;;  %v11539_v58 = vld [vmem:[%s16311_s30 + $0x374] sm:$0xf0]  ;;  %v9626_v28 = vld [vmem:[%s16311_s30 + $0x3a8] sm:$0xf] }
 0x6e5   :  { %v9595_v37 = vor.u32 %v11539_v58, %v9594_v51  ;;  %v16364_v51 = vld [vmem:[#allocation2_spill] sm:$0xff] }
 0x6eb   :  { %v2595_v26 = vpop.f32.mrf.mxu1 }
 0x6ec   :  { %v13856_v14 = vadd.f32 %v2595_v26, %v13669_v3  ;;  %v2755_v3 = vpop.f32.mrf.mxu0 }
 0x6ee   :  { %9548 = vmatmul.msk.bf16.gmra.mxu1 %vm1074_vm2, %v2715_v15 }
 0x6f3   :  { %v2597_v1 = vpop.f32.mrf.mxu1 }
 0x6f4   :  { %v13860_v56 = vadd.f32 %v2597_v1, %v13680_v2  ;;  %v2821_v2 = vpop.f32.mrf.mxu3  ;;  %v2757_v32 = vpop.f32.mrf.mxu0  ;;  %v9627_v1 = vor.u32 %v11547_v9, %v9626_v28 }
 0x6fb   :  { %v2600_v29 = vpop.f32.mrf.mxu1 }
 0x6fc   :  { %v13869_v42 = vadd.f32 %v2600_v29, %v13684_v16  ;;  %v9610_v16 = vld [vmem:[%s16311_s30 + $0x388] sm:$0xf]  ;;  %v2823_v41 = vpop.f32.mrf.mxu3  ;;  %v2760_v50 = vpop.f32.mrf.mxu0 }
 0x6fd   :  { %v9611_v0 = vor.u32 %v11543_v19, %v9610_v16  ;;  %v2798_v16 = vpop.f32.mrf.mxu2 }
 0x6fe   :  { %3154 = vmatmul.bf16.vlgmr.msra.gmra.mxu1 %v9595_v37  ;;  %v16365_v37 = vld [vmem:[#allocation16_spill] sm:$0xff] }
 0x6ff   :  { %3748 = vmatpush.bf16.msra.mxu1 %v12280_v13 }
 0x703   :  { %3749 = vmatpush.bf16.msra.mxu1 %v16338_v22  ;;  %v2602_v6 = vpop.f32.mrf.mxu1 }
 0x704   :  { %v13874_v25 = vadd.f32 %v2602_v6, %v13697_v23  ;;  %v2826_v55 = vpop.f32.mrf.mxu3  ;;  %v2762_v15 = vpop.f32.mrf.mxu0 }
 0x705   :  { %v2800_v28 = vpop.f32.mrf.mxu2 }
 0x707   :  { %3750 = vmatpush.bf16.msra.mxu1 %v16341_v57 }
 0x70b   :  { %3751 = vmatpush.bf16.msra.mxu1 %v16356_v39  ;;  %v2605_v43 = vpop.f32.mrf.mxu1 }
 0x70c   :  { %v13885_v23 = vadd.f32 %v2605_v43, %v16357_v62  ;;  %v2828_v26 = vpop.f32.mrf.mxu3  ;;  %v2765_v6 = vpop.f32.mrf.mxu0  ;;  %v9642_v43 = vld [vmem:[%s16311_s30 + $0x3c8] sm:$0xf]  ;;  %v11551_v62 = vld [vmem:[%s16311_s30 + $0x3d4] sm:$0xf0] }
 0x70e   :  { %16358 = vst [vmem:[#allocation14_spill] sm:$0xff] %v13885_v23  ;;  %3159 = vmatmul.bf16.gmra.mxu1 %v9611_v0  ;;  %v2803_v23 = vpop.f32.mrf.mxu2 }
 0x70f   :  { %3752 = vmatpush.bf16.msra.mxu1 %v16359_v38 }
 0x713   :  { %3753 = vmatpush.bf16.msra.mxu1 %v16360_v46  ;;  %v2607_v27 = vpop.f32.mrf.mxu1 }
 0x714   :  { %v13890_v21 = vadd.f32 %v2607_v27, %v16361_v5  ;;  %v2831_v19 = vpop.f32.mrf.mxu3  ;;  %v9643_v27 = vor.u32 %v11551_v62, %v9642_v43  ;;  %v2767_v5 = vpop.f32.mrf.mxu0 }
 0x716   :  { %16362 = vst [vmem:[#allocation8_spill] sm:$0xff] %v13890_v21 }
 0x717   :  { %3754 = vmatpush.bf16.msra.mxu1 %v16363_v24 }
 0x71b   :  { %3755 = vmatpush.bf16.msra.mxu1 %v16364_v51  ;;  %v2610_v58 = vpop.f32.mrf.mxu1  ;;  %v2789_v51 = vadd.f32 %v2788_v45, %v2755_v3 }
 0x71c   :  { %v13901_v29 = vadd.f32 %v2610_v58, %v16365_v37  ;;  %v2833_v58 = vpop.f32.mrf.mxu3  ;;  %v2791_v37 = vadd.f32 %v2790_v54, %v2757_v32  ;;  %v2770_v38 = vpop.f32.mrf.mxu0  ;;  %v2796_v32 = vadd.f32 %v2795_v8, %v2762_v15 }
 0x71e   :  { %16366 = vst [vmem:[#allocation10_spill] sm:$0xff] %v13901_v29  ;;  %3164 = vmatmul.bf16.gmra.mxu1 %v9627_v1  ;;  %v2822_v1 = vadd.f32 %v2821_v2, %v2789_v51  ;;  %v2824_v29 = vadd.f32 %v2823_v41, %v2791_v37  ;;  %v2794_v2 = vadd.f32 %v2793_v7, %v2760_v50  ;;  %v2805_v41 = vpop.f32.mrf.mxu2  ;;  %v11554_v7 = vld [vmem:[%s16311_s30 + $0x3f4] sm:$0xf]  ;;  %v9692_v50 = vld [vmem:[%s16311_s30 + $0x400] sm:$0xf0] }
 0x71f   :  { %v9695_v8 = vor.u32 %v11554_v7, %v9692_v50 }
 0x723   :  { %v2612_v0 = vpop.f32.mrf.mxu1 }
 0x724   :  { %v13912_v0 = vld [vmem:[%s16311_s30 + $0x3e8] sm:$0xff]  ;;  %v2836_v39 = vpop.f32.mrf.mxu3  ;;  %v2772_v54 = vpop.f32.mrf.mxu0 }
 0x725   :  { %v3028_v62 = vunpack.c.l.b16 %v13912_v0 }
 0x727   :  { %v3048_v3 = vpack.c.b16 %v3028_v62, %v3028_v62 }
 0x72b   :  { %v2854_v9 = vpop.f32.mrf.mxu1 }
 0x72c   :  { %v2855_v21 = vadd.f32 %v2854_v9, %v2822_v1  ;;  %v2838_v51 = vpop.f32.mrf.mxu3  ;;  %v2775_v37 = vpop.f32.mrf.mxu0 }
 0x72d   :  { %v2808_v1 = vpop.f32.mrf.mxu2 }
 0x72e   :  { %3169 = vmatmul.bf16.gmra.mxu1 %v9643_v27 }
 0x733   :  { %v2856_v24 = vpop.f32.mrf.mxu1 }
 0x734   :  { %v2857_v46 = vadd.f32 %v2856_v24, %v2824_v29  ;;  %v2827_v24 = vadd.f32 %v2826_v55, %v2794_v2  ;;  %v2841_v55 = vpop.f32.mrf.mxu3  ;;  %v2777_v62 = vpop.f32.mrf.mxu0 }
 0x736   :  { %v2878_v43 = vpack.c.bf16 %v2857_v46, %v2855_v21  ;;  %v2829_v46 = vadd.f32 %v2828_v26, %v2796_v32  ;;  %v2799_v26 = vadd.f32 %v2798_v16, %v2765_v6  ;;  %v11558_v6 = vld [vmem:[%s16311_s30 + $0x414] sm:$0xf]  ;;  %v9708_v16 = vld [vmem:[%s16311_s30 + $0x420] sm:$0xf0] }
 0x738   :  { %9561 = vmatmul.msk.bf16.vlgmr.msrb.gmra.mxu0 %vm1512_vm3, %v2878_v43  ;;  %v2801_v43 = vadd.f32 %v2800_v28, %v2767_v5  ;;  %v2804_v28 = vadd.f32 %v2803_v23, %v2770_v38  ;;  %v11562_v23 = vld [vmem:[%s16311_s30 + $0x434] sm:$0xf]  ;;  %v9724_v38 = vld [vmem:[%s16311_s30 + $0x440] sm:$0xf0] }
 0x739   :  { %3480 = vmatpush.bf16.msrb.mxu0 %v12560_v48 }
 0x73a   :  { %v2834_v32 = vadd.f32 %v2833_v58, %v2801_v43  ;;  %v2806_v58 = vadd.f32 %v2805_v41, %v2772_v54  ;;  %v2837_v50 = vadd.f32 %v2836_v39, %v2804_v28  ;;  %v2809_v54 = vadd.f32 %v2808_v1, %v2775_v37  ;;  %v11566_v37 = vld [vmem:[%s16311_s30 + $0x454] sm:$0xf]  ;;  %v9740_v1 = vld [vmem:[%s16311_s30 + $0x460] sm:$0xf0]  ;;  %v9634_v28 = vld [vmem:[%s16311_s30 + $0x3c0] sm:$0xf] }
 0x73b   :  { %v2859_v45 = vpop.f32.mrf.mxu1  ;;  %v9727_v41 = vor.u32 %v11562_v23, %v9724_v38  ;;  %v3026_v23 = vunpack.c.l.b16 %v13791_v4 }
 0x73c   :  { %v2860_v29 = vadd.f32 %v2859_v45, %v2827_v24  ;;  %v2832_v45 = vadd.f32 %v2831_v19, %v2799_v26  ;;  %v2843_v2 = vpop.f32.mrf.mxu3  ;;  %v9711_v19 = vor.u32 %v11558_v6, %v9708_v16  ;;  %v2842_v39 = vadd.f32 %v2841_v55, %v2809_v54  ;;  %v11589_v55 = vld [vmem:[%s16312_s4 + $0x88] sm:$0xff]  ;;  %v9596_v16 = vld [vmem:[%s16311_s30 + $0x378] sm:$0xf0] }
 0x73d   :  { %3481 = vmatpush.bf16.msrb.mxu0 %v12576_v52  ;;  %v11537_v6 = vld [vmem:[%s16311_s30 + $0x36c] sm:$0xf]  ;;  %v3046_v38 = vpack.c.b16 %v3026_v23, %v3026_v23  ;;  %v16370_v23 = vld [vmem:[#allocation5_spill] sm:$0xff] }
 0x73e   :  { %3174 = vmatmul.bf16.gmra.mxu1 %v3048_v3  ;;  %v2810_v3 = vpop.f32.mrf.mxu2  ;;  %v11545_v54 = vld [vmem:[%s16311_s30 + $0x3ac] sm:$0xf] }
 0x741   :  { %3482 = vmatpush.bf16.msrb.mxu0 %v12585_v60 }
 0x743   :  { %v2861_v21 = vpop.f32.mrf.mxu1 }
 0x744   :  { %v2862_v27 = vadd.f32 %v2861_v21, %v2829_v46 }
 0x745   :  { %3483 = vmatpush.bf16.msrb.mxu0 %v12597_v40 }
 0x746   :  { %v2879_v9 = vpack.c.bf16 %v2862_v27, %v2860_v29  ;;  %v9602_v27 = vld [vmem:[%s16311_s30 + $0x380] sm:$0xf] }
 0x748   :  { %9562 = vmatmul.msk.bf16.gmra.mxu0 %vm1512_vm3, %v2879_v9  ;;  %v11542_v9 = vld [vmem:[%s16311_s30 + $0x38c] sm:$0xf0] }
 0x749   :  { %3484 = vmatpush.bf16.msrb.mxu0 %v12603_v17  ;;  %v9603_v7 = vor.u32 %v11542_v9, %v9602_v27 }
 0x74b   :  { %v2864_v15 = vpop.f32.mrf.mxu1  ;;  %3093 = vmatmul.bf16.gmra.mxu2 %v9603_v7 }
 0x74c   :  { %v2865_v46 = vadd.f32 %v2864_v15, %v2832_v45 }
 0x74d   :  { %3485 = vmatpush.bf16.msrb.mxu0 %v12618_v30 }
 0x74e   :  { %3455 = vmatmul.bf16.vlgmr.msrb.gmra.mxu1 %v9695_v8  ;;  %v2839_v8 = vadd.f32 %v2838_v51, %v2806_v58  ;;  %v11550_v58 = vld [vmem:[%s16311_s30 + $0x3cc] sm:$0xf0] }
 0x74f   :  { %3923 = vmatpush.bf16.msrb.mxu1 %v11589_v55  ;;  %v9635_v9 = vor.u32 %v11550_v58, %v9634_v28 }
 0x751   :  { %3486 = vmatpush.bf16.msrb.mxu0 %v12623_v33 }
 0x753   :  { %v2866_v24 = vpop.f32.mrf.mxu1 }
 0x754   :  { %v2867_v21 = vadd.f32 %v2866_v24, %v2834_v32  ;;  %v9618_v32 = vld [vmem:[%s16311_s30 + $0x3a0] sm:$0xf]  ;;  %v11546_v24 = vld [vmem:[%s16311_s30 + $0x3ac] sm:$0xf0] }
 0x755   :  { %3487 = vmatpush.bf16.msrb.mxu0 %v12455_v11 }
 0x756   :  { %v2880_v29 = vpack.c.bf16 %v2867_v21, %v2865_v46  ;;  %v9619_v46 = vor.u32 %v11546_v24, %v9618_v32  ;;  %v9743_v21 = vor.u32 %v11566_v37, %v9740_v1 }
 0x758   :  { %9563 = vmatmul.msk.bf16.gmra.mxu0 %vm1512_vm3, %v2880_v29  ;;  %v11588_v29 = vld [vmem:[%s16312_s4 + $0x80] sm:$0xff] }
 0x759   :  { %3924 = vmatpush.bf16.msrb.mxu1 %v11588_v29 }
 0x75b   :  { %v2869_v5 = vpop.f32.mrf.mxu1  ;;  %3098 = vmatmul.bf16.gmra.mxu2 %v9619_v46  ;;  %v3029_v46 = vunpack.c.h.b16 %v13912_v0 }
 0x75c   :  { %v2870_v26 = vadd.f32 %v2869_v5, %v2837_v50  ;;  %v9599_v5 = vor.u32 %v11537_v6, %v9596_v16  ;;  %v11541_v50 = vld [vmem:[%s16311_s30 + $0x38c] sm:$0xf] }
 0x75d   :  { %v3049_v37 = vpack.c.b16 %v3029_v46, %v3029_v46  ;;  %v11565_v46 = vld [vmem:[%s16311_s30 + $0x444] sm:$0xf0] }
 0x75e   :  { %3460 = vmatmul.bf16.gmra.mxu1 %v9711_v19  ;;  %v13979_v19 = vld [vmem:[%s16311_s30 + $0x470] sm:$0xff] }
 0x75f   :  { %v3361_v27 = vunpack.c.h.b16 %v13979_v19 }
 0x761   :  { %v3381_v7 = vpack.c.b16 %v3361_v27, %v3361_v27 }
 0x763   :  { %v2871_v15 = vpop.f32.mrf.mxu1 }
 0x764   :  { %v2872_v43 = vadd.f32 %v2871_v15, %v2839_v8  ;;  %v9612_v8 = vld [vmem:[%s16311_s30 + $0x398] sm:$0xf0] }
 0x765   :  { %v9615_v15 = vor.u32 %v11541_v50, %v9612_v8 }
 0x766   :  { %v2881_v62 = vpack.c.bf16 %v2872_v43, %v2870_v26  ;;  %v9794_v26 = vld [vmem:[%s16311_s30 + $0x480] sm:$0xf]  ;;  %v11574_v43 = vld [vmem:[%s16311_s30 + $0x48c] sm:$0xf0] }
 0x768   :  { %9564 = vmatmul.msk.bf16.gmra.mxu0 %vm1512_vm3, %v2881_v62  ;;  %v9795_v62 = vor.u32 %v11574_v43, %v9794_v26  ;;  %v16368_v43 = vld [vmem:[#allocation14_spill] sm:$0xff] }
 0x76b   :  { %v2874_v3 = vpop.f32.mrf.mxu1  ;;  %3103 = vmatmul.bf16.gmra.mxu2 %v9635_v9 }
 0x76c   :  { %v2875_v51 = vadd.f32 %v2874_v3, %v2842_v39  ;;  %v11549_v3 = vld [vmem:[%s16311_s30 + $0x3cc] sm:$0xf]  ;;  %v9644_v39 = vld [vmem:[%s16311_s30 + $0x3d8] sm:$0xf0] }
 0x76e   :  { %3465 = vmatmul.bf16.gmra.mxu1 %v9727_v41  ;;  %v2882_v2 = vpack.c.bf16 %v2875_v51, %v2875_v51  ;;  %v9628_v41 = vld [vmem:[%s16311_s30 + $0x3b8] sm:$0xf0]  ;;  %v9647_v51 = vor.u32 %v11549_v3, %v9644_v39  ;;  %v16372_v3 = vld [vmem:[#allocation8_spill] sm:$0xff] }
 0x76f   :  { %v9631_v4 = vor.u32 %v11545_v54, %v9628_v41  ;;  %v16371_v41 = vld [vmem:[#allocation4_spill] sm:$0xff] }
 0x773   :  { %v2876_v45 = vpop.f32.mrf.mxu1 }
 0x778   :  { %9565 = vmatmul.msk.bf16.gmra.mxu0 %vm1512_vm3, %v2882_v2 }
 0x77b   :  { %3108 = vmatmul.bf16.gmra.mxu2 %v3046_v38 }
 0x77e   :  { %3470 = vmatmul.bf16.gmra.mxu1 %v9743_v21 }
 0x788   :  { %9648 = vmatmul.msk.bf16.vlgmr.msra.gmra.mxu0 %vm1074_vm2, %v9599_v5  ;;  %v3122_v5 = vpop.f32.mrf.mxu3 }
 0x789   :  { %3781 = vmatpush.bf16.msra.mxu0 %v12427_v49 }
 0x78d   :  { %3782 = vmatpush.bf16.msra.mxu0 %v12432_v61 }
 0x78e   :  { %3475 = vmatmul.bf16.gmra.mxu1 %v3381_v7  ;;  %v11561_v7 = vld [vmem:[%s16311_s30 + $0x424] sm:$0xf0] }
 0x790   :  { %v3124_v9 = vpop.f32.mrf.mxu3 }
 0x791   :  { %3783 = vmatpush.bf16.msra.mxu0 %v12436_v63 }
 0x795   :  { %3784 = vmatpush.bf16.msra.mxu0 %v12380_v53 }
 0x798   :  { %9649 = vmatmul.msk.bf16.gmra.mxu0 %vm1074_vm2, %v9615_v15  ;;  %v16367_v15 = vld [vmem:[#allocation6_spill] sm:$0xff] }
 0x799   :  { %3785 = vmatpush.bf16.msra.mxu0 %v12361_v34 }
 0x79d   :  { %3786 = vmatpush.bf16.msra.mxu0 %v12344_v12 }
 0x79e   :  { %3756 = vmatmul.bf16.vlgmr.msra.gmra.mxu1 %v9795_v62  ;;  %v3127_v62 = vpop.f32.mrf.mxu3 }
 0x79f   :  { %4184 = vmatpush.bf16.msra.mxu1 %v12712_v20 }
 0x7a1   :  { %3787 = vmatpush.bf16.msra.mxu0 %v16324_v10 }
 0x7a3   :  { %4185 = vmatpush.bf16.msra.mxu1 %v12730_v59 }
 0x7a5   :  { %3788 = vmatpush.bf16.msra.mxu0 %v16326_v18 }
 0x7a7   :  { %4186 = vmatpush.bf16.msra.mxu1 %v12738_v31 }
 0x7a8   :  { %9650 = vmatmul.msk.bf16.gmra.mxu0 %vm1074_vm2, %v9631_v4 }
 0x7ab   :  { %4187 = vmatpush.bf16.msra.mxu1 %v12746_v44 }
 0x7af   :  { %4188 = vmatpush.bf16.msra.mxu1 %v12775_v47 }
 0x7b5   :  { %v2924_v45 = vpop.f32.mrf.mxu0 }
 0x7b6   :  { %v14030_v2 = vadd.f32 %v2924_v45, %v13848_v35  ;;  %v9698_v35 = vld [vmem:[%s16311_s30 + $0x3f8] sm:$0xf]  ;;  %v16374_v45 = vld [vmem:[#allocation3_spill] sm:$0xff] }
 0x7b8   :  { %9651 = vmatmul.msk.bf16.gmra.mxu0 %vm1074_vm2, %v9647_v51  ;;  %v3129_v51 = vpop.f32.mrf.mxu3 }
 0x7bd   :  { %v2926_v32 = vpop.f32.mrf.mxu0 }
 0x7be   :  { %v14034_v24 = vadd.f32 %v2926_v32, %v13852_v36  ;;  %v11557_v36 = vld [vmem:[%s16311_s30 + $0x404] sm:$0xf0]  ;;  %v9730_v32 = vld [vmem:[%s16311_s30 + $0x438] sm:$0xf] }
 0x7bf   :  { %v9699_v0 = vor.u32 %v11557_v36, %v9698_v35  ;;  %v16375_v35 = vld [vmem:[#allocation2_spill] sm:$0xff] }
 0x7c5   :  { %v2929_v1 = vpop.f32.mrf.mxu0 }
 0x7c6   :  { %v14038_v55 = vadd.f32 %v2929_v1, %v13856_v14  ;;  %v3089_v14 = vpop.f32.mrf.mxu2 }
 0x7c8   :  { %9652 = vmatmul.msk.bf16.gmra.mxu0 %vm1074_vm2, %v3049_v37 }
 0x7cd   :  { %v2931_v21 = vpop.f32.mrf.mxu0 }
 0x7ce   :  { %v14042_v29 = vadd.f32 %v2931_v21, %v13860_v56  ;;  %v3155_v56 = vpop.f32.mrf.mxu1  ;;  %v3091_v27 = vpop.f32.mrf.mxu2  ;;  %v9731_v21 = vor.u32 %v11565_v46, %v9730_v32  ;;  %v3123_v46 = vadd.f32 %v3122_v5, %v3089_v14 }
 0x7d5   :  { %v2934_v6 = vpop.f32.mrf.mxu0 }
 0x7d6   :  { %v14051_v16 = vadd.f32 %v2934_v6, %v13869_v42  ;;  %v9714_v42 = vld [vmem:[%s16311_s30 + $0x418] sm:$0xf]  ;;  %v3157_v50 = vpop.f32.mrf.mxu1  ;;  %v3094_v38 = vpop.f32.mrf.mxu2 }
 0x7d7   :  { %v9715_v8 = vor.u32 %v11561_v7, %v9714_v42 }
 0x7d8   :  { %3488 = vmatmul.bf16.vlgmr.msrb.gmra.mxu0 %v9699_v0  ;;  %v16376_v0 = vld [vmem:[#allocation10_spill] sm:$0xff] }
 0x7d9   :  { %4082 = vmatpush.bf16.msrb.mxu0 %v12280_v13 }
 0x7dd   :  { %4083 = vmatpush.bf16.msrb.mxu0 %v16338_v22  ;;  %v2936_v28 = vpop.f32.mrf.mxu0 }
 0x7de   :  { %v14056_v58 = vadd.f32 %v2936_v28, %v13874_v25  ;;  %v3160_v54 = vpop.f32.mrf.mxu1  ;;  %v3096_v37 = vpop.f32.mrf.mxu2 }
 0x7df   :  { %v3132_v28 = vpop.f32.mrf.mxu3 }
 0x7e1   :  { %4084 = vmatpush.bf16.msrb.mxu0 %v16341_v57 }
 0x7e5   :  { %4085 = vmatpush.bf16.msrb.mxu0 %v16367_v15  ;;  %v2939_v26 = vpop.f32.mrf.mxu0 }
 0x7e6   :  { %v14067_v25 = vadd.f32 %v2939_v26, %v16368_v43  ;;  %v3162_v1 = vpop.f32.mrf.mxu1  ;;  %v9746_v26 = vld [vmem:[%s16311_s30 + $0x458] sm:$0xf]  ;;  %v11569_v43 = vld [vmem:[%s16311_s30 + $0x464] sm:$0xf0] }
 0x7e8   :  { %16369 = vst [vmem:[#allocation11_spill] sm:$0xff] %v14067_v25  ;;  %3493 = vmatmul.bf16.gmra.mxu0 %v9715_v8  ;;  %v3099_v8 = vpop.f32.mrf.mxu2 }
 0x7e9   :  { %4086 = vmatpush.bf16.msrb.mxu0 %v16370_v23 }
 0x7ed   :  { %4087 = vmatpush.bf16.msrb.mxu0 %v16371_v41  ;;  %v2941_v4 = vpop.f32.mrf.mxu0 }
 0x7ee   :  { %v14072_v39 = vadd.f32 %v2941_v4, %v16372_v3  ;;  %v3165_v42 = vpop.f32.mrf.mxu1  ;;  %v9747_v4 = vor.u32 %v11569_v43, %v9746_v26  ;;  %v3134_v3 = vpop.f32.mrf.mxu3 }
 0x7f0   :  { %16373 = vst [vmem:[#allocation17_spill] sm:$0xff] %v14072_v39  ;;  %v14094_v39 = vld [vmem:[%s16311_s30 + $0x478] sm:$0xff] }
 0x7f1   :  { %4088 = vmatpush.bf16.msrb.mxu0 %v16374_v45  ;;  %v3362_v26 = vunpack.c.l.b16 %v14094_v39 }
 0x7f3   :  { %v3382_v5 = vpack.c.b16 %v3362_v26, %v3362_v26 }
 0x7f5   :  { %4089 = vmatpush.bf16.msrb.mxu0 %v16375_v35  ;;  %v2944_v36 = vpop.f32.mrf.mxu0 }
 0x7f6   :  { %v14083_v6 = vadd.f32 %v2944_v36, %v16376_v0  ;;  %v3167_v35 = vpop.f32.mrf.mxu1  ;;  %v3101_v36 = vpop.f32.mrf.mxu2  ;;  %v3125_v0 = vadd.f32 %v3124_v9, %v3091_v27  ;;  %v3128_v27 = vadd.f32 %v3127_v62, %v3094_v38  ;;  %v3130_v9 = vadd.f32 %v3129_v51, %v3096_v37  ;;  %v11572_v62 = vld [vmem:[%s16311_s30 + $0x484] sm:$0xf]  ;;  %v9796_v38 = vld [vmem:[%s16311_s30 + $0x490] sm:$0xf0] }
 0x7f7   :  { %v3137_v25 = vpop.f32.mrf.mxu3  ;;  %v9799_v37 = vor.u32 %v11572_v62, %v9796_v38  ;;  %v3135_v26 = vadd.f32 %v3134_v3, %v3101_v36 }
 0x7f8   :  { %16377 = vst [vmem:[#allocation15_spill] sm:$0xff] %v14083_v6  ;;  %3498 = vmatmul.bf16.gmra.mxu0 %v9731_v21  ;;  %v3156_v21 = vadd.f32 %v3155_v56, %v3123_v46  ;;  %v3158_v6 = vadd.f32 %v3157_v50, %v3125_v0 }
 0x7fd   :  { %v2946_v7 = vpop.f32.mrf.mxu0 }
 0x7fe   :  { %v3170_v43 = vpop.f32.mrf.mxu1  ;;  %v3104_v14 = vpop.f32.mrf.mxu2 }
 0x7ff   :  { %v3139_v50 = vpop.f32.mrf.mxu3  ;;  %v3138_v36 = vadd.f32 %v3137_v25, %v3104_v14  ;;  %v9706_v25 = vld [vmem:[%s16311_s30 + $0x410] sm:$0xf] }
 0x805   :  { %v3188_v32 = vpop.f32.mrf.mxu0 }
 0x806   :  { %v3189_v45 = vadd.f32 %v3188_v32, %v3156_v21 }
 0x807   :  { %v3142_v21 = vpop.f32.mrf.mxu3 }
 0x808   :  { %3503 = vmatmul.bf16.gmra.mxu0 %v9747_v4  ;;  %v3161_v4 = vadd.f32 %v3160_v54, %v3128_v27 }
 0x80d   :  { %v3190_v7 = vpop.f32.mrf.mxu0 }
 0x80e   :  { %v3191_v41 = vadd.f32 %v3190_v7, %v3158_v6  ;;  %v3172_v6 = vpop.f32.mrf.mxu1  ;;  %v3133_v7 = vadd.f32 %v3132_v28, %v3099_v8  ;;  %v11576_v28 = vld [vmem:[%s16311_s30 + $0x4a4] sm:$0xf]  ;;  %v9812_v8 = vld [vmem:[%s16311_s30 + $0x4b0] sm:$0xf0] }
 0x810   :  { %v3212_v23 = vpack.c.bf16 %v3191_v41, %v3189_v45  ;;  %v3106_v41 = vpop.f32.mrf.mxu2  ;;  %v3163_v45 = vadd.f32 %v3162_v1, %v3130_v9 }
 0x812   :  { %9665 = vmatmul.msk.bf16.vlgmr.msrb.gmra.mxu2 %vm1512_vm3, %v3212_v23 }
 0x813   :  { %3814 = vmatpush.bf16.msrb.mxu2 %v12560_v48 }
 0x815   :  { %v3193_v56 = vpop.f32.mrf.mxu0 }
 0x816   :  { %v3194_v46 = vadd.f32 %v3193_v56, %v3161_v4  ;;  %v3175_v54 = vpop.f32.mrf.mxu1  ;;  %v3166_v56 = vadd.f32 %v3165_v42, %v3133_v7  ;;  %v3168_v4 = vadd.f32 %v3167_v35, %v3135_v26  ;;  %v9815_v42 = vor.u32 %v11576_v28, %v9812_v8  ;;  %v11580_v26 = vld [vmem:[%s16311_s30 + $0x4c4] sm:$0xf]  ;;  %v11606_v28 = vld [vmem:[%s16312_s4 + $0x90] sm:$0xff]  ;;  %v11555_v8 = vld [vmem:[%s16311_s30 + $0x3fc] sm:$0xf] }
 0x817   :  { %3815 = vmatpush.bf16.msrb.mxu2 %v12576_v52  ;;  %v3140_v35 = vadd.f32 %v3139_v50, %v3106_v41 }
 0x818   :  { %3508 = vmatmul.bf16.gmra.mxu0 %v3382_v5  ;;  %v3109_v51 = vpop.f32.mrf.mxu2  ;;  %v3144_v5 = vpop.f32.mrf.mxu3 }
 0x819   :  { %v3173_v62 = vadd.f32 %v3172_v6, %v3140_v35  ;;  %v9828_v5 = vld [vmem:[%s16311_s30 + $0x4d0] sm:$0xf0] }
 0x81a   :  { %v9831_v14 = vor.u32 %v11580_v26, %v9828_v5  ;;  %v9898_v5 = vld [vmem:[%s16311_s30 + $0x510] sm:$0xf] }
 0x81b   :  { %3816 = vmatpush.bf16.msrb.mxu2 %v12585_v60 }
 0x81d   :  { %v3195_v32 = vpop.f32.mrf.mxu0 }
 0x81e   :  { %v3196_v0 = vadd.f32 %v3195_v32, %v3163_v45  ;;  %v3177_v27 = vpop.f32.mrf.mxu1 }
 0x81f   :  { %3817 = vmatpush.bf16.msrb.mxu2 %v12597_v40 }
 0x820   :  { %v3213_v23 = vpack.c.bf16 %v3196_v0, %v3194_v46  ;;  %v3111_v9 = vpop.f32.mrf.mxu2 }
 0x822   :  { %9666 = vmatmul.msk.bf16.gmra.mxu2 %vm1512_vm3, %v3213_v23  ;;  %v3171_v23 = vadd.f32 %v3170_v43, %v3138_v36  ;;  %v11560_v43 = vld [vmem:[%s16311_s30 + $0x41c] sm:$0xf0] }
 0x823   :  { %3818 = vmatpush.bf16.msrb.mxu2 %v12603_v17  ;;  %v9707_v50 = vor.u32 %v11560_v43, %v9706_v25  ;;  %v11563_v43 = vld [vmem:[%s16311_s30 + $0x43c] sm:$0xf] }
 0x825   :  { %v3198_v1 = vpop.f32.mrf.mxu0  ;;  %3427 = vmatmul.bf16.gmra.mxu3 %v9707_v50  ;;  %v3360_v50 = vunpack.c.l.b16 %v13979_v19  ;;  %v9748_v19 = vld [vmem:[%s16311_s30 + $0x468] sm:$0xf0] }
 0x826   :  { %v3199_v32 = vadd.f32 %v3198_v1, %v3166_v56  ;;  %v3143_v56 = vadd.f32 %v3142_v21, %v3109_v51  ;;  %v11584_v21 = vld [vmem:[%s16311_s30 + $0x4e4] sm:$0xf]  ;;  %v9844_v51 = vld [vmem:[%s16311_s30 + $0x4f0] sm:$0xf0] }
 0x827   :  { %3819 = vmatpush.bf16.msrb.mxu2 %v12618_v30 }
 0x828   :  { %3789 = vmatmul.bf16.vlgmr.msra.gmra.mxu0 %v9799_v37  ;;  %v3176_v41 = vadd.f32 %v3175_v54, %v3143_v56  ;;  %v9722_v54 = vld [vmem:[%s16311_s30 + $0x430] sm:$0xf]  ;;  %v11592_v56 = vld [vmem:[%s16311_s30 + $0x51c] sm:$0xf0] }
 0x829   :  { %v9899_v25 = vor.u32 %v11592_v56, %v9898_v5  ;;  %v16378_v5 = vld [vmem:[#allocation5_spill] sm:$0xff] }
 0x82b   :  { %3820 = vmatpush.bf16.msrb.mxu2 %v12623_v33 }
 0x82d   :  { %v3200_v45 = vpop.f32.mrf.mxu0 }
 0x82e   :  { %v3201_v46 = vadd.f32 %v3200_v45, %v3168_v4  ;;  %v11607_v45 = vld [vmem:[%s16312_s4 + $0x98] sm:$0xff] }
 0x82f   :  { %3821 = vmatpush.bf16.msrb.mxu2 %v12455_v11  ;;  %4257 = vmatpush.bf16.msra.mxu0 %v11607_v45 }
 0x830   :  { %v3214_v0 = vpack.c.bf16 %v3201_v46, %v3199_v32  ;;  %v11564_v32 = vld [vmem:[%s16311_s30 + $0x43c] sm:$0xf0]  ;;  %v9847_v46 = vor.u32 %v11584_v21, %v9844_v51  ;;  %v3363_v51 = vunpack.c.h.b16 %v14094_v39 }
 0x832   :  { %9667 = vmatmul.msk.bf16.gmra.mxu2 %vm1512_vm3, %v3214_v0  ;;  %v9723_v0 = vor.u32 %v11564_v32, %v9722_v54  ;;  %v3383_v54 = vpack.c.b16 %v3363_v51, %v3363_v51 }
 0x833   :  { %4258 = vmatpush.bf16.msra.mxu0 %v11606_v28  ;;  %v9802_v28 = vld [vmem:[%s16311_s30 + $0x488] sm:$0xf] }
 0x835   :  { %v3203_v3 = vpop.f32.mrf.mxu0  ;;  %3432 = vmatmul.bf16.gmra.mxu3 %v9723_v0 }
 0x836   :  { %v3204_v37 = vadd.f32 %v3203_v3, %v3171_v23  ;;  %v14161_v3 = vld [vmem:[%s16311_s30 + $0x500] sm:$0xff] }
 0x837   :  { %v3695_v35 = vunpack.c.h.b16 %v14161_v3 }
 0x838   :  { %3794 = vmatmul.bf16.gmra.mxu0 %v9815_v42  ;;  %v9700_v42 = vld [vmem:[%s16311_s30 + $0x408] sm:$0xf0] }
 0x839   :  { %v9703_v36 = vor.u32 %v11555_v8, %v9700_v42  ;;  %v3715_v23 = vpack.c.b16 %v3695_v35, %v3695_v35  ;;  %v3456_v35 = vpop.f32.mrf.mxu1 }
 0x83d   :  { %v3205_v38 = vpop.f32.mrf.mxu0 }
 0x83e   :  { %v3206_v1 = vadd.f32 %v3205_v38, %v3173_v62  ;;  %v9738_v62 = vld [vmem:[%s16311_s30 + $0x450] sm:$0xf]  ;;  %v11568_v38 = vld [vmem:[%s16311_s30 + $0x45c] sm:$0xf0] }
 0x840   :  { %v3215_v7 = vpack.c.bf16 %v3206_v1, %v3204_v37  ;;  %v9739_v37 = vor.u32 %v11568_v38, %v9738_v62  ;;  %v11559_v1 = vld [vmem:[%s16311_s30 + $0x41c] sm:$0xf]  ;;  %v11579_v62 = vld [vmem:[%s16311_s30 + $0x4b4] sm:$0xf0] }
 0x842   :  { %9668 = vmatmul.msk.bf16.gmra.mxu2 %vm1512_vm3, %v3215_v7  ;;  %v9716_v7 = vld [vmem:[%s16311_s30 + $0x428] sm:$0xf0] }
 0x843   :  { %v9719_v26 = vor.u32 %v11559_v1, %v9716_v7  ;;  %v3458_v1 = vpop.f32.mrf.mxu1 }
 0x845   :  { %v3208_v6 = vpop.f32.mrf.mxu0  ;;  %3437 = vmatmul.bf16.gmra.mxu3 %v9739_v37 }
 0x846   :  { %v3209_v27 = vadd.f32 %v3208_v6, %v3176_v41  ;;  %v3380_v41 = vpack.c.b16 %v3360_v50, %v3360_v50  ;;  %v16381_v50 = vld [vmem:[#allocation4_spill] sm:$0xff] }
 0x848   :  { %3799 = vmatmul.bf16.gmra.mxu0 %v9831_v14  ;;  %v3216_v4 = vpack.c.bf16 %v3209_v27, %v3209_v27  ;;  %v9732_v14 = vld [vmem:[%s16311_s30 + $0x448] sm:$0xf0]  ;;  %v11567_v27 = vld [vmem:[%s16311_s30 + $0x45c] sm:$0xf] }
 0x849   :  { %v9735_v6 = vor.u32 %v11563_v43, %v9732_v14 }
 0x84b   :  { %v3461_v14 = vpop.f32.mrf.mxu1 }
 0x84d   :  { %v3210_v9 = vpop.f32.mrf.mxu0 }
 0x84e   :  { %v9751_v9 = vor.u32 %v11567_v27, %v9748_v19  ;;  %v9834_v27 = vld [vmem:[%s16311_s30 + $0x4c8] sm:$0xf]  ;;  %v11583_v19 = vld [vmem:[%s16311_s30 + $0x4d4] sm:$0xf0] }
 0x852   :  { %9669 = vmatmul.msk.bf16.gmra.mxu2 %vm1512_vm3, %v3216_v4 }
 0x855   :  { %3442 = vmatmul.bf16.gmra.mxu3 %v3380_v41 }
 0x858   :  { %3804 = vmatmul.bf16.gmra.mxu0 %v9847_v46 }
 0x862   :  { %9752 = vmatmul.msk.bf16.vlgmr.msra.gmra.mxu2 %vm1074_vm2, %v9703_v36  ;;  %v3423_v36 = vpop.f32.mrf.mxu3 }
 0x863   :  { %4115 = vmatpush.bf16.msra.mxu2 %v12427_v49 }
 0x867   :  { %4116 = vmatpush.bf16.msra.mxu2 %v12432_v61 }
 0x868   :  { %3809 = vmatmul.bf16.gmra.mxu0 %v3715_v23  ;;  %v3489_v23 = vpop.f32.mrf.mxu0 }
 0x86a   :  { %v3425_v7 = vpop.f32.mrf.mxu3 }
 0x86b   :  { %4117 = vmatpush.bf16.msra.mxu2 %v12436_v63 }
 0x86f   :  { %4118 = vmatpush.bf16.msra.mxu2 %v12380_v53 }
 0x872   :  { %9753 = vmatmul.msk.bf16.gmra.mxu2 %vm1074_vm2, %v9719_v26  ;;  %v3491_v26 = vpop.f32.mrf.mxu0 }
 0x873   :  { %4119 = vmatpush.bf16.msra.mxu2 %v12361_v34 }
 0x877   :  { %4120 = vmatpush.bf16.msra.mxu2 %v12344_v12 }
 0x878   :  { %4090 = vmatmul.bf16.vlgmr.msrb.gmra.mxu0 %v9899_v25  ;;  %v16379_v25 = vld [vmem:[#allocation11_spill] sm:$0xff] }
 0x879   :  { %4518 = vmatpush.bf16.msrb.mxu0 %v12712_v20 }
 0x87a   :  { %v3494_v41 = vpop.f32.mrf.mxu0 }
 0x87b   :  { %4121 = vmatpush.bf16.msra.mxu2 %v16324_v10 }
 0x87d   :  { %4519 = vmatpush.bf16.msrb.mxu0 %v12730_v59 }
 0x87f   :  { %4122 = vmatpush.bf16.msra.mxu2 %v16326_v18 }
 0x881   :  { %4520 = vmatpush.bf16.msrb.mxu0 %v12738_v31 }
 0x882   :  { %9754 = vmatmul.msk.bf16.gmra.mxu2 %vm1074_vm2, %v9735_v6 }
 0x885   :  { %4521 = vmatpush.bf16.msrb.mxu0 %v12746_v44 }
 0x889   :  { %4522 = vmatpush.bf16.msrb.mxu0 %v12775_v47 }
 0x892   :  { %9755 = vmatmul.msk.bf16.gmra.mxu2 %vm1074_vm2, %v9751_v9 }
 0x895   :  { %v3258_v4 = vpop.f32.mrf.mxu2 }
 0x896   :  { %v14213_v21 = vadd.f32 %v3258_v4, %v14030_v2  ;;  %v11575_v2 = vld [vmem:[%s16311_s30 + $0x494] sm:$0xf0] }
 0x897   :  { %v16383_v4 = vld [vmem:[#allocation17_spill] sm:$0xff] }
 0x89d   :  { %v3260_v45 = vpop.f32.mrf.mxu2 }
 0x89e   :  { %v14217_v32 = vadd.f32 %v3260_v45, %v14034_v24  ;;  %v9803_v24 = vor.u32 %v11575_v2, %v9802_v28  ;;  %v9835_v45 = vor.u32 %v11583_v19, %v9834_v27  ;;  %v3496_v2 = vpop.f32.mrf.mxu0 }
 0x8a2   :  { %9756 = vmatmul.msk.bf16.gmra.mxu2 %vm1074_vm2, %v3383_v54  ;;  %v16385_v54 = vld [vmem:[#allocation2_spill] sm:$0xff] }
 0x8a5   :  { %v3263_v46 = vpop.f32.mrf.mxu2 }
 0x8a6   :  { %v14221_v0 = vadd.f32 %v3263_v46, %v14038_v55  ;;  %v3463_v46 = vpop.f32.mrf.mxu1 }
 0x8a8   :  { %v3428_v6 = vpop.f32.mrf.mxu3 }
 0x8ad   :  { %v3265_v39 = vpop.f32.mrf.mxu2 }
 0x8ae   :  { %v14230_v8 = vadd.f32 %v3265_v39, %v14042_v29  ;;  %v9818_v29 = vld [vmem:[%s16311_s30 + $0x4a8] sm:$0xf] }
 0x8b0   :  { %v3430_v28 = vpop.f32.mrf.mxu3 }
 0x8b2   :  { %3822 = vmatmul.bf16.vlgmr.msrb.gmra.mxu2 %v9803_v24  ;;  %v16386_v24 = vld [vmem:[#allocation15_spill] sm:$0xff] }
 0x8b3   :  { %4416 = vmatpush.bf16.msrb.mxu2 %v12280_v13 }
 0x8b5   :  { %v3268_v42 = vpop.f32.mrf.mxu2 }
 0x8b6   :  { %v14234_v55 = vadd.f32 %v3268_v42, %v14051_v16  ;;  %v9819_v16 = vor.u32 %v11579_v62, %v9818_v29  ;;  %v3466_v29 = vpop.f32.mrf.mxu1  ;;  %v9850_v62 = vld [vmem:[%s16311_s30 + $0x4e8] sm:$0xf] }
 0x8b7   :  { %4417 = vmatpush.bf16.msrb.mxu2 %v16338_v22 }
 0x8bb   :  { %4418 = vmatpush.bf16.msrb.mxu2 %v16341_v57 }
 0x8bd   :  { %v3270_v38 = vpop.f32.mrf.mxu2 }
 0x8be   :  { %v14245_v37 = vadd.f32 %v3270_v38, %v14056_v58  ;;  %v16382_v58 = vld [vmem:[#allocation3_spill] sm:$0xff]  ;;  %v11587_v38 = vld [vmem:[%s16311_s30 + $0x4f4] sm:$0xf0]  ;;  %v3468_v19 = vpop.f32.mrf.mxu1 }
 0x8bf   :  { %4419 = vmatpush.bf16.msrb.mxu2 %v16367_v15  ;;  %v9851_v27 = vor.u32 %v11587_v38, %v9850_v62  ;;  %v3462_v15 = vadd.f32 %v3461_v14, %v3428_v6 }
 0x8c2   :  { %3827 = vmatmul.bf16.gmra.mxu2 %v9819_v16  ;;  %v3499_v16 = vpop.f32.mrf.mxu0 }
 0x8c3   :  { %4420 = vmatpush.bf16.msrb.mxu2 %v16378_v5 }
 0x8c5   :  { %v3273_v56 = vpop.f32.mrf.mxu2 }
 0x8c6   :  { %v14250_v43 = vadd.f32 %v3273_v56, %v16379_v25  ;;  %v3433_v25 = vpop.f32.mrf.mxu3  ;;  %v3471_v38 = vpop.f32.mrf.mxu1 }
 0x8c7   :  { %4421 = vmatpush.bf16.msrb.mxu2 %v16381_v50 }
 0x8c8   :  { %16380 = vst [vmem:[#allocation9_spill] sm:$0xff] %v14250_v43 }
 0x8cb   :  { %4422 = vmatpush.bf16.msrb.mxu2 %v16382_v58 }
 0x8cd   :  { %v3275_v9 = vpop.f32.mrf.mxu2 }
 0x8ce   :  { %v14261_v51 = vadd.f32 %v3275_v9, %v16383_v4  ;;  %v3457_v4 = vadd.f32 %v3456_v35, %v3423_v36 }
 0x8cf   :  { %4423 = vmatpush.bf16.msrb.mxu2 %v16385_v54 }
 0x8d0   :  { %16384 = vst [vmem:[#allocation12_spill] sm:$0xff] %v14261_v51  ;;  %v3490_v54 = vadd.f32 %v3489_v23, %v3457_v4  ;;  %v3464_v23 = vadd.f32 %v3463_v46, %v3430_v28  ;;  %v3467_v4 = vadd.f32 %v3466_v29, %v3433_v25 }
 0x8d2   :  { %3832 = vmatmul.bf16.gmra.mxu2 %v9835_v45  ;;  %v3501_v45 = vpop.f32.mrf.mxu0 }
 0x8d5   :  { %v3278_v39 = vpop.f32.mrf.mxu2 }
 0x8d6   :  { %v14265_v42 = vadd.f32 %v3278_v39, %v16386_v24  ;;  %v14276_v39 = vld [vmem:[%s16311_s30 + $0x508] sm:$0xff]  ;;  %v3435_v24 = vpop.f32.mrf.mxu3 }
 0x8d7   :  { %v3696_v51 = vunpack.c.l.b16 %v14276_v39 }
 0x8d8   :  { %16387 = vst [vmem:[#allocation13_spill] sm:$0xff] %v14265_v42  ;;  %v3459_v42 = vadd.f32 %v3458_v1, %v3425_v7  ;;  %v3473_v1 = vpop.f32.mrf.mxu1  ;;  %v3495_v7 = vadd.f32 %v3494_v41, %v3462_v15 }
 0x8d9   :  { %v3716_v62 = vpack.c.b16 %v3696_v51, %v3696_v51  ;;  %v3497_v51 = vadd.f32 %v3496_v2, %v3464_v23  ;;  %v3469_v2 = vadd.f32 %v3468_v19, %v3435_v24  ;;  %v9916_v23 = vld [vmem:[%s16311_s30 + $0x540] sm:$0xf0] }
 0x8da   :  { %v3492_v58 = vadd.f32 %v3491_v26, %v3459_v42  ;;  %v3504_v5 = vpop.f32.mrf.mxu0 }
 0x8dd   :  { %v3280_v56 = vpop.f32.mrf.mxu2 }
 0x8de   :  { %v3438_v36 = vpop.f32.mrf.mxu3 }
 0x8df   :  { %v3472_v24 = vadd.f32 %v3471_v38, %v3438_v36 }
 0x8e0   :  { %v3476_v41 = vpop.f32.mrf.mxu1 }
 0x8e2   :  { %3837 = vmatmul.bf16.gmra.mxu2 %v9851_v27  ;;  %v3506_v26 = vpop.f32.mrf.mxu0 }
 0x8e5   :  { %v3522_v9 = vpop.f32.mrf.mxu2 }
 0x8e6   :  { %v3523_v56 = vadd.f32 %v3522_v9, %v3490_v54 }
 0x8ea   :  { %v3509_v46 = vpop.f32.mrf.mxu0 }
 0x8ed   :  { %v3524_v50 = vpop.f32.mrf.mxu2 }
 0x8ee   :  { %v3525_v43 = vadd.f32 %v3524_v50, %v3492_v58  ;;  %v9900_v50 = vld [vmem:[%s16311_s30 + $0x520] sm:$0xf0]  ;;  %v3440_v58 = vpop.f32.mrf.mxu3 }
 0x8f0   :  { %v3546_v27 = vpack.c.bf16 %v3525_v43, %v3523_v56  ;;  %v11590_v43 = vld [vmem:[%s16311_s30 + $0x514] sm:$0xf]  ;;  %v3478_v56 = vpop.f32.mrf.mxu1 }
 0x8f1   :  { %v9903_v42 = vor.u32 %v11590_v43, %v9900_v50  ;;  %v3502_v43 = vadd.f32 %v3501_v45, %v3469_v2  ;;  %v9932_v45 = vld [vmem:[%s16311_s30 + $0x560] sm:$0xf0] }
 0x8f2   :  { %9769 = vmatmul.msk.bf16.vlgmr.msra.gmra.mxu3 %vm1512_vm3, %v3546_v27  ;;  %3842 = vmatmul.bf16.gmra.mxu2 %v3716_v62  ;;  %v3500_v62 = vadd.f32 %v3499_v16, %v3467_v4  ;;  %v3511_v27 = vpop.f32.mrf.mxu0 }
 0x8f3   :  { %4148 = vmatpush.bf16.msra.mxu3 %v12560_v48 }
 0x8f5   :  { %v3527_v35 = vpop.f32.mrf.mxu2 }
 0x8f6   :  { %v3528_v14 = vadd.f32 %v3527_v35, %v3495_v7  ;;  %v3443_v28 = vpop.f32.mrf.mxu3  ;;  %v11594_v35 = vld [vmem:[%s16311_s30 + $0x534] sm:$0xf] }
 0x8f7   :  { %4149 = vmatpush.bf16.msra.mxu3 %v12576_v52 }
 0x8fb   :  { %4150 = vmatpush.bf16.msra.mxu3 %v12585_v60 }
 0x8fd   :  { %v3529_v54 = vpop.f32.mrf.mxu2 }
 0x8fe   :  { %v3530_v6 = vadd.f32 %v3529_v54, %v3497_v51  ;;  %v3445_v7 = vpop.f32.mrf.mxu3  ;;  %v9919_v51 = vor.u32 %v11594_v35, %v9916_v23  ;;  %v3474_v54 = vadd.f32 %v3473_v1, %v3440_v58  ;;  %v11602_v1 = vld [vmem:[%s16311_s30 + $0x574] sm:$0xf]  ;;  %v9810_v58 = vld [vmem:[%s16311_s30 + $0x4a0] sm:$0xf] }
 0x8ff   :  { %4151 = vmatpush.bf16.msra.mxu3 %v12597_v40  ;;  %v11624_v7 = vld [vmem:[%s16312_s4 + $0xa0] sm:$0xff] }
 0x900   :  { %v3547_v15 = vpack.c.bf16 %v3530_v6, %v3528_v14  ;;  %v3505_v14 = vadd.f32 %v3504_v5, %v3472_v24  ;;  %v11598_v6 = vld [vmem:[%s16311_s30 + $0x554] sm:$0xf] }
 0x901   :  { %v9935_v2 = vor.u32 %v11598_v6, %v9932_v45  ;;  %v11586_v6 = vld [vmem:[%s16311_s30 + $0x4ec] sm:$0xf0]  ;;  %v11577_v45 = vld [vmem:[%s16311_s30 + $0x4ac] sm:$0xf] }
 0x902   :  { %9770 = vmatmul.msk.bf16.gmra.mxu3 %vm1512_vm3, %v3547_v15  ;;  %4123 = vmatmul.bf16.vlgmr.msra.gmra.mxu2 %v9903_v42  ;;  %v3507_v42 = vadd.f32 %v3506_v26, %v3474_v54  ;;  %v9948_v26 = vld [vmem:[%s16311_s30 + $0x580] sm:$0xf0] }
 0x903   :  { %4152 = vmatpush.bf16.msra.mxu3 %v12603_v17  ;;  %v9951_v23 = vor.u32 %v11602_v1, %v9948_v26  ;;  %v11585_v26 = vld [vmem:[%s16311_s30 + $0x4ec] sm:$0xf] }
 0x905   :  { %v3532_v9 = vpop.f32.mrf.mxu2 }
 0x906   :  { %v3533_v29 = vadd.f32 %v3532_v9, %v3500_v62  ;;  %v3477_v62 = vadd.f32 %v3476_v41, %v3443_v28  ;;  %v11578_v41 = vld [vmem:[%s16311_s30 + $0x4ac] sm:$0xf0] }
 0x907   :  { %4153 = vmatpush.bf16.msra.mxu3 %v12618_v30  ;;  %v9811_v28 = vor.u32 %v11578_v41, %v9810_v58  ;;  %v9852_v58 = vld [vmem:[%s16311_s30 + $0x4f8] sm:$0xf0] }
 0x908   :  { %v3510_v5 = vadd.f32 %v3509_v46, %v3477_v62  ;;  %v11625_v46 = vld [vmem:[%s16312_s4 + $0xa8] sm:$0xff]  ;;  %v9855_v41 = vor.u32 %v11585_v26, %v9852_v58 }
 0x909   :  { %4591 = vmatpush.bf16.msra.mxu2 %v11625_v46  ;;  %3761 = vmatmul.bf16.gmra.mxu1 %v9811_v28  ;;  %v11581_v62 = vld [vmem:[%s16311_s30 + $0x4cc] sm:$0xf]  ;;  %v11601_v26 = vld [vmem:[%s16311_s30 + $0x564] sm:$0xf0] }
 0x90b   :  { %4154 = vmatpush.bf16.msra.mxu3 %v12623_v33 }
 0x90d   :  { %v3534_v50 = vpop.f32.mrf.mxu2  ;;  %4592 = vmatpush.bf16.msra.mxu2 %v11624_v7 }
 0x90e   :  { %v3535_v25 = vadd.f32 %v3534_v50, %v3502_v43  ;;  %v14331_v43 = vld [vmem:[%s16311_s30 + $0x590] sm:$0xff]  ;;  %v11573_v50 = vld [vmem:[%s16311_s30 + $0x48c] sm:$0xf] }
 0x90f   :  { %4155 = vmatpush.bf16.msra.mxu3 %v12455_v11 }
 0x910   :  { %v3548_v16 = vpack.c.bf16 %v3535_v25, %v3533_v29  ;;  %v4029_v29 = vunpack.c.h.b16 %v14331_v43  ;;  %v9804_v25 = vld [vmem:[%s16311_s30 + $0x498] sm:$0xf0] }
 0x911   :  { %v9807_v24 = vor.u32 %v11573_v50, %v9804_v25 }
 0x912   :  { %9771 = vmatmul.msk.bf16.gmra.mxu3 %vm1512_vm3, %v3548_v16  ;;  %4128 = vmatmul.bf16.gmra.mxu2 %v9919_v51  ;;  %v9826_v51 = vld [vmem:[%s16311_s30 + $0x4c0] sm:$0xf]  ;;  %v11582_v16 = vld [vmem:[%s16311_s30 + $0x4cc] sm:$0xf0]  ;;  %v4049_v54 = vpack.c.b16 %v4029_v29, %v4029_v29  ;;  %v9906_v29 = vld [vmem:[%s16311_s30 + $0x518] sm:$0xf] }
 0x915   :  { %v3537_v19 = vpop.f32.mrf.mxu2 }
 0x916   :  { %v3538_v9 = vadd.f32 %v3537_v19, %v3505_v14  ;;  %v9827_v19 = vor.u32 %v11582_v16, %v9826_v51  ;;  %v9842_v14 = vld [vmem:[%s16311_s30 + $0x4e0] sm:$0xf]  ;;  %v3790_v16 = vpop.f32.mrf.mxu0 }
 0x919   :  { %3766 = vmatmul.bf16.gmra.mxu1 %v9827_v19  ;;  %v3757_v19 = vpop.f32.mrf.mxu1 }
 0x91d   :  { %v3539_v15 = vpop.f32.mrf.mxu2 }
 0x91e   :  { %v3540_v4 = vadd.f32 %v3539_v15, %v3507_v42  ;;  %v9843_v42 = vor.u32 %v11586_v6, %v9842_v14  ;;  %v9820_v15 = vld [vmem:[%s16311_s30 + $0x4b8] sm:$0xf0] }
 0x920   :  { %v3549_v56 = vpack.c.bf16 %v3540_v4, %v3538_v9  ;;  %v10002_v9 = vld [vmem:[%s16311_s30 + $0x5a0] sm:$0xf]  ;;  %v11610_v4 = vld [vmem:[%s16311_s30 + $0x5ac] sm:$0xf0] }
 0x922   :  { %9772 = vmatmul.msk.bf16.gmra.mxu3 %vm1512_vm3, %v3549_v56  ;;  %4133 = vmatmul.bf16.gmra.mxu2 %v9935_v2  ;;  %v9823_v2 = vor.u32 %v11577_v45, %v9820_v15  ;;  %v10003_v56 = vor.u32 %v11610_v4, %v10002_v9  ;;  %v3792_v45 = vpop.f32.mrf.mxu0  ;;  %v3759_v15 = vpop.f32.mrf.mxu1  ;;  %v16389_v4 = vld [vmem:[#allocation5_spill] sm:$0xff] }
 0x925   :  { %v3542_v38 = vpop.f32.mrf.mxu2 }
 0x926   :  { %v3543_v36 = vadd.f32 %v3542_v38, %v3510_v5  ;;  %v9836_v38 = vld [vmem:[%s16311_s30 + $0x4d8] sm:$0xf0] }
 0x927   :  { %v9839_v5 = vor.u32 %v11581_v62, %v9836_v38 }
 0x928   :  { %v3550_v35 = vpack.c.bf16 %v3543_v36, %v3543_v36  ;;  %v3694_v36 = vunpack.c.l.b16 %v14161_v3  ;;  %v3697_v3 = vunpack.c.h.b16 %v14276_v39 }
 0x929   :  { %3771 = vmatmul.bf16.gmra.mxu1 %v9843_v42  ;;  %v16388_v42 = vld [vmem:[#allocation6_spill] sm:$0xff] }
 0x92a   :  { %v3714_v1 = vpack.c.b16 %v3694_v36, %v3694_v36  ;;  %v3795_v38 = vpop.f32.mrf.mxu0 }
 0x92d   :  { %v3544_v27 = vpop.f32.mrf.mxu2 }
 0x932   :  { %9773 = vmatmul.msk.bf16.gmra.mxu3 %vm1512_vm3, %v3550_v35  ;;  %4138 = vmatmul.bf16.gmra.mxu2 %v9951_v23  ;;  %v3717_v35 = vpack.c.b16 %v3697_v3, %v3697_v3 }
 0x939   :  { %3776 = vmatmul.bf16.gmra.mxu1 %v3714_v1  ;;  %v16393_v1 = vld [vmem:[#allocation3_spill] sm:$0xff] }
 0x942   :  { %9856 = vmatmul.msk.bf16.vlgmr.msrb.gmra.mxu3 %vm1074_vm2, %v9807_v24  ;;  %4143 = vmatmul.bf16.gmra.mxu2 %v4049_v54  ;;  %v3823_v24 = vpop.f32.mrf.mxu2  ;;  %v11597_v54 = vld [vmem:[%s16311_s30 + $0x544] sm:$0xf0] }
 0x943   :  { %4449 = vmatpush.bf16.msrb.mxu3 %v12427_v49 }
 0x947   :  { %4450 = vmatpush.bf16.msrb.mxu3 %v12432_v61 }
 0x94a   :  { %v3825_v9 = vpop.f32.mrf.mxu2 }
 0x94b   :  { %4451 = vmatpush.bf16.msrb.mxu3 %v12436_v63 }
 0x94f   :  { %4452 = vmatpush.bf16.msrb.mxu3 %v12380_v53 }
 0x952   :  { %9857 = vmatmul.msk.bf16.gmra.mxu3 %vm1074_vm2, %v9823_v2  ;;  %4424 = vmatmul.bf16.vlgmr.msrb.gmra.mxu2 %v10003_v56  ;;  %v16390_v56 = vld [vmem:[#allocation9_spill] sm:$0xff]  ;;  %v3828_v36 = vpop.f32.mrf.mxu2 }
 0x953   :  { %4453 = vmatpush.bf16.msrb.mxu3 %v12361_v34  ;;  %4852 = vmatpush.bf16.msrb.mxu2 %v12712_v20 }
 0x957   :  { %4454 = vmatpush.bf16.msrb.mxu3 %v12344_v12  ;;  %4853 = vmatpush.bf16.msrb.mxu2 %v12730_v59 }
 0x95b   :  { %4455 = vmatpush.bf16.msrb.mxu3 %v16324_v10  ;;  %4854 = vmatpush.bf16.msrb.mxu2 %v12738_v31 }
 0x95f   :  { %4456 = vmatpush.bf16.msrb.mxu3 %v16326_v18  ;;  %4855 = vmatpush.bf16.msrb.mxu2 %v12746_v44 }
 0x962   :  { %9858 = vmatmul.msk.bf16.gmra.mxu3 %vm1074_vm2, %v9839_v5  ;;  %v16392_v5 = vld [vmem:[#allocation4_spill] sm:$0xff] }
 0x963   :  { %4856 = vmatpush.bf16.msrb.mxu2 %v12775_v47 }
 0x972   :  { %9859 = vmatmul.msk.bf16.gmra.mxu3 %vm1074_vm2, %v9855_v41 }
 0x975   :  { %v3592_v46 = vpop.f32.mrf.mxu3 }
 0x976   :  { %v14395_v28 = vadd.f32 %v3592_v46, %v14213_v21  ;;  %v11593_v21 = vld [vmem:[%s16311_s30 + $0x524] sm:$0xf0]  ;;  %v16394_v46 = vld [vmem:[#allocation12_spill] sm:$0xff] }
 0x97d   :  { %v3594_v27 = vpop.f32.mrf.mxu3 }
 0x97e   :  { %v14399_v23 = vadd.f32 %v3594_v27, %v14217_v32  ;;  %v9907_v32 = vor.u32 %v11593_v21, %v9906_v29  ;;  %v3830_v21 = vpop.f32.mrf.mxu2 }
 0x982   :  { %9860 = vmatmul.msk.bf16.gmra.mxu3 %vm1074_vm2, %v3717_v35  ;;  %v16396_v35 = vld [vmem:[#allocation2_spill] sm:$0xff] }
 0x985   :  { %v3597_v7 = vpop.f32.mrf.mxu3 }
 0x986   :  { %v14403_v50 = vadd.f32 %v3597_v7, %v14221_v0  ;;  %v3762_v58 = vpop.f32.mrf.mxu1  ;;  %v3797_v7 = vpop.f32.mrf.mxu0 }
 0x98d   :  { %v3599_v39 = vpop.f32.mrf.mxu3 }
 0x98e   :  { %v14412_v25 = vadd.f32 %v3599_v39, %v14230_v8  ;;  %v9922_v8 = vld [vmem:[%s16311_s30 + $0x538] sm:$0xf]  ;;  %v3764_v29 = vpop.f32.mrf.mxu1 }
 0x992   :  { %4156 = vmatmul.bf16.vlgmr.msra.gmra.mxu3 %v9907_v32  ;;  %v16397_v32 = vld [vmem:[#allocation13_spill] sm:$0xff] }
 0x993   :  { %4750 = vmatpush.bf16.msra.mxu3 %v12280_v13 }
 0x995   :  { %v3602_v51 = vpop.f32.mrf.mxu3 }
 0x996   :  { %v14416_v0 = vadd.f32 %v3602_v51, %v14234_v55  ;;  %v9923_v55 = vor.u32 %v11597_v54, %v9922_v8  ;;  %v3800_v8 = vpop.f32.mrf.mxu0  ;;  %v9954_v54 = vld [vmem:[%s16311_s30 + $0x578] sm:$0xf] }
 0x997   :  { %4751 = vmatpush.bf16.msra.mxu3 %v16338_v22 }
 0x99b   :  { %4752 = vmatpush.bf16.msra.mxu3 %v16341_v57 }
 0x99d   :  { %v3604_v14 = vpop.f32.mrf.mxu3 }
 0x99e   :  { %v14427_v6 = vadd.f32 %v3604_v14, %v14245_v37  ;;  %v9938_v37 = vld [vmem:[%s16311_s30 + $0x558] sm:$0xf]  ;;  %v11605_v14 = vld [vmem:[%s16311_s30 + $0x584] sm:$0xf0] }
 0x99f   :  { %4753 = vmatpush.bf16.msra.mxu3 %v16388_v42  ;;  %v9939_v27 = vor.u32 %v11601_v26, %v9938_v37  ;;  %v9955_v37 = vor.u32 %v11605_v14, %v9954_v54  ;;  %v3802_v26 = vpop.f32.mrf.mxu0  ;;  %v3796_v42 = vadd.f32 %v3795_v38, %v3762_v58 }
 0x9a2   :  { %4161 = vmatmul.bf16.gmra.mxu3 %v9923_v55  ;;  %v3833_v55 = vpop.f32.mrf.mxu2 }
 0x9a3   :  { %4754 = vmatpush.bf16.msra.mxu3 %v16389_v4 }
 0x9a5   :  { %v3607_v2 = vpop.f32.mrf.mxu3 }
 0x9a6   :  { %v14432_v62 = vadd.f32 %v3607_v2, %v16390_v56  ;;  %v3767_v56 = vpop.f32.mrf.mxu1 }
 0x9a7   :  { %4755 = vmatpush.bf16.msra.mxu3 %v16392_v5  ;;  %v3805_v14 = vpop.f32.mrf.mxu0 }
 0x9a8   :  { %16391 = vst [vmem:[#allocation7_spill] sm:$0xff] %v14432_v62 }
 0x9ab   :  { %4756 = vmatpush.bf16.msra.mxu3 %v16393_v1 }
 0x9ad   :  { %v3609_v41 = vpop.f32.mrf.mxu3 }
 0x9ae   :  { %v14443_v3 = vadd.f32 %v3609_v41, %v16394_v46  ;;  %v3791_v46 = vadd.f32 %v3790_v16, %v3757_v19 }
 0x9af   :  { %4757 = vmatpush.bf16.msra.mxu3 %v16396_v35 }
 0x9b0   :  { %16395 = vst [vmem:[#allocation16_spill] sm:$0xff] %v14443_v3  ;;  %v3824_v35 = vadd.f32 %v3823_v24, %v3791_v46  ;;  %v3798_v24 = vadd.f32 %v3797_v7, %v3764_v29  ;;  %v3801_v46 = vadd.f32 %v3800_v8, %v3767_v56 }
 0x9b2   :  { %4166 = vmatmul.bf16.gmra.mxu3 %v9939_v27  ;;  %v3835_v27 = vpop.f32.mrf.mxu2 }
 0x9b5   :  { %v3612_v39 = vpop.f32.mrf.mxu3 }
 0x9b6   :  { %v14447_v51 = vadd.f32 %v3612_v39, %v16397_v32  ;;  %v14458_v39 = vld [vmem:[%s16311_s30 + $0x598] sm:$0xff]  ;;  %v3769_v32 = vpop.f32.mrf.mxu1 }
 0x9b7   :  { %v4030_v1 = vunpack.c.l.b16 %v14458_v39 }
 0x9b8   :  { %16398 = vst [vmem:[#allocation14_spill] sm:$0xff] %v14447_v51  ;;  %v3793_v51 = vadd.f32 %v3792_v45, %v3759_v15  ;;  %v3807_v45 = vpop.f32.mrf.mxu0  ;;  %v3829_v15 = vadd.f32 %v3828_v36, %v3796_v42 }
 0x9b9   :  { %v4050_v54 = vpack.c.b16 %v4030_v1, %v4030_v1 }
 0x9ba   :  { %v3826_v3 = vadd.f32 %v3825_v9, %v3793_v51  ;;  %v3838_v62 = vpop.f32.mrf.mxu2 }
 0x9bd   :  { %v3614_v2 = vpop.f32.mrf.mxu3 }
 0x9be   :  { %v3772_v16 = vpop.f32.mrf.mxu1 }
 0x9c0   :  { %v3810_v36 = vpop.f32.mrf.mxu0 }
 0x9c2   :  { %4171 = vmatmul.bf16.gmra.mxu3 %v9955_v37  ;;  %v3840_v9 = vpop.f32.mrf.mxu2 }
 0x9c5   :  { %v3856_v41 = vpop.f32.mrf.mxu3 }
 0x9c6   :  { %v3857_v2 = vadd.f32 %v3856_v41, %v3824_v35  ;;  %v3774_v1 = vpop.f32.mrf.mxu1 }
 0x9ca   :  { %v3843_v7 = vpop.f32.mrf.mxu2 }
 0x9cd   :  { %v3858_v5 = vpop.f32.mrf.mxu3 }
 0x9ce   :  { %v3859_v4 = vadd.f32 %v3858_v5, %v3826_v3  ;;  %v10004_v5 = vld [vmem:[%s16311_s30 + $0x5b0] sm:$0xf0]  ;;  %v3831_v3 = vadd.f32 %v3830_v21, %v3798_v24  ;;  %v3777_v29 = vpop.f32.mrf.mxu1  ;;  %v3803_v21 = vadd.f32 %v3802_v26, %v3769_v32  ;;  %v3806_v32 = vadd.f32 %v3805_v14, %v3772_v16  ;;  %v11596_v14 = vld [vmem:[%s16311_s30 + $0x53c] sm:$0xf0] }
 0x9cf   :  { %v10020_v24 = vld [vmem:[%s16311_s30 + $0x5d0] sm:$0xf0] }
 0x9d0   :  { %v3880_v37 = vpack.c.bf16 %v3859_v4, %v3857_v2  ;;  %v11608_v4 = vld [vmem:[%s16311_s30 + $0x5a4] sm:$0xf]  ;;  %v3812_v2 = vpop.f32.mrf.mxu0 }
 0x9d1   :  { %v10007_v51 = vor.u32 %v11608_v4, %v10004_v5  ;;  %v3836_v4 = vadd.f32 %v3835_v27, %v3803_v21  ;;  %v10036_v27 = vld [vmem:[%s16311_s30 + $0x5f0] sm:$0xf0] }
 0x9d2   :  { %9873 = vmatmul.msk.bf16.vlgmr.msrb.gmra.mxu1 %vm1512_vm3, %v3880_v37  ;;  %4176 = vmatmul.bf16.gmra.mxu3 %v4050_v54  ;;  %v3834_v54 = vadd.f32 %v3833_v55, %v3801_v46  ;;  %v3845_v37 = vpop.f32.mrf.mxu2 }
 0x9d3   :  { %4482 = vmatpush.bf16.msrb.mxu1 %v12560_v48  ;;  %v11643_v37 = vld [vmem:[%s16312_s4 + $0xb8] sm:$0xff] }
 0x9d5   :  { %v3861_v19 = vpop.f32.mrf.mxu3 }
 0x9d6   :  { %v3862_v38 = vadd.f32 %v3861_v19, %v3829_v15  ;;  %v11612_v19 = vld [vmem:[%s16311_s30 + $0x5c4] sm:$0xf]  ;;  %v3779_v15 = vpop.f32.mrf.mxu1 }
 0x9d7   :  { %4483 = vmatpush.bf16.msrb.mxu1 %v12576_v52 }
 0x9db   :  { %4484 = vmatpush.bf16.msrb.mxu1 %v12585_v60 }
 0x9dd   :  { %v3863_v35 = vpop.f32.mrf.mxu3 }
 0x9de   :  { %v3864_v58 = vadd.f32 %v3863_v35, %v3831_v3  ;;  %v10023_v3 = vor.u32 %v11612_v19, %v10020_v24  ;;  %v3808_v35 = vadd.f32 %v3807_v45, %v3774_v1 }
 0x9df   :  { %4485 = vmatpush.bf16.msrb.mxu1 %v12597_v40 }
 0x9e0   :  { %v3881_v42 = vpack.c.bf16 %v3864_v58, %v3862_v38  ;;  %v3839_v38 = vadd.f32 %v3838_v62, %v3806_v32  ;;  %v11616_v58 = vld [vmem:[%s16311_s30 + $0x5e4] sm:$0xf]  ;;  %v9914_v62 = vld [vmem:[%s16311_s30 + $0x530] sm:$0xf] }
 0x9e1   :  { %v10039_v21 = vor.u32 %v11616_v58, %v10036_v27  ;;  %v9915_v16 = vor.u32 %v11596_v14, %v9914_v62  ;;  %v11604_v58 = vld [vmem:[%s16311_s30 + $0x57c] sm:$0xf0]  ;;  %v11599_v14 = vld [vmem:[%s16311_s30 + $0x55c] sm:$0xf] }
 0x9e2   :  { %9874 = vmatmul.msk.bf16.gmra.mxu1 %vm1512_vm3, %v3881_v42  ;;  %4457 = vmatmul.bf16.vlgmr.msrb.gmra.mxu3 %v10007_v51  ;;  %v3841_v51 = vadd.f32 %v3840_v9, %v3808_v35 }
 0x9e3   :  { %4486 = vmatpush.bf16.msrb.mxu1 %v12603_v17  ;;  %4095 = vmatmul.bf16.gmra.mxu0 %v9915_v16  ;;  %v9940_v16 = vld [vmem:[%s16311_s30 + $0x568] sm:$0xf0] }
 0x9e4   :  { %4925 = vmatpush.bf16.msrb.mxu3 %v11643_v37 }
 0x9e5   :  { %v3866_v41 = vpop.f32.mrf.mxu3 }
 0x9e6   :  { %v3867_v8 = vadd.f32 %v3866_v41, %v3834_v54  ;;  %v3811_v54 = vadd.f32 %v3810_v36, %v3777_v29  ;;  %v11620_v36 = vld [vmem:[%s16311_s30 + $0x604] sm:$0xf]  ;;  %v10052_v29 = vld [vmem:[%s16311_s30 + $0x610] sm:$0xf0] }
 0x9e7   :  { %4487 = vmatpush.bf16.msrb.mxu1 %v12618_v30  ;;  %v10055_v15 = vor.u32 %v11620_v36, %v10052_v29 }
 0x9e8   :  { %v3844_v9 = vadd.f32 %v3843_v7, %v3811_v54  ;;  %v11642_v7 = vld [vmem:[%s16312_s4 + $0xb0] sm:$0xff]  ;;  %v4028_v54 = vunpack.c.l.b16 %v14331_v43  ;;  %v11603_v43 = vld [vmem:[%s16311_s30 + $0x57c] sm:$0xf] }
 0x9e9   :  { %4926 = vmatpush.bf16.msrb.mxu3 %v11642_v7 }
 0x9ea   :  { %v4048_v62 = vpack.c.b16 %v4028_v54, %v4028_v54  ;;  %v16402_v54 = vld [vmem:[#allocation5_spill] sm:$0xff] }
 0x9eb   :  { %4488 = vmatpush.bf16.msrb.mxu1 %v12623_v33 }
 0x9ed   :  { %v3868_v5 = vpop.f32.mrf.mxu3 }
 0x9ee   :  { %v3869_v56 = vadd.f32 %v3868_v5, %v3836_v4  ;;  %v9930_v4 = vld [vmem:[%s16311_s30 + $0x550] sm:$0xf]  ;;  %v11600_v5 = vld [vmem:[%s16311_s30 + $0x55c] sm:$0xf0] }
 0x9ef   :  { %4489 = vmatpush.bf16.msrb.mxu1 %v12455_v11 }
 0x9f0   :  { %v3882_v55 = vpack.c.bf16 %v3869_v56, %v3867_v8  ;;  %v9931_v8 = vor.u32 %v11600_v5, %v9930_v4  ;;  %v14519_v56 = vld [vmem:[%s16311_s30 + $0x620] sm:$0xff] }
 0x9f2   :  { %9875 = vmatmul.msk.bf16.gmra.mxu1 %vm1512_vm3, %v3882_v55  ;;  %4462 = vmatmul.bf16.gmra.mxu3 %v10023_v3  ;;  %v4363_v3 = vunpack.c.h.b16 %v14519_v56  ;;  %v11591_v55 = vld [vmem:[%s16311_s30 + $0x51c] sm:$0xf] }
 0x9f3   :  { %4100 = vmatmul.bf16.gmra.mxu0 %v9931_v8 }
 0x9f4   :  { %v4383_v35 = vpack.c.b16 %v4363_v3, %v4363_v3 }
 0x9f5   :  { %v3871_v26 = vpop.f32.mrf.mxu3 }
 0x9f6   :  { %v3872_v41 = vadd.f32 %v3871_v26, %v3839_v38  ;;  %v9908_v26 = vld [vmem:[%s16311_s30 + $0x528] sm:$0xf0]  ;;  %v9946_v38 = vld [vmem:[%s16311_s30 + $0x570] sm:$0xf] }
 0x9f7   :  { %v9911_v32 = vor.u32 %v11591_v55, %v9908_v26  ;;  %v9947_v27 = vor.u32 %v11604_v58, %v9946_v38  ;;  %v4124_v26 = vpop.f32.mrf.mxu2 }
 0x9fd   :  { %v3873_v42 = vpop.f32.mrf.mxu3 }
 0x9fe   :  { %v3874_v46 = vadd.f32 %v3873_v42, %v3841_v51  ;;  %v11595_v51 = vld [vmem:[%s16311_s30 + $0x53c] sm:$0xf]  ;;  %v9924_v42 = vld [vmem:[%s16311_s30 + $0x548] sm:$0xf0] }
 0x9ff   :  { %v4126_v58 = vpop.f32.mrf.mxu2 }
 0xa00   :  { %v3883_v2 = vpack.c.bf16 %v3874_v46, %v3872_v41  ;;  %v10106_v41 = vld [vmem:[%s16311_s30 + $0x630] sm:$0xf]  ;;  %v11628_v46 = vld [vmem:[%s16311_s30 + $0x63c] sm:$0xf0] }
 0xa02   :  { %9876 = vmatmul.msk.bf16.gmra.mxu1 %vm1512_vm3, %v3883_v2  ;;  %4467 = vmatmul.bf16.gmra.mxu3 %v10039_v21  ;;  %v9927_v21 = vor.u32 %v11595_v51, %v9924_v42  ;;  %v10107_v2 = vor.u32 %v11628_v46, %v10106_v41  ;;  %v16399_v41 = vld [vmem:[#allocation6_spill] sm:$0xff] }
 0xa03   :  { %4105 = vmatmul.bf16.gmra.mxu0 %v9947_v27  ;;  %v11615_v27 = vld [vmem:[%s16311_s30 + $0x5d4] sm:$0xf0] }
 0xa05   :  { %v3876_v45 = vpop.f32.mrf.mxu3 }
 0xa06   :  { %v3877_v1 = vadd.f32 %v3876_v45, %v3844_v9  ;;  %v9943_v45 = vor.u32 %v11599_v14, %v9940_v16  ;;  %v9956_v9 = vld [vmem:[%s16311_s30 + $0x588] sm:$0xf0]  ;;  %v16403_v16 = vld [vmem:[#allocation4_spill] sm:$0xff] }
 0xa08   :  { %v3884_v24 = vpack.c.bf16 %v3877_v1, %v3877_v1  ;;  %v9959_v1 = vor.u32 %v11603_v43, %v9956_v9  ;;  %v16404_v43 = vld [vmem:[#allocation16_spill] sm:$0xff] }
 0xa0d   :  { %v3878_v19 = vpop.f32.mrf.mxu3 }
 0xa12   :  { %9877 = vmatmul.msk.bf16.gmra.mxu1 %vm1512_vm3, %v3884_v24  ;;  %4472 = vmatmul.bf16.gmra.mxu3 %v10055_v15  ;;  %v4031_v24 = vunpack.c.h.b16 %v14458_v39 }
 0xa13   :  { %4110 = vmatmul.bf16.gmra.mxu0 %v4048_v62 }
 0xa14   :  { %v4051_v15 = vpack.c.b16 %v4031_v24, %v4031_v24  ;;  %v11619_v24 = vld [vmem:[%s16311_s30 + $0x5f4] sm:$0xf0] }
 0xa22   :  { %9960 = vmatmul.msk.bf16.vlgmr.msra.gmra.mxu1 %vm1074_vm2, %v9911_v32  ;;  %4477 = vmatmul.bf16.gmra.mxu3 %v4383_v35 }
 0xa23   :  { %4783 = vmatpush.bf16.msra.mxu1 %v12427_v49 }
 0xa27   :  { %4784 = vmatpush.bf16.msra.mxu1 %v12432_v61 }
 0xa2b   :  { %4785 = vmatpush.bf16.msra.mxu1 %v12436_v63 }
 0xa2f   :  { %4786 = vmatpush.bf16.msra.mxu1 %v12380_v53 }
 0xa32   :  { %9961 = vmatmul.msk.bf16.gmra.mxu1 %vm1074_vm2, %v9927_v21  ;;  %4758 = vmatmul.bf16.vlgmr.msra.gmra.mxu3 %v10107_v2  ;;  %v16400_v21 = vld [vmem:[#allocation7_spill] sm:$0xff]  ;;  %v4129_v2 = vpop.f32.mrf.mxu2 }
 0xa33   :  { %4787 = vmatpush.bf16.msra.mxu1 %v12361_v34  ;;  %5186 = vmatpush.bf16.msra.mxu3 %v12712_v20 }
 0xa37   :  { %4788 = vmatpush.bf16.msra.mxu1 %v12344_v12  ;;  %5187 = vmatpush.bf16.msra.mxu3 %v12730_v59 }
 0xa3b   :  { %4789 = vmatpush.bf16.msra.mxu1 %v16324_v10  ;;  %5188 = vmatpush.bf16.msra.mxu3 %v12738_v31 }
 0xa3f   :  { %4790 = vmatpush.bf16.msra.mxu1 %v16326_v18  ;;  %5189 = vmatpush.bf16.msra.mxu3 %v12746_v44 }
 0xa42   :  { %9962 = vmatmul.msk.bf16.gmra.mxu1 %vm1074_vm2, %v9943_v45 }
 0xa43   :  { %5190 = vmatpush.bf16.msra.mxu3 %v12775_v47 }
 0xa4f   :  { %v3926_v36 = vpop.f32.mrf.mxu1 }
 0xa50   :  { %v14576_v29 = vadd.f32 %v3926_v36, %v14395_v28  ;;  %v10010_v28 = vld [vmem:[%s16311_s30 + $0x5a8] sm:$0xf] }
 0xa51   :  { %v16406_v36 = vld [vmem:[#allocation3_spill] sm:$0xff] }
 0xa52   :  { %9963 = vmatmul.msk.bf16.gmra.mxu1 %vm1074_vm2, %v9959_v1  ;;  %v4131_v1 = vpop.f32.mrf.mxu2 }
 0xa57   :  { %v3928_v37 = vpop.f32.mrf.mxu1 }
 0xa58   :  { %v14580_v19 = vadd.f32 %v3928_v37, %v14399_v23  ;;  %v11611_v23 = vld [vmem:[%s16311_s30 + $0x5b4] sm:$0xf0]  ;;  %v10042_v37 = vld [vmem:[%s16311_s30 + $0x5e8] sm:$0xf] }
 0xa59   :  { %v10011_v39 = vor.u32 %v11611_v23, %v10010_v28  ;;  %v16407_v28 = vld [vmem:[#allocation2_spill] sm:$0xff] }
 0xa5f   :  { %v3931_v7 = vpop.f32.mrf.mxu1 }
 0xa60   :  { %v14584_v4 = vadd.f32 %v3931_v7, %v14403_v50  ;;  %v4091_v50 = vpop.f32.mrf.mxu0 }
 0xa62   :  { %9964 = vmatmul.msk.bf16.gmra.mxu1 %vm1074_vm2, %v4051_v15 }
 0xa67   :  { %v3933_v5 = vpop.f32.mrf.mxu1 }
 0xa68   :  { %v14588_v8 = vadd.f32 %v3933_v5, %v14412_v25  ;;  %v4157_v25 = vpop.f32.mrf.mxu3  ;;  %v4093_v38 = vpop.f32.mrf.mxu0  ;;  %v10043_v5 = vor.u32 %v11619_v24, %v10042_v37 }
 0xa6f   :  { %v3936_v3 = vpop.f32.mrf.mxu1 }
 0xa70   :  { %v14597_v55 = vadd.f32 %v3936_v3, %v14416_v0  ;;  %v10026_v0 = vld [vmem:[%s16311_s30 + $0x5c8] sm:$0xf]  ;;  %v4159_v51 = vpop.f32.mrf.mxu3  ;;  %v4096_v62 = vpop.f32.mrf.mxu0 }
 0xa71   :  { %v10027_v42 = vor.u32 %v11615_v27, %v10026_v0  ;;  %v4134_v0 = vpop.f32.mrf.mxu2 }
 0xa72   :  { %4490 = vmatmul.bf16.vlgmr.msrb.gmra.mxu1 %v10011_v39  ;;  %v16408_v39 = vld [vmem:[#allocation14_spill] sm:$0xff] }
 0xa73   :  { %5084 = vmatpush.bf16.msrb.mxu1 %v12280_v13 }
 0xa77   :  { %5085 = vmatpush.bf16.msrb.mxu1 %v16338_v22  ;;  %v3938_v32 = vpop.f32.mrf.mxu1 }
 0xa78   :  { %v14602_v35 = vadd.f32 %v3938_v32, %v14427_v6  ;;  %v4162_v14 = vpop.f32.mrf.mxu3  ;;  %v4098_v15 = vpop.f32.mrf.mxu0 }
 0xa79   :  { %v4136_v37 = vpop.f32.mrf.mxu2 }
 0xa7b   :  { %5086 = vmatpush.bf16.msrb.mxu1 %v16341_v57 }
 0xa7f   :  { %5087 = vmatpush.bf16.msrb.mxu1 %v16399_v41  ;;  %v3941_v46 = vpop.f32.mrf.mxu1 }
 0xa80   :  { %v14613_v6 = vadd.f32 %v3941_v46, %v16400_v21  ;;  %v4164_v7 = vpop.f32.mrf.mxu3  ;;  %v4101_v32 = vpop.f32.mrf.mxu0  ;;  %v10058_v46 = vld [vmem:[%s16311_s30 + $0x608] sm:$0xf]  ;;  %v11623_v21 = vld [vmem:[%s16311_s30 + $0x614] sm:$0xf0] }
 0xa82   :  { %16401 = vst [vmem:[#allocation8_spill] sm:$0xff] %v14613_v6  ;;  %4495 = vmatmul.bf16.gmra.mxu1 %v10027_v42  ;;  %v4139_v6 = vpop.f32.mrf.mxu2 }
 0xa83   :  { %5088 = vmatpush.bf16.msrb.mxu1 %v16402_v54 }
 0xa87   :  { %5089 = vmatpush.bf16.msrb.mxu1 %v16403_v16  ;;  %v3943_v45 = vpop.f32.mrf.mxu1 }
 0xa88   :  { %v14618_v9 = vadd.f32 %v3943_v45, %v16404_v43  ;;  %v4167_v27 = vpop.f32.mrf.mxu3  ;;  %v10059_v45 = vor.u32 %v11623_v21, %v10058_v46  ;;  %v4103_v43 = vpop.f32.mrf.mxu0 }
 0xa8a   :  { %16405 = vst [vmem:[#allocation10_spill] sm:$0xff] %v14618_v9 }
 0xa8b   :  { %5090 = vmatpush.bf16.msrb.mxu1 %v16406_v36 }
 0xa8f   :  { %5091 = vmatpush.bf16.msrb.mxu1 %v16407_v28  ;;  %v3946_v23 = vpop.f32.mrf.mxu1  ;;  %v4125_v28 = vadd.f32 %v4124_v26, %v4091_v50 }
 0xa90   :  { %v14629_v3 = vadd.f32 %v3946_v23, %v16408_v39  ;;  %v4169_v23 = vpop.f32.mrf.mxu3  ;;  %v4127_v39 = vadd.f32 %v4126_v58, %v4093_v38  ;;  %v4106_v54 = vpop.f32.mrf.mxu0  ;;  %v4132_v38 = vadd.f32 %v4131_v1, %v4098_v15 }
 0xa92   :  { %16409 = vst [vmem:[#allocation11_spill] sm:$0xff] %v14629_v3  ;;  %4500 = vmatmul.bf16.gmra.mxu1 %v10043_v5  ;;  %v4158_v5 = vadd.f32 %v4157_v25, %v4125_v28  ;;  %v4160_v3 = vadd.f32 %v4159_v51, %v4127_v39  ;;  %v4130_v25 = vadd.f32 %v4129_v2, %v4096_v62  ;;  %v4141_v51 = vpop.f32.mrf.mxu2  ;;  %v11626_v2 = vld [vmem:[%s16311_s30 + $0x634] sm:$0xf]  ;;  %v10108_v62 = vld [vmem:[%s16311_s30 + $0x640] sm:$0xf0] }
 0xa93   :  { %v10111_v1 = vor.u32 %v11626_v2, %v10108_v62 }
 0xa97   :  { %v3948_v42 = vpop.f32.mrf.mxu1 }
 0xa98   :  { %v14640_v42 = vld [vmem:[%s16311_s30 + $0x628] sm:$0xff]  ;;  %v4172_v41 = vpop.f32.mrf.mxu3  ;;  %v4108_v58 = vpop.f32.mrf.mxu0 }
 0xa99   :  { %v4364_v21 = vunpack.c.l.b16 %v14640_v42 }
 0xa9b   :  { %v4384_v50 = vpack.c.b16 %v4364_v21, %v4364_v21 }
 0xa9f   :  { %v4190_v24 = vpop.f32.mrf.mxu1 }
 0xaa0   :  { %v4191_v9 = vadd.f32 %v4190_v24, %v4158_v5  ;;  %v4174_v28 = vpop.f32.mrf.mxu3  ;;  %v4111_v39 = vpop.f32.mrf.mxu0 }
 0xaa1   :  { %v4144_v5 = vpop.f32.mrf.mxu2 }
 0xaa2   :  { %4505 = vmatmul.bf16.gmra.mxu1 %v10059_v45 }
 0xaa7   :  { %v4192_v36 = vpop.f32.mrf.mxu1 }
 0xaa8   :  { %v4193_v16 = vadd.f32 %v4192_v36, %v4160_v3  ;;  %v4163_v36 = vadd.f32 %v4162_v14, %v4130_v25  ;;  %v4177_v14 = vpop.f32.mrf.mxu3  ;;  %v4113_v21 = vpop.f32.mrf.mxu0 }
 0xaaa   :  { %v4214_v46 = vpack.c.bf16 %v4193_v16, %v4191_v9  ;;  %v4165_v16 = vadd.f32 %v4164_v7, %v4132_v38  ;;  %v4135_v7 = vadd.f32 %v4134_v0, %v4101_v32  ;;  %v11630_v32 = vld [vmem:[%s16311_s30 + $0x654] sm:$0xf]  ;;  %v10124_v0 = vld [vmem:[%s16311_s30 + $0x660] sm:$0xf0] }
 0xaac   :  { %9977 = vmatmul.msk.bf16.vlgmr.msra.gmra.mxu0 %vm1512_vm3, %v4214_v46  ;;  %v4137_v46 = vadd.f32 %v4136_v37, %v4103_v43  ;;  %v4140_v37 = vadd.f32 %v4139_v6, %v4106_v54  ;;  %v11634_v6 = vld [vmem:[%s16311_s30 + $0x674] sm:$0xf]  ;;  %v10140_v54 = vld [vmem:[%s16311_s30 + $0x680] sm:$0xf0] }
 0xaad   :  { %4816 = vmatpush.bf16.msra.mxu0 %v12560_v48 }
 0xaae   :  { %v4170_v38 = vadd.f32 %v4169_v23, %v4137_v46  ;;  %v4142_v23 = vadd.f32 %v4141_v51, %v4108_v58  ;;  %v4173_v62 = vadd.f32 %v4172_v41, %v4140_v37  ;;  %v4145_v58 = vadd.f32 %v4144_v5, %v4111_v39  ;;  %v11638_v39 = vld [vmem:[%s16311_s30 + $0x694] sm:$0xf]  ;;  %v10156_v5 = vld [vmem:[%s16311_s30 + $0x6a0] sm:$0xf0]  ;;  %v10050_v37 = vld [vmem:[%s16311_s30 + $0x600] sm:$0xf] }
 0xaaf   :  { %v4195_v26 = vpop.f32.mrf.mxu1  ;;  %v10143_v51 = vor.u32 %v11634_v6, %v10140_v54  ;;  %v4362_v6 = vunpack.c.l.b16 %v14519_v56 }
 0xab0   :  { %v4196_v3 = vadd.f32 %v4195_v26, %v4163_v36  ;;  %v4168_v26 = vadd.f32 %v4167_v27, %v4135_v7  ;;  %v4179_v25 = vpop.f32.mrf.mxu3  ;;  %v10127_v27 = vor.u32 %v11630_v32, %v10124_v0  ;;  %v4178_v41 = vadd.f32 %v4177_v14, %v4145_v58  ;;  %v11661_v14 = vld [vmem:[%s16312_s4 + $0xc8] sm:$0xff]  ;;  %v10012_v0 = vld [vmem:[%s16311_s30 + $0x5b8] sm:$0xf0] }
 0xab1   :  { %4817 = vmatpush.bf16.msra.mxu0 %v12576_v52  ;;  %v11609_v32 = vld [vmem:[%s16311_s30 + $0x5ac] sm:$0xf]  ;;  %v4382_v54 = vpack.c.b16 %v4362_v6, %v4362_v6  ;;  %v16413_v6 = vld [vmem:[#allocation5_spill] sm:$0xff] }
 0xab2   :  { %4510 = vmatmul.bf16.gmra.mxu1 %v4384_v50  ;;  %v4146_v50 = vpop.f32.mrf.mxu2  ;;  %v11617_v58 = vld [vmem:[%s16311_s30 + $0x5ec] sm:$0xf] }
 0xab5   :  { %4818 = vmatpush.bf16.msra.mxu0 %v12585_v60 }
 0xab7   :  { %v4197_v9 = vpop.f32.mrf.mxu1 }
 0xab8   :  { %v4198_v45 = vadd.f32 %v4197_v9, %v4165_v16 }
 0xab9   :  { %4819 = vmatpush.bf16.msra.mxu0 %v12597_v40 }
 0xaba   :  { %v4215_v24 = vpack.c.bf16 %v4198_v45, %v4196_v3  ;;  %v10018_v45 = vld [vmem:[%s16311_s30 + $0x5c0] sm:$0xf] }
 0xabc   :  { %9978 = vmatmul.msk.bf16.gmra.mxu0 %vm1512_vm3, %v4215_v24  ;;  %v11614_v24 = vld [vmem:[%s16311_s30 + $0x5cc] sm:$0xf0] }
 0xabd   :  { %4820 = vmatpush.bf16.msra.mxu0 %v12603_v17  ;;  %v10019_v2 = vor.u32 %v11614_v24, %v10018_v45 }
 0xabf   :  { %v4200_v15 = vpop.f32.mrf.mxu1  ;;  %4429 = vmatmul.bf16.gmra.mxu2 %v10019_v2 }
 0xac0   :  { %v4201_v16 = vadd.f32 %v4200_v15, %v4168_v26 }
 0xac1   :  { %4821 = vmatpush.bf16.msra.mxu0 %v12618_v30 }
 0xac2   :  { %4791 = vmatmul.bf16.vlgmr.msra.gmra.mxu1 %v10111_v1  ;;  %v4175_v1 = vadd.f32 %v4174_v28, %v4142_v23  ;;  %v11622_v23 = vld [vmem:[%s16311_s30 + $0x60c] sm:$0xf0] }
 0xac3   :  { %5259 = vmatpush.bf16.msra.mxu1 %v11661_v14  ;;  %v10051_v24 = vor.u32 %v11622_v23, %v10050_v37 }
 0xac5   :  { %4822 = vmatpush.bf16.msra.mxu0 %v12623_v33 }
 0xac7   :  { %v4202_v36 = vpop.f32.mrf.mxu1 }
 0xac8   :  { %v4203_v9 = vadd.f32 %v4202_v36, %v4170_v38  ;;  %v10034_v38 = vld [vmem:[%s16311_s30 + $0x5e0] sm:$0xf]  ;;  %v11618_v36 = vld [vmem:[%s16311_s30 + $0x5ec] sm:$0xf0] }
 0xac9   :  { %4823 = vmatpush.bf16.msra.mxu0 %v12455_v11 }
 0xaca   :  { %v4216_v3 = vpack.c.bf16 %v4203_v9, %v4201_v16  ;;  %v10035_v16 = vor.u32 %v11618_v36, %v10034_v38  ;;  %v10159_v9 = vor.u32 %v11638_v39, %v10156_v5 }
 0xacc   :  { %9979 = vmatmul.msk.bf16.gmra.mxu0 %vm1512_vm3, %v4216_v3  ;;  %v11660_v3 = vld [vmem:[%s16312_s4 + $0xc0] sm:$0xff] }
 0xacd   :  { %5260 = vmatpush.bf16.msra.mxu1 %v11660_v3 }
 0xacf   :  { %v4205_v43 = vpop.f32.mrf.mxu1  ;;  %4434 = vmatmul.bf16.gmra.mxu2 %v10035_v16  ;;  %v4365_v16 = vunpack.c.h.b16 %v14640_v42 }
 0xad0   :  { %v4206_v7 = vadd.f32 %v4205_v43, %v4173_v62  ;;  %v10015_v43 = vor.u32 %v11609_v32, %v10012_v0  ;;  %v11613_v62 = vld [vmem:[%s16311_s30 + $0x5cc] sm:$0xf] }
 0xad1   :  { %v4385_v39 = vpack.c.b16 %v4365_v16, %v4365_v16  ;;  %v11637_v16 = vld [vmem:[%s16311_s30 + $0x684] sm:$0xf0] }
 0xad2   :  { %4796 = vmatmul.bf16.gmra.mxu1 %v10127_v27  ;;  %v14707_v27 = vld [vmem:[%s16311_s30 + $0x6b0] sm:$0xff] }
 0xad3   :  { %v4697_v45 = vunpack.c.h.b16 %v14707_v27 }
 0xad5   :  { %v4717_v2 = vpack.c.b16 %v4697_v45, %v4697_v45 }
 0xad7   :  { %v4207_v15 = vpop.f32.mrf.mxu1 }
 0xad8   :  { %v4208_v46 = vadd.f32 %v4207_v15, %v4175_v1  ;;  %v10028_v1 = vld [vmem:[%s16311_s30 + $0x5d8] sm:$0xf0] }
 0xad9   :  { %v10031_v15 = vor.u32 %v11613_v62, %v10028_v1 }
 0xada   :  { %v4217_v21 = vpack.c.bf16 %v4208_v46, %v4206_v7  ;;  %v10210_v7 = vld [vmem:[%s16311_s30 + $0x6c0] sm:$0xf]  ;;  %v11646_v46 = vld [vmem:[%s16311_s30 + $0x6cc] sm:$0xf0] }
 0xadc   :  { %9980 = vmatmul.msk.bf16.gmra.mxu0 %vm1512_vm3, %v4217_v21  ;;  %v10211_v21 = vor.u32 %v11646_v46, %v10210_v7  ;;  %v16411_v46 = vld [vmem:[#allocation8_spill] sm:$0xff] }
 0xadf   :  { %v4210_v50 = vpop.f32.mrf.mxu1  ;;  %4439 = vmatmul.bf16.gmra.mxu2 %v10051_v24 }
 0xae0   :  { %v4211_v28 = vadd.f32 %v4210_v50, %v4178_v41  ;;  %v11621_v50 = vld [vmem:[%s16311_s30 + $0x60c] sm:$0xf]  ;;  %v10060_v41 = vld [vmem:[%s16311_s30 + $0x618] sm:$0xf0] }
 0xae2   :  { %4801 = vmatmul.bf16.gmra.mxu1 %v10143_v51  ;;  %v4218_v25 = vpack.c.bf16 %v4211_v28, %v4211_v28  ;;  %v10044_v51 = vld [vmem:[%s16311_s30 + $0x5f8] sm:$0xf0]  ;;  %v10063_v28 = vor.u32 %v11621_v50, %v10060_v41  ;;  %v16415_v50 = vld [vmem:[#allocation10_spill] sm:$0xff] }
 0xae3   :  { %v10047_v56 = vor.u32 %v11617_v58, %v10044_v51  ;;  %v16414_v51 = vld [vmem:[#allocation4_spill] sm:$0xff] }
 0xae7   :  { %v4212_v26 = vpop.f32.mrf.mxu1 }
 0xaec   :  { %9981 = vmatmul.msk.bf16.gmra.mxu0 %vm1512_vm3, %v4218_v25 }
 0xaef   :  { %4444 = vmatmul.bf16.gmra.mxu2 %v4382_v54 }
 0xaf2   :  { %4806 = vmatmul.bf16.gmra.mxu1 %v10159_v9 }
 0xafc   :  { %10064 = vmatmul.msk.bf16.vlgmr.msrb.gmra.mxu0 %vm1074_vm2, %v10015_v43  ;;  %v4458_v43 = vpop.f32.mrf.mxu3 }
 0xafd   :  { %5117 = vmatpush.bf16.msrb.mxu0 %v12427_v49 }
 0xb01   :  { %5118 = vmatpush.bf16.msrb.mxu0 %v12432_v61 }
 0xb02   :  { %4811 = vmatmul.bf16.gmra.mxu1 %v4717_v2  ;;  %v11633_v2 = vld [vmem:[%s16311_s30 + $0x664] sm:$0xf0] }
 0xb04   :  { %v4460_v24 = vpop.f32.mrf.mxu3 }
 0xb05   :  { %5119 = vmatpush.bf16.msrb.mxu0 %v12436_v63 }
 0xb09   :  { %5120 = vmatpush.bf16.msrb.mxu0 %v12380_v53 }
 0xb0c   :  { %10065 = vmatmul.msk.bf16.gmra.mxu0 %vm1074_vm2, %v10031_v15  ;;  %v16410_v15 = vld [vmem:[#allocation6_spill] sm:$0xff] }
 0xb0d   :  { %5121 = vmatpush.bf16.msrb.mxu0 %v12361_v34 }
 0xb11   :  { %5122 = vmatpush.bf16.msrb.mxu0 %v12344_v12 }
 0xb12   :  { %5092 = vmatmul.bf16.vlgmr.msrb.gmra.mxu1 %v10211_v21  ;;  %v4463_v21 = vpop.f32.mrf.mxu3 }
 0xb13   :  { %5520 = vmatpush.bf16.msrb.mxu1 %v12712_v20 }
 0xb15   :  { %5123 = vmatpush.bf16.msrb.mxu0 %v16324_v10 }
 0xb17   :  { %5521 = vmatpush.bf16.msrb.mxu1 %v12730_v59 }
 0xb19   :  { %5124 = vmatpush.bf16.msrb.mxu0 %v16326_v18 }
 0xb1b   :  { %5522 = vmatpush.bf16.msrb.mxu1 %v12738_v31 }
 0xb1c   :  { %10066 = vmatmul.msk.bf16.gmra.mxu0 %vm1074_vm2, %v10047_v56 }
 0xb1f   :  { %5523 = vmatpush.bf16.msrb.mxu1 %v12746_v44 }
 0xb23   :  { %5524 = vmatpush.bf16.msrb.mxu1 %v12775_v47 }
 0xb29   :  { %v4260_v26 = vpop.f32.mrf.mxu0 }
 0xb2a   :  { %v14758_v25 = vadd.f32 %v4260_v26, %v14576_v29  ;;  %v10114_v29 = vld [vmem:[%s16311_s30 + $0x638] sm:$0xf]  ;;  %v16417_v26 = vld [vmem:[#allocation3_spill] sm:$0xff] }
 0xb2c   :  { %10067 = vmatmul.msk.bf16.gmra.mxu0 %vm1074_vm2, %v10063_v28  ;;  %v4465_v28 = vpop.f32.mrf.mxu3 }
 0xb31   :  { %v4262_v38 = vpop.f32.mrf.mxu0 }
 0xb32   :  { %v14762_v36 = vadd.f32 %v4262_v38, %v14580_v19  ;;  %v11629_v19 = vld [vmem:[%s16311_s30 + $0x644] sm:$0xf0]  ;;  %v10146_v38 = vld [vmem:[%s16311_s30 + $0x678] sm:$0xf] }
 0xb33   :  { %v10115_v42 = vor.u32 %v11629_v19, %v10114_v29  ;;  %v16418_v29 = vld [vmem:[#allocation2_spill] sm:$0xff] }
 0xb39   :  { %v4265_v5 = vpop.f32.mrf.mxu0 }
 0xb3a   :  { %v14766_v14 = vadd.f32 %v4265_v5, %v14584_v4  ;;  %v4425_v4 = vpop.f32.mrf.mxu2 }
 0xb3c   :  { %10068 = vmatmul.msk.bf16.gmra.mxu0 %vm1074_vm2, %v4385_v39 }
 0xb41   :  { %v4267_v9 = vpop.f32.mrf.mxu0 }
 0xb42   :  { %v14770_v3 = vadd.f32 %v4267_v9, %v14588_v8  ;;  %v4491_v8 = vpop.f32.mrf.mxu1  ;;  %v4427_v45 = vpop.f32.mrf.mxu2  ;;  %v10147_v9 = vor.u32 %v11637_v16, %v10146_v38  ;;  %v4459_v16 = vadd.f32 %v4458_v43, %v4425_v4 }
 0xb49   :  { %v4270_v32 = vpop.f32.mrf.mxu0 }
 0xb4a   :  { %v14779_v0 = vadd.f32 %v4270_v32, %v14597_v55  ;;  %v10130_v55 = vld [vmem:[%s16311_s30 + $0x658] sm:$0xf]  ;;  %v4493_v62 = vpop.f32.mrf.mxu1  ;;  %v4430_v54 = vpop.f32.mrf.mxu2 }
 0xb4b   :  { %v10131_v1 = vor.u32 %v11633_v2, %v10130_v55 }
 0xb4c   :  { %4824 = vmatmul.bf16.vlgmr.msra.gmra.mxu0 %v10115_v42  ;;  %v16419_v42 = vld [vmem:[#allocation11_spill] sm:$0xff] }
 0xb4d   :  { %5418 = vmatpush.bf16.msra.mxu0 %v12280_v13 }
 0xb51   :  { %5419 = vmatpush.bf16.msra.mxu0 %v16338_v22  ;;  %v4272_v37 = vpop.f32.mrf.mxu0 }
 0xb52   :  { %v14784_v23 = vadd.f32 %v4272_v37, %v14602_v35  ;;  %v4496_v58 = vpop.f32.mrf.mxu1  ;;  %v4432_v39 = vpop.f32.mrf.mxu2 }
 0xb53   :  { %v4468_v37 = vpop.f32.mrf.mxu3 }
 0xb55   :  { %5420 = vmatpush.bf16.msra.mxu0 %v16341_v57 }
 0xb59   :  { %5421 = vmatpush.bf16.msra.mxu0 %v16410_v15  ;;  %v4275_v7 = vpop.f32.mrf.mxu0 }
 0xb5a   :  { %v14795_v35 = vadd.f32 %v4275_v7, %v16411_v46  ;;  %v4498_v5 = vpop.f32.mrf.mxu1  ;;  %v10162_v7 = vld [vmem:[%s16311_s30 + $0x698] sm:$0xf]  ;;  %v11641_v46 = vld [vmem:[%s16311_s30 + $0x6a4] sm:$0xf0] }
 0xb5c   :  { %16412 = vst [vmem:[#allocation17_spill] sm:$0xff] %v14795_v35  ;;  %4829 = vmatmul.bf16.gmra.mxu0 %v10131_v1  ;;  %v4435_v1 = vpop.f32.mrf.mxu2 }
 0xb5d   :  { %5422 = vmatpush.bf16.msra.mxu0 %v16413_v6 }
 0xb61   :  { %5423 = vmatpush.bf16.msra.mxu0 %v16414_v51  ;;  %v4277_v56 = vpop.f32.mrf.mxu0 }
 0xb62   :  { %v14800_v41 = vadd.f32 %v4277_v56, %v16415_v50  ;;  %v4501_v55 = vpop.f32.mrf.mxu1  ;;  %v10163_v56 = vor.u32 %v11641_v46, %v10162_v7  ;;  %v4470_v50 = vpop.f32.mrf.mxu3 }
 0xb64   :  { %16416 = vst [vmem:[#allocation15_spill] sm:$0xff] %v14800_v41  ;;  %v14822_v41 = vld [vmem:[%s16311_s30 + $0x6b8] sm:$0xff] }
 0xb65   :  { %5424 = vmatpush.bf16.msra.mxu0 %v16417_v26  ;;  %v4698_v7 = vunpack.c.l.b16 %v14822_v41 }
 0xb67   :  { %v4718_v43 = vpack.c.b16 %v4698_v7, %v4698_v7 }
 0xb69   :  { %5425 = vmatpush.bf16.msra.mxu0 %v16418_v29  ;;  %v4280_v19 = vpop.f32.mrf.mxu0 }
 0xb6a   :  { %v14811_v32 = vadd.f32 %v4280_v19, %v16419_v42  ;;  %v4503_v29 = vpop.f32.mrf.mxu1  ;;  %v4437_v19 = vpop.f32.mrf.mxu2  ;;  %v4461_v42 = vadd.f32 %v4460_v24, %v4427_v45  ;;  %v4464_v45 = vadd.f32 %v4463_v21, %v4430_v54  ;;  %v4466_v24 = vadd.f32 %v4465_v28, %v4432_v39  ;;  %v11644_v21 = vld [vmem:[%s16311_s30 + $0x6c4] sm:$0xf]  ;;  %v10212_v54 = vld [vmem:[%s16311_s30 + $0x6d0] sm:$0xf0] }
 0xb6b   :  { %v4473_v35 = vpop.f32.mrf.mxu3  ;;  %v10215_v39 = vor.u32 %v11644_v21, %v10212_v54  ;;  %v4471_v7 = vadd.f32 %v4470_v50, %v4437_v19 }
 0xb6c   :  { %16420 = vst [vmem:[#allocation9_spill] sm:$0xff] %v14811_v32  ;;  %4834 = vmatmul.bf16.gmra.mxu0 %v10147_v9  ;;  %v4492_v9 = vadd.f32 %v4491_v8, %v4459_v16  ;;  %v4494_v32 = vadd.f32 %v4493_v62, %v4461_v42 }
 0xb71   :  { %v4282_v2 = vpop.f32.mrf.mxu0 }
 0xb72   :  { %v4506_v46 = vpop.f32.mrf.mxu1  ;;  %v4440_v4 = vpop.f32.mrf.mxu2 }
 0xb73   :  { %v4475_v62 = vpop.f32.mrf.mxu3  ;;  %v4474_v19 = vadd.f32 %v4473_v35, %v4440_v4  ;;  %v10122_v35 = vld [vmem:[%s16311_s30 + $0x650] sm:$0xf] }
 0xb79   :  { %v4524_v38 = vpop.f32.mrf.mxu0 }
 0xb7a   :  { %v4525_v26 = vadd.f32 %v4524_v38, %v4492_v9 }
 0xb7b   :  { %v4478_v9 = vpop.f32.mrf.mxu3 }
 0xb7c   :  { %4839 = vmatmul.bf16.gmra.mxu0 %v10163_v56  ;;  %v4497_v56 = vadd.f32 %v4496_v58, %v4464_v45 }
 0xb81   :  { %v4526_v2 = vpop.f32.mrf.mxu0 }
 0xb82   :  { %v4527_v51 = vadd.f32 %v4526_v2, %v4494_v32  ;;  %v4508_v32 = vpop.f32.mrf.mxu1  ;;  %v4469_v2 = vadd.f32 %v4468_v37, %v4435_v1  ;;  %v11648_v37 = vld [vmem:[%s16311_s30 + $0x6e4] sm:$0xf]  ;;  %v10228_v1 = vld [vmem:[%s16311_s30 + $0x6f0] sm:$0xf0] }
 0xb84   :  { %v4548_v6 = vpack.c.bf16 %v4527_v51, %v4525_v26  ;;  %v4442_v51 = vpop.f32.mrf.mxu2  ;;  %v4499_v26 = vadd.f32 %v4498_v5, %v4466_v24 }
 0xb86   :  { %10081 = vmatmul.msk.bf16.vlgmr.msra.gmra.mxu2 %vm1512_vm3, %v4548_v6 }
 0xb87   :  { %5150 = vmatpush.bf16.msra.mxu2 %v12560_v48 }
 0xb89   :  { %v4529_v8 = vpop.f32.mrf.mxu0 }
 0xb8a   :  { %v4530_v16 = vadd.f32 %v4529_v8, %v4497_v56  ;;  %v4511_v58 = vpop.f32.mrf.mxu1  ;;  %v4502_v8 = vadd.f32 %v4501_v55, %v4469_v2  ;;  %v4504_v56 = vadd.f32 %v4503_v29, %v4471_v7  ;;  %v10231_v55 = vor.u32 %v11648_v37, %v10228_v1  ;;  %v11652_v7 = vld [vmem:[%s16311_s30 + $0x704] sm:$0xf]  ;;  %v11678_v37 = vld [vmem:[%s16312_s4 + $0xd0] sm:$0xff]  ;;  %v11627_v1 = vld [vmem:[%s16311_s30 + $0x63c] sm:$0xf] }
 0xb8b   :  { %5151 = vmatpush.bf16.msra.mxu2 %v12576_v52  ;;  %v4476_v29 = vadd.f32 %v4475_v62, %v4442_v51 }
 0xb8c   :  { %4844 = vmatmul.bf16.gmra.mxu0 %v4718_v43  ;;  %v4445_v28 = vpop.f32.mrf.mxu2  ;;  %v4480_v43 = vpop.f32.mrf.mxu3 }
 0xb8d   :  { %v4509_v21 = vadd.f32 %v4508_v32, %v4476_v29  ;;  %v10244_v43 = vld [vmem:[%s16311_s30 + $0x710] sm:$0xf0] }
 0xb8e   :  { %v10247_v4 = vor.u32 %v11652_v7, %v10244_v43  ;;  %v10314_v43 = vld [vmem:[%s16311_s30 + $0x750] sm:$0xf] }
 0xb8f   :  { %5152 = vmatpush.bf16.msra.mxu2 %v12585_v60 }
 0xb91   :  { %v4531_v38 = vpop.f32.mrf.mxu0 }
 0xb92   :  { %v4532_v42 = vadd.f32 %v4531_v38, %v4499_v26  ;;  %v4513_v45 = vpop.f32.mrf.mxu1 }
 0xb93   :  { %5153 = vmatpush.bf16.msra.mxu2 %v12597_v40 }
 0xb94   :  { %v4549_v6 = vpack.c.bf16 %v4532_v42, %v4530_v16  ;;  %v4447_v24 = vpop.f32.mrf.mxu2 }
 0xb96   :  { %10082 = vmatmul.msk.bf16.gmra.mxu2 %vm1512_vm3, %v4549_v6  ;;  %v4507_v6 = vadd.f32 %v4506_v46, %v4474_v19  ;;  %v11632_v46 = vld [vmem:[%s16311_s30 + $0x65c] sm:$0xf0] }
 0xb97   :  { %5154 = vmatpush.bf16.msra.mxu2 %v12603_v17  ;;  %v10123_v62 = vor.u32 %v11632_v46, %v10122_v35  ;;  %v11635_v46 = vld [vmem:[%s16311_s30 + $0x67c] sm:$0xf] }
 0xb99   :  { %v4534_v5 = vpop.f32.mrf.mxu0  ;;  %4763 = vmatmul.bf16.gmra.mxu3 %v10123_v62  ;;  %v4696_v62 = vunpack.c.l.b16 %v14707_v27  ;;  %v10164_v27 = vld [vmem:[%s16311_s30 + $0x6a8] sm:$0xf0] }
 0xb9a   :  { %v4535_v38 = vadd.f32 %v4534_v5, %v4502_v8  ;;  %v4479_v8 = vadd.f32 %v4478_v9, %v4445_v28  ;;  %v11656_v9 = vld [vmem:[%s16311_s30 + $0x724] sm:$0xf]  ;;  %v10260_v28 = vld [vmem:[%s16311_s30 + $0x730] sm:$0xf0] }
 0xb9b   :  { %5155 = vmatpush.bf16.msra.mxu2 %v12618_v30 }
 0xb9c   :  { %5125 = vmatmul.bf16.vlgmr.msrb.gmra.mxu0 %v10215_v39  ;;  %v4512_v51 = vadd.f32 %v4511_v58, %v4479_v8  ;;  %v10138_v58 = vld [vmem:[%s16311_s30 + $0x670] sm:$0xf]  ;;  %v11664_v8 = vld [vmem:[%s16311_s30 + $0x75c] sm:$0xf0] }
 0xb9d   :  { %v10315_v35 = vor.u32 %v11664_v8, %v10314_v43  ;;  %v16424_v43 = vld [vmem:[#allocation5_spill] sm:$0xff] }
 0xb9f   :  { %5156 = vmatpush.bf16.msra.mxu2 %v12623_v33 }
 0xba1   :  { %v4536_v26 = vpop.f32.mrf.mxu0 }
 0xba2   :  { %v4537_v16 = vadd.f32 %v4536_v26, %v4504_v56  ;;  %v11679_v26 = vld [vmem:[%s16312_s4 + $0xd8] sm:$0xff] }
 0xba3   :  { %5157 = vmatpush.bf16.msra.mxu2 %v12455_v11  ;;  %5593 = vmatpush.bf16.msrb.mxu0 %v11679_v26 }
 0xba4   :  { %v4550_v42 = vpack.c.bf16 %v4537_v16, %v4535_v38  ;;  %v11636_v38 = vld [vmem:[%s16311_s30 + $0x67c] sm:$0xf0]  ;;  %v10263_v16 = vor.u32 %v11656_v9, %v10260_v28  ;;  %v4699_v28 = vunpack.c.h.b16 %v14822_v41 }
 0xba6   :  { %10083 = vmatmul.msk.bf16.gmra.mxu2 %vm1512_vm3, %v4550_v42  ;;  %v10139_v42 = vor.u32 %v11636_v38, %v10138_v58  ;;  %v4719_v58 = vpack.c.b16 %v4699_v28, %v4699_v28 }
 0xba7   :  { %5594 = vmatpush.bf16.msrb.mxu0 %v11678_v37  ;;  %v10218_v37 = vld [vmem:[%s16311_s30 + $0x6c8] sm:$0xf] }
 0xba9   :  { %v4539_v50 = vpop.f32.mrf.mxu0  ;;  %4768 = vmatmul.bf16.gmra.mxu3 %v10139_v42 }
 0xbaa   :  { %v4540_v39 = vadd.f32 %v4539_v50, %v4507_v6  ;;  %v14889_v50 = vld [vmem:[%s16311_s30 + $0x740] sm:$0xff] }
 0xbab   :  { %v5031_v29 = vunpack.c.h.b16 %v14889_v50 }
 0xbac   :  { %5130 = vmatmul.bf16.gmra.mxu0 %v10231_v55  ;;  %v10116_v55 = vld [vmem:[%s16311_s30 + $0x648] sm:$0xf0] }
 0xbad   :  { %v10119_v19 = vor.u32 %v11627_v1, %v10116_v55  ;;  %v5051_v6 = vpack.c.b16 %v5031_v29, %v5031_v29  ;;  %v4792_v29 = vpop.f32.mrf.mxu1 }
 0xbb1   :  { %v4541_v54 = vpop.f32.mrf.mxu0 }
 0xbb2   :  { %v4542_v5 = vadd.f32 %v4541_v54, %v4509_v21  ;;  %v10154_v21 = vld [vmem:[%s16311_s30 + $0x690] sm:$0xf]  ;;  %v11640_v54 = vld [vmem:[%s16311_s30 + $0x69c] sm:$0xf0] }
 0xbb4   :  { %v4551_v2 = vpack.c.bf16 %v4542_v5, %v4540_v39  ;;  %v10155_v39 = vor.u32 %v11640_v54, %v10154_v21  ;;  %v11631_v5 = vld [vmem:[%s16311_s30 + $0x65c] sm:$0xf]  ;;  %v11651_v21 = vld [vmem:[%s16311_s30 + $0x6f4] sm:$0xf0] }
 0xbb6   :  { %10084 = vmatmul.msk.bf16.gmra.mxu2 %vm1512_vm3, %v4551_v2  ;;  %v10132_v2 = vld [vmem:[%s16311_s30 + $0x668] sm:$0xf0] }
 0xbb7   :  { %v10135_v7 = vor.u32 %v11631_v5, %v10132_v2  ;;  %v4794_v5 = vpop.f32.mrf.mxu1 }
 0xbb9   :  { %v4544_v32 = vpop.f32.mrf.mxu0  ;;  %4773 = vmatmul.bf16.gmra.mxu3 %v10155_v39 }
 0xbba   :  { %v4545_v45 = vadd.f32 %v4544_v32, %v4512_v51  ;;  %v4716_v51 = vpack.c.b16 %v4696_v62, %v4696_v62  ;;  %v16426_v62 = vld [vmem:[#allocation4_spill] sm:$0xff] }
 0xbbc   :  { %5135 = vmatmul.bf16.gmra.mxu0 %v10247_v4  ;;  %v4552_v56 = vpack.c.bf16 %v4545_v45, %v4545_v45  ;;  %v10148_v4 = vld [vmem:[%s16311_s30 + $0x688] sm:$0xf0]  ;;  %v11639_v45 = vld [vmem:[%s16311_s30 + $0x69c] sm:$0xf] }
 0xbbd   :  { %v10151_v32 = vor.u32 %v11635_v46, %v10148_v4 }
 0xbbf   :  { %v4797_v4 = vpop.f32.mrf.mxu1 }
 0xbc1   :  { %v4546_v24 = vpop.f32.mrf.mxu0 }
 0xbc2   :  { %v10167_v24 = vor.u32 %v11639_v45, %v10164_v27  ;;  %v10250_v45 = vld [vmem:[%s16311_s30 + $0x708] sm:$0xf]  ;;  %v11655_v27 = vld [vmem:[%s16311_s30 + $0x714] sm:$0xf0] }
 0xbc6   :  { %10085 = vmatmul.msk.bf16.gmra.mxu2 %vm1512_vm3, %v4552_v56 }
 0xbc9   :  { %4778 = vmatmul.bf16.gmra.mxu3 %v4716_v51 }
 0xbcc   :  { %5140 = vmatmul.bf16.gmra.mxu0 %v10263_v16 }
 0xbd6   :  { %10168 = vmatmul.msk.bf16.vlgmr.msrb.gmra.mxu2 %vm1074_vm2, %v10119_v19  ;;  %v4759_v19 = vpop.f32.mrf.mxu3 }
 0xbd7   :  { %5451 = vmatpush.bf16.msrb.mxu2 %v12427_v49 }
 0xbdb   :  { %5452 = vmatpush.bf16.msrb.mxu2 %v12432_v61 }
 0xbdc   :  { %5145 = vmatmul.bf16.gmra.mxu0 %v5051_v6  ;;  %v4825_v6 = vpop.f32.mrf.mxu0 }
 0xbde   :  { %v4761_v2 = vpop.f32.mrf.mxu3 }
 0xbdf   :  { %5453 = vmatpush.bf16.msrb.mxu2 %v12436_v63 }
 0xbe3   :  { %5454 = vmatpush.bf16.msrb.mxu2 %v12380_v53 }
 0xbe6   :  { %10169 = vmatmul.msk.bf16.gmra.mxu2 %vm1074_vm2, %v10135_v7  ;;  %v4827_v7 = vpop.f32.mrf.mxu0 }
 0xbe7   :  { %5455 = vmatpush.bf16.msrb.mxu2 %v12361_v34 }
 0xbeb   :  { %5456 = vmatpush.bf16.msrb.mxu2 %v12344_v12 }
 0xbec   :  { %5426 = vmatmul.bf16.vlgmr.msra.gmra.mxu0 %v10315_v35  ;;  %v16425_v35 = vld [vmem:[#allocation17_spill] sm:$0xff] }
 0xbed   :  { %5854 = vmatpush.bf16.msra.mxu0 %v12712_v20 }
 0xbee   :  { %v4830_v51 = vpop.f32.mrf.mxu0 }
 0xbef   :  { %5457 = vmatpush.bf16.msrb.mxu2 %v16324_v10 }
 0xbf1   :  { %5855 = vmatpush.bf16.msra.mxu0 %v12730_v59 }
 0xbf3   :  { %5458 = vmatpush.bf16.msrb.mxu2 %v16326_v18 }
 0xbf5   :  { %5856 = vmatpush.bf16.msra.mxu0 %v12738_v31 }
 0xbf6   :  { %10170 = vmatmul.msk.bf16.gmra.mxu2 %vm1074_vm2, %v10151_v32 }
 0xbf9   :  { %5857 = vmatpush.bf16.msra.mxu0 %v12746_v44 }
 0xbfd   :  { %5858 = vmatpush.bf16.msra.mxu0 %v12775_v47 }
 0xc06   :  { %10171 = vmatmul.msk.bf16.gmra.mxu2 %vm1074_vm2, %v10167_v24 }
 0xc09   :  { %v4594_v56 = vpop.f32.mrf.mxu2 }
 0xc0a   :  { %v14941_v9 = vadd.f32 %v4594_v56, %v14758_v25  ;;  %v11647_v25 = vld [vmem:[%s16311_s30 + $0x6d4] sm:$0xf0]  ;;  %v16428_v56 = vld [vmem:[#allocation15_spill] sm:$0xff] }
 0xc11   :  { %v4596_v26 = vpop.f32.mrf.mxu2 }
 0xc12   :  { %v14945_v38 = vadd.f32 %v4596_v26, %v14762_v36  ;;  %v10219_v36 = vor.u32 %v11647_v25, %v10218_v37  ;;  %v10251_v26 = vor.u32 %v11655_v27, %v10250_v45  ;;  %v4832_v25 = vpop.f32.mrf.mxu0 }
 0xc14   :  { %16421 = vst [vmem:[#allocation12_spill] sm:$0xff] %v14945_v38 }
 0xc16   :  { %10172 = vmatmul.msk.bf16.gmra.mxu2 %vm1074_vm2, %v4719_v58  ;;  %v16430_v58 = vld [vmem:[#allocation2_spill] sm:$0xff] }
 0xc19   :  { %v4599_v16 = vpop.f32.mrf.mxu2 }
 0xc1a   :  { %v14949_v42 = vadd.f32 %v4599_v16, %v14766_v14  ;;  %v4799_v16 = vpop.f32.mrf.mxu1 }
 0xc1c   :  { %v4764_v32 = vpop.f32.mrf.mxu3 }
 0xc21   :  { %v4601_v41 = vpop.f32.mrf.mxu2 }
 0xc22   :  { %v14958_v1 = vadd.f32 %v4601_v41, %v14770_v3  ;;  %v10234_v3 = vld [vmem:[%s16311_s30 + $0x6e8] sm:$0xf] }
 0xc24   :  { %16422 = vst [vmem:[#allocation13_spill] sm:$0xff] %v14958_v1  ;;  %v4766_v37 = vpop.f32.mrf.mxu3 }
 0xc26   :  { %5158 = vmatmul.bf16.vlgmr.msra.gmra.mxu2 %v10219_v36  ;;  %v16431_v36 = vld [vmem:[#allocation9_spill] sm:$0xff] }
 0xc27   :  { %5752 = vmatpush.bf16.msra.mxu2 %v12280_v13 }
 0xc29   :  { %v4604_v55 = vpop.f32.mrf.mxu2 }
 0xc2a   :  { %v14962_v14 = vadd.f32 %v4604_v55, %v14779_v0  ;;  %v10235_v0 = vor.u32 %v11651_v21, %v10234_v3  ;;  %v4802_v3 = vpop.f32.mrf.mxu1  ;;  %v10266_v21 = vld [vmem:[%s16311_s30 + $0x728] sm:$0xf] }
 0xc2b   :  { %5753 = vmatpush.bf16.msra.mxu2 %v16338_v22 }
 0xc2f   :  { %5754 = vmatpush.bf16.msra.mxu2 %v16341_v57 }
 0xc31   :  { %v4606_v54 = vpop.f32.mrf.mxu2 }
 0xc32   :  { %v14973_v39 = vadd.f32 %v4606_v54, %v14784_v23  ;;  %v16427_v23 = vld [vmem:[#allocation3_spill] sm:$0xff]  ;;  %v11659_v54 = vld [vmem:[%s16311_s30 + $0x734] sm:$0xf0]  ;;  %v4804_v27 = vpop.f32.mrf.mxu1 }
 0xc33   :  { %5755 = vmatpush.bf16.msra.mxu2 %v16410_v15  ;;  %v10267_v45 = vor.u32 %v11659_v54, %v10266_v21 }
 0xc34   :  { %16423 = vst [vmem:[#allocation7_spill] sm:$0xff] %v14973_v39 }
 0xc36   :  { %5163 = vmatmul.bf16.gmra.mxu2 %v10235_v0  ;;  %v4835_v0 = vpop.f32.mrf.mxu0 }
 0xc37   :  { %5756 = vmatpush.bf16.msra.mxu2 %v16424_v43 }
 0xc39   :  { %v4609_v8 = vpop.f32.mrf.mxu2 }
 0xc3a   :  { %v14978_v46 = vadd.f32 %v4609_v8, %v16425_v35  ;;  %v4769_v35 = vpop.f32.mrf.mxu3  ;;  %v4807_v54 = vpop.f32.mrf.mxu1 }
 0xc3b   :  { %5757 = vmatpush.bf16.msra.mxu2 %v16426_v62  ;;  %v4798_v62 = vadd.f32 %v4797_v4, %v4764_v32 }
 0xc3f   :  { %5758 = vmatpush.bf16.msra.mxu2 %v16427_v23 }
 0xc41   :  { %v4611_v24 = vpop.f32.mrf.mxu2 }
 0xc42   :  { %v14989_v28 = vadd.f32 %v4611_v24, %v16428_v56  ;;  %v4793_v56 = vadd.f32 %v4792_v29, %v4759_v19 }
 0xc43   :  { %5759 = vmatpush.bf16.msra.mxu2 %v16430_v58 }
 0xc44   :  { %16429 = vst [vmem:[#allocation16_spill] sm:$0xff] %v14989_v28  ;;  %v4795_v28 = vadd.f32 %v4794_v5, %v4761_v2  ;;  %v4826_v39 = vadd.f32 %v4825_v6, %v4793_v56  ;;  %v4800_v6 = vadd.f32 %v4799_v16, %v4766_v37  ;;  %v4809_v5 = vpop.f32.mrf.mxu1  ;;  %v4831_v2 = vadd.f32 %v4830_v51, %v4798_v62 }
 0xc45   :  { %v4803_v56 = vadd.f32 %v4802_v3, %v4769_v35 }
 0xc46   :  { %5168 = vmatmul.bf16.gmra.mxu2 %v10251_v26  ;;  %v4837_v26 = vpop.f32.mrf.mxu0  ;;  %v4828_v38 = vadd.f32 %v4827_v7, %v4795_v28  ;;  %v4833_v28 = vadd.f32 %v4832_v25, %v4800_v6  ;;  %v10332_v6 = vld [vmem:[%s16311_s30 + $0x780] sm:$0xf0] }
 0xc49   :  { %v4614_v41 = vpop.f32.mrf.mxu2 }
 0xc4a   :  { %v14993_v55 = vadd.f32 %v4614_v41, %v16431_v36  ;;  %v15004_v41 = vld [vmem:[%s16311_s30 + $0x748] sm:$0xff]  ;;  %v4771_v36 = vpop.f32.mrf.mxu3 }
 0xc4b   :  { %v5032_v1 = vunpack.c.l.b16 %v15004_v41  ;;  %v4805_v25 = vadd.f32 %v4804_v27, %v4771_v36 }
 0xc4c   :  { %16432 = vst [vmem:[#allocation14_spill] sm:$0xff] %v14993_v55  ;;  %v4812_v51 = vpop.f32.mrf.mxu1 }
 0xc4d   :  { %v5052_v21 = vpack.c.b16 %v5032_v1, %v5032_v1  ;;  %v10316_v1 = vld [vmem:[%s16311_s30 + $0x760] sm:$0xf0] }
 0xc4e   :  { %v4840_v23 = vpop.f32.mrf.mxu0 }
 0xc51   :  { %v4616_v8 = vpop.f32.mrf.mxu2 }
 0xc52   :  { %v4774_v19 = vpop.f32.mrf.mxu3 }
 0xc53   :  { %v4808_v36 = vadd.f32 %v4807_v54, %v4774_v19 }
 0xc56   :  { %5173 = vmatmul.bf16.gmra.mxu2 %v10267_v45  ;;  %v4842_v7 = vpop.f32.mrf.mxu0 }
 0xc59   :  { %v4858_v24 = vpop.f32.mrf.mxu2 }
 0xc5a   :  { %v4859_v8 = vadd.f32 %v4858_v24, %v4826_v39  ;;  %v4776_v39 = vpop.f32.mrf.mxu3 }
 0xc5e   :  { %v4845_v16 = vpop.f32.mrf.mxu0 }
 0xc61   :  { %v4860_v55 = vpop.f32.mrf.mxu2 }
 0xc62   :  { %v4861_v58 = vadd.f32 %v4860_v55, %v4828_v38  ;;  %v11662_v38 = vld [vmem:[%s16311_s30 + $0x754] sm:$0xf]  ;;  %v4779_v37 = vpop.f32.mrf.mxu3 }
 0xc63   :  { %v10319_v55 = vor.u32 %v11662_v38, %v10316_v1  ;;  %v4838_v38 = vadd.f32 %v4837_v26, %v4805_v25  ;;  %v10348_v26 = vld [vmem:[%s16311_s30 + $0x7a0] sm:$0xf0] }
 0xc64   :  { %v4882_v45 = vpack.c.bf16 %v4861_v58, %v4859_v8  ;;  %v4814_v8 = vpop.f32.mrf.mxu1 }
 0xc66   :  { %10185 = vmatmul.msk.bf16.vlgmr.msrb.gmra.mxu3 %vm1512_vm3, %v4882_v45  ;;  %5178 = vmatmul.bf16.gmra.mxu2 %v5052_v21  ;;  %v4836_v21 = vadd.f32 %v4835_v0, %v4803_v56  ;;  %v4847_v45 = vpop.f32.mrf.mxu0 }
 0xc67   :  { %5484 = vmatpush.bf16.msrb.mxu3 %v12560_v48 }
 0xc69   :  { %v4863_v29 = vpop.f32.mrf.mxu2 }
 0xc6a   :  { %v4864_v4 = vadd.f32 %v4863_v29, %v4831_v2  ;;  %v11666_v29 = vld [vmem:[%s16311_s30 + $0x774] sm:$0xf]  ;;  %v4781_v2 = vpop.f32.mrf.mxu3 }
 0xc6b   :  { %5485 = vmatpush.bf16.msrb.mxu3 %v12576_v52  ;;  %v11696_v2 = vld [vmem:[%s16312_s4 + $0xe0] sm:$0xff] }
 0xc6f   :  { %5486 = vmatpush.bf16.msrb.mxu3 %v12585_v60 }
 0xc71   :  { %v4865_v58 = vpop.f32.mrf.mxu2 }
 0xc72   :  { %v4866_v32 = vadd.f32 %v4865_v58, %v4833_v28  ;;  %v10335_v28 = vor.u32 %v11666_v29, %v10332_v6  ;;  %v4810_v58 = vadd.f32 %v4809_v5, %v4776_v39  ;;  %v11674_v5 = vld [vmem:[%s16311_s30 + $0x7b4] sm:$0xf]  ;;  %v10226_v39 = vld [vmem:[%s16311_s30 + $0x6e0] sm:$0xf] }
 0xc73   :  { %5487 = vmatpush.bf16.msrb.mxu3 %v12597_v40 }
 0xc74   :  { %v4883_v62 = vpack.c.bf16 %v4866_v32, %v4864_v4  ;;  %v4841_v4 = vadd.f32 %v4840_v23, %v4808_v36  ;;  %v11670_v32 = vld [vmem:[%s16311_s30 + $0x794] sm:$0xf] }
 0xc75   :  { %v10351_v25 = vor.u32 %v11670_v32, %v10348_v26  ;;  %v11658_v32 = vld [vmem:[%s16311_s30 + $0x72c] sm:$0xf0]  ;;  %v11649_v26 = vld [vmem:[%s16311_s30 + $0x6ec] sm:$0xf] }
 0xc76   :  { %10186 = vmatmul.msk.bf16.gmra.mxu3 %vm1512_vm3, %v4883_v62  ;;  %5459 = vmatmul.bf16.vlgmr.msrb.gmra.mxu2 %v10319_v55  ;;  %v4843_v55 = vadd.f32 %v4842_v7, %v4810_v58  ;;  %v10364_v7 = vld [vmem:[%s16311_s30 + $0x7c0] sm:$0xf0] }
 0xc77   :  { %5488 = vmatpush.bf16.msrb.mxu3 %v12603_v17  ;;  %v10367_v6 = vor.u32 %v11674_v5, %v10364_v7 }
 0xc79   :  { %v4868_v24 = vpop.f32.mrf.mxu2 }
 0xc7a   :  { %v4869_v3 = vadd.f32 %v4868_v24, %v4836_v21  ;;  %v4813_v21 = vadd.f32 %v4812_v51, %v4779_v37  ;;  %v11650_v51 = vld [vmem:[%s16311_s30 + $0x6ec] sm:$0xf0] }
 0xc7b   :  { %5489 = vmatpush.bf16.msrb.mxu3 %v12618_v30  ;;  %v10227_v37 = vor.u32 %v11650_v51, %v10226_v39 }
 0xc7c   :  { %v4846_v23 = vadd.f32 %v4845_v16, %v4813_v21  ;;  %v11697_v16 = vld [vmem:[%s16312_s4 + $0xe8] sm:$0xff] }
 0xc7d   :  { %5927 = vmatpush.bf16.msrb.mxu2 %v11697_v16  ;;  %5097 = vmatmul.bf16.gmra.mxu1 %v10227_v37  ;;  %v11653_v21 = vld [vmem:[%s16311_s30 + $0x70c] sm:$0xf]  ;;  %v10322_v37 = vld [vmem:[%s16311_s30 + $0x758] sm:$0xf] }
 0xc7f   :  { %5490 = vmatpush.bf16.msrb.mxu3 %v12623_v33 }
 0xc81   :  { %v4870_v1 = vpop.f32.mrf.mxu2  ;;  %5928 = vmatpush.bf16.msrb.mxu2 %v11696_v2  ;;  %v5093_v2 = vpop.f32.mrf.mxu1 }
 0xc82   :  { %v4871_v35 = vadd.f32 %v4870_v1, %v4838_v38  ;;  %v15059_v38 = vld [vmem:[%s16311_s30 + $0x7d0] sm:$0xff]  ;;  %v11645_v1 = vld [vmem:[%s16311_s30 + $0x6cc] sm:$0xf] }
 0xc83   :  { %5491 = vmatpush.bf16.msrb.mxu3 %v12455_v11 }
 0xc84   :  { %v4884_v0 = vpack.c.bf16 %v4871_v35, %v4869_v3  ;;  %v5365_v3 = vunpack.c.h.b16 %v15059_v38  ;;  %v10220_v35 = vld [vmem:[%s16311_s30 + $0x6d8] sm:$0xf0] }
 0xc85   :  { %v10223_v36 = vor.u32 %v11645_v1, %v10220_v35 }
 0xc86   :  { %10187 = vmatmul.msk.bf16.gmra.mxu3 %vm1512_vm3, %v4884_v0  ;;  %5464 = vmatmul.bf16.gmra.mxu2 %v10335_v28  ;;  %v10242_v28 = vld [vmem:[%s16311_s30 + $0x700] sm:$0xf]  ;;  %v11654_v0 = vld [vmem:[%s16311_s30 + $0x70c] sm:$0xf0]  ;;  %v5385_v58 = vpack.c.b16 %v5365_v3, %v5365_v3 }
 0xc89   :  { %v4873_v27 = vpop.f32.mrf.mxu2 }
 0xc8a   :  { %v4874_v24 = vadd.f32 %v4873_v27, %v4841_v4  ;;  %v10243_v27 = vor.u32 %v11654_v0, %v10242_v28  ;;  %v10258_v4 = vld [vmem:[%s16311_s30 + $0x720] sm:$0xf]  ;;  %v5095_v0 = vpop.f32.mrf.mxu1 }
 0xc8d   :  { %5102 = vmatmul.bf16.gmra.mxu1 %v10243_v27 }
 0xc91   :  { %v4875_v62 = vpop.f32.mrf.mxu2 }
 0xc92   :  { %v4876_v56 = vadd.f32 %v4875_v62, %v4843_v55  ;;  %v10259_v55 = vor.u32 %v11658_v32, %v10258_v4  ;;  %v10236_v62 = vld [vmem:[%s16311_s30 + $0x6f8] sm:$0xf0]  ;;  %v16435_v32 = vld [vmem:[#allocation2_spill] sm:$0xff] }
 0xc94   :  { %v4885_v8 = vpack.c.bf16 %v4876_v56, %v4874_v24  ;;  %v10418_v24 = vld [vmem:[%s16311_s30 + $0x7e0] sm:$0xf]  ;;  %v11682_v56 = vld [vmem:[%s16311_s30 + $0x7ec] sm:$0xf0] }
 0xc96   :  { %10188 = vmatmul.msk.bf16.gmra.mxu3 %vm1512_vm3, %v4885_v8  ;;  %5469 = vmatmul.bf16.gmra.mxu2 %v10351_v25  ;;  %v10239_v25 = vor.u32 %v11649_v26, %v10236_v62  ;;  %v10419_v8 = vor.u32 %v11682_v56, %v10418_v24 }
 0xc99   :  { %v4878_v54 = vpop.f32.mrf.mxu2 }
 0xc9a   :  { %v4879_v19 = vadd.f32 %v4878_v54, %v4846_v23  ;;  %v10252_v54 = vld [vmem:[%s16311_s30 + $0x718] sm:$0xf0] }
 0xc9b   :  { %v10255_v23 = vor.u32 %v11653_v21, %v10252_v54 }
 0xc9c   :  { %v4886_v29 = vpack.c.bf16 %v4879_v19, %v4879_v19  ;;  %v10268_v19 = vld [vmem:[%s16311_s30 + $0x738] sm:$0xf0] }
 0xc9d   :  { %5107 = vmatmul.bf16.gmra.mxu1 %v10259_v55 }
 0xca1   :  { %v4880_v45 = vpop.f32.mrf.mxu2 }
 0xca6   :  { %10189 = vmatmul.msk.bf16.gmra.mxu3 %vm1512_vm3, %v4886_v29  ;;  %5474 = vmatmul.bf16.gmra.mxu2 %v10367_v6 }
 0xca9   :  { %v5159_v1 = vpop.f32.mrf.mxu2 }
 0xcb1   :  { %v5161_v28 = vpop.f32.mrf.mxu2 }
 0xcb6   :  { %10272 = vmatmul.msk.bf16.vlgmr.msra.gmra.mxu3 %vm1074_vm2, %v10223_v36  ;;  %5479 = vmatmul.bf16.gmra.mxu2 %v5385_v58  ;;  %v16433_v36 = vld [vmem:[#allocation4_spill] sm:$0xff]  ;;  %v16434_v58 = vld [vmem:[#allocation3_spill] sm:$0xff] }
 0xcb7   :  { %5785 = vmatpush.bf16.msra.mxu3 %v12427_v49 }
 0xcbb   :  { %5786 = vmatpush.bf16.msra.mxu3 %v12432_v61 }
 0xcbf   :  { %5787 = vmatpush.bf16.msra.mxu3 %v12436_v63 }
 0xcc3   :  { %5788 = vmatpush.bf16.msra.mxu3 %v12380_v53 }
 0xcc6   :  { %10273 = vmatmul.msk.bf16.gmra.mxu3 %vm1074_vm2, %v10239_v25  ;;  %5760 = vmatmul.bf16.vlgmr.msra.gmra.mxu2 %v10419_v8 }
 0xcc7   :  { %5789 = vmatpush.bf16.msra.mxu3 %v12361_v34  ;;  %6188 = vmatpush.bf16.msra.mxu2 %v12712_v20  ;;  %v5030_v20 = vunpack.c.l.b16 %v14889_v50  ;;  %v5033_v50 = vunpack.c.h.b16 %v15004_v41 }
 0xcc9   :  { %v5053_v39 = vpack.c.b16 %v5033_v50, %v5033_v50 }
 0xccb   :  { %5790 = vmatpush.bf16.msra.mxu3 %v12344_v12  ;;  %6189 = vmatpush.bf16.msra.mxu2 %v12730_v59  ;;  %v5050_v59 = vpack.c.b16 %v5030_v20, %v5030_v20 }
 0xccd   :  { %5112 = vmatmul.bf16.gmra.mxu1 %v5050_v59 }
 0xccf   :  { %5791 = vmatpush.bf16.msra.mxu3 %v16324_v10  ;;  %6190 = vmatpush.bf16.msra.mxu2 %v12738_v31  ;;  %v11657_v31 = vld [vmem:[%s16311_s30 + $0x72c] sm:$0xf] }
 0xcd0   :  { %v10271_v5 = vor.u32 %v11657_v31, %v10268_v19 }
 0xcd3   :  { %5792 = vmatpush.bf16.msra.mxu3 %v16326_v18  ;;  %6191 = vmatpush.bf16.msra.mxu2 %v12746_v44 }
 0xcd6   :  { %10274 = vmatmul.msk.bf16.gmra.mxu3 %vm1074_vm2, %v10255_v23 }
 0xcd7   :  { %6192 = vmatpush.bf16.msra.mxu2 %v12775_v47 }
 0xce6   :  { %10275 = vmatmul.msk.bf16.gmra.mxu3 %vm1074_vm2, %v10271_v5 }
 0xce9   :  { %v4928_v44 = vpop.f32.mrf.mxu3 }
 0xcea   :  { %v15123_v7 = vadd.f32 %v4928_v44, %v14941_v9  ;;  %v11665_v9 = vld [vmem:[%s16311_s30 + $0x764] sm:$0xf0] }
 0xceb   :  { %v10323_v41 = vor.u32 %v11665_v9, %v10322_v37 }
 0xcf1   :  { %v15126_v47 = vpop.f32.mrf.mxu3 }
 0xcf6   :  { %10276 = vmatmul.msk.bf16.gmra.mxu3 %vm1074_vm2, %v5053_v39 }
 0xcf9   :  { %v4933_v51 = vpop.f32.mrf.mxu3 }
 0xcfa   :  { %v15130_v16 = vadd.f32 %v4933_v51, %v14949_v42  ;;  %v5126_v42 = vpop.f32.mrf.mxu0 }
 0xcfb   :  { %v5127_v23 = vadd.f32 %v5126_v42, %v5093_v2 }
 0xcfd   :  { %v5160_v19 = vadd.f32 %v5159_v1, %v5127_v23 }
 0xd01   :  { %v15138_v45 = vpop.f32.mrf.mxu3 }
 0xd02   :  { %v5128_v35 = vpop.f32.mrf.mxu0 }
 0xd03   :  { %v5129_v31 = vadd.f32 %v5128_v35, %v5095_v0 }
 0xd05   :  { %v5162_v5 = vadd.f32 %v5161_v28, %v5129_v31 }
 0xd06   :  { %5492 = vmatmul.bf16.vlgmr.msrb.gmra.mxu3 %v10323_v41 }
 0xd07   :  { %6086 = vmatpush.bf16.msrb.mxu3 %v12280_v13 }
 0xd09   :  { %v4938_v29 = vpop.f32.mrf.mxu3 }
 0xd0a   :  { %v15142_v6 = vadd.f32 %v4938_v29, %v14962_v14  ;;  %v5131_v27 = vpop.f32.mrf.mxu0 }
 0xd0b   :  { %6087 = vmatpush.bf16.msrb.mxu3 %v16338_v22  ;;  %v5164_v22 = vpop.f32.mrf.mxu2 }
 0xd0f   :  { %6088 = vmatpush.bf16.msrb.mxu3 %v16341_v57  ;;  %v5098_v57 = vpop.f32.mrf.mxu1 }
 0xd11   :  { %v15146_v3 = vpop.f32.mrf.mxu3 }
 0xd13   :  { %6089 = vmatpush.bf16.msrb.mxu3 %v16410_v15  ;;  %v5133_v15 = vpop.f32.mrf.mxu0  ;;  %v5166_v55 = vpop.f32.mrf.mxu2 }
 0xd17   :  { %6090 = vmatpush.bf16.msrb.mxu3 %v16424_v43  ;;  %v5100_v26 = vpop.f32.mrf.mxu1  ;;  %v16436_v43 = vld [vmem:[#allocation14_spill] sm:$0xff] }
 0xd18   :  { %v5134_v42 = vadd.f32 %v5133_v15, %v5100_v26 }
 0xd19   :  { %v4943_v13 = vpop.f32.mrf.mxu3 }
 0xd1a   :  { %v15151_v14 = vadd.f32 %v4943_v13, %v14978_v46  ;;  %v5132_v13 = vadd.f32 %v5131_v27, %v5098_v57  ;;  %v5167_v0 = vadd.f32 %v5166_v55, %v5134_v42 }
 0xd1b   :  { %6091 = vmatpush.bf16.msrb.mxu3 %v16433_v36  ;;  %v5136_v46 = vpop.f32.mrf.mxu0  ;;  %v5169_v56 = vpop.f32.mrf.mxu2 }
 0xd1c   :  { %v5165_v35 = vadd.f32 %v5164_v22, %v5132_v13 }
 0xd1f   :  { %6092 = vmatpush.bf16.msrb.mxu3 %v16434_v58  ;;  %v5103_v8 = vpop.f32.mrf.mxu1 }
 0xd20   :  { %v5137_v22 = vadd.f32 %v5136_v46, %v5103_v8  ;;  %v10338_v46 = vld [vmem:[%s16311_s30 + $0x778] sm:$0xf] }
 0xd21   :  { %v15155_v4 = vpop.f32.mrf.mxu3 }
 0xd22   :  { %v5170_v55 = vadd.f32 %v5169_v56, %v5137_v22  ;;  %v11669_v56 = vld [vmem:[%s16311_s30 + $0x784] sm:$0xf0]  ;;  %v11663_v22 = vld [vmem:[%s16311_s30 + $0x75c] sm:$0xf] }
 0xd23   :  { %6093 = vmatpush.bf16.msrb.mxu3 %v16435_v32  ;;  %v5138_v21 = vpop.f32.mrf.mxu0  ;;  %v5171_v20 = vpop.f32.mrf.mxu2  ;;  %v10339_v8 = vor.u32 %v11669_v56, %v10338_v46 }
 0xd25   :  { %5497 = vmatmul.bf16.gmra.mxu3 %v10339_v8 }
 0xd27   :  { %v5105_v59 = vpop.f32.mrf.mxu1 }
 0xd28   :  { %v5139_v26 = vadd.f32 %v5138_v21, %v5105_v59 }
 0xd29   :  { %v4948_v62 = vpop.f32.mrf.mxu3 }
 0xd2a   :  { %v15159_v24 = vadd.f32 %v4948_v62, %v16436_v43  ;;  %v5172_v31 = vadd.f32 %v5171_v20, %v5139_v26  ;;  %v10324_v26 = vld [vmem:[%s16311_s30 + $0x768] sm:$0xf0] }
 0xd2b   :  { %v5141_v51 = vpop.f32.mrf.mxu0  ;;  %v5174_v9 = vpop.f32.mrf.mxu2 }
 0xd2f   :  { %v5108_v41 = vpop.f32.mrf.mxu1 }
 0xd30   :  { %v5142_v20 = vadd.f32 %v5141_v51, %v5108_v41 }
 0xd31   :  { %v4950_v25 = vpop.f32.mrf.mxu3 }
 0xd33   :  { %v5143_v2 = vpop.f32.mrf.mxu0  ;;  %v5176_v1 = vpop.f32.mrf.mxu2 }
 0xd37   :  { %v5110_v28 = vpop.f32.mrf.mxu1 }
 0xd38   :  { %v5144_v59 = vadd.f32 %v5143_v2, %v5110_v28  ;;  %v10354_v28 = vld [vmem:[%s16311_s30 + $0x798] sm:$0xf] }
 0xd39   :  { %v5192_v54 = vpop.f32.mrf.mxu3 }
 0xd3a   :  { %v5193_v50 = vadd.f32 %v5192_v54, %v5160_v19 }
 0xd3b   :  { %v5146_v43 = vpop.f32.mrf.mxu0  ;;  %v5179_v27 = vpop.f32.mrf.mxu2 }
 0xd41   :  { %v5194_v44 = vpop.f32.mrf.mxu3 }
 0xd42   :  { %v5195_v39 = vadd.f32 %v5194_v44, %v5162_v5 }
 0xd43   :  { %v5148_v25 = vpop.f32.mrf.mxu0  ;;  %v5181_v54 = vpop.f32.mrf.mxu2 }
 0xd44   :  { %v5216_v37 = vpack.c.bf16 %v5195_v39, %v5193_v50  ;;  %v5175_v39 = vadd.f32 %v5174_v9, %v5142_v20  ;;  %v10327_v25 = vor.u32 %v11663_v22, %v10324_v26  ;;  %v11677_v54 = vld [vmem:[%s16311_s30 + $0x7c4] sm:$0xf0] }
 0xd46   :  { %10289 = vmatmul.msk.bf16.vlgmr.msra.gmra.mxu1 %vm1512_vm3, %v5216_v37  ;;  %v5177_v37 = vadd.f32 %v5176_v1, %v5144_v59 }
 0xd47   :  { %5818 = vmatpush.bf16.msra.mxu1 %v12560_v48 }
 0xd49   :  { %v5197_v29 = vpop.f32.mrf.mxu3 }
 0xd4a   :  { %v5198_v58 = vadd.f32 %v5197_v29, %v5165_v35  ;;  %v5113_v57 = vpop.f32.mrf.mxu1 }
 0xd4b   :  { %5819 = vmatpush.bf16.msra.mxu1 %v12576_v52 }
 0xd4f   :  { %5820 = vmatpush.bf16.msra.mxu1 %v12585_v60 }
 0xd51   :  { %v5199_v36 = vpop.f32.mrf.mxu3 }
 0xd52   :  { %v5200_v32 = vadd.f32 %v5199_v36, %v5167_v0  ;;  %v5115_v23 = vpop.f32.mrf.mxu1  ;;  %v5147_v0 = vadd.f32 %v5146_v43, %v5113_v57  ;;  %v10330_v36 = vld [vmem:[%s16311_s30 + $0x770] sm:$0xf]  ;;  %v11672_v57 = vld [vmem:[%s16311_s30 + $0x79c] sm:$0xf0] }
 0xd53   :  { %5821 = vmatpush.bf16.msra.mxu1 %v12597_v40 }
 0xd54   :  { %v5217_v62 = vpack.c.bf16 %v5200_v32, %v5198_v58  ;;  %v11668_v58 = vld [vmem:[%s16311_s30 + $0x77c] sm:$0xf0]  ;;  %v5180_v41 = vadd.f32 %v5179_v27, %v5147_v0  ;;  %v10346_v27 = vld [vmem:[%s16311_s30 + $0x790] sm:$0xf] }
 0xd55   :  { %v10331_v32 = vor.u32 %v11668_v58, %v10330_v36  ;;  %v5460_v36 = vpop.f32.mrf.mxu2 }
 0xd56   :  { %10290 = vmatmul.msk.bf16.gmra.mxu1 %vm1512_vm3, %v5217_v62  ;;  %v11673_v62 = vld [vmem:[%s16311_s30 + $0x7a4] sm:$0xf0] }
 0xd57   :  { %5822 = vmatpush.bf16.msra.mxu1 %v12603_v17  ;;  %5431 = vmatmul.bf16.gmra.mxu0 %v10331_v32  ;;  %v10355_v43 = vor.u32 %v11673_v62, %v10354_v28 }
 0xd59   :  { %v5202_v15 = vpop.f32.mrf.mxu3  ;;  %5502 = vmatmul.bf16.gmra.mxu3 %v10355_v43 }
 0xd5a   :  { %v5203_v5 = vadd.f32 %v5202_v15, %v5170_v55  ;;  %v10347_v15 = vor.u32 %v11672_v57, %v10346_v27  ;;  %v10370_v55 = vld [vmem:[%s16311_s30 + $0x7b8] sm:$0xf] }
 0xd5b   :  { %5823 = vmatpush.bf16.msra.mxu1 %v12618_v30  ;;  %v10371_v23 = vor.u32 %v11677_v54, %v10370_v55 }
 0xd5f   :  { %5824 = vmatpush.bf16.msra.mxu1 %v12623_v33 }
 0xd61   :  { %v5204_v19 = vpop.f32.mrf.mxu3 }
 0xd62   :  { %v5205_v44 = vadd.f32 %v5204_v19, %v5172_v31  ;;  %v10362_v31 = vld [vmem:[%s16311_s30 + $0x7b0] sm:$0xf]  ;;  %v11676_v19 = vld [vmem:[%s16311_s30 + $0x7bc] sm:$0xf0] }
 0xd63   :  { %5825 = vmatpush.bf16.msra.mxu1 %v12455_v11 }
 0xd64   :  { %v5218_v50 = vpack.c.bf16 %v5205_v44, %v5203_v5  ;;  %v10363_v5 = vor.u32 %v11676_v19, %v10362_v31  ;;  %v11667_v44 = vld [vmem:[%s16311_s30 + $0x77c] sm:$0xf] }
 0xd66   :  { %10291 = vmatmul.msk.bf16.gmra.mxu1 %vm1512_vm3, %v5218_v50  ;;  %v10340_v50 = vld [vmem:[%s16311_s30 + $0x788] sm:$0xf0] }
 0xd67   :  { %5436 = vmatmul.bf16.gmra.mxu0 %v10347_v15  ;;  %v10343_v46 = vor.u32 %v11667_v44, %v10340_v50 }
 0xd69   :  { %v5207_v21 = vpop.f32.mrf.mxu3  ;;  %5507 = vmatmul.bf16.gmra.mxu3 %v10371_v23 }
 0xd6a   :  { %v5208_v13 = vadd.f32 %v5207_v21, %v5175_v39 }
 0xd71   :  { %v5209_v29 = vpop.f32.mrf.mxu3 }
 0xd72   :  { %v5210_v42 = vadd.f32 %v5209_v29, %v5177_v37 }
 0xd74   :  { %v5219_v35 = vpack.c.bf16 %v5210_v42, %v5208_v13 }
 0xd76   :  { %10292 = vmatmul.msk.bf16.gmra.mxu1 %vm1512_vm3, %v5219_v35 }
 0xd77   :  { %5441 = vmatmul.bf16.gmra.mxu0 %v10363_v5 }
 0xd79   :  { %v5212_v51 = vpop.f32.mrf.mxu3 }
 0xd7a   :  { %v5213_v9 = vadd.f32 %v5212_v51, %v5180_v41  ;;  %v5462_v51 = vpop.f32.mrf.mxu2 }
 0xd7c   :  { %v5220_v1 = vpack.c.bf16 %v5213_v9, %v5213_v9 }
 0xd81   :  { %v5214_v2 = vpop.f32.mrf.mxu3 }
 0xd86   :  { %10293 = vmatmul.msk.bf16.gmra.mxu1 %vm1512_vm3, %v5220_v1  ;;  %v5465_v1 = vpop.f32.mrf.mxu2 }
 0xd89   :  { %v5493_v58 = vpop.f32.mrf.mxu3 }
 0xd8e   :  { %v5467_v27 = vpop.f32.mrf.mxu2 }
 0xd91   :  { %v5495_v9 = vpop.f32.mrf.mxu3 }
 0xd96   :  { %10376 = vmatmul.msk.bf16.vlgmr.msrb.gmra.mxu1 %vm1074_vm2, %v10327_v25  ;;  %v5470_v25 = vpop.f32.mrf.mxu2 }
 0xd97   :  { %6119 = vmatpush.bf16.msrb.mxu1 %v12427_v49  ;;  %v10311_v49 = vld [vmem:[%s16311_s30 + $0x7d8] sm:$0xff] }
 0xd9b   :  { %6120 = vmatpush.bf16.msrb.mxu1 %v12432_v61  ;;  %v5366_v61 = vunpack.c.l.b16 %v10311_v49 }
 0xd9d   :  { %v5386_v56 = vpack.c.b16 %v5366_v61, %v5366_v61 }
 0xd9e   :  { %v5472_v31 = vpop.f32.mrf.mxu2 }
 0xd9f   :  { %6121 = vmatpush.bf16.msrb.mxu1 %v12436_v63  ;;  %v5364_v63 = vunpack.c.l.b16 %v15059_v38  ;;  %5512 = vmatmul.bf16.gmra.mxu3 %v5386_v56  ;;  %v11675_v38 = vld [vmem:[%s16311_s30 + $0x7bc] sm:$0xf] }
 0xda1   :  { %v5384_v8 = vpack.c.b16 %v5364_v63, %v5364_v63 }
 0xda3   :  { %6122 = vmatpush.bf16.msrb.mxu1 %v12380_v53  ;;  %v11671_v53 = vld [vmem:[%s16311_s30 + $0x79c] sm:$0xf]  ;;  %5446 = vmatmul.bf16.gmra.mxu0 %v5384_v8 }
 0xda6   :  { %10377 = vmatmul.msk.bf16.gmra.mxu1 %vm1074_vm2, %v10343_v46  ;;  %v5475_v8 = vpop.f32.mrf.mxu2 }
 0xda7   :  { %6123 = vmatpush.bf16.msrb.mxu1 %v12361_v34  ;;  %v10356_v34 = vld [vmem:[%s16311_s30 + $0x7a8] sm:$0xf0] }
 0xda8   :  { %v5498_v62 = vpop.f32.mrf.mxu3 }
 0xdab   :  { %6124 = vmatpush.bf16.msrb.mxu1 %v12344_v12  ;;  %v10359_v12 = vor.u32 %v11671_v53, %v10356_v34 }
 0xdaf   :  { %6125 = vmatpush.bf16.msrb.mxu1 %v16324_v10  ;;  %v10372_v10 = vld [vmem:[%s16311_s30 + $0x7c8] sm:$0xf0] }
 0xdb0   :  { %v10375_v21 = vor.u32 %v11675_v38, %v10372_v10  ;;  %v5500_v15 = vpop.f32.mrf.mxu3 }
 0xdb3   :  { %6126 = vmatpush.bf16.msrb.mxu1 %v16326_v18  ;;  %v5367_v18 = vunpack.c.h.b16 %v10311_v49 }
 0xdb5   :  { %v5387_v37 = vpack.c.b16 %v5367_v18, %v5367_v18 }
 0xdb6   :  { %10378 = vmatmul.msk.bf16.gmra.mxu1 %vm1074_vm2, %v10359_v12 }
 0xdc3   :  { %v5262_v20 = vpop.f32.mrf.mxu1 }
 0xdc4   :  { %v15250_v59 = vadd.f32 %v5262_v20, %v15123_v7  ;;  %v5427_v7 = vpop.f32.mrf.mxu0 }
 0xdc5   :  { %v5461_v19 = vadd.f32 %v5460_v36, %v5427_v7 }
 0xdc6   :  { %10379 = vmatmul.msk.bf16.gmra.mxu1 %vm1074_vm2, %v10375_v21  ;;  %v5477_v21 = vpop.f32.mrf.mxu2 }
 0xdc7   :  { %v5494_v50 = vadd.f32 %v5493_v58, %v5461_v19  ;;  %v11684_v19 = vld [vmem:[%s16311_s30 + $0x804] sm:$0xf] }
 0xdcb   :  { %v15253_v39 = vpop.f32.mrf.mxu1 }
 0xdcc   :  { %v5429_v41 = vpop.f32.mrf.mxu0 }
 0xdcd   :  { %v5463_v5 = vadd.f32 %v5462_v51, %v5429_v41 }
 0xdce   :  { %v5480_v58 = vpop.f32.mrf.mxu2 }
 0xdcf   :  { %v5496_v46 = vadd.f32 %v5495_v9, %v5463_v5  ;;  %v10436_v5 = vld [vmem:[%s16311_s30 + $0x810] sm:$0xf0] }
 0xdd3   :  { %v5267_v29 = vpop.f32.mrf.mxu1 }
 0xdd4   :  { %v15256_v13 = vadd.f32 %v5267_v29, %v15130_v16  ;;  %v5432_v28 = vpop.f32.mrf.mxu0 }
 0xdd5   :  { %v5466_v12 = vadd.f32 %v5465_v1, %v5432_v28 }
 0xdd6   :  { %10380 = vmatmul.msk.bf16.gmra.mxu1 %vm1074_vm2, %v5387_v37 }
 0xdd7   :  { %v5499_v20 = vadd.f32 %v5498_v62, %v5466_v12 }
 0xddb   :  { %v15259_v42 = vpop.f32.mrf.mxu1 }
 0xddc   :  { %v5503_v54 = vpop.f32.mrf.mxu3 }
 0xde3   :  { %v5272_v35 = vpop.f32.mrf.mxu1 }
 0xde4   :  { %v15262_v0 = vadd.f32 %v5272_v35, %v15142_v6  ;;  %v5434_v6 = vpop.f32.mrf.mxu0  ;;  %v5505_v44 = vpop.f32.mrf.mxu3 }
 0xde5   :  { %v5468_v38 = vadd.f32 %v5467_v27, %v5434_v6  ;;  %v11680_v27 = vld [vmem:[%s16311_s30 + $0x7e4] sm:$0xf] }
 0xde7   :  { %v5501_v18 = vadd.f32 %v5500_v15, %v5468_v38  ;;  %v11690_v38 = vld [vmem:[%s16311_s30 + $0x82c] sm:$0xf0] }
 0xdeb   :  { %v15264_v32 = vpop.f32.mrf.mxu1 }
 0xdec   :  { %v5437_v26 = vpop.f32.mrf.mxu0 }
 0xded   :  { %v5471_v41 = vadd.f32 %v5470_v25, %v5437_v26  ;;  %v11683_v26 = vld [vmem:[%s16311_s30 + $0x7f4] sm:$0xf0]  ;;  %v10434_v25 = vld [vmem:[%s16311_s30 + $0x800] sm:$0xf] }
 0xdef   :  { %v5504_v1 = vadd.f32 %v5503_v54, %v5471_v41  ;;  %v11694_v41 = vld [vmem:[%s16311_s30 + $0x84c] sm:$0xf0] }
 0xdf3   :  { %v5277_v2 = vpop.f32.mrf.mxu1 }
 0xdf4   :  { %v15267_v16 = vadd.f32 %v5277_v2, %v15151_v14  ;;  %v5439_v23 = vpop.f32.mrf.mxu0  ;;  %v5482_v2 = vpop.f32.mrf.mxu2 }
 0xdf5   :  { %v10468_v2 = vld [vmem:[%s16311_s30 + $0x850] sm:$0xf0] }
 0xdfb   :  { %v15269_v43 = vpop.f32.mrf.mxu1 }
 0xdfc   :  { %v5442_v56 = vpop.f32.mrf.mxu0 }
 0xe03   :  { %v5282_v57 = vpop.f32.mrf.mxu1 }
 0xe04   :  { %v15272_v22 = vadd.f32 %v5282_v57, %v15159_v24  ;;  %v5508_v24 = vpop.f32.mrf.mxu3  ;;  %v5444_v10 = vpop.f32.mrf.mxu0 }
 0xe0b   :  { %v5284_v55 = vpop.f32.mrf.mxu1 }
 0xe0c   :  { %v5510_v29 = vpop.f32.mrf.mxu3 }
 0xe13   :  { %v5526_v14 = vpop.f32.mrf.mxu1 }
 0xe14   :  { %v5527_v61 = vadd.f32 %v5526_v14, %v5494_v50  ;;  %v5478_v14 = vadd.f32 %v5477_v21, %v5444_v10 }
 0xe16   :  { %v5511_v50 = vadd.f32 %v5510_v29, %v5478_v14 }
 0xe1b   :  { %v5528_v49 = vpop.f32.mrf.mxu1 }
 0xe1c   :  { %v5529_v63 = vadd.f32 %v5528_v49, %v5496_v46  ;;  %v10439_v46 = vor.u32 %v11684_v19, %v10436_v5 }
 0xe1e   :  { %v5550_v53 = vpack.c.bf16 %v5529_v63, %v5527_v61 }
 0xe20   :  { %10393 = vmatmul.msk.bf16.vlgmr.msrb.gmra.mxu0 %vm1512_vm3, %v5550_v53 }
 0xe21   :  { %6152 = vmatpush.bf16.msrb.mxu0 %v12560_v48  ;;  %v5447_v48 = vpop.f32.mrf.mxu0 }
 0xe22   :  { %v5513_v51 = vpop.f32.mrf.mxu3 }
 0xe23   :  { %v5531_v34 = vpop.f32.mrf.mxu1 }
 0xe24   :  { %v5532_v35 = vadd.f32 %v5531_v34, %v5499_v20  ;;  %v5481_v34 = vadd.f32 %v5480_v58, %v5447_v48  ;;  %v10458_v48 = vld [vmem:[%s16311_s30 + $0x828] sm:$0xf]  ;;  %v11691_v58 = vld [vmem:[%s16311_s30 + $0x834] sm:$0xf0] }
 0xe25   :  { %6153 = vmatpush.bf16.msrb.mxu0 %v12576_v52 }
 0xe26   :  { %v5514_v20 = vadd.f32 %v5513_v51, %v5481_v34  ;;  %v10459_v51 = vor.u32 %v11691_v58, %v10458_v48 }
 0xe29   :  { %6154 = vmatpush.bf16.msrb.mxu0 %v12585_v60  ;;  %v5473_v60 = vadd.f32 %v5472_v31, %v5439_v23  ;;  %v5449_v9 = vpop.f32.mrf.mxu0  ;;  %v5476_v31 = vadd.f32 %v5475_v8, %v5442_v56  ;;  %v10442_v56 = vld [vmem:[%s16311_s30 + $0x808] sm:$0xf]  ;;  %v11687_v8 = vld [vmem:[%s16311_s30 + $0x814] sm:$0xf0] }
 0xe2a   :  { %v5515_v62 = vpop.f32.mrf.mxu3  ;;  %v10443_v12 = vor.u32 %v11687_v8, %v10442_v56  ;;  %v11692_v9 = vld [vmem:[%s16311_s30 + $0x844] sm:$0xf] }
 0xe2b   :  { %v5533_v37 = vpop.f32.mrf.mxu1  ;;  %v5506_v28 = vadd.f32 %v5505_v44, %v5473_v60  ;;  %v5509_v44 = vadd.f32 %v5508_v24, %v5476_v31  ;;  %v10450_v24 = vld [vmem:[%s16311_s30 + $0x820] sm:$0xf]  ;;  %v10415_v31 = vld [vmem:[%s16311_s30 + $0x868] sm:$0xff] }
 0xe2c   :  { %v5534_v7 = vadd.f32 %v5533_v37, %v5501_v18  ;;  %v10451_v10 = vor.u32 %v11690_v38, %v10450_v24  ;;  %v11688_v18 = vld [vmem:[%s16311_s30 + $0x824] sm:$0xf]  ;;  %v10452_v37 = vld [vmem:[%s16311_s30 + $0x830] sm:$0xf0]  ;;  %v5700_v19 = vunpack.c.l.b16 %v10415_v31 }
 0xe2d   :  { %6155 = vmatpush.bf16.msrb.mxu0 %v12597_v40 }
 0xe2e   :  { %v5551_v36 = vpack.c.bf16 %v5534_v7, %v5532_v35  ;;  %v10455_v35 = vor.u32 %v11688_v18, %v10452_v37  ;;  %v5720_v5 = vpack.c.b16 %v5700_v19, %v5700_v19 }
 0xe30   :  { %10394 = vmatmul.msk.bf16.gmra.mxu0 %vm1512_vm3, %v5551_v36 }
 0xe31   :  { %6156 = vmatpush.bf16.msrb.mxu0 %v12603_v17  ;;  %v10420_v17 = vld [vmem:[%s16311_s30 + $0x7f0] sm:$0xf0] }
 0xe33   :  { %v5536_v52 = vpop.f32.mrf.mxu1 }
 0xe34   :  { %v5537_v6 = vadd.f32 %v5536_v52, %v5504_v1  ;;  %v10466_v52 = vld [vmem:[%s16311_s30 + $0x840] sm:$0xf]  ;;  %v11681_v1 = vld [vmem:[%s16311_s30 + $0x7ec] sm:$0xf] }
 0xe35   :  { %6157 = vmatpush.bf16.msrb.mxu0 %v12618_v30  ;;  %v10423_v30 = vor.u32 %v11680_v27, %v10420_v17  ;;  %v10467_v60 = vor.u32 %v11694_v41, %v10466_v52  ;;  %v10474_v27 = vld [vmem:[%s16311_s30 + $0x848] sm:$0xf]  ;;  %v11695_v17 = vld [vmem:[%s16311_s30 + $0x854] sm:$0xf0] }
 0xe37   :  { %5793 = vmatmul.bf16.vlgmr.msra.gmra.mxu3 %v10423_v30  ;;  %v10444_v30 = vld [vmem:[%s16311_s30 + $0x818] sm:$0xf0] }
 0xe39   :  { %6158 = vmatpush.bf16.msrb.mxu0 %v12623_v33  ;;  %v10426_v33 = vld [vmem:[%s16311_s30 + $0x7e8] sm:$0xf] }
 0xe3a   :  { %v10427_v55 = vor.u32 %v11683_v26, %v10426_v33  ;;  %v10414_v33 = vld [vmem:[%s16311_s30 + $0x860] sm:$0xff] }
 0xe3b   :  { %v5538_v40 = vpop.f32.mrf.mxu1  ;;  %v5698_v26 = vunpack.c.l.b16 %v10414_v33 }
 0xe3c   :  { %v5539_v57 = vadd.f32 %v5538_v40, %v5506_v28  ;;  %5826 = vmatmul.bf16.vlgmr.msra.gmra.mxu1 %v10427_v55  ;;  %v10428_v28 = vld [vmem:[%s16311_s30 + $0x7f8] sm:$0xf0]  ;;  %v10471_v40 = vor.u32 %v11692_v9, %v10468_v2 }
 0xe3d   :  { %6159 = vmatpush.bf16.msrb.mxu0 %v12455_v11  ;;  %v11686_v11 = vld [vmem:[%s16311_s30 + $0x80c] sm:$0xf0]  ;;  %v10431_v62 = vor.u32 %v11681_v1, %v10428_v28  ;;  %v5718_v55 = vpack.c.b16 %v5698_v26, %v5698_v26 }
 0xe3e   :  { %v5552_v15 = vpack.c.bf16 %v5539_v57, %v5537_v6  ;;  %v10435_v54 = vor.u32 %v11686_v11, %v10434_v25  ;;  %v10475_v6 = vor.u32 %v11695_v17, %v10474_v27  ;;  %v11685_v57 = vld [vmem:[%s16311_s30 + $0x80c] sm:$0xf]  ;;  %v5699_v25 = vunpack.c.h.b16 %v10414_v33 }
 0xe40   :  { %10395 = vmatmul.msk.bf16.gmra.mxu0 %vm1512_vm3, %v5552_v15  ;;  %5765 = vmatmul.bf16.gmra.mxu2 %v10435_v54  ;;  %v10447_v15 = vor.u32 %v11685_v57, %v10444_v30  ;;  %v5719_v11 = vpack.c.b16 %v5699_v25, %v5699_v25  ;;  %v11689_v54 = vld [vmem:[%s16311_s30 + $0x82c] sm:$0xf] }
 0xe43   :  { %v5541_v23 = vpop.f32.mrf.mxu1 }
 0xe44   :  { %v5542_v61 = vadd.f32 %v5541_v23, %v5509_v44  ;;  %v10460_v23 = vld [vmem:[%s16311_s30 + $0x838] sm:$0xf0]  ;;  %v11693_v44 = vld [vmem:[%s16311_s30 + $0x84c] sm:$0xf] }
 0xe45   :  { %v10463_v14 = vor.u32 %v11689_v54, %v10460_v23 }
 0xe47   :  { %5798 = vmatmul.bf16.gmra.mxu3 %v10439_v46 }
 0xe4b   :  { %v5543_v49 = vpop.f32.mrf.mxu1 }
 0xe4c   :  { %v5544_v63 = vadd.f32 %v5543_v49, %v5511_v50  ;;  %5831 = vmatmul.bf16.gmra.mxu1 %v10443_v12  ;;  %v10476_v50 = vld [vmem:[%s16311_s30 + $0x858] sm:$0xf0] }
 0xe4d   :  { %v10479_v46 = vor.u32 %v11693_v44, %v10476_v50 }
 0xe4e   :  { %v5553_v53 = vpack.c.bf16 %v5544_v63, %v5542_v61 }
 0xe50   :  { %10396 = vmatmul.msk.bf16.gmra.mxu0 %vm1512_vm3, %v5553_v53  ;;  %5770 = vmatmul.bf16.gmra.mxu2 %v10451_v10  ;;  %v5701_v53 = vunpack.c.h.b16 %v10415_v31 }
 0xe52   :  { %v5721_v34 = vpack.c.b16 %v5701_v53, %v5701_v53 }
 0xe53   :  { %v5546_v21 = vpop.f32.mrf.mxu1 }
 0xe54   :  { %v5547_v29 = vadd.f32 %v5546_v21, %v5514_v20 }
 0xe56   :  { %v5554_v36 = vpack.c.bf16 %v5547_v29, %v5547_v29 }
 0xe57   :  { %5803 = vmatmul.bf16.gmra.mxu3 %v10455_v35 }
 0xe5b   :  { %v5548_v7 = vpop.f32.mrf.mxu1 }
 0xe5c   :  { %5836 = vmatmul.bf16.gmra.mxu1 %v10459_v51 }
 0xe60   :  { %10397 = vmatmul.msk.bf16.gmra.mxu0 %vm1512_vm3, %v5554_v36  ;;  %5775 = vmatmul.bf16.gmra.mxu2 %v10467_v60 }
 0xe67   :  { %5808 = vmatmul.bf16.gmra.mxu3 %v10471_v40 }
 0xe6c   :  { %5841 = vmatmul.bf16.gmra.mxu1 %v10475_v6 }
 0xe70   :  { %10480 = vmatmul.msk.bf16.vlgmr.msra.gmra.mxu0 %vm1074_vm2, %v10431_v62  ;;  %5780 = vmatmul.bf16.gmra.mxu2 %v5718_v55 }
 0xe77   :  { %5813 = vmatmul.bf16.gmra.mxu3 %v5719_v11 }
 0xe7c   :  { %5846 = vmatmul.bf16.gmra.mxu1 %v5720_v5 }
 0xe80   :  { %10481 = vmatmul.msk.bf16.gmra.mxu0 %vm1074_vm2, %v10447_v15 }
 0xe90   :  { %10482 = vmatmul.msk.bf16.gmra.mxu0 %vm1074_vm2, %v10463_v14 }
 0xe9d   :  { %v5596_v49 = vpop.f32.mrf.mxu0 }
 0xe9e   :  { %v15387_v61 = vadd.f32 %v5596_v49, %v15250_v59  ;;  %v5761_v59 = vpop.f32.mrf.mxu2 }
 0xea0   :  { %10483 = vmatmul.msk.bf16.gmra.mxu0 %vm1074_vm2, %v10479_v46 }
 0xea5   :  { %v15390_v63 = vpop.f32.mrf.mxu0 }
 0xea6   :  { %v5763_v18 = vpop.f32.mrf.mxu2 }
 0xead   :  { %v5601_v56 = vpop.f32.mrf.mxu0 }
 0xeae   :  { %v15393_v8 = vadd.f32 %v5601_v56, %v15256_v13 }
 0xeb0   :  { %10484 = vmatmul.msk.bf16.gmra.mxu0 %vm1074_vm2, %v5721_v34 }
 0xeb5   :  { %v15396_v24 = vpop.f32.mrf.mxu0 }
 0xeb9   :  { %v5827_v10 = vpop.f32.mrf.mxu1 }
 0xeba   :  { %v5794_v21 = vpop.f32.mrf.mxu3 }
 0xebb   :  { %v5795_v62 = vadd.f32 %v5794_v21, %v5761_v59 }
 0xebd   :  { %v5606_v12 = vpop.f32.mrf.mxu0  ;;  %v5828_v57 = vadd.f32 %v5827_v10, %v5795_v62  ;;  %v11701_v62 = vld [vmem:[%s16311_s30 + $0x884] sm:$0xf0] }
 0xebe   :  { %v15399_v38 = vadd.f32 %v5606_v12, %v15262_v0 }
 0xec1   :  { %v5829_v29 = vpop.f32.mrf.mxu1 }
 0xec2   :  { %v5796_v37 = vpop.f32.mrf.mxu3 }
 0xec3   :  { %v5766_v7 = vpop.f32.mrf.mxu2  ;;  %v5797_v17 = vadd.f32 %v5796_v37, %v5763_v18 }
 0xec5   :  { %v15401_v20 = vpop.f32.mrf.mxu0  ;;  %v5830_v30 = vadd.f32 %v5829_v29, %v5797_v17 }
 0xec9   :  { %v5832_v48 = vpop.f32.mrf.mxu1 }
 0xeca   :  { %v5799_v36 = vpop.f32.mrf.mxu3 }
 0xecb   :  { %v5768_v52 = vpop.f32.mrf.mxu2  ;;  %v5800_v23 = vadd.f32 %v5799_v36, %v5766_v7 }
 0xecd   :  { %v5611_v35 = vpop.f32.mrf.mxu0  ;;  %v5833_v14 = vadd.f32 %v5832_v48, %v5800_v23 }
 0xece   :  { %v15404_v13 = vadd.f32 %v5611_v35, %v15267_v16 }
 0xed1   :  { %v5834_v41 = vpop.f32.mrf.mxu1 }
 0xed2   :  { %v5801_v0 = vpop.f32.mrf.mxu3 }
 0xed3   :  { %v5771_v9 = vpop.f32.mrf.mxu2  ;;  %v5802_v31 = vadd.f32 %v5801_v0, %v5768_v52 }
 0xed5   :  { %v15406_v58 = vpop.f32.mrf.mxu0  ;;  %v5835_v44 = vadd.f32 %v5834_v41, %v5802_v31  ;;  %v10522_v41 = vld [vmem:[%s16311_s30 + $0x870] sm:$0xf] }
 0xed6   :  { %v10538_v31 = vld [vmem:[%s16311_s30 + $0x890] sm:$0xf] }
 0xed9   :  { %v5837_v28 = vpop.f32.mrf.mxu1 }
 0xeda   :  { %v5804_v1 = vpop.f32.mrf.mxu3 }
 0xedb   :  { %v5773_v16 = vpop.f32.mrf.mxu2  ;;  %v5805_v21 = vadd.f32 %v5804_v1, %v5771_v9  ;;  %v11700_v9 = vld [vmem:[%s16311_s30 + $0x87c] sm:$0xf0] }
 0xedc   :  { %v10523_v1 = vor.u32 %v11700_v9, %v10522_v41  ;;  %v11710_v41 = vld [vmem:[%s16311_s30 + $0x8d4] sm:$0xf] }
 0xedd   :  { %v5616_v51 = vpop.f32.mrf.mxu0  ;;  %v5838_v37 = vadd.f32 %v5837_v28, %v5805_v21  ;;  %v10524_v28 = vld [vmem:[%s16311_s30 + $0x880] sm:$0xf0]  ;;  %v11706_v21 = vld [vmem:[%s16311_s30 + $0x8b4] sm:$0xf] }
 0xede   :  { %v15409_v60 = vadd.f32 %v5616_v51, %v15272_v22  ;;  %6094 = vmatmul.bf16.vlgmr.msrb.gmra.mxu3 %v10523_v1  ;;  %v10578_v1 = vld [vmem:[%s16311_s30 + $0x8d8] sm:$0xf] }
 0xee1   :  { %v5839_v6 = vpop.f32.mrf.mxu1 }
 0xee2   :  { %v5806_v27 = vpop.f32.mrf.mxu3 }
 0xee3   :  { %v5776_v55 = vpop.f32.mrf.mxu2  ;;  %v5807_v18 = vadd.f32 %v5806_v27, %v5773_v16 }
 0xee5   :  { %v5618_v2 = vpop.f32.mrf.mxu0  ;;  %v5840_v7 = vadd.f32 %v5839_v6, %v5807_v18  ;;  %v10556_v18 = vld [vmem:[%s16311_s30 + $0x8c0] sm:$0xf0] }
 0xee6   :  { %v11698_v2 = vld [vmem:[%s16311_s30 + $0x874] sm:$0xf] }
 0xee7   :  { %v10527_v16 = vor.u32 %v11698_v2, %v10524_v28  ;;  %v10572_v2 = vld [vmem:[%s16311_s30 + $0x8e0] sm:$0xf0]  ;;  %v11713_v28 = vld [vmem:[%s16311_s30 + $0x8e4] sm:$0xf0] }
 0xee9   :  { %v5842_v22 = vpop.f32.mrf.mxu1  ;;  %6127 = vmatmul.bf16.vlgmr.msrb.gmra.mxu1 %v10527_v16  ;;  %v11703_v16 = vld [vmem:[%s16311_s30 + $0x89c] sm:$0xf] }
 0xeea   :  { %v5809_v11 = vpop.f32.mrf.mxu3 }
 0xeeb   :  { %v5778_v19 = vpop.f32.mrf.mxu2  ;;  %v5810_v6 = vadd.f32 %v5809_v11, %v5776_v55  ;;  %v11704_v55 = vld [vmem:[%s16311_s30 + $0x89c] sm:$0xf0]  ;;  %v11702_v11 = vld [vmem:[%s16311_s30 + $0x894] sm:$0xf] }
 0xeed   :  { %v5860_v40 = vpop.f32.mrf.mxu0 }
 0xeee   :  { %v5861_v33 = vadd.f32 %v5860_v40, %v5828_v57  ;;  %v10530_v40 = vld [vmem:[%s16311_s30 + $0x878] sm:$0xf] }
 0xeef   :  { %v10531_v27 = vor.u32 %v11701_v62, %v10530_v40  ;;  %v10575_v40 = vor.u32 %v11710_v41, %v10572_v2  ;;  %v10579_v62 = vor.u32 %v11713_v28, %v10578_v1 }
 0xef1   :  { %v5844_v46 = vpop.f32.mrf.mxu1  ;;  %6160 = vmatmul.bf16.vlgmr.msrb.gmra.mxu0 %v10531_v27  ;;  %v10548_v27 = vld [vmem:[%s16311_s30 + $0x8a8] sm:$0xf0] }
 0xef2   :  { %v5811_v5 = vpop.f32.mrf.mxu3 }
 0xef3   :  { %v5781_v56 = vpop.f32.mrf.mxu2  ;;  %v5812_v57 = vadd.f32 %v5811_v5, %v5778_v19  ;;  %v10546_v19 = vld [vmem:[%s16311_s30 + $0x898] sm:$0xf]  ;;  %v11705_v5 = vld [vmem:[%s16311_s30 + $0x8a4] sm:$0xf0] }
 0xef5   :  { %v5862_v15 = vpop.f32.mrf.mxu0 }
 0xef6   :  { %v5863_v26 = vadd.f32 %v5862_v15, %v5830_v30  ;;  %v5843_v30 = vadd.f32 %v5842_v22, %v5810_v6  ;;  %v5845_v15 = vadd.f32 %v5844_v46, %v5812_v57  ;;  %v10539_v22 = vor.u32 %v11704_v55, %v10538_v31  ;;  %v11707_v6 = vld [vmem:[%s16311_s30 + $0x8bc] sm:$0xf]  ;;  %v10564_v57 = vld [vmem:[%s16311_s30 + $0x8c8] sm:$0xf0] }
 0xef8   :  { %v5884_v25 = vpack.c.bf16 %v5863_v26, %v5861_v33  ;;  %6099 = vmatmul.bf16.gmra.mxu3 %v10539_v22  ;;  %v10580_v22 = vld [vmem:[%s16311_s30 + $0x8e8] sm:$0xf0] }
 0xef9   :  { %v5847_v10 = vpop.f32.mrf.mxu1 }
 0xefa   :  { %10497 = vmatmul.msk.bf16.vlgmr.msrb.gmra.mxu2 %vm1512_vm3, %v5884_v25  ;;  %v5814_v12 = vpop.f32.mrf.mxu3 }
 0xefb   :  { %v5783_v29 = vpop.f32.mrf.mxu2  ;;  %v5815_v23 = vadd.f32 %v5814_v12, %v5781_v56  ;;  %v10554_v12 = vld [vmem:[%s16311_s30 + $0x8b0] sm:$0xf] }
 0xefc   :  { %v11709_v29 = vld [vmem:[%s16311_s30 + $0x8c4] sm:$0xf0] }
 0xefd   :  { %v5865_v54 = vpop.f32.mrf.mxu0 }
 0xefe   :  { %v5866_v49 = vadd.f32 %v5865_v54, %v5833_v14  ;;  %v10540_v14 = vld [vmem:[%s16311_s30 + $0x8a0] sm:$0xf0] }
 0xf01   :  { %v5849_v48 = vpop.f32.mrf.mxu1 }
 0xf02   :  { %v5816_v35 = vpop.f32.mrf.mxu3  ;;  %v10532_v48 = vld [vmem:[%s16311_s30 + $0x888] sm:$0xf0] }
 0xf03   :  { %v10559_v35 = vor.u32 %v11706_v21, %v10556_v18  ;;  %v11715_v18 = vld [vmem:[%s16312_s4 + $0xf8] sm:$0xff] }
 0xf04   :  { %6261 = vmatpush.bf16.msra.mxu3 %v11715_v18 }
 0xf05   :  { %v5867_v50 = vpop.f32.mrf.mxu0 }
 0xf06   :  { %v5868_v53 = vadd.f32 %v5867_v50, %v5835_v44  ;;  %v10543_v44 = vor.u32 %v11702_v11, %v10540_v14  ;;  %v10547_v50 = vor.u32 %v11705_v5, %v10546_v19  ;;  %v11711_v11 = vld [vmem:[%s16311_s30 + $0x8dc] sm:$0xf] }
 0xf07   :  { %v10583_v14 = vor.u32 %v11711_v11, %v10580_v22 }
 0xf08   :  { %v5885_v34 = vpack.c.bf16 %v5868_v53, %v5866_v49  ;;  %v5848_v49 = vadd.f32 %v5847_v10, %v5815_v23  ;;  %6132 = vmatmul.bf16.gmra.mxu1 %v10543_v44  ;;  %6165 = vmatmul.bf16.gmra.mxu0 %v10547_v50 }
 0xf0a   :  { %10498 = vmatmul.msk.bf16.gmra.mxu2 %vm1512_vm3, %v5885_v34 }
 0xf0d   :  { %v5870_v59 = vpop.f32.mrf.mxu0 }
 0xf0e   :  { %v5871_v52 = vadd.f32 %v5870_v59, %v5838_v37  ;;  %v11708_v59 = vld [vmem:[%s16311_s30 + $0x8bc] sm:$0xf0]  ;;  %v10562_v37 = vld [vmem:[%s16311_s30 + $0x8b8] sm:$0xf] }
 0xf0f   :  { %v10555_v10 = vor.u32 %v11708_v59, %v10554_v12 }
 0xf11   :  { %6104 = vmatmul.bf16.gmra.mxu3 %v10555_v10 }
 0xf15   :  { %v5872_v36 = vpop.f32.mrf.mxu0 }
 0xf16   :  { %v5873_v0 = vadd.f32 %v5872_v36, %v5840_v7  ;;  %v10563_v7 = vor.u32 %v11709_v29, %v10562_v37  ;;  %v11699_v36 = vld [vmem:[%s16311_s30 + $0x87c] sm:$0xf] }
 0xf18   :  { %v5886_v51 = vpack.c.bf16 %v5873_v0, %v5871_v52  ;;  %6137 = vmatmul.bf16.gmra.mxu1 %v10559_v35  ;;  %6170 = vmatmul.bf16.gmra.mxu0 %v10563_v7  ;;  %v10535_v52 = vor.u32 %v11699_v36, %v10532_v48  ;;  %v10570_v0 = vld [vmem:[%s16311_s30 + $0x8d0] sm:$0xf] }
 0xf1a   :  { %10499 = vmatmul.msk.bf16.gmra.mxu2 %vm1512_vm3, %v5886_v51  ;;  %v11712_v51 = vld [vmem:[%s16311_s30 + $0x8dc] sm:$0xf0] }
 0xf1b   :  { %v10571_v9 = vor.u32 %v11712_v51, %v10570_v0  ;;  %v11714_v0 = vld [vmem:[%s16312_s4 + $0xf0] sm:$0xff] }
 0xf1c   :  { %6262 = vmatpush.bf16.msra.mxu3 %v11714_v0 }
 0xf1d   :  { %v5875_v17 = vpop.f32.mrf.mxu0 }
 0xf1e   :  { %v5876_v26 = vadd.f32 %v5875_v17, %v5843_v30  ;;  %v10551_v17 = vor.u32 %v11703_v16, %v10548_v27  ;;  %v10518_v30 = vld [vmem:[%s16311_s30 + $0x8f0] sm:$0xff] }
 0xf21   :  { %6109 = vmatmul.bf16.gmra.mxu3 %v10571_v9 }
 0xf25   :  { %v5877_v33 = vpop.f32.mrf.mxu0 }
 0xf26   :  { %v5878_v25 = vadd.f32 %v5877_v33, %v5845_v15  ;;  %v6032_v15 = vunpack.c.l.b16 %v10518_v30  ;;  %v10567_v33 = vor.u32 %v11707_v6, %v10564_v57 }
 0xf28   :  { %v5887_v54 = vpack.c.bf16 %v5878_v25, %v5876_v26  ;;  %6142 = vmatmul.bf16.gmra.mxu1 %v10575_v40  ;;  %6175 = vmatmul.bf16.gmra.mxu0 %v10579_v62  ;;  %v6052_v26 = vpack.c.b16 %v6032_v15, %v6032_v15  ;;  %v6033_v25 = vunpack.c.h.b16 %v10518_v30 }
 0xf2a   :  { %10500 = vmatmul.msk.bf16.gmra.mxu2 %vm1512_vm3, %v5887_v54  ;;  %v10519_v54 = vld [vmem:[%s16311_s30 + $0x8f8] sm:$0xff]  ;;  %v6053_v23 = vpack.c.b16 %v6033_v25, %v6033_v25 }
 0xf2b   :  { %v6034_v31 = vunpack.c.l.b16 %v10519_v54  ;;  %v6035_v44 = vunpack.c.h.b16 %v10519_v54 }
 0xf2d   :  { %v5880_v46 = vpop.f32.mrf.mxu0  ;;  %v6054_v55 = vpack.c.b16 %v6034_v31, %v6034_v31 }
 0xf2e   :  { %v5881_v53 = vadd.f32 %v5880_v46, %v5848_v49  ;;  %v6055_v46 = vpack.c.b16 %v6035_v44, %v6035_v44 }
 0xf30   :  { %v5888_v56 = vpack.c.bf16 %v5881_v53, %v5881_v53 }
 0xf31   :  { %6114 = vmatmul.bf16.gmra.mxu3 %v6052_v26 }
 0xf35   :  { %v5882_v34 = vpop.f32.mrf.mxu0 }
 0xf38   :  { %6147 = vmatmul.bf16.gmra.mxu1 %v6053_v23  ;;  %6180 = vmatmul.bf16.gmra.mxu0 %v6054_v55 }
 0xf3a   :  { %10501 = vmatmul.msk.bf16.gmra.mxu2 %vm1512_vm3, %v5888_v56 }
 0xf4a   :  { %10584 = vmatmul.msk.bf16.vlgmr.msra.gmra.mxu2 %vm1074_vm2, %v10535_v52 }
 0xf5a   :  { %10585 = vmatmul.msk.bf16.gmra.mxu2 %vm1074_vm2, %v10551_v17 }
 0xf66   :  { %v6128_v59 = vpop.f32.mrf.mxu1 }
 0xf6a   :  { %10586 = vmatmul.msk.bf16.gmra.mxu2 %vm1074_vm2, %v10567_v33 }
 0xf6e   :  { %v6161_v21 = vpop.f32.mrf.mxu0  ;;  %v6130_v37 = vpop.f32.mrf.mxu1 }
 0xf7a   :  { %10587 = vmatmul.msk.bf16.gmra.mxu2 %vm1074_vm2, %v10583_v14 }
 0xf7d   :  { %v5930_v19 = vpop.f32.mrf.mxu2 }
 0xf7e   :  { %v15523_v5 = vadd.f32 %v5930_v19, %v15387_v61  ;;  %v6095_v61 = vpop.f32.mrf.mxu3 }
 0xf7f   :  { %v6129_v27 = vadd.f32 %v6128_v59, %v6095_v61 }
 0xf81   :  { %v6162_v15 = vadd.f32 %v6161_v21, %v6129_v27 }
 0xf85   :  { %v15525_v50 = vpop.f32.mrf.mxu2 }
 0xf86   :  { %v6097_v29 = vpop.f32.mrf.mxu3 }
 0xf87   :  { %v6131_v57 = vadd.f32 %v6130_v37, %v6097_v29 }
 0xf8a   :  { %10588 = vmatmul.msk.bf16.gmra.mxu2 %vm1074_vm2, %v6055_v46 }
 0xf8d   :  { %v5935_v49 = vpop.f32.mrf.mxu2 }
 0xf8e   :  { %v15529_v53 = vadd.f32 %v5935_v49, %v15393_v8  ;;  %v6163_v8 = vpop.f32.mrf.mxu0  ;;  %v6100_v36 = vpop.f32.mrf.mxu3 }
 0xf8f   :  { %v6164_v33 = vadd.f32 %v6163_v8, %v6131_v57 }
 0xf95   :  { %v15531_v34 = vpop.f32.mrf.mxu2 }
 0xf96   :  { %v6166_v48 = vpop.f32.mrf.mxu0  ;;  %v6102_v51 = vpop.f32.mrf.mxu3 }
 0xf9d   :  { %v5940_v56 = vpop.f32.mrf.mxu2 }
 0xf9e   :  { %v15534_v12 = vadd.f32 %v5940_v56, %v15399_v38  ;;  %v6133_v38 = vpop.f32.mrf.mxu1  ;;  %v6168_v2 = vpop.f32.mrf.mxu0 }
 0xf9f   :  { %v6105_v28 = vpop.f32.mrf.mxu3  ;;  %v6134_v22 = vadd.f32 %v6133_v38, %v6100_v36 }
 0xfa1   :  { %v6167_v19 = vadd.f32 %v6166_v48, %v6134_v22 }
 0xfa5   :  { %v15536_v10 = vpop.f32.mrf.mxu2 }
 0xfa6   :  { %v6135_v41 = vpop.f32.mrf.mxu1  ;;  %v6171_v62 = vpop.f32.mrf.mxu0 }
 0xfa7   :  { %v6107_v17 = vpop.f32.mrf.mxu3  ;;  %v6136_v14 = vadd.f32 %v6135_v41, %v6102_v51 }
 0xfa9   :  { %v6169_v49 = vadd.f32 %v6168_v2, %v6136_v14 }
 0xfad   :  { %v5945_v35 = vpop.f32.mrf.mxu2 }
 0xfae   :  { %v15542_v7 = vadd.f32 %v5945_v35, %v15404_v13  ;;  %v6138_v40 = vpop.f32.mrf.mxu1  ;;  %v6173_v30 = vpop.f32.mrf.mxu0 }
 0xfaf   :  { %v6110_v31 = vpop.f32.mrf.mxu3  ;;  %v6139_v0 = vadd.f32 %v6138_v40, %v6105_v28 }
 0xfb5   :  { %v15544_v52 = vpop.f32.mrf.mxu2 }
 0xfb6   :  { %v6140_v6 = vpop.f32.mrf.mxu1 }
 0xfb7   :  { %v6112_v44 = vpop.f32.mrf.mxu3 }
 0xfbd   :  { %v5950_v9 = vpop.f32.mrf.mxu2 }
 0xfbe   :  { %v15550_v1 = vadd.f32 %v5950_v9, %v15409_v60  ;;  %v6143_v55 = vpop.f32.mrf.mxu1  ;;  %v6176_v60 = vpop.f32.mrf.mxu0  ;;  %v6141_v9 = vadd.f32 %v6140_v6, %v6107_v17 }
 0xfbf   :  { %v6115_v37 = vpop.f32.mrf.mxu3 }
 0xfc0   :  { %v6174_v48 = vadd.f32 %v6173_v30, %v6141_v9 }
 0xfc5   :  { %v5952_v13 = vpop.f32.mrf.mxu2 }
 0xfc6   :  { %v6145_v46 = vpop.f32.mrf.mxu1  ;;  %v6178_v59 = vpop.f32.mrf.mxu0  ;;  %v6172_v13 = vadd.f32 %v6171_v62, %v6139_v0 }
 0xfc7   :  { %v6117_v36 = vpop.f32.mrf.mxu3 }
 0xfcd   :  { %v6194_v16 = vpop.f32.mrf.mxu2 }
 0xfce   :  { %v6195_v25 = vadd.f32 %v6194_v16, %v6162_v15  ;;  %v6148_v29 = vpop.f32.mrf.mxu1  ;;  %v6181_v35 = vpop.f32.mrf.mxu0  ;;  %v6144_v15 = vadd.f32 %v6143_v55, %v6110_v31 }
 0xfcf   :  { %v6149_v62 = vadd.f32 %v6148_v29, %v6115_v37 }
 0xfd1   :  { %v6182_v6 = vadd.f32 %v6181_v35, %v6149_v62 }
 0xfd5   :  { %v6196_v26 = vpop.f32.mrf.mxu2 }
 0xfd6   :  { %v6197_v54 = vadd.f32 %v6196_v26, %v6164_v33  ;;  %v6150_v38 = vpop.f32.mrf.mxu1  ;;  %v6183_v41 = vpop.f32.mrf.mxu0  ;;  %v6146_v33 = vadd.f32 %v6145_v46, %v6112_v44  ;;  %v6177_v26 = vadd.f32 %v6176_v60, %v6144_v15  ;;  %v11840_v46 = vld [vmem:[%s16438_s0] ss:$0 sm:$0xff] }
 0xfd8   :  { %v6218_v23 = vpack.c.bf16 %v6197_v54, %v6195_v25  ;;  %v6179_v25 = vadd.f32 %v6178_v59, %v6146_v33 }
 0xfda   :  { %10601 = vmatmul.msk.bf16.vlgmr.msra.gmra.mxu3 %vm1512_vm3, %v6218_v23 }
 0xfdd   :  { %v6199_v11 = vpop.f32.mrf.mxu2 }
 0xfde   :  { %v6200_v21 = vadd.f32 %v6199_v11, %v6167_v19  ;;  %v16437_v19 = vld [vmem:[#allocation12_spill] sm:$0xff] }
 0xfdf   :  { %v4953_v31 = vadd.f32 %v15126_v47, %v16437_v19 }
 0xfe1   :  { %v5287_v60 = vadd.f32 %v15253_v39, %v4953_v31 }
 0xfe3   :  { %v5621_v44 = vadd.f32 %v15390_v63, %v5287_v60  ;;  %v11726_v60 = vld [vmem:[%s16442_s28 + $0x30] sm:$0xff] }
 0xfe5   :  { %v6201_v56 = vpop.f32.mrf.mxu2 }
 0xfe6   :  { %v6202_v61 = vadd.f32 %v6201_v56, %v6169_v49  ;;  %v5955_v49 = vadd.f32 %v15525_v50, %v5621_v44  ;;  %v11725_v44 = vld [vmem:[%s16442_s28 + $0x28] sm:$0xff] }
 0xfe8   :  { %v6219_v18 = vpack.c.bf16 %v6202_v61, %v6200_v21 }
 0xfea   :  { %10602 = vmatmul.msk.bf16.gmra.mxu3 %vm1512_vm3, %v6219_v18 }
 0xfed   :  { %v6204_v8 = vpop.f32.mrf.mxu2 }
 0xfee   :  { %v6205_v2 = vadd.f32 %v6204_v8, %v6172_v13 }
 0xff5   :  { %v6206_v51 = vpop.f32.mrf.mxu2 }
 0xff6   :  { %v6207_v16 = vadd.f32 %v6206_v51, %v6174_v48 }
 0xff8   :  { %v6220_v27 = vpack.c.bf16 %v6207_v16, %v6205_v2  ;;  %v16440_v2 = vld [vmem:[#allocation7_spill] sm:$0xff] }
 0xffa   :  { %10603 = vmatmul.msk.bf16.gmra.mxu3 %vm1512_vm3, %v6220_v27 }
 0xffd   :  { %v6209_v57 = vpop.f32.mrf.mxu2 }
 0xffe   :  { %v6210_v23 = vadd.f32 %v6209_v57, %v6177_v26 }
0x1005   :  { %v6211_v54 = vpop.f32.mrf.mxu2 }
0x1006   :  { %v6212_v28 = vadd.f32 %v6211_v54, %v6179_v25 }
0x1008   :  { %v6221_v40 = vpack.c.bf16 %v6212_v28, %v6210_v23  ;;  %v16441_v23 = vld [vmem:[#allocation16_spill] sm:$0xff] }
0x100a   :  { %10604 = vmatmul.msk.bf16.gmra.mxu3 %vm1512_vm3, %v6221_v40 }
0x100d   :  { %v6214_v17 = vpop.f32.mrf.mxu2 }
0x100e   :  { %v6215_v30 = vadd.f32 %v6214_v17, %v6182_v6 }
0x1010   :  { %v6222_v22 = vpack.c.bf16 %v6215_v30, %v6215_v30 }
0x1015   :  { %v6216_v11 = vpop.f32.mrf.mxu2 }
0x101a   :  { %10605 = vmatmul.msk.bf16.gmra.mxu3 %vm1512_vm3, %v6222_v22 }
0x105d   :  { %v6264_v14 = vpop.f32.mrf.mxu3 }
0x105e   :  { %v6288_v55 = vadd.f32 %v6264_v14, %v15523_v5  ;;  %v16439_v5 = vld [vmem:[#allocation13_spill] sm:$0xff] }
0x105f   :  { %v4955_v39 = vadd.f32 %v15138_v45, %v16439_v5  ;;  %v4957_v45 = vadd.f32 %v15146_v3, %v16440_v2  ;;  %v4959_v3 = vadd.f32 %v15155_v4, %v16441_v23  ;;  %v11718_v5 = vld [vmem:[%s16442_s28] sm:$0xff]  ;;  %v11735_v23 = vld [vmem:[%s16248_s6 + $0x38] sm:$0xff] }
0x1060   :  { %v6301_v59 = vadd.f32 %v11840_v46, %v6288_v55  ;;  %v11728_v55 = vld [vmem:[%s16248_s6 + $0x20] sm:$0xff] }
0x1061   :  { %v5289_v63 = vadd.f32 %v15259_v42, %v4955_v39  ;;  %v5291_v42 = vadd.f32 %v15264_v32, %v4957_v45  ;;  %v5293_v32 = vadd.f32 %v15269_v43, %v4959_v3  ;;  %v11732_v39 = vld [vmem:[%s16442_s28 + $0x50] sm:$0xff]  ;;  %v11764_v3 = vld [vmem:[%s16248_s6 + $0x80] sm:$0xff] }
0x1062   :  { %v6310_v18 = vmax.f32 %v6301_v59, 0.0  ;;  %v11717_v59 = vld [vmem:[%s16248_s6 + $0x8] sm:$0xff] }
0x1063   :  { %v5623_v8 = vadd.f32 %v15396_v24, %v5289_v63  ;;  %v5625_v24 = vadd.f32 %v15401_v20, %v5291_v42  ;;  %v5627_v20 = vadd.f32 %v15406_v58, %v5293_v32  ;;  %v11731_v63 = vld [vmem:[%s16442_s28 + $0x48] sm:$0xff]  ;;  %v11758_v32 = vld [vmem:[%s16248_s6 + $0x70] sm:$0xff] }
0x1065   :  { %v6266_v56 = vpop.f32.mrf.mxu3  ;;  %v5957_v50 = vadd.f32 %v15531_v34, %v5623_v8  ;;  %v5959_v34 = vadd.f32 %v15536_v10, %v5625_v24  ;;  %v5961_v10 = vadd.f32 %v15544_v52, %v5627_v20  ;;  %v11722_v52 = vld [vmem:[%s16248_s6 + $0x10] sm:$0xff]  ;;  %v11730_v8 = vld [vmem:[%s16442_s28 + $0x40] sm:$0xff]  ;;  %v11759_v20 = vld [vmem:[%s16248_s6 + $0x78] sm:$0xff] }
0x1066   :  { %v6289_v21 = vadd.f32 %v6266_v56, %v5955_v49  ;;  %v11723_v49 = vld [vmem:[%s16248_s6 + $0x18] sm:$0xff]  ;;  %v11729_v56 = vld [vmem:[%s16248_s6 + $0x28] sm:$0xff] }
0x1068   :  { %v6302_v61 = vadd.f32 %v11840_v46, %v6289_v21  ;;  %v11740_v21 = vld [vmem:[%s16248_s6 + $0x40] sm:$0xff] }
0x106a   :  { %v6311_v37 = vmax.f32 %v6302_v61, 0.0  ;;  %v11721_v61 = vld [vmem:[%s16442_s28 + $0x18] sm:$0xff] }
0x106b   :  { %6510 = vmatpush.bf16.msrb.mxu2 %v11721_v61 }
0x106c   :  { %v15566_v29 = vpack.c.bf16 %v6311_v37, %v6310_v18  ;;  %v11720_v18 = vld [vmem:[%s16442_s28 + $0x10] sm:$0xff]  ;;  %v11719_v37 = vld [vmem:[%s16442_s28 + $0x8] sm:$0xff] }
0x106d   :  { %v6269_v47 = vpop.f32.mrf.mxu3 }
0x106e   :  { %v6290_v35 = vadd.f32 %v6269_v47, %v15529_v53  ;;  %v11733_v47 = vld [vmem:[%s16442_s28 + $0x58] sm:$0xff] }
0x106f   :  { %6511 = vmatpush.bf16.msrb.mxu2 %v11720_v18  ;;  %v11756_v18 = vld [vmem:[%s16442_s28 + $0xd0] sm:$0xff] }
0x1070   :  { %v6303_v9 = vadd.f32 %v11840_v46, %v6290_v35 }
0x1072   :  { %v6312_v38 = vmax.f32 %v6303_v9, 0.0 }
0x1073   :  { %6512 = vmatpush.bf16.msrb.mxu2 %v11719_v37 }
0x1075   :  { %v6271_v0 = vpop.f32.mrf.mxu3 }
0x1076   :  { %v6291_v13 = vadd.f32 %v6271_v0, %v5957_v50 }
0x1077   :  { %6513 = vmatpush.bf16.msrb.mxu2 %v11718_v5  ;;  %v11751_v5 = vld [vmem:[%s16442_s28 + $0xb8] sm:$0xff] }
0x1078   :  { %v6304_v36 = vadd.f32 %v11840_v46, %v6291_v13 }
0x107a   :  { %v6313_v48 = vmax.f32 %v6304_v36, 0.0 }
0x107c   :  { %v15574_v51 = vpack.c.bf16 %v6313_v48, %v6312_v38  ;;  %v11741_v48 = vld [vmem:[%s16248_s6 + $0x48] sm:$0xff] }
0x107d   :  { %v6274_v41 = vpop.f32.mrf.mxu3 }
0x107e   :  { %v6292_v53 = vadd.f32 %v6274_v41, %v15534_v12 }
0x1080   :  { %v6305_v27 = vadd.f32 %v11840_v46, %v6292_v53 }
0x1082   :  { %v6314_v33 = vmax.f32 %v6305_v27, 0.0 }
0x1085   :  { %v6276_v16 = vpop.f32.mrf.mxu3 }
0x1086   :  { %v6293_v57 = vadd.f32 %v6276_v16, %v5959_v34 }
0x1088   :  { %v6306_v15 = vadd.f32 %v11840_v46, %v6293_v57  ;;  %v11752_v57 = vld [vmem:[%s16248_s6 + $0x60] sm:$0xff] }
0x108a   :  { %v6315_v26 = vmax.f32 %v6306_v15, 0.0 }
0x108c   :  { %v15582_v25 = vpack.c.bf16 %v6315_v26, %v6314_v33  ;;  %v11734_v26 = vld [vmem:[%s16248_s6 + $0x30] sm:$0xff] }
0x108d   :  { %v6279_v54 = vpop.f32.mrf.mxu3 }
0x108e   :  { %v6294_v12 = vadd.f32 %v6279_v54, %v15542_v7  ;;  %v11727_v7 = vld [vmem:[%s16442_s28 + $0x38] sm:$0xff]  ;;  %v11753_v54 = vld [vmem:[%s16248_s6 + $0x68] sm:$0xff] }
0x1090   :  { %v6307_v40 = vadd.f32 %v11840_v46, %v6294_v12  ;;  %v11745_v12 = vld [vmem:[%s16442_s28 + $0x98] sm:$0xff] }
0x1092   :  { %v6316_v6 = vmax.f32 %v6307_v40, 0.0 }
0x1095   :  { %v6281_v28 = vpop.f32.mrf.mxu3 }
0x1096   :  { %v6295_v62 = vadd.f32 %v6281_v28, %v5961_v10  ;;  %v11739_v10 = vld [vmem:[%s16442_s28 + $0x78] sm:$0xff]  ;;  %v11744_v28 = vld [vmem:[%s16442_s28 + $0x90] sm:$0xff] }
0x1097   :  { %6714 = vmatpush.bf16.msra.mxu2 %v11739_v10 }
0x1098   :  { %v6308_v17 = vadd.f32 %v11840_v46, %v6295_v62  ;;  %v11743_v62 = vld [vmem:[%s16442_s28 + $0x88] sm:$0xff] }
0x109a   :  { %v6317_v30 = vmax.f32 %v6308_v17, 0.0 }
0x109c   :  { %v15590_v11 = vpack.c.bf16 %v6317_v30, %v6316_v6  ;;  %v11738_v6 = vld [vmem:[%s16442_s28 + $0x70] sm:$0xff]  ;;  %v11742_v30 = vld [vmem:[%s16442_s28 + $0x80] sm:$0xff] }
0x109d   :  { %v6284_v22 = vpop.f32.mrf.mxu3  ;;  %6715 = vmatpush.bf16.msra.mxu2 %v11738_v6 }
0x109e   :  { %v6296_v14 = vadd.f32 %v6284_v22, %v15550_v1  ;;  %v11716_v1 = vld [vmem:[%s16248_s6] sm:$0xff] }
0x10a0   :  { %v6309_v4 = vadd.f32 %v11840_v46, %v6296_v14  ;;  %v11724_v46 = vld [vmem:[%s16442_s28 + $0x20] sm:$0xff] }
0x10a2   :  { %v6318_v19 = vmax.f32 %v6309_v4, 0.0 }
0x10a4   :  { %v6323_v43 = vpack.c.bf16 %v6318_v19, %v6318_v19 }
0x10a5   :  { %v6286_v31 = vpop.f32.mrf.mxu3 }
0x10a6   :  { %v15594_v58 = vsel %vm1090_vm1, %v6323_v43, 0  ;;  %vm8594_vm1 = vcmask 31744  }
0x10a7   :  { %6350 = vmatpush.bf16.msra.mxu1 %v15594_v58  ;;  %6400 = vmatpush.bf16.msra.mxu0 %v15594_v58 }
0x10a8   :  { %6549 = vmatpush.bf16.msrb.mxu3 %v15594_v58 }
0x10ab   :  { %6351 = vmatpush.bf16.msra.mxu1 %v15590_v11  ;;  %6401 = vmatpush.bf16.msra.mxu0 %v15590_v11 }
0x10ac   :  { %6550 = vmatpush.bf16.msrb.mxu3 %v15590_v11 }
0x10af   :  { %6352 = vmatpush.bf16.msra.mxu1 %v15582_v25  ;;  %6402 = vmatpush.bf16.msra.mxu0 %v15582_v25 }
0x10b0   :  { %6551 = vmatpush.bf16.msrb.mxu3 %v15582_v25 }
0x10b3   :  { %6353 = vmatpush.bf16.msra.mxu1 %v15574_v51  ;;  %6403 = vmatpush.bf16.msra.mxu0 %v15574_v51 }
0x10b4   :  { %6552 = vmatpush.bf16.msrb.mxu3 %v15574_v51 }
0x10b7   :  { %6354 = vmatpush.bf16.msra.mxu1 %v15566_v29  ;;  %6404 = vmatpush.bf16.msra.mxu0 %v15566_v29 }
0x10b8   :  { %6553 = vmatpush.bf16.msrb.mxu3 %v15566_v29 }
0x10ba   :  { %10628 = vmatmul.msk.bf16.vlgmr.msra.gmra.mxu0 %vm1074_vm2, %v11722_v52  ;;  %10614 = vmatmul.msk.bf16.vlgmr.msra.gmra.mxu1 %vm1074_vm2, %v11716_v1 }
0x10bb   :  { %6461 = vmatpush.bf16.msrb.mxu1 %v11727_v7  ;;  %10686 = vmatmul.msk.bf16.vlgmr.msrb.gmra.mxu3 %vm1074_vm2, %v11728_v55 }
0x10bc   :  { %6757 = vmatpush.bf16.msra.mxu3 %v15594_v58  ;;  %6610 = vmatpush.bf16.msrb.mxu0 %v11733_v47 }
0x10bf   :  { %6462 = vmatpush.bf16.msrb.mxu1 %v11726_v60 }
0x10c0   :  { %6758 = vmatpush.bf16.msra.mxu3 %v15590_v11  ;;  %6611 = vmatpush.bf16.msrb.mxu0 %v11732_v39  ;;  %v11755_v39 = vld [vmem:[%s16442_s28 + $0xc8] sm:$0xff] }
0x10c3   :  { %6463 = vmatpush.bf16.msrb.mxu1 %v11725_v44 }
0x10c4   :  { %6759 = vmatpush.bf16.msra.mxu3 %v15582_v25  ;;  %6612 = vmatpush.bf16.msrb.mxu0 %v11731_v63 }
0x10c7   :  { %6464 = vmatpush.bf16.msrb.mxu1 %v11724_v46 }
0x10c8   :  { %6760 = vmatpush.bf16.msra.mxu3 %v15574_v51  ;;  %6613 = vmatpush.bf16.msrb.mxu0 %v11730_v8  ;;  %v11750_v8 = vld [vmem:[%s16442_s28 + $0xb0] sm:$0xff] }
0x10ca   :  { %10629 = vmatmul.msk.bf16.gmra.mxu0 %vm1074_vm2, %v11723_v49  ;;  %10615 = vmatmul.msk.bf16.gmra.mxu1 %vm1074_vm2, %v11717_v59  ;;  %v11757_v49 = vld [vmem:[%s16442_s28 + $0xd8] sm:$0xff] }
0x10cb   :  { %6653 = vmatpush.bf16.msra.mxu1 %v15594_v58  ;;  %10687 = vmatmul.msk.bf16.gmra.mxu3 %vm1074_vm2, %v11729_v56 }
0x10cc   :  { %6761 = vmatpush.bf16.msra.mxu3 %v15566_v29  ;;  %6818 = vmatpush.bf16.msra.mxu0 %v11745_v12 }
0x10cf   :  { %6654 = vmatpush.bf16.msra.mxu1 %v15590_v11 }
0x10d0   :  { %6965 = vmatpush.bf16.msrb.mxu3 %v15594_v58  ;;  %6819 = vmatpush.bf16.msra.mxu0 %v11744_v28 }
0x10d3   :  { %6655 = vmatpush.bf16.msra.mxu1 %v15582_v25 }
0x10d4   :  { %6966 = vmatpush.bf16.msrb.mxu3 %v15590_v11  ;;  %6820 = vmatpush.bf16.msra.mxu0 %v11743_v62 }
0x10d7   :  { %6656 = vmatpush.bf16.msra.mxu1 %v15574_v51 }
0x10d8   :  { %6967 = vmatpush.bf16.msrb.mxu3 %v15582_v25  ;;  %6821 = vmatpush.bf16.msra.mxu0 %v11742_v30 }
0x10db   :  { %6657 = vmatpush.bf16.msra.mxu1 %v15566_v29  ;;  %10766 = vmatmul.msk.bf16.vlgmr.msra.gmra.mxu3 %vm1074_vm2, %v11740_v21 }
0x10dc   :  { %6968 = vmatpush.bf16.msrb.mxu3 %v15574_v51 }
0x10e0   :  { %6969 = vmatpush.bf16.msrb.mxu3 %v15566_v29 }
0x10e4   :  { %7173 = vmatpush.bf16.msra.mxu3 %v15594_v58 }
0x10e8   :  { %7174 = vmatpush.bf16.msra.mxu3 %v15590_v11 }
0x10eb   :  { %10767 = vmatmul.msk.bf16.gmra.mxu3 %vm1074_vm2, %v11741_v48 }
0x10ec   :  { %7175 = vmatpush.bf16.msra.mxu3 %v15582_v25 }
0x10f0   :  { %7176 = vmatpush.bf16.msra.mxu3 %v15574_v51 }
0x10f4   :  { %7177 = vmatpush.bf16.msra.mxu3 %v15566_v29 }
0x10fb   :  { %10846 = vmatmul.msk.bf16.vlgmr.msrb.gmra.mxu3 %vm1074_vm2, %v11752_v57  ;;  %v11767_v57 = vld [vmem:[%s16442_s28 + $0x108] sm:$0xff] }
0x110b   :  { %10847 = vmatmul.msk.bf16.gmra.mxu3 %vm1074_vm2, %v11753_v54  ;;  %v11761_v54 = vld [vmem:[%s16442_s28 + $0xe8] sm:$0xff] }
0x111b   :  { %10926 = vmatmul.msk.bf16.vlgmr.msra.gmra.mxu3 %vm1074_vm2, %v11764_v3 }
0x1137   :  { %v6406_v35 = vpop.f32.mrf.mxu0  ;;  %v6356_v50 = vpop.f32.mrf.mxu1 }
0x113e   :  { %v6555_v0 = vpop.f32.mrf.mxu3 }
0x113f   :  { %v6408_v9 = vpop.f32.mrf.mxu0  ;;  %v6358_v13 = vpop.f32.mrf.mxu1 }
0x1140   :  { %v6416_v36 = vpack.c.bf16 %v6408_v9, %v6406_v35  ;;  %v6366_v38 = vpack.c.bf16 %v6358_v13, %v6356_v50  ;;  %v11754_v35 = vld [vmem:[%s16442_s28 + $0xc0] sm:$0xff]  ;;  %v11749_v50 = vld [vmem:[%s16442_s28 + $0xa8] sm:$0xff] }
0x1142   :  { %10654 = vmatmul.msk.bf16.vlgmr.msrb.gmra.mxu1 %vm487_vm0, %v6416_v36  ;;  %10672 = vmatmul.msk.bf16.vlgmr.msrb.gmra.mxu2 %vm487_vm0, %v6366_v38  ;;  %v11748_v36 = vld [vmem:[%s16442_s28 + $0xa0] sm:$0xff] }
0x1143   :  { %6861 = vmatpush.bf16.msrb.mxu1 %v15594_v58 }
0x1146   :  { %v6557_v41 = vpop.f32.mrf.mxu3 }
0x1147   :  { %6862 = vmatpush.bf16.msrb.mxu1 %v15590_v11  ;;  %v6411_v2 = vpop.f32.mrf.mxu0  ;;  %v6565_v45 = vpack.c.bf16 %v6557_v41, %v6555_v0  ;;  %v6361_v42 = vpop.f32.mrf.mxu1 }
0x1149   :  { %10712 = vmatmul.msk.bf16.vlgmr.msrb.gmra.mxu0 %vm487_vm0, %v6565_v45 }
0x114a   :  { %7026 = vmatpush.bf16.msrb.mxu0 %v11757_v49 }
0x114b   :  { %6863 = vmatpush.bf16.msrb.mxu1 %v15582_v25 }
0x114e   :  { %v6560_v24 = vpop.f32.mrf.mxu3  ;;  %7027 = vmatpush.bf16.msrb.mxu0 %v11756_v18 }
0x114f   :  { %6864 = vmatpush.bf16.msrb.mxu1 %v15574_v51  ;;  %v6413_v53 = vpop.f32.mrf.mxu0  ;;  %v6363_v16 = vpop.f32.mrf.mxu1 }
0x1150   :  { %v6417_v34 = vpack.c.bf16 %v6413_v53, %v6411_v2  ;;  %v6367_v27 = vpack.c.bf16 %v6363_v16, %v6361_v42  ;;  %v11769_v42 = vld [vmem:[%s16442_s28 + $0x118] sm:$0xff]  ;;  %v11768_v53 = vld [vmem:[%s16442_s28 + $0x110] sm:$0xff] }
0x1152   :  { %10655 = vmatmul.msk.bf16.gmra.mxu1 %vm487_vm0, %v6417_v34  ;;  %10673 = vmatmul.msk.bf16.gmra.mxu2 %vm487_vm0, %v6367_v27  ;;  %v11763_v27 = vld [vmem:[%s16442_s28 + $0xf8] sm:$0xff] }
0x1153   :  { %6865 = vmatpush.bf16.msrb.mxu1 %v15566_v29  ;;  %7028 = vmatpush.bf16.msrb.mxu0 %v11755_v39 }
0x1156   :  { %v6562_v15 = vpop.f32.mrf.mxu3 }
0x1157   :  { %v6566_v33 = vpack.c.bf16 %v6562_v15, %v6560_v24  ;;  %7029 = vmatpush.bf16.msrb.mxu0 %v11754_v35 }
0x1159   :  { %10713 = vmatmul.msk.bf16.gmra.mxu0 %vm487_vm0, %v6566_v33  ;;  %v11762_v33 = vld [vmem:[%s16442_s28 + $0xf0] sm:$0xff] }
0x115e   :  { %v6763_v40 = vpop.f32.mrf.mxu3 }
0x1162   :  { %10726 = vmatmul.msk.bf16.vlgmr.msra.gmra.mxu1 %vm1074_vm2, %v11734_v26  ;;  %v11766_v26 = vld [vmem:[%s16442_s28 + $0x100] sm:$0xff] }
0x1163   :  { %7069 = vmatpush.bf16.msra.mxu1 %v15594_v58  ;;  %v11736_v58 = vld [vmem:[%s16442_s28 + $0x60] sm:$0xff] }
0x1166   :  { %v6765_v22 = vpop.f32.mrf.mxu3 }
0x1167   :  { %7070 = vmatpush.bf16.msra.mxu1 %v15590_v11  ;;  %v11737_v11 = vld [vmem:[%s16442_s28 + $0x68] sm:$0xff]  ;;  %v6773_v14 = vpack.c.bf16 %v6765_v22, %v6763_v40 }
0x1168   :  { %6716 = vmatpush.bf16.msra.mxu2 %v11737_v11 }
0x1169   :  { %10792 = vmatmul.msk.bf16.vlgmr.msra.gmra.mxu0 %vm487_vm0, %v6773_v14 }
0x116a   :  { %7234 = vmatpush.bf16.msra.mxu0 %v11769_v42 }
0x116b   :  { %7071 = vmatpush.bf16.msra.mxu1 %v15582_v25  ;;  %v11746_v25 = vld [vmem:[%s16248_s6 + $0x50] sm:$0xff] }
0x116c   :  { %6717 = vmatpush.bf16.msra.mxu2 %v11736_v58 }
0x116e   :  { %v6768_v52 = vpop.f32.mrf.mxu3  ;;  %7235 = vmatpush.bf16.msra.mxu0 %v11768_v53 }
0x116f   :  { %7072 = vmatpush.bf16.msra.mxu1 %v15574_v51  ;;  %v11765_v51 = vld [vmem:[%s16248_s6 + $0x88] sm:$0xff] }
0x1170   :  { %10927 = vmatmul.msk.bf16.gmra.mxu3 %vm1074_vm2, %v11765_v51  ;;  %6922 = vmatpush.bf16.msrb.mxu2 %v11751_v5  ;;  %v11760_v51 = vld [vmem:[%s16442_s28 + $0xe0] sm:$0xff] }
0x1172   :  { %10727 = vmatmul.msk.bf16.gmra.mxu1 %vm1074_vm2, %v11735_v23  ;;  %7236 = vmatpush.bf16.msra.mxu0 %v11767_v57 }
0x1173   :  { %7073 = vmatpush.bf16.msra.mxu1 %v15566_v29  ;;  %v11747_v29 = vld [vmem:[%s16248_s6 + $0x58] sm:$0xff] }
0x1174   :  { %6923 = vmatpush.bf16.msrb.mxu2 %v11750_v8 }
0x1176   :  { %v6770_v44 = vpop.f32.mrf.mxu3  ;;  %7237 = vmatpush.bf16.msra.mxu0 %v11766_v26 }
0x1177   :  { %v6774_v46 = vpack.c.bf16 %v6770_v44, %v6768_v52 }
0x1178   :  { %6924 = vmatpush.bf16.msrb.mxu2 %v11749_v50 }
0x1179   :  { %10793 = vmatmul.msk.bf16.gmra.mxu0 %vm487_vm0, %v6774_v46 }
0x117c   :  { %6925 = vmatpush.bf16.msrb.mxu2 %v11748_v36 }
0x117e   :  { %v6971_v47 = vpop.f32.mrf.mxu3 }
0x1182   :  { %10806 = vmatmul.msk.bf16.vlgmr.msrb.gmra.mxu1 %vm1074_vm2, %v11746_v25 }
0x1186   :  { %v6973_v0 = vpop.f32.mrf.mxu3 }
0x1187   :  { %v6981_v9 = vpack.c.bf16 %v6973_v0, %v6971_v47 }
0x1189   :  { %10872 = vmatmul.msk.bf16.vlgmr.msrb.gmra.mxu0 %vm487_vm0, %v6981_v9 }
0x118e   :  { %v6976_v48 = vpop.f32.mrf.mxu3 }
0x1192   :  { %10807 = vmatmul.msk.bf16.gmra.mxu1 %vm1074_vm2, %v11747_v29 }
0x1196   :  { %v6978_v2 = vpop.f32.mrf.mxu3 }
0x1197   :  { %v6982_v45 = vpack.c.bf16 %v6978_v2, %v6976_v48 }
0x1199   :  { %10873 = vmatmul.msk.bf16.gmra.mxu0 %vm487_vm0, %v6982_v45 }
0x119e   :  { %v7179_v16 = vpop.f32.mrf.mxu3 }
0x11a2   :  { %10886 = vmatmul.msk.bf16.vlgmr.msra.gmra.mxu1 %vm1074_vm2, %v11758_v32 }
0x11a6   :  { %v7181_v23 = vpop.f32.mrf.mxu3 }
0x11a7   :  { %v7189_v3 = vpack.c.bf16 %v7181_v23, %v7179_v16 }
0x11a9   :  { %10952 = vmatmul.msk.bf16.vlgmr.msra.gmra.mxu0 %vm487_vm0, %v7189_v3 }
0x11b2   :  { %10887 = vmatmul.msk.bf16.gmra.mxu1 %vm1074_vm2, %v11759_v20 }
0x11bf   :  { %v6466_v17 = vpop.f32.mrf.mxu1 }
0x11c5   :  { %v6515_v4 = vpop.f32.mrf.mxu2 }
0x11c6   :  { %v6516_v19 = vadd.f32 %v6515_v4, %v6466_v17  ;;  %v6615_v43 = vpop.f32.mrf.mxu0 }
0x11c7   :  { %v15777_v31 = vpop.f32.mrf.mxu1 }
0x11c8   :  { %v15782_v7 = vadd.f32 %v6615_v43, %v6516_v19 }
0x11cd   :  { %v15784_v1 = vpop.f32.mrf.mxu2 }
0x11ce   :  { %v15786_v55 = vpop.f32.mrf.mxu0  ;;  %v6518_v36 = vadd.f32 %v15784_v1, %v15777_v31 }
0x11cf   :  { %v6471_v60 = vpop.f32.mrf.mxu1 }
0x11d0   :  { %v6626_v48 = vadd.f32 %v15786_v55, %v6518_v36 }
0x11d5   :  { %v6520_v56 = vpop.f32.mrf.mxu2 }
0x11d6   :  { %v6620_v59 = vpop.f32.mrf.mxu0  ;;  %v6521_v61 = vadd.f32 %v6520_v56, %v6471_v60 }
0x11d7   :  { %v15792_v21 = vpop.f32.mrf.mxu1 }
0x11d8   :  { %v15797_v37 = vadd.f32 %v6620_v59, %v6521_v61 }
0x11dd   :  { %v6522_v43 = vpop.f32.mrf.mxu2 }
0x11de   :  { %v6622_v14 = vpop.f32.mrf.mxu0 }
0x11df   :  { %v6659_v63 = vpop.f32.mrf.mxu1 }
0x11e6   :  { %v6823_v4 = vpop.f32.mrf.mxu0 }
0x11e7   :  { %v6661_v13 = vpop.f32.mrf.mxu1 }
0x11e8   :  { %v6669_v38 = vpack.c.bf16 %v6661_v13, %v6659_v63 }
0x11ea   :  { %10752 = vmatmul.msk.bf16.vlgmr.msra.gmra.mxu2 %vm487_vm0, %v6669_v38 }
0x11eb   :  { %7130 = vmatpush.bf16.msra.mxu2 %v11763_v27 }
0x11ee   :  { %v6825_v19 = vpop.f32.mrf.mxu0 }
0x11ef   :  { %v6664_v41 = vpop.f32.mrf.mxu1  ;;  %7131 = vmatpush.bf16.msra.mxu2 %v11762_v33 }
0x11f3   :  { %7132 = vmatpush.bf16.msra.mxu2 %v11761_v54  ;;  %v7184_v32 = vpop.f32.mrf.mxu3 }
0x11f6   :  { %v6828_v52 = vpop.f32.mrf.mxu0 }
0x11f7   :  { %v6666_v24 = vpop.f32.mrf.mxu1  ;;  %7133 = vmatpush.bf16.msra.mxu2 %v11760_v51 }
0x11f8   :  { %v6670_v34 = vpack.c.bf16 %v6666_v24, %v6664_v41  ;;  %v6523_v41 = vadd.f32 %v6522_v43, %v15792_v21  ;;  %v7275_v43 = vld [vmem:[%s16251_s9] sm:$0xf] }
0x11fa   :  { %10753 = vmatmul.msk.bf16.gmra.mxu2 %vm487_vm0, %v6670_v34  ;;  %v6628_v42 = vadd.f32 %v6622_v14, %v6523_v41  ;;  %v11022_v41 = vld [vmem:[%s16251_s9 + $0x10] sm:$0xf] }
0x11fb   :  { %v7186_v12 = vpop.f32.mrf.mxu3 }
0x11fc   :  { %v7190_v10 = vpack.c.bf16 %v7186_v12, %v7184_v32 }
0x11fe   :  { %10953 = vmatmul.msk.bf16.gmra.mxu0 %vm487_vm0, %v7190_v10  ;;  %v6830_v49 = vpop.f32.mrf.mxu0 }
0x11ff   :  { %v6867_v15 = vpop.f32.mrf.mxu1 }
0x1206   :  { %v7031_v18 = vpop.f32.mrf.mxu0 }
0x1207   :  { %v6869_v25 = vpop.f32.mrf.mxu1 }
0x1208   :  { %v6877_v29 = vpack.c.bf16 %v6869_v25, %v6867_v15 }
0x120a   :  { %10832 = vmatmul.msk.bf16.vlgmr.msrb.gmra.mxu2 %vm487_vm0, %v6877_v29  ;;  %v11841_v29 = vld [vmem:[%s16249_s8] ss:$0 sm:$0xff] }
0x120e   :  { %v7033_v5 = vpop.f32.mrf.mxu0 }
0x120f   :  { %v6872_v20 = vpop.f32.mrf.mxu1 }
0x1216   :  { %v7036_v8 = vpop.f32.mrf.mxu0 }
0x1217   :  { %v6874_v28 = vpop.f32.mrf.mxu1 }
0x1218   :  { %v6878_v40 = vpack.c.bf16 %v6874_v28, %v6872_v20 }
0x121a   :  { %10833 = vmatmul.msk.bf16.gmra.mxu2 %vm487_vm0, %v6878_v40 }
0x121e   :  { %v7038_v50 = vpop.f32.mrf.mxu0 }
0x121f   :  { %v7075_v62 = vpop.f32.mrf.mxu1 }
0x1226   :  { %v7239_v9 = vpop.f32.mrf.mxu0 }
0x1227   :  { %v7077_v17 = vpop.f32.mrf.mxu1 }
0x1228   :  { %v7085_v6 = vpack.c.bf16 %v7077_v17, %v7075_v62 }
0x122a   :  { %10912 = vmatmul.msk.bf16.vlgmr.msra.gmra.mxu2 %vm487_vm0, %v7085_v6 }
0x122e   :  { %v7241_v38 = vpop.f32.mrf.mxu0 }
0x122f   :  { %v7080_v30 = vpop.f32.mrf.mxu1 }
0x1237   :  { %v7082_v11 = vpop.f32.mrf.mxu1 }
0x1238   :  { %v7086_v22 = vpack.c.bf16 %v7082_v11, %v7080_v30 }
0x123a   :  { %10913 = vmatmul.msk.bf16.gmra.mxu2 %vm487_vm0, %v7086_v22 }
0x126d   :  { %v6719_v58 = vpop.f32.mrf.mxu2 }
0x126e   :  { %v6729_v60 = vadd.f32 %v6719_v58, %v15782_v7  ;;  %v11774_v7 = vld [vmem:[%s16250_s10 + $0x8] sm:$0xff]  ;;  %v10977_v58 = vld [vmem:[%s16251_s9 + $0x4] sm:$0xf] }
0x126f   :  { %7318 = vmatpush.bf16.msrb.mxu2 %v11774_v7 }
0x1270   :  { %v6833_v44 = vadd.f32 %v6823_v4, %v6729_v60  ;;  %v11037_v60 = vld [vmem:[%s16251_s9 + $0x14] sm:$0xf] }
0x1275   :  { %v6721_v46 = vpop.f32.mrf.mxu2 }
0x1276   :  { %v6730_v45 = vadd.f32 %v6721_v46, %v6626_v48  ;;  %v11097_v46 = vld [vmem:[%s16251_s9 + $0x24] sm:$0xf]  ;;  %v10992_v48 = vld [vmem:[%s16251_s9 + $0x8] sm:$0xf] }
0x1278   :  { %v6834_v24 = vadd.f32 %v6825_v19, %v6730_v45  ;;  %v11082_v45 = vld [vmem:[%s16251_s9 + $0x20] sm:$0xf] }
0x127b   :  { %v7244_v57 = vpop.f32.mrf.mxu0 }
0x127d   :  { %v6724_v56 = vpop.f32.mrf.mxu2 }
0x127e   :  { %v6731_v59 = vadd.f32 %v6724_v56, %v15797_v37  ;;  %v11773_v37 = vld [vmem:[%s16250_s10] sm:$0xff]  ;;  %v11127_v56 = vld [vmem:[%s16251_s9 + $0x2c] sm:$0xf] }
0x127f   :  { %7319 = vmatpush.bf16.msrb.mxu2 %v11773_v37 }
0x1280   :  { %v6835_v61 = vadd.f32 %v6828_v52, %v6731_v59  ;;  %v11007_v52 = vld [vmem:[%s16251_s9 + $0xc] sm:$0xf] }
0x1283   :  { %v7246_v12 = vpop.f32.mrf.mxu0 }
0x1285   :  { %v6726_v47 = vpop.f32.mrf.mxu2 }
0x1286   :  { %v6732_v53 = vadd.f32 %v6726_v47, %v6628_v42  ;;  %v11157_v42 = vld [vmem:[%s16251_s9 + $0x34] sm:$0xf] }
0x1288   :  { %v6836_v15 = vadd.f32 %v6830_v49, %v6732_v53  ;;  %v7274_v49 = vld [vmem:[%s16252_s12 + $0x18] sm:$0x1]  ;;  %v11187_v53 = vld [vmem:[%s16251_s9 + $0x3c] sm:$0xf] }
0x1289   :  { %v7338_v59 = vunpack.c.l.b16 %v7274_v49 }
0x128d   :  { %v6927_v39 = vpop.f32.mrf.mxu2 }
0x128e   :  { %v6937_v33 = vadd.f32 %v6927_v39, %v6833_v44  ;;  %v11067_v44 = vld [vmem:[%s16251_s9 + $0x1c] sm:$0xf]  ;;  %v11772_v39 = vld [vmem:[%s16252_s12 + $0x10] sm:$0xff] }
0x1290   :  { %v7041_v23 = vadd.f32 %v7031_v18, %v6937_v33  ;;  %v11864_v18 = vmov 0   ;;  %v11780_v33 = vld [vmem:[%s16250_s10 + $0x38] sm:$0xff] }
0x1291   :  { %v7352_v47 = vsel %vm7350_vm4, 65535, %v11864_v18  ;;  %11838 = vset.pattern.permute.xlu0 %v11864_v18  ;;  %vm8652_vm4 = vcmask 531456  }
0x1295   :  { %v6929_v63 = vpop.f32.mrf.mxu2 }
0x1296   :  { %v6938_v16 = vadd.f32 %v6929_v63, %v6834_v24  ;;  %v11771_v63 = vld [vmem:[%s16252_s12 + $0x8] sm:$0xff] }
0x1297   :  { %v11112_v24 = vld [vmem:[%s16251_s9 + $0x28] sm:$0xf] }
0x1298   :  { %v7042_v54 = vadd.f32 %v7033_v5, %v6938_v16 }
0x129d   :  { %v6932_v35 = vpop.f32.mrf.mxu2 }
0x129e   :  { %v6939_v34 = vadd.f32 %v6932_v35, %v6835_v61  ;;  %v7342_v61 = vpack.c.b16 %v7338_v59, %v7338_v59  ;;  %v7267_v35 = vld [vmem:[%s16253_s11] sm:$0xf] }
0x12a0   :  { %v7043_v26 = vadd.f32 %v7036_v8, %v6939_v34  ;;  %v7354_v5 = vand.u32 %v7352_v47, %v7342_v61  ;;  %v11770_v8 = vld [vmem:[%s16252_s12] sm:$0xff]  ;;  %v11142_v34 = vld [vmem:[%s16251_s9 + $0x30] sm:$0xf] }
0x12a1   :  { %v11789_v61 = vld [vmem:[%s16250_s10 + $0x80] sm:$0xff] }
0x12a2   :  { %7360 = vmatpush.bf16.msrb.mxu3 %v7354_v5  ;;  %v11796_v5 = vld [vmem:[%s16250_s10 + $0xb8] sm:$0xff] }
0x12a5   :  { %v6934_v0 = vpop.f32.mrf.mxu2 }
0x12a6   :  { %v6940_v31 = vadd.f32 %v6934_v0, %v6836_v15  ;;  %7361 = vmatpush.bf16.msrb.mxu3 %v11772_v39  ;;  %v11775_v0 = vld [vmem:[%s16250_s10 + $0x10] sm:$0xff] }
0x12a8   :  { %v7044_v55 = vadd.f32 %v7038_v50, %v6940_v31  ;;  %v11776_v50 = vld [vmem:[%s16250_s10 + $0x18] sm:$0xff] }
0x12aa   :  { %7362 = vmatpush.bf16.msrb.mxu3 %v11771_v63  ;;  %v11794_v63 = vld [vmem:[%s16250_s10 + $0xa8] sm:$0xff] }
0x12ad   :  { %v7135_v13 = vpop.f32.mrf.mxu2 }
0x12ae   :  { %v7145_v25 = vadd.f32 %v7135_v13, %v7041_v23  ;;  %7363 = vmatpush.bf16.msrb.mxu3 %v11770_v8  ;;  %v11782_v23 = vld [vmem:[%s16250_s10 + $0x48] sm:$0xff]  ;;  %v11795_v8 = vld [vmem:[%s16250_s10 + $0xb0] sm:$0xff] }
0x12b0   :  { %v7249_v10 = vadd.f32 %v7239_v9, %v7145_v25  ;;  %v11784_v25 = vld [vmem:[%s16250_s10 + $0x58] sm:$0xff] }
0x12b1   :  { %10976 = vmatmul.msk.bf16.vlgmr.msrb.gmra.mxu3 %vm7346_vm5, %v7267_v35  ;;  %vm8654_vm5 = vcmask 539648  }
0x12b2   :  { %v7257_v6 = vadd.f32 %v11841_v29, %v7249_v10 }
0x12b4   :  { %v7261_v4 = vmax.f32 %v7257_v6, 0.0 }
0x12b5   :  { %v7137_v2 = vpop.f32.mrf.mxu2 }
0x12b6   :  { %v7146_v3 = vadd.f32 %v7137_v2, %v7042_v54  ;;  %v11052_v2 = vld [vmem:[%s16251_s9 + $0x18] sm:$0xf]  ;;  %v11779_v54 = vld [vmem:[%s16250_s10 + $0x30] sm:$0xff] }
0x12b8   :  { %v7250_v32 = vadd.f32 %v7241_v38, %v7146_v3 }
0x12ba   :  { %v7258_v62 = vadd.f32 %v11841_v29, %v7250_v32 }
0x12bc   :  { %v7262_v22 = vmax.f32 %v7258_v62, 0.0 }
0x12bd   :  { %v7140_v27 = vpop.f32.mrf.mxu2 }
0x12be   :  { %v7147_v1 = vadd.f32 %v7140_v27, %v7043_v26  ;;  %v15871_v19 = vpack.c.bf16 %v7262_v22, %v7261_v4  ;;  %v11778_v27 = vld [vmem:[%s16250_s10 + $0x28] sm:$0xff]  ;;  %v11777_v26 = vld [vmem:[%s16250_s10 + $0x20] sm:$0xff] }
0x12bf   :  { %7467 = vmatpush.bf16.msra.mxu3 %v11778_v27  ;;  %v11802_v27 = vld [vmem:[%s16250_s10 + $0xe8] sm:$0xff] }
0x12c0   :  { %v7251_v21 = vadd.f32 %v7244_v57, %v7147_v1  ;;  %v11172_v57 = vld [vmem:[%s16251_s9 + $0x38] sm:$0xf] }
0x12c2   :  { %v7259_v28 = vadd.f32 %v11841_v29, %v7251_v21 }
0x12c3   :  { %7468 = vmatpush.bf16.msra.mxu3 %v11777_v26 }
0x12c4   :  { %v7263_v30 = vmax.f32 %v7259_v28, 0.0 }
0x12c5   :  { %v7142_v51 = vpop.f32.mrf.mxu2 }
0x12c6   :  { %v7148_v20 = vadd.f32 %v7142_v51, %v7044_v55  ;;  %v11781_v51 = vld [vmem:[%s16250_s10 + $0x40] sm:$0xff] }
0x12c7   :  { %7573 = vmatpush.bf16.msrb.mxu3 %v11782_v23 }
0x12c8   :  { %v7252_v40 = vadd.f32 %v7246_v12, %v7148_v20 }
0x12ca   :  { %v7260_v17 = vadd.f32 %v11841_v29, %v7252_v40  ;;  %v11783_v29 = vld [vmem:[%s16250_s10 + $0x50] sm:$0xff] }
0x12cb   :  { %7574 = vmatpush.bf16.msrb.mxu3 %v11781_v51 }
0x12cc   :  { %v7264_v11 = vmax.f32 %v7260_v17, 0.0  ;;  %v11788_v17 = vld [vmem:[%s16250_s10 + $0x78] sm:$0xff] }
0x12ce   :  { %v15866_v14 = vpack.c.bf16 %v7264_v11, %v7263_v30  ;;  %v11786_v30 = vld [vmem:[%s16250_s10 + $0x68] sm:$0xff]  ;;  %v11787_v11 = vld [vmem:[%s16250_s10 + $0x70] sm:$0xff] }
0x12d0   :  { %7285 = vmatpush.bf16.msrb.mxu1 %v15866_v14  ;;  %7380 = vmatpush.bf16.msrb.mxu0 %v15866_v14 }
0x12d1   :  { %7433 = vmatpush.bf16.msra.mxu2 %v15866_v14 }
0x12d4   :  { %7286 = vmatpush.bf16.msrb.mxu1 %v15871_v19  ;;  %7381 = vmatpush.bf16.msrb.mxu0 %v15871_v19 }
0x12d5   :  { %7434 = vmatpush.bf16.msra.mxu2 %v15871_v19 }
0x12d7   :  { %10954 = vmatmul.msk.bf16.vlgmr.msrb.gmra.mxu1 %vm1512_vm3, %v7275_v43  ;;  %10978 = vmatmul.msk.bf16.vlgmr.msrb.gmra.mxu0 %vm1512_vm3, %v10977_v58 }
0x12d8   :  { %7486 = vmatpush.bf16.msra.mxu0 %v15866_v14  ;;  %7414 = vmatpush.bf16.msra.mxu1 %v11776_v50 }
0x12dc   :  { %7487 = vmatpush.bf16.msra.mxu0 %v15871_v19  ;;  %7415 = vmatpush.bf16.msra.mxu1 %v11775_v0 }
0x12e0   :  { %7592 = vmatpush.bf16.msrb.mxu0 %v15866_v14  ;;  %7520 = vmatpush.bf16.msrb.mxu1 %v11780_v33 }
0x12e4   :  { %7593 = vmatpush.bf16.msrb.mxu0 %v15871_v19  ;;  %7521 = vmatpush.bf16.msrb.mxu1 %v11779_v54  ;;  %v8167_v54 = vld [vmem:[%s16254_s14] sm:$0xff] }
0x12e5   :  { %8170 = vperm.xlu0 %11838, %v8167_v54  }
0x12e7   :  { %11008 = vmatmul.msk.bf16.vlgmr.msra.gmra.mxu0 %vm1512_vm3, %v11007_v52  ;;  %v11792_v52 = vld [vmem:[%s16250_s10 + $0x98] sm:$0xff] }
0x12e8   :  { %7698 = vmatpush.bf16.msra.mxu0 %v15866_v14 }
0x12ec   :  { %7699 = vmatpush.bf16.msra.mxu0 %v15871_v19 }
0x12f7   :  { %11038 = vmatmul.msk.bf16.vlgmr.msrb.gmra.mxu0 %vm1512_vm3, %v11037_v60 }
0x12f8   :  { %7804 = vmatpush.bf16.msrb.mxu0 %v15866_v14 }
0x12fc   :  { %7805 = vmatpush.bf16.msrb.mxu0 %v15871_v19 }
0x1307   :  { %11068 = vmatmul.msk.bf16.vlgmr.msra.gmra.mxu0 %vm1512_vm3, %v11067_v44  ;;  %v11790_v44 = vld [vmem:[%s16250_s10 + $0x88] sm:$0xff] }
0x1308   :  { %7910 = vmatpush.bf16.msra.mxu0 %v15866_v14 }
0x130c   :  { %7911 = vmatpush.bf16.msra.mxu0 %v15871_v19 }
0x1317   :  { %11098 = vmatmul.msk.bf16.vlgmr.msrb.gmra.mxu0 %vm1512_vm3, %v11097_v46  ;;  %v11791_v46 = vld [vmem:[%s16250_s10 + $0x90] sm:$0xff] }
0x1318   :  { %8016 = vmatpush.bf16.msrb.mxu0 %v15866_v14 }
0x131c   :  { %8017 = vmatpush.bf16.msrb.mxu0 %v15871_v19 }
0x1327   :  { %11128 = vmatmul.msk.bf16.vlgmr.msra.gmra.mxu0 %vm1512_vm3, %v11127_v56 }
0x1328   :  { %8122 = vmatpush.bf16.msra.mxu0 %v15866_v14 }
0x132c   :  { %8123 = vmatpush.bf16.msra.mxu0 %v15871_v19 }
0x1334   :  { %v7365_v16 = vpop.f32.mrf.mxu3 }
0x1337   :  { %11158 = vmatmul.msk.bf16.vlgmr.msrb.gmra.mxu0 %vm1512_vm3, %v11157_v42  ;;  %v11797_v42 = vld [vmem:[%s16250_s10 + $0xc0] sm:$0xff] }
0x133c   :  { %v7367_v15 = vpop.f32.mrf.mxu3 }
0x1347   :  { %11188 = vmatmul.msk.bf16.vlgmr.msra.gmra.mxu0 %vm1512_vm3, %v11187_v53 }
0x1354   :  { %v7288_v9 = vpop.f32.mrf.mxu1  ;;  %v7383_v7 = vpop.f32.mrf.mxu0 }
0x1355   :  { %v7292_v13 = vpack.c.bf16 %v7288_v9, %v7288_v9  ;;  %v7387_v37 = vpack.c.bf16 %v7383_v7, %v7383_v7  ;;  %v11793_v9 = vld [vmem:[%s16250_s10 + $0xa0] sm:$0xff] }
0x1357   :  { %10963 = vmatmul.msk.bf16.vlgmr.msrb.gmra.mxu2 %vm1512_vm3, %v7292_v13  ;;  %10991 = vmatmul.msk.bf16.vlgmr.msra.gmra.mxu1 %vm1512_vm3, %v7387_v37  ;;  %v11800_v37 = vld [vmem:[%s16250_s10 + $0xd8] sm:$0xff] }
0x1358   :  { %7539 = vmatpush.bf16.msrb.mxu2 %v15866_v14  ;;  %7626 = vmatpush.bf16.msra.mxu1 %v11784_v25 }
0x135c   :  { %7540 = vmatpush.bf16.msrb.mxu2 %v15871_v19  ;;  %v7290_v36 = vpop.f32.mrf.mxu1  ;;  %v7385_v38 = vpop.f32.mrf.mxu0  ;;  %7627 = vmatpush.bf16.msra.mxu1 %v11783_v29 }
0x135d   :  { %v11798_v38 = vld [vmem:[%s16250_s10 + $0xc8] sm:$0xff] }
0x1364   :  { %v7489_v31 = vpop.f32.mrf.mxu0 }
0x1365   :  { %v7493_v1 = vpack.c.bf16 %v7489_v31, %v7489_v31  ;;  %v11801_v31 = vld [vmem:[%s16250_s10 + $0xe0] sm:$0xff] }
0x1367   :  { %10993 = vmatmul.msk.bf16.vlgmr.msra.gmra.mxu2 %vm1512_vm3, %v10992_v48  ;;  %11021 = vmatmul.msk.bf16.vlgmr.msrb.gmra.mxu1 %vm1512_vm3, %v7493_v1  ;;  %v11799_v48 = vld [vmem:[%s16250_s10 + $0xd0] sm:$0xff] }
0x1368   :  { %7645 = vmatpush.bf16.msra.mxu2 %v15866_v14  ;;  %7732 = vmatpush.bf16.msrb.mxu1 %v11788_v17 }
0x136c   :  { %7646 = vmatpush.bf16.msra.mxu2 %v15871_v19  ;;  %v7491_v3 = vpop.f32.mrf.mxu0  ;;  %7733 = vmatpush.bf16.msrb.mxu1 %v11787_v11 }
0x1374   :  { %v7595_v20 = vpop.f32.mrf.mxu0 }
0x1375   :  { %v7599_v10 = vpack.c.bf16 %v7595_v20, %v7595_v20 }
0x1377   :  { %11023 = vmatmul.msk.bf16.vlgmr.msrb.gmra.mxu2 %vm1512_vm3, %v11022_v41  ;;  %11051 = vmatmul.msk.bf16.vlgmr.msra.gmra.mxu1 %vm1512_vm3, %v7599_v10 }
0x1378   :  { %7751 = vmatpush.bf16.msrb.mxu2 %v15866_v14  ;;  %7838 = vmatpush.bf16.msra.mxu1 %v11792_v52 }
0x137c   :  { %7752 = vmatpush.bf16.msrb.mxu2 %v15871_v19  ;;  %v7597_v62 = vpop.f32.mrf.mxu0  ;;  %7839 = vmatpush.bf16.msra.mxu1 %v11791_v46 }
0x1387   :  { %11053 = vmatmul.msk.bf16.vlgmr.msra.gmra.mxu2 %vm1512_vm3, %v11052_v2 }
0x1388   :  { %7857 = vmatpush.bf16.msra.mxu2 %v15866_v14 }
0x138c   :  { %7858 = vmatpush.bf16.msra.mxu2 %v15871_v19 }
0x1397   :  { %11083 = vmatmul.msk.bf16.vlgmr.msrb.gmra.mxu2 %vm1512_vm3, %v11082_v45 }
0x1398   :  { %7963 = vmatpush.bf16.msrb.mxu2 %v15866_v14 }
0x139c   :  { %7964 = vmatpush.bf16.msrb.mxu2 %v15871_v19 }
0x13a7   :  { %11113 = vmatmul.msk.bf16.vlgmr.msra.gmra.mxu2 %vm1512_vm3, %v11112_v24 }
0x13a8   :  { %8069 = vmatpush.bf16.msra.mxu2 %v15866_v14  ;;  %v7701_v14 = vpop.f32.mrf.mxu0 }
0x13a9   :  { %v7705_v4 = vpack.c.bf16 %v7701_v14, %v7701_v14 }
0x13ab   :  { %11081 = vmatmul.msk.bf16.vlgmr.msrb.gmra.mxu1 %vm1512_vm3, %v7705_v4 }
0x13ac   :  { %8070 = vmatpush.bf16.msra.mxu2 %v15871_v19  ;;  %v11785_v19 = vld [vmem:[%s16250_s10 + $0x60] sm:$0xff]  ;;  %7944 = vmatpush.bf16.msrb.mxu1 %v11796_v5 }
0x13b0   :  { %v7703_v58 = vpop.f32.mrf.mxu0  ;;  %7945 = vmatpush.bf16.msrb.mxu1 %v11795_v8  ;;  %v11816_v8 = vld [vmem:[%s16256_s15 + $0x58] sm:$0xff] }
0x13b1   :  { %8320 = vmatpush.bf16.msrb.mxu0 %v11816_v8 }
0x13b7   :  { %11143 = vmatmul.msk.bf16.vlgmr.msrb.gmra.mxu2 %vm1512_vm3, %v11142_v34  ;;  %v11804_v34 = vld [vmem:[%s16250_s10 + $0xf8] sm:$0xff] }
0x13b8   :  { %v7807_v56 = vpop.f32.mrf.mxu0 }
0x13b9   :  { %v7811_v59 = vpack.c.bf16 %v7807_v56, %v7807_v56 }
0x13bb   :  { %11111 = vmatmul.msk.bf16.vlgmr.msra.gmra.mxu1 %vm1512_vm3, %v7811_v59 }
0x13bc   :  { %8050 = vmatpush.bf16.msra.mxu1 %v11800_v37  ;;  %v11806_v37 = vld [vmem:[%s16256_s15 + $0x8] sm:$0xff] }
0x13c0   :  { %v7809_v47 = vpop.f32.mrf.mxu0  ;;  %8051 = vmatpush.bf16.msra.mxu1 %v11799_v48  ;;  %v11819_v48 = vld [vmem:[%s16257_s16 + $0x10] sm:$0xff] }
0x13c7   :  { %11173 = vmatmul.msk.bf16.vlgmr.msra.gmra.mxu2 %vm1512_vm3, %v11172_v57  ;;  %v11803_v57 = vld [vmem:[%s16250_s10 + $0xf0] sm:$0xff]  ;;  %s11868_s10 = smov 64  }
0x13c8   :  { %v7913_v50 = vpop.f32.mrf.mxu0 }
0x13c9   :  { %v7917_v0 = vpack.c.bf16 %v7913_v50, %v7913_v50  ;;  %v11811_v50 = vld [vmem:[%s16256_s15 + $0x30] sm:$0xff] }
0x13cb   :  { %11141 = vmatmul.msk.bf16.vlgmr.msrb.gmra.mxu1 %vm1512_vm3, %v7917_v0  ;;  %v11815_v0 = vld [vmem:[%s16256_s15 + $0x50] sm:$0xff] }
0x13cc   :  { %8156 = vmatpush.bf16.msrb.mxu1 %v11804_v34  ;;  %8321 = vmatpush.bf16.msrb.mxu0 %v11815_v0  ;;  %v8171_v34 = vpop.permute.xlu0 %8170 }
0x13d0   :  { %v7915_v13 = vpop.f32.mrf.mxu0  ;;  %8157 = vmatpush.bf16.msrb.mxu1 %v11803_v57  ;;  %v11817_v57 = vld [vmem:[%s16257_s16] sm:$0xff] }
0x13d4   :  { %v7417_v55 = vpop.f32.mrf.mxu1 }
0x13d8   :  { %v8019_v2 = vpop.f32.mrf.mxu0 }
0x13d9   :  { %v8023_v45 = vpack.c.bf16 %v8019_v2, %v8019_v2  ;;  %v11805_v2 = vld [vmem:[%s16256_s15] sm:$0xff] }
0x13da   :  { %v7321_v21 = vpop.f32.mrf.mxu2 }
0x13db   :  { %v7366_v32 = vadd.f32 %v7365_v16, %v7321_v21  ;;  %11171 = vmatmul.msk.bf16.vlgmr.msra.gmra.mxu1 %vm1512_vm3, %v8023_v45  ;;  %v11809_v45 = vld [vmem:[%s16256_s15 + $0x20] sm:$0xff] }
0x13dc   :  { %v7419_v12 = vpop.f32.mrf.mxu1 }
0x13dd   :  { %v16014_v28 = vadd.f32 %v7417_v55, %v7366_v32 }
0x13e0   :  { %v8021_v53 = vpop.f32.mrf.mxu0 }
0x13e2   :  { %v7323_v40 = vpop.f32.mrf.mxu2 }
0x13e4   :  { %v7523_v29 = vpop.f32.mrf.mxu1 }
0x13e8   :  { %v8125_v33 = vpop.f32.mrf.mxu0 }
0x13e9   :  { %v8129_v26 = vpack.c.bf16 %v8125_v33, %v8125_v33  ;;  %v11823_v33 = vld [vmem:[%s16257_s16 + $0x30] sm:$0xff] }
0x13ea   :  { %v7436_v6 = vpop.f32.mrf.mxu2 }
0x13eb   :  { %v7440_v22 = vpack.c.bf16 %v7436_v6, %v7436_v6  ;;  %11201 = vmatmul.msk.bf16.vlgmr.msrb.gmra.mxu1 %vm1512_vm3, %v8129_v26  ;;  %v11828_v26 = vld [vmem:[%s16257_s16 + $0x58] sm:$0xff] }
0x13ec   :  { %v7525_v20 = vpop.f32.mrf.mxu1 }
0x13ed   :  { %11006 = vmatmul.msk.bf16.vlgmr.msra.gmra.mxu3 %vm1512_vm3, %v7440_v22 }
0x13ee   :  { %7679 = vmatpush.bf16.msra.mxu3 %v11786_v30 }
0x13f0   :  { %v8127_v23 = vpop.f32.mrf.mxu0 }
0x13f1   :  { %v11822_v23 = vld [vmem:[%s16257_s16 + $0x28] sm:$0xff] }
0x13f2   :  { %v7438_v43 = vpop.f32.mrf.mxu2  ;;  %7680 = vmatpush.bf16.msra.mxu3 %v11785_v19 }
0x13f4   :  { %v7629_v12 = vpop.f32.mrf.mxu1 }
0x13fa   :  { %v7542_v60 = vpop.f32.mrf.mxu2 }
0x13fb   :  { %v7546_v49 = vpack.c.bf16 %v7542_v60, %v7542_v60 }
0x13fc   :  { %v7631_v10 = vpop.f32.mrf.mxu1 }
0x13fd   :  { %11036 = vmatmul.msk.bf16.vlgmr.msrb.gmra.mxu3 %vm1512_vm3, %v7546_v49 }
0x13fe   :  { %7785 = vmatpush.bf16.msrb.mxu3 %v11790_v44 }
0x1402   :  { %v7544_v18 = vpop.f32.mrf.mxu2  ;;  %7786 = vmatpush.bf16.msrb.mxu3 %v11789_v61 }
0x140a   :  { %v7648_v39 = vpop.f32.mrf.mxu2 }
0x140b   :  { %v7652_v35 = vpack.c.bf16 %v7648_v39, %v7648_v39  ;;  %v11808_v39 = vld [vmem:[%s16256_s15 + $0x18] sm:$0xff] }
0x140c   :  { %8218 = vmatpush.bf16.msrb.mxu2 %v11808_v39 }
0x140d   :  { %11066 = vmatmul.msk.bf16.vlgmr.msra.gmra.mxu3 %vm1512_vm3, %v7652_v35  ;;  %v11807_v35 = vld [vmem:[%s16256_s15 + $0x10] sm:$0xff] }
0x140e   :  { %7891 = vmatpush.bf16.msra.mxu3 %v11794_v63  ;;  %v11812_v63 = vld [vmem:[%s16256_s15 + $0x38] sm:$0xff] }
0x1410   :  { %8219 = vmatpush.bf16.msrb.mxu2 %v11807_v35 }
0x1412   :  { %v7650_v7 = vpop.f32.mrf.mxu2  ;;  %7892 = vmatpush.bf16.msra.mxu3 %v11793_v9 }
0x1413   :  { %v11820_v7 = vld [vmem:[%s16257_s16 + $0x18] sm:$0xff] }
0x1414   :  { %8372 = vmatpush.bf16.msra.mxu1 %v11820_v7  ;;  %8220 = vmatpush.bf16.msrb.mxu2 %v11806_v37 }
0x1418   :  { %8373 = vmatpush.bf16.msra.mxu1 %v11819_v48  ;;  %8221 = vmatpush.bf16.msrb.mxu2 %v11805_v2 }
0x141a   :  { %v7754_v36 = vpop.f32.mrf.mxu2 }
0x141b   :  { %v7758_v41 = vpack.c.bf16 %v7754_v36, %v7754_v36  ;;  %v11810_v36 = vld [vmem:[%s16256_s15 + $0x28] sm:$0xff] }
0x141d   :  { %11096 = vmatmul.msk.bf16.vlgmr.msrb.gmra.mxu3 %vm1512_vm3, %v7758_v41 }
0x141e   :  { %7997 = vmatpush.bf16.msrb.mxu3 %v11798_v38  ;;  %v11814_v38 = vld [vmem:[%s16256_s15 + $0x48] sm:$0xff] }
0x141f   :  { %8322 = vmatpush.bf16.msrb.mxu0 %v11814_v38 }
0x1422   :  { %v7756_v24 = vpop.f32.mrf.mxu2  ;;  %7998 = vmatpush.bf16.msrb.mxu3 %v11797_v42  ;;  %v11813_v42 = vld [vmem:[%s16256_s15 + $0x40] sm:$0xff] }
0x1423   :  { %v11818_v24 = vld [vmem:[%s16257_s16 + $0x8] sm:$0xff]  ;;  %8323 = vmatpush.bf16.msrb.mxu0 %v11813_v42 }
0x1424   :  { %8374 = vmatpush.bf16.msra.mxu1 %v11818_v24 }
0x1428   :  { %v7735_v40 = vpop.f32.mrf.mxu1  ;;  %8375 = vmatpush.bf16.msra.mxu1 %v11817_v57 }
0x142a   :  { %v7860_v16 = vpop.f32.mrf.mxu2 }
0x142b   :  { %v7864_v15 = vpack.c.bf16 %v7860_v16, %v7860_v16  ;;  %v8166_v16 = vld [vmem:[%s16258_s13] sm:$0xff] }
0x142d   :  { %11126 = vmatmul.msk.bf16.vlgmr.msra.gmra.mxu3 %vm1512_vm3, %v7864_v15  ;;  %v16151_v15 = vmul.f32 %v8171_v34, %v8166_v16  ;;  %v11847_v16 = vld [vmem:[%s16259_s18 + $0x2] ss:$0 sm:$0xff] }
0x142e   :  { %8103 = vmatpush.bf16.msra.mxu3 %v11802_v27  ;;  %v11824_v27 = vld [vmem:[%s16257_s16 + $0x38] sm:$0xff] }
0x142f   :  { %8423 = vmatpush.bf16.msra.mxu2 %v11824_v27  ;;  %v8174_v54 = vpack.c.bf16 %v16151_v15, %v16151_v15 }
0x1430   :  { %v7737_v30 = vpop.f32.mrf.mxu1 }
0x1431   :  { %11287 = vmatmul.msk.bf16.vlgmr.msra.gmra.mxu1 %vm487_vm0, %v8174_v54 }
0x1432   :  { %v7862_v1 = vpop.f32.mrf.mxu2  ;;  %8104 = vmatpush.bf16.msra.mxu3 %v11801_v31  ;;  %v11827_v31 = vld [vmem:[%s16257_s16 + $0x50] sm:$0xff] }
0x1433   :  { %8424 = vmatpush.bf16.msra.mxu2 %v11823_v33 }
0x1437   :  { %8425 = vmatpush.bf16.msra.mxu2 %v11822_v23 }
0x1438   :  { %v7841_v22 = vpop.f32.mrf.mxu1 }
0x143a   :  { %v7966_v3 = vpop.f32.mrf.mxu2 }
0x143b   :  { %v7970_v55 = vpack.c.bf16 %v7966_v3, %v7966_v3  ;;  %v11826_v3 = vld [vmem:[%s16257_s16 + $0x48] sm:$0xff] }
0x143d   :  { %11156 = vmatmul.msk.bf16.vlgmr.msrb.gmra.mxu3 %vm1512_vm3, %v7970_v55  ;;  %v11821_v55 = vld [vmem:[%s16257_s16 + $0x20] sm:$0xff] }
0x143e   :  { %8269 = vmatpush.bf16.msrb.mxu3 %v11812_v63  ;;  %8426 = vmatpush.bf16.msra.mxu2 %v11821_v55 }
0x1440   :  { %v7843_v43 = vpop.f32.mrf.mxu1 }
0x1442   :  { %v7968_v25 = vpop.f32.mrf.mxu2  ;;  %8270 = vmatpush.bf16.msrb.mxu3 %v11811_v50  ;;  %v11830_v50 = vld [vmem:[%s16261_s19 + $0x8] sm:$0xff] }
0x1446   :  { %8271 = vmatpush.bf16.msrb.mxu3 %v11810_v36 }
0x1448   :  { %v16093_v52 = vpop.f32.mrf.mxu1 }
0x144a   :  { %v8072_v21 = vpop.f32.mrf.mxu2  ;;  %8272 = vmatpush.bf16.msrb.mxu3 %v11809_v45 }
0x144b   :  { %v8076_v51 = vpack.c.bf16 %v8072_v21, %v8072_v21  ;;  %v11825_v21 = vld [vmem:[%s16257_s16 + $0x40] sm:$0xff] }
0x144d   :  { %11186 = vmatmul.msk.bf16.vlgmr.msra.gmra.mxu3 %vm1512_vm3, %v8076_v51 }
0x144e   :  { %8474 = vmatpush.bf16.msra.mxu3 %v11828_v26  ;;  %v11842_v26 = vld [vmem:[%s16255_s17 + $0x2] ss:$0 sm:$0xff] }
0x1450   :  { %v7949_v49 = vpop.f32.mrf.mxu1 }
0x1452   :  { %v8074_v32 = vpop.f32.mrf.mxu2  ;;  %8475 = vmatpush.bf16.msra.mxu3 %v11827_v31 }
0x1456   :  { %8476 = vmatpush.bf16.msra.mxu3 %v11826_v3 }
0x1458   :  { %v16095_v59 = vpop.f32.mrf.mxu1 }
0x145a   :  { %8477 = vmatpush.bf16.msra.mxu3 %v11825_v21 }
0x1460   :  { %v8055_v47 = vpop.f32.mrf.mxu1 }
0x1468   :  { %v8159_v9 = vpop.f32.mrf.mxu1 }
0x1470   :  { %v7470_v62 = vpop.f32.mrf.mxu3  ;;  %v8161_v41 = vpop.f32.mrf.mxu1 }
0x1471   :  { %v7474_v17 = vadd.f32 %v7470_v62, %v16014_v28  ;;  %v8601_v41 = vld [vmem:[%s16262_s21] sm:$0xff] }
0x1472   :  { %8603 = vrot.lane.b32.xlu0 %v8601_v41, %s11865_s24 }
0x1473   :  { %v7527_v6 = vadd.f32 %v7523_v29, %v7474_v17 }
0x1478   :  { %v7472_v11 = vpop.f32.mrf.mxu3 }
0x1480   :  { %v7576_v14 = vpop.f32.mrf.mxu3 }
0x1481   :  { %v7580_v4 = vadd.f32 %v7576_v14, %v7527_v6  ;;  %v11845_v14 = vld [vmem:[%s16259_s18] ss:$0 sm:$0xff] }
0x1483   :  { %v7633_v19 = vadd.f32 %v7629_v12, %v7580_v4  ;;  %v11843_v4 = vld [vmem:[%s16255_s17] ss:$0 sm:$0xff] }
0x1488   :  { %v7578_v58 = vpop.f32.mrf.mxu3 }
0x1490   :  { %v7682_v60 = vpop.f32.mrf.mxu3 }
0x1491   :  { %v7686_v44 = vadd.f32 %v7682_v60, %v7633_v19 }
0x1493   :  { %v7739_v46 = vadd.f32 %v7735_v40, %v7686_v44 }
0x1498   :  { %v7684_v56 = vpop.f32.mrf.mxu3 }
0x14a0   :  { %v7788_v61 = vpop.f32.mrf.mxu3 }
0x14a1   :  { %v7792_v28 = vadd.f32 %v7788_v61, %v7739_v46 }
0x14a3   :  { %v7845_v18 = vadd.f32 %v7841_v22, %v7792_v28  ;;  %v11844_v28 = vld [vmem:[%s16255_s17 + $0x1] ss:$0 sm:$0xff] }
0x14a8   :  { %v7790_v5 = vpop.f32.mrf.mxu3 }
0x14a9   :  { %v11831_v5 = vld [vmem:[%s16261_s19 + $0x10] sm:$0xff] }
0x14ae   :  { %v8377_v30 = vpop.f32.mrf.mxu1 }
0x14af   :  { %v8378_v19 = vadd.f32 %v11845_v14, %v8377_v30 }
0x14b0   :  { %v7894_v13 = vpop.f32.mrf.mxu3 }
0x14b1   :  { %v7898_v25 = vadd.f32 %v7894_v13, %v7845_v18  ;;  %v11846_v18 = vld [vmem:[%s16259_s18 + $0x1] ss:$0 sm:$0xff] }
0x14b2   :  { %v11829_v13 = vld [vmem:[%s16261_s19] sm:$0xff] }
0x14b3   :  { %v7951_v29 = vadd.f32 %v16093_v52, %v7898_v25 }
0x14b6   :  { %v8379_v11 = vpop.f32.mrf.mxu1 }
0x14b8   :  { %v7896_v53 = vpop.f32.mrf.mxu3 }
0x14c0   :  { %v8000_v1 = vpop.f32.mrf.mxu3 }
0x14c1   :  { %v8004_v32 = vadd.f32 %v8000_v1, %v7951_v29 }
0x14c3   :  { %v8057_v20 = vadd.f32 %v16095_v59, %v8004_v32  ;;  %v11832_v59 = vld [vmem:[%s16261_s19 + $0x18] sm:$0xff] }
0x14c4   :  { %8574 = vmatpush.bf16.msra.mxu0 %v11832_v59 }
0x14c8   :  { %v8002_v51 = vpop.f32.mrf.mxu3  ;;  %8575 = vmatpush.bf16.msra.mxu0 %v11831_v5 }
0x14cc   :  { %8576 = vmatpush.bf16.msra.mxu0 %v11830_v50 }
0x14d0   :  { %v8106_v12 = vpop.f32.mrf.mxu3  ;;  %8577 = vmatpush.bf16.msra.mxu0 %v11829_v13 }
0x14d1   :  { %v8110_v10 = vadd.f32 %v8106_v12, %v8057_v20 }
0x14d3   :  { %v8163_v40 = vadd.f32 %v8159_v9, %v8110_v10 }
0x14d5   :  { %v8164_v62 = vmax.f32 %v8163_v40, 0.0 }
0x14d7   :  { %v8165_v17 = vpack.c.bf16 %v8164_v62, %v8164_v62 }
0x14d8   :  { %v8108_v6 = vpop.f32.mrf.mxu3 }
0x14d9   :  { %11218 = vmatmul.msk.bf16.vlgmr.msrb.gmra.mxu2 %vm487_vm0, %v8165_v17  ;;  %11244 = vmatmul.msk.bf16.vlgmr.msrb.gmra.mxu3 %vm487_vm0, %v8165_v17 }
0x14da   :  { %11270 = vmatmul.msk.bf16.vlgmr.msrb.gmra.mxu0 %vm487_vm0, %v8165_v17 }
0x14e9   :  { %11313 = vmatmul.msk.bf16.vlgmr.msra.gmra.mxu2 %vm487_vm0, %v8174_v54  ;;  %11339 = vmatmul.msk.bf16.vlgmr.msra.gmra.mxu3 %vm487_vm0, %v8174_v54 }
0x1557   :  { %v8325_v22 = vpop.f32.mrf.mxu0 }
0x1558   :  { %v8326_v23 = vadd.f32 %v11842_v26, %v8325_v22  ;;  %v11848_v22 = vld [vmem:[%s16260_s20] ss:$0 sm:$0xff]  ;;  %s11866_s20 = smov 127  }
0x155c   :  { %v8223_v43 = vpop.f32.mrf.mxu2  ;;  %v8274_v58 = vpop.f32.mrf.mxu3 }
0x155d   :  { %v8224_v52 = vadd.f32 %v11843_v4, %v8223_v43  ;;  %v8275_v8 = vadd.f32 %v11844_v28, %v8274_v58  ;;  %v8604_v4 = vpop.permute.xlu0 %8603 }
0x155f   :  { %v8483_v60 = vadd.f32 %v8378_v19, %v8224_v52  ;;  %v8327_v44 = vpop.f32.mrf.mxu0 }
0x1561   :  { %v11340_v46 = vmul.f32 -1.442695, %v8483_v60  ;;  %v8610_v60 = vlaneseq }
0x1563   :  { %11849 = vpow2.f32 %v11340_v46  ;;  %v8611_v44 = vand.u32 127, %v8610_v60 }
0x1564   :  { %v8225_v49 = vpop.f32.mrf.mxu2  ;;  %v8276_v56 = vpop.f32.mrf.mxu3 }
0x1569   :  { %v11850_v61 = vpop.eup %11849 }
0x156a   :  { %v8487_v47 = vadd.f32 1.0, %v11850_v61 }
0x156c   :  { %11851 = vrcp.f32 %v8487_v47  ;;  %v8428_v39 = vpop.f32.mrf.mxu2  ;;  %v8479_v63 = vpop.f32.mrf.mxu3  ;;  %v8499_v45 = vand.u32 2147483648, %v8487_v47  ;;  %v8497_v42 = vand.u32 2147483647, %v8487_v47  ;;  %vm8493_vm7 = vweird.f32 %v8487_v47 }
0x156d   :  { %v8429_v35 = vadd.f32 %v11846_v18, %v8428_v39  ;;  %v8480_v54 = vadd.f32 %v11847_v16, %v8479_v63 }
0x156e   :  { %v8500_v57 = vor.u32 1.1754944e-38, %v8499_v45  ;;  %vm8498_vm9 = vcmp.eq.f32.partialorder %v8497_v42, 8.507059e+37 }
0x156f   :  { %v8503_v0 = vadd.f32 %v8429_v35, %v8275_v8 }
0x1571   :  { %v11341_v9 = vmul.f32 -1.442695, %v8503_v0 }
0x1572   :  { %v11852_v7 = vpop.eup %11851 }
0x1573   :  { %11853 = vpow2.f32 %v11341_v9  ;;  %v8489_v37 = vmul.f32 %v11852_v7, %v8487_v47  ;;  %vm8494_vm6 = vweird.f32 %v11852_v7 }
0x1574   :  { %v8430_v36 = vpop.f32.mrf.mxu2  ;;  %v8481_v38 = vpop.f32.mrf.mxu3  ;;  %vm8495_vm8 = vmor %vm8493_vm7, %vm8494_vm6  ;;  %vm8656_vm6 = vcmask 547840  }
0x1575   :  { %v8490_v48 = vsub.f32 1.0, %v8489_v37 }
0x1577   :  { %v8491_v2 = vmul.f32 %v11852_v7, %v8490_v48  ;;  %v11867_v48 = vmov 0.0  }
0x1579   :  { %v11854_v24 = vpop.eup %11853  ;;  %v8492_v53 = vadd.f32 %v11852_v7, %v8491_v2 }
0x157a   :  { %v8507_v34 = vadd.f32 1.0, %v11854_v24 }
0x157b   :  { %v8496_v27 = vsel %vm8495_vm8, %v11852_v7, %v8492_v53 }
0x157c   :  { %11855 = vrcp.f32 %v8507_v34  ;;  %v8501_v33 = vsel %vm8498_vm9, %v8500_v57, %v8496_v27  ;;  %v8519_v21 = vand.u32 2147483648, %v8507_v34  ;;  %v8517_v29 = vand.u32 2147483647, %v8507_v34 }
0x157d   :  { %v8523_v31 = vmul.f32 %v8501_v33, %v8480_v54  ;;  %vm8513_vm11 = vweird.f32 %v8507_v34 }
0x157e   :  { %v8520_v20 = vor.u32 1.1754944e-38, %v8519_v21  ;;  %vm8518_vm13 = vcmp.eq.f32.partialorder %v8517_v29, 8.507059e+37 }
0x157f   :  { %v8524_v55 = vadd.f32 %v8523_v31, %v8326_v23 }
0x1581   :  { %11857 = vtanh.f32 %v8524_v55 }
0x1582   :  { %v11856_v1 = vpop.eup %11855 }
0x1583   :  { %v8509_v3 = vmul.f32 %v11856_v1, %v8507_v34  ;;  %vm8514_vm10 = vweird.f32 %v11856_v1 }
0x1584   :  { %vm8515_vm12 = vmor %vm8513_vm11, %vm8514_vm10 }
0x1585   :  { %v8510_v25 = vsub.f32 1.0, %v8509_v3 }
0x1587   :  { %v8511_v51 = vmul.f32 %v11856_v1, %v8510_v25  ;;  %v11858_v62 = vpop.eup %11857 }
0x1589   :  { %v8512_v32 = vadd.f32 %v11856_v1, %v8511_v51 }
0x158b   :  { %v8516_v12 = vsel %vm8515_vm12, %v11856_v1, %v8512_v32 }
0x158c   :  { %v8521_v10 = vsel %vm8518_vm13, %v8520_v20, %v8516_v12 }
0x158d   :  { %v8526_v40 = vsub.f32 1.0, %v8521_v10  ;;  %v8528_v6 = vmul.f32 %v8521_v10, %v16151_v15 }
0x158f   :  { %v8527_v17 = vmul.f32 %v11858_v62, %v8526_v40 }
0x1591   :  { %v16219_v30 = vadd.f32 %v8528_v6, %v8527_v17 }
0x1593   :  { %v8530_v11 = vpack.c.bf16 %v16219_v30, %v16219_v30 }
0x1595   :  { %11358 = vmatmul.msk.bf16.vlgmr.msra.gmra.mxu0 %vm487_vm0, %v8530_v11 }
0x1612   :  { %v8579_v14 = vpop.f32.mrf.mxu0 }
0x1613   :  { %v8580_v19 = vadd.f32 %v11848_v22, %v8579_v14 }
0x1615   :  { %v8606_v43 = vadd.f32 %v8604_v4, %v8580_v19  ;;  %v8584_v58 = vsel %vm8583_vm14, %v8580_v19, -inf }
0x1616   :  { %8585 = vmax.xlane.f32.xlu2 %v8584_v58 }
0x1617   :  { %v8607_v15 = vsel %vm8583_vm14, %v8606_v43, -inf }
0x1618   :  { %8608 = vmax.xlane.f32.xlu1 %v8607_v15 }
0x161a   :  { %v8581_v52 = vpop.f32.mrf.mxu0 }
0x1631   :  { %8613 = vrot.lane.b32.xlu1 %v8611_v44, %s11865_s24 }
0x1689   :  { %v8586_v46 = vpop.xlane.xlu2 %8585 }
0x168a   :  { %v8587_v49 = vsub.f32 %v8580_v19, %v8586_v46 }
0x168b   :  { %v8609_v61 = vpop.xlane.xlu1 %8608 }
0x168c   :  { %v8588_v56 = vmul.f32 1.442695, %v8587_v49  ;;  %vm8612_vm15 = vcmp.ge.f32.partialorder %v8606_v43, %v8609_v61 }
0x168e   :  { %11859 = vpow2.f32 %v8588_v56 }
0x1694   :  { %v11860_v59 = vpop.eup %11859 }
0x1695   :  { %8591 = vrot.lane.b32.xlu0 %v11860_v59, %s11866_s20 }
0x16a3   :  { %v8614_v28 = vpop.permute.xlu1 %8613 }
0x16a4   :  { %v8615_v18 = vsel %vm8612_vm15, %v8614_v28, 4 }
0x16a5   :  { %v8616_v47 = vsel %vm8583_vm14, %v8615_v18, 2147483647 }
0x16a6   :  { %v8618_v5 = vshra.s32 %v8616_v47, 16  ;;  %v8617_v35 = vand.u32 65535, %v8616_v47 }
0x16a8   :  { %v8620_v39 = vcvt.s32.f32 %v8618_v5  ;;  %v8619_v0 = vcvt.s32.f32 %v8617_v35 }
0x16aa   :  { %8621 = vmin.xlane.f32.xlu2 %v8620_v39 }
0x1707   :  { %v8592_v63 = vpop.permute.xlu0 %8591 }
0x1708   :  { %v8595_v8 = vsel %vm8594_vm1, %v8592_v63, 0.0 }
0x1709   :  { %8596 = vadd.xlane.f32.xlu0 %v8595_v8 }
0x171d   :  { %v8622_v50 = vpop.xlane.xlu2 %8621 }
0x171e   :  { %vm8623_vm2 = vcmp.eq.f32.partialorder %v8620_v39, %v8622_v50  ;;  %v8628_v7 = vcvt.f32.s32 %v8622_v50 }
0x171f   :  { %v8624_v9 = vsel %vm8623_vm2, %v8619_v0, inf }
0x1720   :  { %8625 = vmin.xlane.f32.xlu2 %v8624_v9  ;;  %v8629_v37 = vshll.u32 %v8628_v7, 16 }
0x177c   :  { %v8597_v2 = vpop.xlane.xlu0 %8596 }
0x177d   :  { %11861 = vlog2.f32 %v8597_v2 }
0x1783   :  { %v11862_v45 = vpop.eup %11861 }
0x1784   :  { %v8599_v42 = vmul.f32 0.6931472, %v11862_v45 }
0x1786   :  { %v8600_v24 = vsub.f32 %v8587_v49, %v8599_v42 }
0x1793   :  { %v8626_v13 = vpop.xlane.xlu2 %8625 }
0x1794   :  { %v8627_v36 = vcvt.f32.s32 %v8626_v13 }
0x1796   :  { %v8630_v38 = vadd.s32 %v8629_v37, %v8627_v36 }
0x1798   :  { %vm8631_vm3 = vcmp.eq.s32.totalorder %v8611_v44, %v8630_v38  ;;  %v8646_v26 = vcvt.s32.f32 %v8630_v38 }
0x1799   :  { %v11359_v41 = vsel %vm8631_vm3, 1.0, %v11867_v48 }
0x179a   :  { %8635 = vrot.lane.b32.xlu2 %v11359_v41, %s11865_s24 }
0x17f4   :  { %v8636_v53 = vpop.permute.xlu2 %8635 }
0x17f5   :  { %v8638_v34 = vmul.f32 %v8636_v53, %v8600_v24 }
0x17f7   :  { %8640 = vrot.lane.b32.xlu1 %v8638_v34, %s11866_s20 }
0x17ff   :  { %8648 = vrot.lane.b32.xlu1 %v8580_v19, %s11868_s10 }
0x1869   :  { %v8641_v16 = vpop.permute.xlu1 %8640 }
0x186a   :  { %v8643_v27 = vsel %vm8594_vm1, %v8641_v16, 0.0 }
0x186b   :  { %8644 = vadd.xlane.f32.xlu2 %v8643_v27 }
0x1871   :  { %v8649_v57 = vpop.permute.xlu1 %8648 }
0x1872   :  { %v8651_v33 = vsel %vm487_vm0, %v16219_v30, %v8649_v57 }
0x1873   :  { %v8653_v31 = vsel %vm8652_vm4, %v8651_v33, %v8646_v26 }
0x18de   :  { %v8645_v54 = vpop.xlane.xlu2 %8644 }
0x18df   :  { %v8655_v1 = vsel %vm8654_vm5, %v8653_v31, %v8645_v54 }
0x18e0   :  { %v8657_v23 = vsel %vm8656_vm6, %v8655_v1, 0.0 }
0x18e1   :  { %8658 = vst [vmem:[%s16263_s22] sm:$0xff] %v8657_v23 }

</bundles_post_ra>
